<compile_context>
chip_gen: v7x
topology: tpu7x:2x2x1
jax: 0.10.0
libtpu: 0.0.40
codegen_flags: <defaults>
</compile_context>

<pallas_src>
import functools

import jax
import jax.numpy as jnp
from jax.experimental import pallas as pl
from jax.experimental.pallas import tpu as pltpu


_LEAD = 16  # bf16-sublane-aligned leading halo for the VMEM intermediate scratch


# ----------------------------------------------------------------------------
# Fused (3x1 conv + ReLU) -> (1x3 conv over [t, skip] + folded BN + ReLU)
# optionally followed by the 1x1 "downsample" head.
# ----------------------------------------------------------------------------
def _pair_kernel(*refs, H, W, dh, dw, has_skip, emit_t, has_head):
    i = 0
    x_ref = refs[i]; i += 1                       # (HW + 2*dh*W, Cin)  bf16
    if has_skip:
        s_ref = refs[i]; i += 1                   # (HW + 2*dw, Cs)     bf16
    w1_ref = refs[i]; i += 1                      # (3*Cin, C1)         bf16
    b1_ref = refs[i]; i += 1                      # (1, C1)             f32
    w2_ref = refs[i]; i += 1                      # (3*(C1+Cs), 64)     bf16
    b2_ref = refs[i]; i += 1                      # (1, 64)             f32
    if has_head:
        wh_ref = refs[i]; i += 1                  # (1, 64)             f32
    if emit_t:
        t_out_ref = refs[i]; i += 1               # (HW, C1)            bf16
    out_ref = refs[i]; i += 1                     # (HW, 64) bf16 or (HW, 1) f32
    t_scr = refs[i]; i += 1                       # VMEM (HW + 2*_LEAD, C1) bf16

    HW = H * W
    offh = dh * W

    # ---- conv 3x1 (along H).  The zero halo of the padded input block
    #      implements the (dh, 0) zero padding exactly (padding == dilation).
    taps1 = [x_ref[pl.ds(k * offh, HW), :] for k in range(3)]
    xf1 = jnp.concatenate(taps1, axis=-1)                     # (HW, 3*Cin)
    t = jnp.dot(xf1, w1_ref[...], preferred_element_type=jnp.float32)
    t = jnp.maximum(t + b1_ref[...], 0.0)
    t_bf = t.astype(jnp.bfloat16)
    if emit_t:
        t_out_ref[...] = t_bf

    # ---- stage the intermediate in a haloed VMEM scratch for the 1x3 stage.
    t_scr[...] = jnp.zeros(t_scr.shape, jnp.bfloat16)
    t_scr[pl.ds(_LEAD, HW), :] = t_bf

    # ---- conv 1x3 (along W) over channels [t, skip]; BN folded into w2/b2.
    wpos = jax.lax.broadcasted_iota(jnp.int32, (HW, 1), 0) % W

    def wmask(o):
        if o < 0:
            return wpos >= (-o)
        if o > 0:
            return wpos < (W - o)
        return None

    def wtaps(read, lead):
        out = []
        for k in range(3):
            o = (k - 1) * dw
            v = read(lead + o)
            m = wmask(o)
            out.append(v if m is None else jnp.where(m, v, jnp.zeros_like(v)))
        return out

    taps2 = wtaps(lambda s: t_scr[pl.ds(s, HW), :], _LEAD)
    if has_skip:
        taps2 += wtaps(lambda s: s_ref[pl.ds(s, HW), :], dw)
    xf2 = jnp.concatenate(taps2, axis=-1)                     # (HW, 3*(C1+Cs))
    u = jnp.dot(xf2, w2_ref[...], preferred_element_type=jnp.float32)
    u = jnp.maximum(u + b2_ref[...], 0.0)                     # (HW, 64) f32

    if has_head:
        # fused 1x1 'downsample' head: weighted lane-sum -> (HW, 1)
        out_ref[...] = jnp.sum(u * wh_ref[...], axis=-1, keepdims=True)
    else:
        out_ref[...] = u.astype(out_ref.dtype)


def _run_pair(x, skip, w1, b1, w2, b2, bn2, *, dh, dw, emit_t, head_w=None):
    """x, skip: NHWC. Returns NHWC output(s)."""
    N, H, W, cin = x.shape
    HW = H * W
    c1 = w1.shape[0]
    cout = w2.shape[0]
    cs = 0 if skip is None else skip.shape[-1]
    assert w2.shape[1] == c1 + cs
    offh = dh * W
    has_head = head_w is not None

    # ---- fold conv1 weights -> (3*Cin, C1)
    w1f = jnp.transpose(w1[:, :, :, 0], (2, 1, 0)).reshape(3 * cin, c1)
    w1f = w1f.astype(jnp.bfloat16)
    b1v = b1.reshape(1, c1).astype(jnp.float32)

    # ---- fold conv2 weights + BN scale -> (3*(C1+Cs), 64)
    gamma, beta, mean, var = bn2
    scale = gamma / jnp.sqrt(var + 1e-5)
    w2s = w2[:, :, 0, :]                                       # (cout, C1+Cs, 3)
    parts = [jnp.transpose(w2s[:, :c1, :], (2, 1, 0)).reshape(3 * c1, cout)]
    if cs:
        parts.append(jnp.transpose(w2s[:, c1:, :], (2, 1, 0)).reshape(3 * cs, cout))
    w2f = (jnp.concatenate(parts, axis=0) * scale[None, :]).astype(jnp.bfloat16)
    b2v = (b2 * scale + beta - mean * scale).reshape(1, cout).astype(jnp.float32)

    # ---- flatten + halo-pad the activation once (cheap, 1x; no K-fold stack)
    xpad = jnp.pad(x.reshape(N, HW, cin).astype(jnp.bfloat16),
                   ((0, 0), (offh, offh), (0, 0)))

    inputs = [xpad]
    in_specs = [pl.BlockSpec((None, HW + 2 * offh, cin), lambda n: (n, 0, 0))]
    if cs:
        spad = jnp.pad(skip.reshape(N, HW, cs).astype(jnp.bfloat16),
                       ((0, 0), (dw, dw), (0, 0)))
        inputs.append(spad)
        in_specs.append(pl.BlockSpec((None, HW + 2 * dw, cs), lambda n: (n, 0, 0)))
    inputs += [w1f, b1v, w2f, b2v]
    in_specs += [
        pl.BlockSpec((3 * cin, c1), lambda n: (0, 0)),
        pl.BlockSpec((1, c1), lambda n: (0, 0)),
        pl.BlockSpec((3 * (c1 + cs), cout), lambda n: (0, 0)),
        pl.BlockSpec((1, cout), lambda n: (0, 0)),
    ]
    if has_head:
        inputs.append(head_w.reshape(1, cout).astype(jnp.float32))
        in_specs.append(pl.BlockSpec((1, cout), lambda n: (0, 0)))

    out_shapes, out_specs = [], []
    if emit_t:
        out_shapes.append(jax.ShapeDtypeStruct((N, HW, c1), jnp.bfloat16))
        out_specs.append(pl.BlockSpec((None, HW, c1), lambda n: (n, 0, 0)))
    if has_head:
        out_shapes.append(jax.ShapeDtypeStruct((N, HW, 1), jnp.float32))
        out_specs.append(pl.BlockSpec((None, HW, 1), lambda n: (n, 0, 0)))
    else:
        out_shapes.append(jax.ShapeDtypeStruct((N, HW, cout), jnp.bfloat16))
        out_specs.append(pl.BlockSpec((None, HW, cout), lambda n: (n, 0, 0)))

    kernel = functools.partial(_pair_kernel, H=H, W=W, dh=dh, dw=dw,
                               has_skip=cs > 0, emit_t=emit_t,
                               has_head=has_head)
    outs = pl.pallas_call(
        kernel,
        out_shape=tuple(out_shapes),
        grid_spec=pltpu.PrefetchScalarGridSpec(
            num_scalar_prefetch=0,
            grid=(N,),
            in_specs=in_specs,
            out_specs=tuple(out_specs),
            scratch_shapes=[pltpu.VMEM((HW + 2 * _LEAD, c1), jnp.bfloat16)],
        ),
        compiler_params=pltpu.CompilerParams(
            dimension_semantics=("parallel",)),
    )(*inputs)
    if not isinstance(outs, (tuple, list)):
        outs = [outs]
    outs = list(outs)

    res = []
    if emit_t:
        res.append(outs.pop(0).reshape(N, H, W, c1))
    last = outs.pop(0)
    res.append(last.reshape(N, H, W, 1 if has_head else cout))
    return tuple(res) if len(res) > 1 else res[0]


# ----------------------------------------------------------------------------
# Bridge: 3x3 conv + folded BN + ReLU (single fused contraction of depth 9*64)
# ----------------------------------------------------------------------------
def _bridge_kernel(x_ref, w_ref, b_ref, out_ref, *, H, W):
    HW = H * W
    halo = W + 1
    wpos = jax.lax.broadcasted_iota(jnp.int32, (HW, 1), 0) % W
    taps = []
    for di in (-1, 0, 1):
        for dj in (-1, 0, 1):
            v = x_ref[pl.ds(halo + di * W + dj, HW), :]
            if dj < 0:
                m = wpos >= (-dj)
            elif dj > 0:
                m = wpos < (W - dj)
            else:
                m = None
            taps.append(v if m is None else jnp.where(m, v, jnp.zeros_like(v)))
    xf = jnp.concatenate(taps, axis=-1)                        # (HW, 9*C)
    y = jnp.dot(xf, w_ref[...], preferred_element_type=jnp.float32)
    y = jnp.maximum(y + b_ref[...], 0.0)
    out_ref[...] = y.astype(out_ref.dtype)


def _run_bridge(x, w, b, bn):
    N, H, W, c = x.shape
    HW = H * W
    cout = w.shape[0]
    gamma, beta, mean, var = bn
    scale = gamma / jnp.sqrt(var + 1e-5)
    wf = (jnp.transpose(w, (2, 3, 1, 0)).reshape(9 * c, cout)
          * scale[None, :]).astype(jnp.bfloat16)
    bv = (b * scale + beta - mean * scale).reshape(1, cout).astype(jnp.float32)
    halo = W + 1
    xpad = jnp.pad(x.reshape(N, HW, c).astype(jnp.bfloat16),
                   ((0, 0), (halo, halo), (0, 0)))
    out = pl.pallas_call(
        functools.partial(_bridge_kernel, H=H, W=W),
        out_shape=jax.ShapeDtypeStruct((N, HW, cout), jnp.bfloat16),
        grid_spec=pltpu.PrefetchScalarGridSpec(
            num_scalar_prefetch=0,
            grid=(N,),
            in_specs=[
                pl.BlockSpec((None, HW + 2 * halo, c), lambda n: (n, 0, 0)),
                pl.BlockSpec((9 * c, cout), lambda n: (0, 0)),
                pl.BlockSpec((1, cout), lambda n: (0, 0)),
            ],
            out_specs=pl.BlockSpec((None, HW, cout), lambda n: (n, 0, 0)),
        ),
        compiler_params=pltpu.CompilerParams(
            dimension_semantics=("parallel",)),
    )(xpad, wf, bv)
    return out.reshape(N, H, W, cout)


# ----------------------------------------------------------------------------
# Pool / upsample glue (plain JAX)
# ----------------------------------------------------------------------------
def maxpool2x2(x):
    # TODO(synk): MaxPool2d ceil_mode=True for odd spatial sizes is not
    # handled; with a 16x16 input every pooled size stays even.
    N, H, W, C = x.shape
    return x.reshape(N, H // 2, 2, W // 2, 2, C).max(axis=(2, 4))


def upsample_bilinear_2x(x):
    # NHWC, matches torch bilinear with align_corners=False.
    N, H, W, C = x.shape

    def idx(out_size, in_size):
        i = jnp.arange(out_size, dtype=jnp.float32)
        src = jnp.clip((i + 0.5) / 2.0 - 0.5, 0.0, in_size - 1)
        i0 = jnp.floor(src).astype(jnp.int32)
        i1 = jnp.minimum(i0 + 1, in_size - 1)
        lam = src - i0.astype(jnp.float32)
        return i0, i1, lam

    h0, h1, lh = idx(2 * H, H)
    w0, w1, lw = idx(2 * W, W)
    xh = (x[:, h0] * (1.0 - lh)[None, :, None, None]
          + x[:, h1] * lh[None, :, None, None])
    out = (xh[:, :, w0] * (1.0 - lw)[None, None, :, None]
           + xh[:, :, w1] * lw[None, None, :, None])
    return out


# ----------------------------------------------------------------------------
# Deterministic parameter init (torch-like fan-in uniform; BN in eval mode)
# ----------------------------------------------------------------------------
def conv_init(key, cin, cout, kh, kw, bias=True):
    k1, k2 = jax.random.split(key)
    bound = 1.0 / float(jnp.sqrt(cin * kh * kw))
    w = jax.random.uniform(k1, (cout, cin, kh, kw), jnp.float32, -bound, bound)
    b = (jax.random.uniform(k2, (cout,), jnp.float32, -bound, bound)
         if bias else None)
    return w, b


def bn_init(key, c):
    k1, k2 = jax.random.split(key)
    gamma = 1.0 + 0.1 * jax.random.normal(k1, (c,), jnp.float32)
    beta = 0.1 * jax.random.normal(k2, (c,), jnp.float32)
    mean = jnp.zeros((c,), jnp.float32)
    var = jnp.ones((c,), jnp.float32)
    return gamma, beta, mean, var


def make_params(key, in_ch, out_ch):
    keys = iter(jax.random.split(key, 64))
    p = {}
    p['conv3x1_e1'] = conv_init(next(keys), in_ch, out_ch, 3, 1)
    p['conv1x3_e1'] = conv_init(next(keys), out_ch, 64, 1, 3)
    p['bn_e1'] = bn_init(next(keys), 64)
    p['conv3x1_e2'] = conv_init(next(keys), 64, 64, 3, 1)
    p['conv1x3_e2'] = conv_init(next(keys), 64, 64, 1, 3)
    p['bn_e2'] = bn_init(next(keys), 64)
    p['conv3x1_e3'] = conv_init(next(keys), 64, 64, 3, 1)
    p['conv1x3_e3'] = conv_init(next(keys), 64, 64, 1, 3)
    p['bn_e3'] = bn_init(next(keys), 64)
    p['conv3x1_e4'] = conv_init(next(keys), 64, 64, 3, 1)
    p['conv1x3_e4'] = conv_init(next(keys), 64, 64, 1, 3)
    p['bn_e4'] = bn_init(next(keys), 64)
    p['convb'] = conv_init(next(keys), 64, 64, 3, 3)
    p['bnb'] = bn_init(next(keys), 64)
    p['conv3x1_d4'] = conv_init(next(keys), 64, 64, 3, 1)
    p['conv1x3_d4'] = conv_init(next(keys), 128, 64, 1, 3)
    p['bn_d4'] = bn_init(next(keys), 64)
    p['conv3x1_d3'] = conv_init(next(keys), 64, 64, 3, 1)
    p['conv1x3_d3'] = conv_init(next(keys), 128, 64, 1, 3)
    p['bn_d3'] = bn_init(next(keys), 64)
    p['conv3x1_d2'] = conv_init(next(keys), 64, 64, 3, 1)
    p['conv1x3_d2'] = conv_init(next(keys), 128, 64, 1, 3)
    p['bn_d2'] = bn_init(next(keys), 64)
    p['conv3x1_d1'] = conv_init(next(keys), 64, 64, 3, 1)
    p['conv1x3_d1'] = conv_init(next(keys), out_ch + 64, 64, 1, 3)
    p['bn_d1'] = bn_init(next(keys), 64)
    p['downsample'] = conv_init(next(keys), 64, 1, 1, 1, bias=False)
    return p


# ----------------------------------------------------------------------------
# RRS_1D forward (NCHW in / NCHW out, internal NHWC / flat-rows)
# ----------------------------------------------------------------------------
def rrs_1d_forward(x_nchw, p):
    x = jnp.transpose(x_nchw, (0, 2, 3, 1)).astype(jnp.float32)  # NHWC

    # ----- encoder (each call = fused 3x1+ReLU, 1x3+BN+ReLU) -----
    ex1, hx = _run_pair(x, None, *p['conv3x1_e1'], *p['conv1x3_e1'],
                        p['bn_e1'], dh=1, dw=1, emit_t=True)
    hx = maxpool2x2(hx)
    ex2, hx = _run_pair(hx, None, *p['conv3x1_e2'], *p['conv1x3_e2'],
                        p['bn_e2'], dh=1, dw=1, emit_t=True)
    hx = maxpool2x2(hx)
    ex3, hx = _run_pair(hx, None, *p['conv3x1_e3'], *p['conv1x3_e3'],
                        p['bn_e3'], dh=2, dw=2, emit_t=True)
    hx = maxpool2x2(hx)
    ex4, hx = _run_pair(hx, None, *p['conv3x1_e4'], *p['conv1x3_e4'],
                        p['bn_e4'], dh=4, dw=4, emit_t=True)
    hx = maxpool2x2(hx)

    # ----- bridge -----
    eb = _run_bridge(hx, *p['convb'], p['bnb'])

    # ----- decoder (channel-concat folded into the split w2 weights) -----
    hx = upsample_bilinear_2x(eb)
    dx4 = _run_pair(hx, ex4, *p['conv3x1_d4'], *p['conv1x3_d4'],
                    p['bn_d4'], dh=4, dw=4, emit_t=False)
    hx = upsample_bilinear_2x(dx4)
    dx3 = _run_pair(hx, ex3, *p['conv3x1_d3'], *p['conv1x3_d3'],
                    p['bn_d3'], dh=2, dw=2, emit_t=False)
    hx = upsample_bilinear_2x(dx3)
    dx2 = _run_pair(hx, ex2, *p['conv3x1_d2'], *p['conv1x3_d2'],
                    p['bn_d2'], dh=1, dw=1, emit_t=False)
    hx = upsample_bilinear_2x(dx2)
    # last pair also applies the fused 1x1 'downsample' head -> residual
    residual = _run_pair(hx, ex1, *p['conv3x1_d1'], *p['conv1x3_d1'],
                         p['bn_d1'], dh=1, dw=1, emit_t=False,
                         head_w=p['downsample'][0])              # (N,H,W,1) f32

    residual = jnp.transpose(residual, (0, 3, 1, 2))              # (N,1,H,W)
    return x_nchw + residual                                      # broadcast over C


if __name__ == "__main__":
    key = jax.random.PRNGKey(0)
    k_x, k_p = jax.random.split(key)

    in_ch, out_ch = 4, 4
    x = jax.random.normal(k_x, (2, in_ch, 16, 16), jnp.float32)   # NCHW input
    params = make_params(k_p, in_ch, out_ch)

    fwd = jax.jit(rrs_1d_forward)
    y = fwd(x, params)
    jax.block_until_ready(y)

    assert y.shape == (2, in_ch, 16, 16), y.shape
    assert bool(jnp.all(jnp.isfinite(y)))
    print("KERNEL_OK")
</pallas_src>

<mosaic_0001>
module attributes {stable_mosaic.version = 11 : i64} {
  func.func @_pair_kernel(%arg0: i32, %arg1: memref<1x288x4xbf16, #tpu.memory_space<vmem>>, %arg2: memref<12x4xbf16, #tpu.memory_space<vmem>>, %arg3: memref<1x4xf32, #tpu.memory_space<vmem>>, %arg4: memref<12x64xbf16, #tpu.memory_space<vmem>>, %arg5: memref<1x64xf32, #tpu.memory_space<vmem>>, %arg6: memref<1x256x4xbf16, #tpu.memory_space<vmem>>, %arg7: memref<1x256x64xbf16, #tpu.memory_space<vmem>>, %arg8: memref<288x4xbf16, #tpu.memory_space<vmem>>) attributes {dimension_semantics = [#tpu.dimension_semantics<parallel>], iteration_bounds = array<i64: 2>, scalar_prefetch = 0 : i64, scratch_operands = 1 : i64, tpu.core_type = #tpu.core_type<tc>, window_params = [{transform_indices = @transform_0, window_bounds = array<i64: 1, 288, 4>}, {pipeline_mode = #tpu.pipeline_mode<synchronous>, transform_indices = @transform_1, window_bounds = array<i64: 12, 4>}, {pipeline_mode = #tpu.pipeline_mode<synchronous>, transform_indices = @transform_2, window_bounds = array<i64: 1, 4>}, {pipeline_mode = #tpu.pipeline_mode<synchronous>, transform_indices = @transform_3, window_bounds = array<i64: 12, 64>}, {pipeline_mode = #tpu.pipeline_mode<synchronous>, transform_indices = @transform_4, window_bounds = array<i64: 1, 64>}, {transform_indices = @transform_5, window_bounds = array<i64: 1, 256, 4>}, {transform_indices = @transform_6, window_bounds = array<i64: 1, 256, 64>}]} {
    %c0 = arith.constant 0 : index
    %c0_0 = arith.constant 0 : index
    %c0_1 = arith.constant 0 : index
    %0 = vector.load %arg1[%c0, %c0_0, %c0_1] : memref<1x288x4xbf16, #tpu.memory_space<vmem>>, vector<1x256x4xbf16>
    %1 = vector.shape_cast %0 : vector<1x256x4xbf16> to vector<256x4xbf16>
    %c0_2 = arith.constant 0 : index
    %c16 = arith.constant 16 : index
    %c0_3 = arith.constant 0 : index
    %2 = vector.load %arg1[%c0_2, %c16, %c0_3] : memref<1x288x4xbf16, #tpu.memory_space<vmem>>, vector<1x256x4xbf16>
    %3 = vector.shape_cast %2 : vector<1x256x4xbf16> to vector<256x4xbf16>
    %c0_4 = arith.constant 0 : index
    %c32 = arith.constant 32 : index
    %c0_5 = arith.constant 0 : index
    %4 = vector.load %arg1[%c0_4, %c32, %c0_5] : memref<1x288x4xbf16, #tpu.memory_space<vmem>>, vector<1x256x4xbf16>
    %5 = vector.shape_cast %4 : vector<1x256x4xbf16> to vector<256x4xbf16>
    %6 = tpu.concatenate %1, %3, %5 in 1 : vector<256x4xbf16>, vector<256x4xbf16>, vector<256x4xbf16> -> vector<256x12xbf16>
    %c0_6 = arith.constant 0 : index
    %c0_7 = arith.constant 0 : index
    %7 = vector.load %arg2[%c0_6, %c0_7] : memref<12x4xbf16, #tpu.memory_space<vmem>>, vector<12x4xbf16>
    %cst = arith.constant dense<0.000000e+00> : vector<256x4xf32>
    %8 = tpu.matmul %6, %7, %cst {dimension_numbers = #tpu.dot_dimension_numbers<[1], [0], [0], [1], [0, 0, 1, 1], [], []>} : vector<256x12xbf16>, vector<12x4xbf16>, vector<256x4xf32> -> vector<256x4xf32>
    %c0_8 = arith.constant 0 : index
    %c0_9 = arith.constant 0 : index
    %9 = vector.load %arg3[%c0_8, %c0_9] : memref<1x4xf32, #tpu.memory_space<vmem>>, vector<1x4xf32>
    %10 = vector.broadcast %9 : vector<1x4xf32> to vector<256x4xf32>
    %11 = arith.addf %8, %10 : vector<256x4xf32>
    %cst_10 = arith.constant 0.000000e+00 : f32
    %12 = vector.broadcast %cst_10 : f32 to vector<256x4xf32>
    %13 = arith.maximumf %11, %12 : vector<256x4xf32>
    %14 = arith.truncf %13 : vector<256x4xf32> to vector<256x4xbf16>
    %c0_11 = arith.constant 0 : index
    %c0_12 = arith.constant 0 : index
    %c0_13 = arith.constant 0 : index
    %15 = vector.load %arg6[%c0_11, %c0_12, %c0_13] : memref<1x256x4xbf16, #tpu.memory_space<vmem>>, vector<1x256x4xbf16>
    %16 = vector.shape_cast %15 : vector<1x256x4xbf16> to vector<256x4xbf16>
    %17 = vector.shape_cast %14 : vector<256x4xbf16> to vector<1x256x4xbf16>
    tpu.vector_store %arg6[%c0_11, %c0_12, %c0_13], %17 {strides = array<i32>} : memref<1x256x4xbf16, #tpu.memory_space<vmem>>, vector<1x256x4xbf16>,
    %cst_14 = arith.constant 0.000000e+00 : bf16
    %18 = vector.broadcast %cst_14 : bf16 to vector<288x4xbf16>
    %c0_15 = arith.constant 0 : index
    %c0_16 = arith.constant 0 : index
    %19 = vector.load %arg8[%c0_15, %c0_16] : memref<288x4xbf16, #tpu.memory_space<vmem>>, vector<288x4xbf16>
    tpu.vector_store %arg8[%c0_15, %c0_16], %18 {strides = array<i32>} : memref<288x4xbf16, #tpu.memory_space<vmem>>, vector<288x4xbf16>,
    %c16_17 = arith.constant 16 : index
    %c0_18 = arith.constant 0 : index
    %20 = vector.load %arg8[%c16_17, %c0_18] : memref<288x4xbf16, #tpu.memory_space<vmem>>, vector<256x4xbf16>
    tpu.vector_store %arg8[%c16_17, %c0_18], %14 {strides = array<i32>} : memref<288x4xbf16, #tpu.memory_space<vmem>>, vector<256x4xbf16>,
    %21 = tpu.iota {dimensions = array<i32: 0>} : vector<256x1xi32>
    %c16_i32 = arith.constant 16 : i32
    %c0_i32 = arith.constant 0 : i32
    %22 = arith.cmpi eq, %c16_i32, %c0_i32 : i32
    %c1_i32 = arith.constant 1 : i32
    %23 = arith.select %22, %c1_i32, %c16_i32 : i32
    %24 = vector.broadcast %23 : i32 to vector<256x1xi32>
    %25 = arith.remsi %21, %24 : vector<256x1xi32>
    %c0_i32_19 = arith.constant 0 : i32
    %26 = vector.broadcast %c0_i32_19 : i32 to vector<256x1xi32>
    %27 = arith.cmpi ne, %25, %26 : vector<256x1xi32>
    %c0_i32_20 = arith.constant 0 : i32
    %28 = vector.broadcast %c0_i32_20 : i32 to vector<256x1xi32>
    %29 = arith.cmpi slt, %25, %28 : vector<256x1xi32>
    %c0_i32_21 = arith.constant 0 : i32
    %30 = arith.cmpi slt, %23, %c0_i32_21 : i32
    %31 = vector.broadcast %30 : i1 to vector<256x1xi1>
    %32 = vector.broadcast %31 : vector<256x1xi1> to vector<256x1xi1>
    %33 = arith.xori %29, %32 : vector<256x1xi1>
    %34 = arith.andi %33, %27 : vector<256x1xi1>
    %35 = vector.broadcast %23 : i32 to vector<256x1xi32>
    %36 = arith.addi %25, %35 : vector<256x1xi32>
    %37 = arith.select %34, %36, %25 : vector<256x1xi1>, vector<256x1xi32>
    %c15 = arith.constant 15 : index
    %c0_22 = arith.constant 0 : index
    %38 = vector.load %arg8[%c15, %c0_22] : memref<288x4xbf16, #tpu.memory_space<vmem>>, vector<256x4xbf16>
    %c1_i32_23 = arith.constant 1 : i32
    %39 = vector.broadcast %c1_i32_23 : i32 to vector<256x1xi32>
    %40 = arith.cmpi sge, %37, %39 : vector<256x1xi32>
    %cst_24 = arith.constant 0.000000e+00 : bf16
    %41 = vector.broadcast %cst_24 : bf16 to vector<256x4xbf16>
    %42 = vector.shape_cast %40 : vector<256x1xi1> to vector<256x1xi1>
    %43 = vector.broadcast %42 : vector<256x1xi1> to vector<256x4xi1>
    %44 = arith.select %43, %38, %41 : vector<256x4xi1>, vector<256x4xbf16>
    %c16_25 = arith.constant 16 : index
    %c0_26 = arith.constant 0 : index
    %45 = vector.load %arg8[%c16_25, %c0_26] : memref<288x4xbf16, #tpu.memory_space<vmem>>, vector<256x4xbf16>
    %c17 = arith.constant 17 : index
    %c0_27 = arith.constant 0 : index
    %46 = vector.load %arg8[%c17, %c0_27] : memref<288x4xbf16, #tpu.memory_space<vmem>>, vector<256x4xbf16>
    %c15_i32 = arith.constant 15 : i32
    %47 = vector.broadcast %c15_i32 : i32 to vector<256x1xi32>
    %48 = arith.cmpi slt, %37, %47 : vector<256x1xi32>
    %cst_28 = arith.constant 0.000000e+00 : bf16
    %49 = vector.broadcast %cst_28 : bf16 to vector<256x4xbf16>
    %50 = vector.shape_cast %48 : vector<256x1xi1> to vector<256x1xi1>
    %51 = vector.broadcast %50 : vector<256x1xi1> to vector<256x4xi1>
    %52 = arith.select %51, %46, %49 : vector<256x4xi1>, vector<256x4xbf16>
    %53 = tpu.concatenate %44, %45, %52 in 1 : vector<256x4xbf16>, vector<256x4xbf16>, vector<256x4xbf16> -> vector<256x12xbf16>
    %c0_29 = arith.constant 0 : index
    %c0_30 = arith.constant 0 : index
    %54 = vector.load %arg4[%c0_29, %c0_30] : memref<12x64xbf16, #tpu.memory_space<vmem>>, vector<12x64xbf16>
    %cst_31 = arith.constant dense<0.000000e+00> : vector<256x64xf32>
    %55 = tpu.matmul %53, %54, %cst_31 {dimension_numbers = #tpu.dot_dimension_numbers<[1], [0], [0], [1], [0, 0, 1, 1], [], []>} : vector<256x12xbf16>, vector<12x64xbf16>, vector<256x64xf32> -> vector<256x64xf32>
    %c0_32 = arith.constant 0 : index
    %c0_33 = arith.constant 0 : index
    %56 = vector.load %arg5[%c0_32, %c0_33] : memref<1x64xf32, #tpu.memory_space<vmem>>, vector<1x64xf32>
    %57 = vector.broadcast %56 : vector<1x64xf32> to vector<256x64xf32>
    %58 = arith.addf %55, %57 : vector<256x64xf32>
    %cst_34 = arith.constant 0.000000e+00 : f32
    %59 = vector.broadcast %cst_34 : f32 to vector<256x64xf32>
    %60 = arith.maximumf %58, %59 : vector<256x64xf32>
    %61 = arith.truncf %60 : vector<256x64xf32> to vector<256x64xbf16>
    %c0_35 = arith.constant 0 : index
    %c0_36 = arith.constant 0 : index
    %c0_37 = arith.constant 0 : index
    %62 = vector.load %arg7[%c0_35, %c0_36, %c0_37] : memref<1x256x64xbf16, #tpu.memory_space<vmem>>, vector<1x256x64xbf16>
    %63 = vector.shape_cast %62 : vector<1x256x64xbf16> to vector<256x64xbf16>
    %64 = vector.shape_cast %61 : vector<256x64xbf16> to vector<1x256x64xbf16>
    tpu.vector_store %arg7[%c0_35, %c0_36, %c0_37], %64 {strides = array<i32>} : memref<1x256x64xbf16, #tpu.memory_space<vmem>>, vector<1x256x64xbf16>,
    return
  }
  func.func @transform_0(%arg0: i32) -> (i32, i32, i32) {
    %c0_i32 = arith.constant 0 : i32
    %c0_i32_0 = arith.constant 0 : i32
    %c0_i32_1 = arith.constant 0 : i32
    return %arg0, %c0_i32, %c0_i32_0 : i32, i32, i32
  }
  func.func @transform_1(%arg0: i32) -> (i32, i32) {
    %c0_i32 = arith.constant 0 : i32
    %c0_i32_0 = arith.constant 0 : i32
    %c0_i32_1 = arith.constant 0 : i32
    return %c0_i32, %c0_i32_0 : i32, i32
  }
  func.func @transform_2(%arg0: i32) -> (i32, i32) {
    %c0_i32 = arith.constant 0 : i32
    %c0_i32_0 = arith.constant 0 : i32
    %c0_i32_1 = arith.constant 0 : i32
    return %c0_i32, %c0_i32_0 : i32, i32
  }
  func.func @transform_3(%arg0: i32) -> (i32, i32) {
    %c0_i32 = arith.constant 0 : i32
    %c0_i32_0 = arith.constant 0 : i32
    %c0_i32_1 = arith.constant 0 : i32
    return %c0_i32, %c0_i32_0 : i32, i32
  }
  func.func @transform_4(%arg0: i32) -> (i32, i32) {
    %c0_i32 = arith.constant 0 : i32
    %c0_i32_0 = arith.constant 0 : i32
    %c0_i32_1 = arith.constant 0 : i32
    return %c0_i32, %c0_i32_0 : i32, i32
  }
  func.func @transform_5(%arg0: i32) -> (i32, i32, i32) {
    %c0_i32 = arith.constant 0 : i32
    %c0_i32_0 = arith.constant 0 : i32
    %c0_i32_1 = arith.constant 0 : i32
    return %arg0, %c0_i32, %c0_i32_0 : i32, i32, i32
  }
  func.func @transform_6(%arg0: i32) -> (i32, i32, i32) {
    %c0_i32 = arith.constant 0 : i32
    %c0_i32_0 = arith.constant 0 : i32
    %c0_i32_1 = arith.constant 0 : i32
    return %arg0, %c0_i32, %c0_i32_0 : i32, i32, i32
  }
}

module attributes {stable_mosaic.version = 11 : i64} {
  func.func @_pair_kernel(%arg0: i32, %arg1: memref<1x80x64xbf16, #tpu.memory_space<vmem>>, %arg2: memref<192x64xbf16, #tpu.memory_space<vmem>>, %arg3: memref<1x64xf32, #tpu.memory_space<vmem>>, %arg4: memref<192x64xbf16, #tpu.memory_space<vmem>>, %arg5: memref<1x64xf32, #tpu.memory_space<vmem>>, %arg6: memref<1x64x64xbf16, #tpu.memory_space<vmem>>, %arg7: memref<1x64x64xbf16, #tpu.memory_space<vmem>>, %arg8: memref<96x64xbf16, #tpu.memory_space<vmem>>) attributes {dimension_semantics = [#tpu.dimension_semantics<parallel>], iteration_bounds = array<i64: 2>, scalar_prefetch = 0 : i64, scratch_operands = 1 : i64, tpu.core_type = #tpu.core_type<tc>, window_params = [{transform_indices = @transform_0, window_bounds = array<i64: 1, 80, 64>}, {pipeline_mode = #tpu.pipeline_mode<synchronous>, transform_indices = @transform_1, window_bounds = array<i64: 192, 64>}, {pipeline_mode = #tpu.pipeline_mode<synchronous>, transform_indices = @transform_2, window_bounds = array<i64: 1, 64>}, {pipeline_mode = #tpu.pipeline_mode<synchronous>, transform_indices = @transform_3, window_bounds = array<i64: 192, 64>}, {pipeline_mode = #tpu.pipeline_mode<synchronous>, transform_indices = @transform_4, window_bounds = array<i64: 1, 64>}, {transform_indices = @transform_5, window_bounds = array<i64: 1, 64, 64>}, {transform_indices = @transform_6, window_bounds = array<i64: 1, 64, 64>}]} {
    %c0 = arith.constant 0 : index
    %c0_0 = arith.constant 0 : index
    %c0_1 = arith.constant 0 : index
    %0 = vector.load %arg1[%c0, %c0_0, %c0_1] : memref<1x80x64xbf16, #tpu.memory_space<vmem>>, vector<1x64x64xbf16>
    %1 = vector.shape_cast %0 : vector<1x64x64xbf16> to vector<64x64xbf16>
    %c0_2 = arith.constant 0 : index
    %c8 = arith.constant 8 : index
    %c0_3 = arith.constant 0 : index
    %2 = vector.load %arg1[%c0_2, %c8, %c0_3] : memref<1x80x64xbf16, #tpu.memory_space<vmem>>, vector<1x64x64xbf16>
    %3 = vector.shape_cast %2 : vector<1x64x64xbf16> to vector<64x64xbf16>
    %c0_4 = arith.constant 0 : index
    %c16 = arith.constant 16 : index
    %c0_5 = arith.constant 0 : index
    %4 = vector.load %arg1[%c0_4, %c16, %c0_5] : memref<1x80x64xbf16, #tpu.memory_space<vmem>>, vector<1x64x64xbf16>
    %5 = vector.shape_cast %4 : vector<1x64x64xbf16> to vector<64x64xbf16>
    %6 = tpu.concatenate %1, %3, %5 in 1 : vector<64x64xbf16>, vector<64x64xbf16>, vector<64x64xbf16> -> vector<64x192xbf16>
    %c0_6 = arith.constant 0 : index
    %c0_7 = arith.constant 0 : index
    %7 = vector.load %arg2[%c0_6, %c0_7] : memref<192x64xbf16, #tpu.memory_space<vmem>>, vector<192x64xbf16>
    %cst = arith.constant dense<0.000000e+00> : vector<64x64xf32>
    %8 = tpu.matmul %6, %7, %cst {dimension_numbers = #tpu.dot_dimension_numbers<[1], [0], [0], [1], [0, 0, 1, 1], [], []>} : vector<64x192xbf16>, vector<192x64xbf16>, vector<64x64xf32> -> vector<64x64xf32>
    %c0_8 = arith.constant 0 : index
    %c0_9 = arith.constant 0 : index
    %9 = vector.load %arg3[%c0_8, %c0_9] : memref<1x64xf32, #tpu.memory_space<vmem>>, vector<1x64xf32>
    %10 = vector.broadcast %9 : vector<1x64xf32> to vector<64x64xf32>
    %11 = arith.addf %8, %10 : vector<64x64xf32>
    %cst_10 = arith.constant 0.000000e+00 : f32
    %12 = vector.broadcast %cst_10 : f32 to vector<64x64xf32>
    %13 = arith.maximumf %11, %12 : vector<64x64xf32>
    %14 = arith.truncf %13 : vector<64x64xf32> to vector<64x64xbf16>
    %c0_11 = arith.constant 0 : index
    %c0_12 = arith.constant 0 : index
    %c0_13 = arith.constant 0 : index
    %15 = vector.load %arg6[%c0_11, %c0_12, %c0_13] : memref<1x64x64xbf16, #tpu.memory_space<vmem>>, vector<1x64x64xbf16>
    %16 = vector.shape_cast %15 : vector<1x64x64xbf16> to vector<64x64xbf16>
    %17 = vector.shape_cast %14 : vector<64x64xbf16> to vector<1x64x64xbf16>
    tpu.vector_store %arg6[%c0_11, %c0_12, %c0_13], %17 {strides = array<i32>} : memref<1x64x64xbf16, #tpu.memory_space<vmem>>, vector<1x64x64xbf16>,
    %cst_14 = arith.constant 0.000000e+00 : bf16
    %18 = vector.broadcast %cst_14 : bf16 to vector<96x64xbf16>
    %c0_15 = arith.constant 0 : index
    %c0_16 = arith.constant 0 : index
    %19 = vector.load %arg8[%c0_15, %c0_16] : memref<96x64xbf16, #tpu.memory_space<vmem>>, vector<96x64xbf16>
    tpu.vector_store %arg8[%c0_15, %c0_16], %18 {strides = array<i32>} : memref<96x64xbf16, #tpu.memory_space<vmem>>, vector<96x64xbf16>,
    %c16_17 = arith.constant 16 : index
    %c0_18 = arith.constant 0 : index
    %20 = vector.load %arg8[%c16_17, %c0_18] : memref<96x64xbf16, #tpu.memory_space<vmem>>, vector<64x64xbf16>
    tpu.vector_store %arg8[%c16_17, %c0_18], %14 {strides = array<i32>} : memref<96x64xbf16, #tpu.memory_space<vmem>>, vector<64x64xbf16>,
    %21 = tpu.iota {dimensions = array<i32: 0>} : vector<64x1xi32>
    %c8_i32 = arith.constant 8 : i32
    %c0_i32 = arith.constant 0 : i32
    %22 = arith.cmpi eq, %c8_i32, %c0_i32 : i32
    %c1_i32 = arith.constant 1 : i32
    %23 = arith.select %22, %c1_i32, %c8_i32 : i32
    %24 = vector.broadcast %23 : i32 to vector<64x1xi32>
    %25 = arith.remsi %21, %24 : vector<64x1xi32>
    %c0_i32_19 = arith.constant 0 : i32
    %26 = vector.broadcast %c0_i32_19 : i32 to vector<64x1xi32>
    %27 = arith.cmpi ne, %25, %26 : vector<64x1xi32>
    %c0_i32_20 = arith.constant 0 : i32
    %28 = vector.broadcast %c0_i32_20 : i32 to vector<64x1xi32>
    %29 = arith.cmpi slt, %25, %28 : vector<64x1xi32>
    %c0_i32_21 = arith.constant 0 : i32
    %30 = arith.cmpi slt, %23, %c0_i32_21 : i32
    %31 = vector.broadcast %30 : i1 to vector<64x1xi1>
    %32 = vector.broadcast %31 : vector<64x1xi1> to vector<64x1xi1>
    %33 = arith.xori %29, %32 : vector<64x1xi1>
    %34 = arith.andi %33, %27 : vector<64x1xi1>
    %35 = vector.broadcast %23 : i32 to vector<64x1xi32>
    %36 = arith.addi %25, %35 : vector<64x1xi32>
    %37 = arith.select %34, %36, %25 : vector<64x1xi1>, vector<64x1xi32>
    %c15 = arith.constant 15 : index
    %c0_22 = arith.constant 0 : index
    %38 = vector.load %arg8[%c15, %c0_22] : memref<96x64xbf16, #tpu.memory_space<vmem>>, vector<64x64xbf16>
    %c1_i32_23 = arith.constant 1 : i32
    %39 = vector.broadcast %c1_i32_23 : i32 to vector<64x1xi32>
    %40 = arith.cmpi sge, %37, %39 : vector<64x1xi32>
    %cst_24 = arith.constant 0.000000e+00 : bf16
    %41 = vector.broadcast %cst_24 : bf16 to vector<64x64xbf16>
    %42 = vector.shape_cast %40 : vector<64x1xi1> to vector<64x1xi1>
    %43 = vector.broadcast %42 : vector<64x1xi1> to vector<64x64xi1>
    %44 = arith.select %43, %38, %41 : vector<64x64xi1>, vector<64x64xbf16>
    %c16_25 = arith.constant 16 : index
    %c0_26 = arith.constant 0 : index
    %45 = vector.load %arg8[%c16_25, %c0_26] : memref<96x64xbf16, #tpu.memory_space<vmem>>, vector<64x64xbf16>
    %c17 = arith.constant 17 : index
    %c0_27 = arith.constant 0 : index
    %46 = vector.load %arg8[%c17, %c0_27] : memref<96x64xbf16, #tpu.memory_space<vmem>>, vector<64x64xbf16>
    %c7_i32 = arith.constant 7 : i32
    %47 = vector.broadcast %c7_i32 : i32 to vector<64x1xi32>
    %48 = arith.cmpi slt, %37, %47 : vector<64x1xi32>
    %cst_28 = arith.constant 0.000000e+00 : bf16
    %49 = vector.broadcast %cst_28 : bf16 to vector<64x64xbf16>
    %50 = vector.shape_cast %48 : vector<64x1xi1> to vector<64x1xi1>
    %51 = vector.broadcast %50 : vector<64x1xi1> to vector<64x64xi1>
    %52 = arith.select %51, %46, %49 : vector<64x64xi1>, vector<64x64xbf16>
    %53 = tpu.concatenate %44, %45, %52 in 1 : vector<64x64xbf16>, vector<64x64xbf16>, vector<64x64xbf16> -> vector<64x192xbf16>
    %c0_29 = arith.constant 0 : index
    %c0_30 = arith.constant 0 : index
    %54 = vector.load %arg4[%c0_29, %c0_30] : memref<192x64xbf16, #tpu.memory_space<vmem>>, vector<192x64xbf16>
    %cst_31 = arith.constant dense<0.000000e+00> : vector<64x64xf32>
    %55 = tpu.matmul %53, %54, %cst_31 {dimension_numbers = #tpu.dot_dimension_numbers<[1], [0], [0], [1], [0, 0, 1, 1], [], []>} : vector<64x192xbf16>, vector<192x64xbf16>, vector<64x64xf32> -> vector<64x64xf32>
    %c0_32 = arith.constant 0 : index
    %c0_33 = arith.constant 0 : index
    %56 = vector.load %arg5[%c0_32, %c0_33] : memref<1x64xf32, #tpu.memory_space<vmem>>, vector<1x64xf32>
    %57 = vector.broadcast %56 : vector<1x64xf32> to vector<64x64xf32>
    %58 = arith.addf %55, %57 : vector<64x64xf32>
    %cst_34 = arith.constant 0.000000e+00 : f32
    %59 = vector.broadcast %cst_34 : f32 to vector<64x64xf32>
    %60 = arith.maximumf %58, %59 : vector<64x64xf32>
    %61 = arith.truncf %60 : vector<64x64xf32> to vector<64x64xbf16>
    %c0_35 = arith.constant 0 : index
    %c0_36 = arith.constant 0 : index
    %c0_37 = arith.constant 0 : index
    %62 = vector.load %arg7[%c0_35, %c0_36, %c0_37] : memref<1x64x64xbf16, #tpu.memory_space<vmem>>, vector<1x64x64xbf16>
    %63 = vector.shape_cast %62 : vector<1x64x64xbf16> to vector<64x64xbf16>
    %64 = vector.shape_cast %61 : vector<64x64xbf16> to vector<1x64x64xbf16>
    tpu.vector_store %arg7[%c0_35, %c0_36, %c0_37], %64 {strides = array<i32>} : memref<1x64x64xbf16, #tpu.memory_space<vmem>>, vector<1x64x64xbf16>,
    return
  }
  func.func @transform_0(%arg0: i32) -> (i32, i32, i32) {
    %c0_i32 = arith.constant 0 : i32
    %c0_i32_0 = arith.constant 0 : i32
    %c0_i32_1 = arith.constant 0 : i32
    return %arg0, %c0_i32, %c0_i32_0 : i32, i32, i32
  }
  func.func @transform_1(%arg0: i32) -> (i32, i32) {
    %c0_i32 = arith.constant 0 : i32
    %c0_i32_0 = arith.constant 0 : i32
    %c0_i32_1 = arith.constant 0 : i32
    return %c0_i32, %c0_i32_0 : i32, i32
  }
  func.func @transform_2(%arg0: i32) -> (i32, i32) {
    %c0_i32 = arith.constant 0 : i32
    %c0_i32_0 = arith.constant 0 : i32
    %c0_i32_1 = arith.constant 0 : i32
    return %c0_i32, %c0_i32_0 : i32, i32
  }
  func.func @transform_3(%arg0: i32) -> (i32, i32) {
    %c0_i32 = arith.constant 0 : i32
    %c0_i32_0 = arith.constant 0 : i32
    %c0_i32_1 = arith.constant 0 : i32
    return %c0_i32, %c0_i32_0 : i32, i32
  }
  func.func @transform_4(%arg0: i32) -> (i32, i32) {
    %c0_i32 = arith.constant 0 : i32
    %c0_i32_0 = arith.constant 0 : i32
    %c0_i32_1 = arith.constant 0 : i32
    return %c0_i32, %c0_i32_0 : i32, i32
  }
  func.func @transform_5(%arg0: i32) -> (i32, i32, i32) {
    %c0_i32 = arith.constant 0 : i32
    %c0_i32_0 = arith.constant 0 : i32
    %c0_i32_1 = arith.constant 0 : i32
    return %arg0, %c0_i32, %c0_i32_0 : i32, i32, i32
  }
  func.func @transform_6(%arg0: i32) -> (i32, i32, i32) {
    %c0_i32 = arith.constant 0 : i32
    %c0_i32_0 = arith.constant 0 : i32
    %c0_i32_1 = arith.constant 0 : i32
    return %arg0, %c0_i32, %c0_i32_0 : i32, i32, i32
  }
}

module attributes {stable_mosaic.version = 11 : i64} {
  func.func @_pair_kernel(%arg0: i32, %arg1: memref<1x32x64xbf16, #tpu.memory_space<vmem>>, %arg2: memref<192x64xbf16, #tpu.memory_space<vmem>>, %arg3: memref<1x64xf32, #tpu.memory_space<vmem>>, %arg4: memref<192x64xbf16, #tpu.memory_space<vmem>>, %arg5: memref<1x64xf32, #tpu.memory_space<vmem>>, %arg6: memref<1x16x64xbf16, #tpu.memory_space<vmem>>, %arg7: memref<1x16x64xbf16, #tpu.memory_space<vmem>>, %arg8: memref<48x64xbf16, #tpu.memory_space<vmem>>) attributes {dimension_semantics = [#tpu.dimension_semantics<parallel>], iteration_bounds = array<i64: 2>, scalar_prefetch = 0 : i64, scratch_operands = 1 : i64, tpu.core_type = #tpu.core_type<tc>, window_params = [{transform_indices = @transform_0, window_bounds = array<i64: 1, 32, 64>}, {pipeline_mode = #tpu.pipeline_mode<synchronous>, transform_indices = @transform_1, window_bounds = array<i64: 192, 64>}, {pipeline_mode = #tpu.pipeline_mode<synchronous>, transform_indices = @transform_2, window_bounds = array<i64: 1, 64>}, {pipeline_mode = #tpu.pipeline_mode<synchronous>, transform_indices = @transform_3, window_bounds = array<i64: 192, 64>}, {pipeline_mode = #tpu.pipeline_mode<synchronous>, transform_indices = @transform_4, window_bounds = array<i64: 1, 64>}, {transform_indices = @transform_5, window_bounds = array<i64: 1, 16, 64>}, {transform_indices = @transform_6, window_bounds = array<i64: 1, 16, 64>}]} {
    %c0 = arith.constant 0 : index
    %c0_0 = arith.constant 0 : index
    %c0_1 = arith.constant 0 : index
    %0 = vector.load %arg1[%c0, %c0_0, %c0_1] : memref<1x32x64xbf16, #tpu.memory_space<vmem>>, vector<1x16x64xbf16>
    %1 = vector.shape_cast %0 : vector<1x16x64xbf16> to vector<16x64xbf16>
    %c0_2 = arith.constant 0 : index
    %c8 = arith.constant 8 : index
    %c0_3 = arith.constant 0 : index
    %2 = vector.load %arg1[%c0_2, %c8, %c0_3] : memref<1x32x64xbf16, #tpu.memory_space<vmem>>, vector<1x16x64xbf16>
    %3 = vector.shape_cast %2 : vector<1x16x64xbf16> to vector<16x64xbf16>
    %c0_4 = arith.constant 0 : index
    %c16 = arith.constant 16 : index
    %c0_5 = arith.constant 0 : index
    %4 = vector.load %arg1[%c0_4, %c16, %c0_5] : memref<1x32x64xbf16, #tpu.memory_space<vmem>>, vector<1x16x64xbf16>
    %5 = vector.shape_cast %4 : vector<1x16x64xbf16> to vector<16x64xbf16>
    %6 = tpu.concatenate %1, %3, %5 in 1 : vector<16x64xbf16>, vector<16x64xbf16>, vector<16x64xbf16> -> vector<16x192xbf16>
    %c0_6 = arith.constant 0 : index
    %c0_7 = arith.constant 0 : index
    %7 = vector.load %arg2[%c0_6, %c0_7] : memref<192x64xbf16, #tpu.memory_space<vmem>>, vector<192x64xbf16>
    %cst = arith.constant dense<0.000000e+00> : vector<16x64xf32>
    %8 = tpu.matmul %6, %7, %cst {dimension_numbers = #tpu.dot_dimension_numbers<[1], [0], [0], [1], [0, 0, 1, 1], [], []>} : vector<16x192xbf16>, vector<192x64xbf16>, vector<16x64xf32> -> vector<16x64xf32>
    %c0_8 = arith.constant 0 : index
    %c0_9 = arith.constant 0 : index
    %9 = vector.load %arg3[%c0_8, %c0_9] : memref<1x64xf32, #tpu.memory_space<vmem>>, vector<1x64xf32>
    %10 = vector.broadcast %9 : vector<1x64xf32> to vector<16x64xf32>
    %11 = arith.addf %8, %10 : vector<16x64xf32>
    %cst_10 = arith.constant 0.000000e+00 : f32
    %12 = vector.broadcast %cst_10 : f32 to vector<16x64xf32>
    %13 = arith.maximumf %11, %12 : vector<16x64xf32>
    %14 = arith.truncf %13 : vector<16x64xf32> to vector<16x64xbf16>
    %c0_11 = arith.constant 0 : index
    %c0_12 = arith.constant 0 : index
    %c0_13 = arith.constant 0 : index
    %15 = vector.load %arg6[%c0_11, %c0_12, %c0_13] : memref<1x16x64xbf16, #tpu.memory_space<vmem>>, vector<1x16x64xbf16>
    %16 = vector.shape_cast %15 : vector<1x16x64xbf16> to vector<16x64xbf16>
    %17 = vector.shape_cast %14 : vector<16x64xbf16> to vector<1x16x64xbf16>
    tpu.vector_store %arg6[%c0_11, %c0_12, %c0_13], %17 {strides = array<i32>} : memref<1x16x64xbf16, #tpu.memory_space<vmem>>, vector<1x16x64xbf16>,
    %cst_14 = arith.constant 0.000000e+00 : bf16
    %18 = vector.broadcast %cst_14 : bf16 to vector<48x64xbf16>
    %c0_15 = arith.constant 0 : index
    %c0_16 = arith.constant 0 : index
    %19 = vector.load %arg8[%c0_15, %c0_16] : memref<48x64xbf16, #tpu.memory_space<vmem>>, vector<48x64xbf16>
    tpu.vector_store %arg8[%c0_15, %c0_16], %18 {strides = array<i32>} : memref<48x64xbf16, #tpu.memory_space<vmem>>, vector<48x64xbf16>,
    %c16_17 = arith.constant 16 : index
    %c0_18 = arith.constant 0 : index
    %20 = vector.load %arg8[%c16_17, %c0_18] : memref<48x64xbf16, #tpu.memory_space<vmem>>, vector<16x64xbf16>
    tpu.vector_store %arg8[%c16_17, %c0_18], %14 {strides = array<i32>} : memref<48x64xbf16, #tpu.memory_space<vmem>>, vector<16x64xbf16>,
    %21 = tpu.iota {dimensions = array<i32: 0>} : vector<16x1xi32>
    %c4_i32 = arith.constant 4 : i32
    %c0_i32 = arith.constant 0 : i32
    %22 = arith.cmpi eq, %c4_i32, %c0_i32 : i32
    %c1_i32 = arith.constant 1 : i32
    %23 = arith.select %22, %c1_i32, %c4_i32 : i32
    %24 = vector.broadcast %23 : i32 to vector<16x1xi32>
    %25 = arith.remsi %21, %24 : vector<16x1xi32>
    %c0_i32_19 = arith.constant 0 : i32
    %26 = vector.broadcast %c0_i32_19 : i32 to vector<16x1xi32>
    %27 = arith.cmpi ne, %25, %26 : vector<16x1xi32>
    %c0_i32_20 = arith.constant 0 : i32
    %28 = vector.broadcast %c0_i32_20 : i32 to vector<16x1xi32>
    %29 = arith.cmpi slt, %25, %28 : vector<16x1xi32>
    %c0_i32_21 = arith.constant 0 : i32
    %30 = arith.cmpi slt, %23, %c0_i32_21 : i32
    %31 = vector.broadcast %30 : i1 to vector<16x1xi1>
    %32 = vector.broadcast %31 : vector<16x1xi1> to vector<16x1xi1>
    %33 = arith.xori %29, %32 : vector<16x1xi1>
    %34 = arith.andi %33, %27 : vector<16x1xi1>
    %35 = vector.broadcast %23 : i32 to vector<16x1xi32>
    %36 = arith.addi %25, %35 : vector<16x1xi32>
    %37 = arith.select %34, %36, %25 : vector<16x1xi1>, vector<16x1xi32>
    %c14 = arith.constant 14 : index
    %c0_22 = arith.constant 0 : index
    %38 = vector.load %arg8[%c14, %c0_22] : memref<48x64xbf16, #tpu.memory_space<vmem>>, vector<16x64xbf16>
    %c2_i32 = arith.constant 2 : i32
    %39 = vector.broadcast %c2_i32 : i32 to vector<16x1xi32>
    %40 = arith.cmpi sge, %37, %39 : vector<16x1xi32>
    %cst_23 = arith.constant 0.000000e+00 : bf16
    %41 = vector.broadcast %cst_23 : bf16 to vector<16x64xbf16>
    %42 = vector.shape_cast %40 : vector<16x1xi1> to vector<16x1xi1>
    %43 = vector.broadcast %42 : vector<16x1xi1> to vector<16x64xi1>
    %44 = arith.select %43, %38, %41 : vector<16x64xi1>, vector<16x64xbf16>
    %c16_24 = arith.constant 16 : index
    %c0_25 = arith.constant 0 : index
    %45 = vector.load %arg8[%c16_24, %c0_25] : memref<48x64xbf16, #tpu.memory_space<vmem>>, vector<16x64xbf16>
    %c18 = arith.constant 18 : index
    %c0_26 = arith.constant 0 : index
    %46 = vector.load %arg8[%c18, %c0_26] : memref<48x64xbf16, #tpu.memory_space<vmem>>, vector<16x64xbf16>
    %c2_i32_27 = arith.constant 2 : i32
    %47 = vector.broadcast %c2_i32_27 : i32 to vector<16x1xi32>
    %48 = arith.cmpi slt, %37, %47 : vector<16x1xi32>
    %cst_28 = arith.constant 0.000000e+00 : bf16
    %49 = vector.broadcast %cst_28 : bf16 to vector<16x64xbf16>
    %50 = vector.shape_cast %48 : vector<16x1xi1> to vector<16x1xi1>
    %51 = vector.broadcast %50 : vector<16x1xi1> to vector<16x64xi1>
    %52 = arith.select %51, %46, %49 : vector<16x64xi1>, vector<16x64xbf16>
    %53 = tpu.concatenate %44, %45, %52 in 1 : vector<16x64xbf16>, vector<16x64xbf16>, vector<16x64xbf16> -> vector<16x192xbf16>
    %c0_29 = arith.constant 0 : index
    %c0_30 = arith.constant 0 : index
    %54 = vector.load %arg4[%c0_29, %c0_30] : memref<192x64xbf16, #tpu.memory_space<vmem>>, vector<192x64xbf16>
    %cst_31 = arith.constant dense<0.000000e+00> : vector<16x64xf32>
    %55 = tpu.matmul %53, %54, %cst_31 {dimension_numbers = #tpu.dot_dimension_numbers<[1], [0], [0], [1], [0, 0, 1, 1], [], []>} : vector<16x192xbf16>, vector<192x64xbf16>, vector<16x64xf32> -> vector<16x64xf32>
    %c0_32 = arith.constant 0 : index
    %c0_33 = arith.constant 0 : index
    %56 = vector.load %arg5[%c0_32, %c0_33] : memref<1x64xf32, #tpu.memory_space<vmem>>, vector<1x64xf32>
    %57 = vector.broadcast %56 : vector<1x64xf32> to vector<16x64xf32>
    %58 = arith.addf %55, %57 : vector<16x64xf32>
    %cst_34 = arith.constant 0.000000e+00 : f32
    %59 = vector.broadcast %cst_34 : f32 to vector<16x64xf32>
    %60 = arith.maximumf %58, %59 : vector<16x64xf32>
    %61 = arith.truncf %60 : vector<16x64xf32> to vector<16x64xbf16>
    %c0_35 = arith.constant 0 : index
    %c0_36 = arith.constant 0 : index
    %c0_37 = arith.constant 0 : index
    %62 = vector.load %arg7[%c0_35, %c0_36, %c0_37] : memref<1x16x64xbf16, #tpu.memory_space<vmem>>, vector<1x16x64xbf16>
    %63 = vector.shape_cast %62 : vector<1x16x64xbf16> to vector<16x64xbf16>
    %64 = vector.shape_cast %61 : vector<16x64xbf16> to vector<1x16x64xbf16>
    tpu.vector_store %arg7[%c0_35, %c0_36, %c0_37], %64 {strides = array<i32>} : memref<1x16x64xbf16, #tpu.memory_space<vmem>>, vector<1x16x64xbf16>,
    return
  }
  func.func @transform_0(%arg0: i32) -> (i32, i32, i32) {
    %c0_i32 = arith.constant 0 : i32
    %c0_i32_0 = arith.constant 0 : i32
    %c0_i32_1 = arith.constant 0 : i32
    return %arg0, %c0_i32, %c0_i32_0 : i32, i32, i32
  }
  func.func @transform_1(%arg0: i32) -> (i32, i32) {
    %c0_i32 = arith.constant 0 : i32
    %c0_i32_0 = arith.constant 0 : i32
    %c0_i32_1 = arith.constant 0 : i32
    return %c0_i32, %c0_i32_0 : i32, i32
  }
  func.func @transform_2(%arg0: i32) -> (i32, i32) {
    %c0_i32 = arith.constant 0 : i32
    %c0_i32_0 = arith.constant 0 : i32
    %c0_i32_1 = arith.constant 0 : i32
    return %c0_i32, %c0_i32_0 : i32, i32
  }
  func.func @transform_3(%arg0: i32) -> (i32, i32) {
    %c0_i32 = arith.constant 0 : i32
    %c0_i32_0 = arith.constant 0 : i32
    %c0_i32_1 = arith.constant 0 : i32
    return %c0_i32, %c0_i32_0 : i32, i32
  }
  func.func @transform_4(%arg0: i32) -> (i32, i32) {
    %c0_i32 = arith.constant 0 : i32
    %c0_i32_0 = arith.constant 0 : i32
    %c0_i32_1 = arith.constant 0 : i32
    return %c0_i32, %c0_i32_0 : i32, i32
  }
  func.func @transform_5(%arg0: i32) -> (i32, i32, i32) {
    %c0_i32 = arith.constant 0 : i32
    %c0_i32_0 = arith.constant 0 : i32
    %c0_i32_1 = arith.constant 0 : i32
    return %arg0, %c0_i32, %c0_i32_0 : i32, i32, i32
  }
  func.func @transform_6(%arg0: i32) -> (i32, i32, i32) {
    %c0_i32 = arith.constant 0 : i32
    %c0_i32_0 = arith.constant 0 : i32
    %c0_i32_1 = arith.constant 0 : i32
    return %arg0, %c0_i32, %c0_i32_0 : i32, i32, i32
  }
}

module attributes {stable_mosaic.version = 11 : i64} {
  func.func @_pair_kernel(%arg0: i32, %arg1: memref<1x20x64xbf16, #tpu.memory_space<vmem>>, %arg2: memref<192x64xbf16, #tpu.memory_space<vmem>>, %arg3: memref<1x64xf32, #tpu.memory_space<vmem>>, %arg4: memref<192x64xbf16, #tpu.memory_space<vmem>>, %arg5: memref<1x64xf32, #tpu.memory_space<vmem>>, %arg6: memref<1x4x64xbf16, #tpu.memory_space<vmem>>, %arg7: memref<1x4x64xbf16, #tpu.memory_space<vmem>>, %arg8: memref<36x64xbf16, #tpu.memory_space<vmem>>) attributes {dimension_semantics = [#tpu.dimension_semantics<parallel>], iteration_bounds = array<i64: 2>, scalar_prefetch = 0 : i64, scratch_operands = 1 : i64, tpu.core_type = #tpu.core_type<tc>, window_params = [{transform_indices = @transform_0, window_bounds = array<i64: 1, 20, 64>}, {pipeline_mode = #tpu.pipeline_mode<synchronous>, transform_indices = @transform_1, window_bounds = array<i64: 192, 64>}, {pipeline_mode = #tpu.pipeline_mode<synchronous>, transform_indices = @transform_2, window_bounds = array<i64: 1, 64>}, {pipeline_mode = #tpu.pipeline_mode<synchronous>, transform_indices = @transform_3, window_bounds = array<i64: 192, 64>}, {pipeline_mode = #tpu.pipeline_mode<synchronous>, transform_indices = @transform_4, window_bounds = array<i64: 1, 64>}, {transform_indices = @transform_5, window_bounds = array<i64: 1, 4, 64>}, {transform_indices = @transform_6, window_bounds = array<i64: 1, 4, 64>}]} {
    %c0 = arith.constant 0 : index
    %c0_0 = arith.constant 0 : index
    %c0_1 = arith.constant 0 : index
    %0 = vector.load %arg1[%c0, %c0_0, %c0_1] : memref<1x20x64xbf16, #tpu.memory_space<vmem>>, vector<1x4x64xbf16>
    %1 = vector.shape_cast %0 : vector<1x4x64xbf16> to vector<4x64xbf16>
    %c0_2 = arith.constant 0 : index
    %c8 = arith.constant 8 : index
    %c0_3 = arith.constant 0 : index
    %2 = vector.load %arg1[%c0_2, %c8, %c0_3] : memref<1x20x64xbf16, #tpu.memory_space<vmem>>, vector<1x4x64xbf16>
    %3 = vector.shape_cast %2 : vector<1x4x64xbf16> to vector<4x64xbf16>
    %c0_4 = arith.constant 0 : index
    %c16 = arith.constant 16 : index
    %c0_5 = arith.constant 0 : index
    %4 = vector.load %arg1[%c0_4, %c16, %c0_5] : memref<1x20x64xbf16, #tpu.memory_space<vmem>>, vector<1x4x64xbf16>
    %5 = vector.shape_cast %4 : vector<1x4x64xbf16> to vector<4x64xbf16>
    %6 = tpu.concatenate %1, %3, %5 in 1 : vector<4x64xbf16>, vector<4x64xbf16>, vector<4x64xbf16> -> vector<4x192xbf16>
    %c0_6 = arith.constant 0 : index
    %c0_7 = arith.constant 0 : index
    %7 = vector.load %arg2[%c0_6, %c0_7] : memref<192x64xbf16, #tpu.memory_space<vmem>>, vector<192x64xbf16>
    %cst = arith.constant dense<0.000000e+00> : vector<4x64xf32>
    %8 = tpu.matmul %6, %7, %cst {dimension_numbers = #tpu.dot_dimension_numbers<[1], [0], [0], [1], [0, 0, 1, 1], [], []>} : vector<4x192xbf16>, vector<192x64xbf16>, vector<4x64xf32> -> vector<4x64xf32>
    %c0_8 = arith.constant 0 : index
    %c0_9 = arith.constant 0 : index
    %9 = vector.load %arg3[%c0_8, %c0_9] : memref<1x64xf32, #tpu.memory_space<vmem>>, vector<1x64xf32>
    %10 = vector.broadcast %9 : vector<1x64xf32> to vector<4x64xf32>
    %11 = arith.addf %8, %10 : vector<4x64xf32>
    %cst_10 = arith.constant 0.000000e+00 : f32
    %12 = vector.broadcast %cst_10 : f32 to vector<4x64xf32>
    %13 = arith.maximumf %11, %12 : vector<4x64xf32>
    %14 = arith.truncf %13 : vector<4x64xf32> to vector<4x64xbf16>
    %c0_11 = arith.constant 0 : index
    %c0_12 = arith.constant 0 : index
    %c0_13 = arith.constant 0 : index
    %15 = vector.load %arg6[%c0_11, %c0_12, %c0_13] : memref<1x4x64xbf16, #tpu.memory_space<vmem>>, vector<1x4x64xbf16>
    %16 = vector.shape_cast %15 : vector<1x4x64xbf16> to vector<4x64xbf16>
    %17 = vector.shape_cast %14 : vector<4x64xbf16> to vector<1x4x64xbf16>
    tpu.vector_store %arg6[%c0_11, %c0_12, %c0_13], %17 {strides = array<i32>} : memref<1x4x64xbf16, #tpu.memory_space<vmem>>, vector<1x4x64xbf16>,
    %cst_14 = arith.constant 0.000000e+00 : bf16
    %18 = vector.broadcast %cst_14 : bf16 to vector<36x64xbf16>
    %c0_15 = arith.constant 0 : index
    %c0_16 = arith.constant 0 : index
    %19 = vector.load %arg8[%c0_15, %c0_16] : memref<36x64xbf16, #tpu.memory_space<vmem>>, vector<36x64xbf16>
    tpu.vector_store %arg8[%c0_15, %c0_16], %18 {strides = array<i32>} : memref<36x64xbf16, #tpu.memory_space<vmem>>, vector<36x64xbf16>,
    %c16_17 = arith.constant 16 : index
    %c0_18 = arith.constant 0 : index
    %20 = vector.load %arg8[%c16_17, %c0_18] : memref<36x64xbf16, #tpu.memory_space<vmem>>, vector<4x64xbf16>
    tpu.vector_store %arg8[%c16_17, %c0_18], %14 {strides = array<i32>} : memref<36x64xbf16, #tpu.memory_space<vmem>>, vector<4x64xbf16>,
    %21 = tpu.iota {dimensions = array<i32: 0>} : vector<4x1xi32>
    %c2_i32 = arith.constant 2 : i32
    %c0_i32 = arith.constant 0 : i32
    %22 = arith.cmpi eq, %c2_i32, %c0_i32 : i32
    %c1_i32 = arith.constant 1 : i32
    %23 = arith.select %22, %c1_i32, %c2_i32 : i32
    %24 = vector.broadcast %23 : i32 to vector<4x1xi32>
    %25 = arith.remsi %21, %24 : vector<4x1xi32>
    %c0_i32_19 = arith.constant 0 : i32
    %26 = vector.broadcast %c0_i32_19 : i32 to vector<4x1xi32>
    %27 = arith.cmpi ne, %25, %26 : vector<4x1xi32>
    %c0_i32_20 = arith.constant 0 : i32
    %28 = vector.broadcast %c0_i32_20 : i32 to vector<4x1xi32>
    %29 = arith.cmpi slt, %25, %28 : vector<4x1xi32>
    %c0_i32_21 = arith.constant 0 : i32
    %30 = arith.cmpi slt, %23, %c0_i32_21 : i32
    %31 = vector.broadcast %30 : i1 to vector<4x1xi1>
    %32 = vector.broadcast %31 : vector<4x1xi1> to vector<4x1xi1>
    %33 = arith.xori %29, %32 : vector<4x1xi1>
    %34 = arith.andi %33, %27 : vector<4x1xi1>
    %35 = vector.broadcast %23 : i32 to vector<4x1xi32>
    %36 = arith.addi %25, %35 : vector<4x1xi32>
    %37 = arith.select %34, %36, %25 : vector<4x1xi1>, vector<4x1xi32>
    %c12 = arith.constant 12 : index
    %c0_22 = arith.constant 0 : index
    %38 = vector.load %arg8[%c12, %c0_22] : memref<36x64xbf16, #tpu.memory_space<vmem>>, vector<4x64xbf16>
    %c4_i32 = arith.constant 4 : i32
    %39 = vector.broadcast %c4_i32 : i32 to vector<4x1xi32>
    %40 = arith.cmpi sge, %37, %39 : vector<4x1xi32>
    %cst_23 = arith.constant 0.000000e+00 : bf16
    %41 = vector.broadcast %cst_23 : bf16 to vector<4x64xbf16>
    %42 = vector.shape_cast %40 : vector<4x1xi1> to vector<4x1xi1>
    %43 = vector.broadcast %42 : vector<4x1xi1> to vector<4x64xi1>
    %44 = arith.select %43, %38, %41 : vector<4x64xi1>, vector<4x64xbf16>
    %c16_24 = arith.constant 16 : index
    %c0_25 = arith.constant 0 : index
    %45 = vector.load %arg8[%c16_24, %c0_25] : memref<36x64xbf16, #tpu.memory_space<vmem>>, vector<4x64xbf16>
    %c20 = arith.constant 20 : index
    %c0_26 = arith.constant 0 : index
    %46 = vector.load %arg8[%c20, %c0_26] : memref<36x64xbf16, #tpu.memory_space<vmem>>, vector<4x64xbf16>
    %c-2_i32 = arith.constant -2 : i32
    %47 = vector.broadcast %c-2_i32 : i32 to vector<4x1xi32>
    %48 = arith.cmpi slt, %37, %47 : vector<4x1xi32>
    %cst_27 = arith.constant 0.000000e+00 : bf16
    %49 = vector.broadcast %cst_27 : bf16 to vector<4x64xbf16>
    %50 = vector.shape_cast %48 : vector<4x1xi1> to vector<4x1xi1>
    %51 = vector.broadcast %50 : vector<4x1xi1> to vector<4x64xi1>
    %52 = arith.select %51, %46, %49 : vector<4x64xi1>, vector<4x64xbf16>
    %53 = tpu.concatenate %44, %45, %52 in 1 : vector<4x64xbf16>, vector<4x64xbf16>, vector<4x64xbf16> -> vector<4x192xbf16>
    %c0_28 = arith.constant 0 : index
    %c0_29 = arith.constant 0 : index
    %54 = vector.load %arg4[%c0_28, %c0_29] : memref<192x64xbf16, #tpu.memory_space<vmem>>, vector<192x64xbf16>
    %cst_30 = arith.constant dense<0.000000e+00> : vector<4x64xf32>
    %55 = tpu.matmul %53, %54, %cst_30 {dimension_numbers = #tpu.dot_dimension_numbers<[1], [0], [0], [1], [0, 0, 1, 1], [], []>} : vector<4x192xbf16>, vector<192x64xbf16>, vector<4x64xf32> -> vector<4x64xf32>
    %c0_31 = arith.constant 0 : index
    %c0_32 = arith.constant 0 : index
    %56 = vector.load %arg5[%c0_31, %c0_32] : memref<1x64xf32, #tpu.memory_space<vmem>>, vector<1x64xf32>
    %57 = vector.broadcast %56 : vector<1x64xf32> to vector<4x64xf32>
    %58 = arith.addf %55, %57 : vector<4x64xf32>
    %cst_33 = arith.constant 0.000000e+00 : f32
    %59 = vector.broadcast %cst_33 : f32 to vector<4x64xf32>
    %60 = arith.maximumf %58, %59 : vector<4x64xf32>
    %61 = arith.truncf %60 : vector<4x64xf32> to vector<4x64xbf16>
    %c0_34 = arith.constant 0 : index
    %c0_35 = arith.constant 0 : index
    %c0_36 = arith.constant 0 : index
    %62 = vector.load %arg7[%c0_34, %c0_35, %c0_36] : memref<1x4x64xbf16, #tpu.memory_space<vmem>>, vector<1x4x64xbf16>
    %63 = vector.shape_cast %62 : vector<1x4x64xbf16> to vector<4x64xbf16>
    %64 = vector.shape_cast %61 : vector<4x64xbf16> to vector<1x4x64xbf16>
    tpu.vector_store %arg7[%c0_34, %c0_35, %c0_36], %64 {strides = array<i32>} : memref<1x4x64xbf16, #tpu.memory_space<vmem>>, vector<1x4x64xbf16>,
    return
  }
  func.func @transform_0(%arg0: i32) -> (i32, i32, i32) {
    %c0_i32 = arith.constant 0 : i32
    %c0_i32_0 = arith.constant 0 : i32
    %c0_i32_1 = arith.constant 0 : i32
    return %arg0, %c0_i32, %c0_i32_0 : i32, i32, i32
  }
  func.func @transform_1(%arg0: i32) -> (i32, i32) {
    %c0_i32 = arith.constant 0 : i32
    %c0_i32_0 = arith.constant 0 : i32
    %c0_i32_1 = arith.constant 0 : i32
    return %c0_i32, %c0_i32_0 : i32, i32
  }
  func.func @transform_2(%arg0: i32) -> (i32, i32) {
    %c0_i32 = arith.constant 0 : i32
    %c0_i32_0 = arith.constant 0 : i32
    %c0_i32_1 = arith.constant 0 : i32
    return %c0_i32, %c0_i32_0 : i32, i32
  }
  func.func @transform_3(%arg0: i32) -> (i32, i32) {
    %c0_i32 = arith.constant 0 : i32
    %c0_i32_0 = arith.constant 0 : i32
    %c0_i32_1 = arith.constant 0 : i32
    return %c0_i32, %c0_i32_0 : i32, i32
  }
  func.func @transform_4(%arg0: i32) -> (i32, i32) {
    %c0_i32 = arith.constant 0 : i32
    %c0_i32_0 = arith.constant 0 : i32
    %c0_i32_1 = arith.constant 0 : i32
    return %c0_i32, %c0_i32_0 : i32, i32
  }
  func.func @transform_5(%arg0: i32) -> (i32, i32, i32) {
    %c0_i32 = arith.constant 0 : i32
    %c0_i32_0 = arith.constant 0 : i32
    %c0_i32_1 = arith.constant 0 : i32
    return %arg0, %c0_i32, %c0_i32_0 : i32, i32, i32
  }
  func.func @transform_6(%arg0: i32) -> (i32, i32, i32) {
    %c0_i32 = arith.constant 0 : i32
    %c0_i32_0 = arith.constant 0 : i32
    %c0_i32_1 = arith.constant 0 : i32
    return %arg0, %c0_i32, %c0_i32_0 : i32, i32, i32
  }
}

module attributes {stable_mosaic.version = 11 : i64} {
  func.func @_bridge_kernel(%arg0: i32, %arg1: memref<1x5x64xbf16, #tpu.memory_space<vmem>>, %arg2: memref<576x64xbf16, #tpu.memory_space<vmem>>, %arg3: memref<1x64xf32, #tpu.memory_space<vmem>>, %arg4: memref<1x1x64xbf16, #tpu.memory_space<vmem>>) attributes {dimension_semantics = [#tpu.dimension_semantics<parallel>], iteration_bounds = array<i64: 2>, scalar_prefetch = 0 : i64, scratch_operands = 0 : i64, tpu.core_type = #tpu.core_type<tc>, window_params = [{transform_indices = @transform_0, window_bounds = array<i64: 1, 5, 64>}, {pipeline_mode = #tpu.pipeline_mode<synchronous>, transform_indices = @transform_1, window_bounds = array<i64: 576, 64>}, {pipeline_mode = #tpu.pipeline_mode<synchronous>, transform_indices = @transform_2, window_bounds = array<i64: 1, 64>}, {transform_indices = @transform_3, window_bounds = array<i64: 1, 1, 64>}]} {
    %0 = tpu.iota {dimensions = array<i32: 0>} : vector<1x1xi32>
    %c1_i32 = arith.constant 1 : i32
    %c0_i32 = arith.constant 0 : i32
    %1 = arith.cmpi eq, %c1_i32, %c0_i32 : i32
    %c1_i32_0 = arith.constant 1 : i32
    %2 = arith.select %1, %c1_i32_0, %c1_i32 : i32
    %3 = vector.broadcast %2 : i32 to vector<1x1xi32>
    %4 = arith.remsi %0, %3 : vector<1x1xi32>
    %c0_i32_1 = arith.constant 0 : i32
    %5 = vector.broadcast %c0_i32_1 : i32 to vector<1x1xi32>
    %6 = arith.cmpi ne, %4, %5 : vector<1x1xi32>
    %c0_i32_2 = arith.constant 0 : i32
    %7 = vector.broadcast %c0_i32_2 : i32 to vector<1x1xi32>
    %8 = arith.cmpi slt, %4, %7 : vector<1x1xi32>
    %c0_i32_3 = arith.constant 0 : i32
    %9 = arith.cmpi slt, %2, %c0_i32_3 : i32
    %10 = vector.broadcast %9 : i1 to vector<1x1xi1>
    %11 = vector.broadcast %10 : vector<1x1xi1> to vector<1x1xi1>
    %12 = arith.xori %8, %11 : vector<1x1xi1>
    %13 = arith.andi %12, %6 : vector<1x1xi1>
    %14 = vector.broadcast %2 : i32 to vector<1x1xi32>
    %15 = arith.addi %4, %14 : vector<1x1xi32>
    %16 = arith.select %13, %15, %4 : vector<1x1xi1>, vector<1x1xi32>
    %c0 = arith.constant 0 : index
    %c0_4 = arith.constant 0 : index
    %c0_5 = arith.constant 0 : index
    %17 = vector.load %arg1[%c0, %c0_4, %c0_5] : memref<1x5x64xbf16, #tpu.memory_space<vmem>>, vector<1x1x64xbf16>
    %18 = vector.shape_cast %17 : vector<1x1x64xbf16> to vector<1x64xbf16>
    %c1_i32_6 = arith.constant 1 : i32
    %19 = vector.broadcast %c1_i32_6 : i32 to vector<1x1xi32>
    %20 = arith.cmpi sge, %16, %19 : vector<1x1xi32>
    %cst = arith.constant 0.000000e+00 : bf16
    %21 = vector.broadcast %cst : bf16 to vector<1x64xbf16>
    %22 = vector.shape_cast %20 : vector<1x1xi1> to vector<1x1xi1>
    %23 = vector.broadcast %22 : vector<1x1xi1> to vector<1x64xi1>
    %24 = arith.select %23, %18, %21 : vector<1x64xi1>, vector<1x64xbf16>
    %c0_7 = arith.constant 0 : index
    %c1 = arith.constant 1 : index
    %c0_8 = arith.constant 0 : index
    %25 = vector.load %arg1[%c0_7, %c1, %c0_8] : memref<1x5x64xbf16, #tpu.memory_space<vmem>>, vector<1x1x64xbf16>
    %26 = vector.shape_cast %25 : vector<1x1x64xbf16> to vector<1x64xbf16>
    %c0_9 = arith.constant 0 : index
    %c2 = arith.constant 2 : index
    %c0_10 = arith.constant 0 : index
    %27 = vector.load %arg1[%c0_9, %c2, %c0_10] : memref<1x5x64xbf16, #tpu.memory_space<vmem>>, vector<1x1x64xbf16>
    %28 = vector.shape_cast %27 : vector<1x1x64xbf16> to vector<1x64xbf16>
    %c0_i32_11 = arith.constant 0 : i32
    %29 = vector.broadcast %c0_i32_11 : i32 to vector<1x1xi32>
    %30 = arith.cmpi slt, %16, %29 : vector<1x1xi32>
    %cst_12 = arith.constant 0.000000e+00 : bf16
    %31 = vector.broadcast %cst_12 : bf16 to vector<1x64xbf16>
    %32 = vector.shape_cast %30 : vector<1x1xi1> to vector<1x1xi1>
    %33 = vector.broadcast %32 : vector<1x1xi1> to vector<1x64xi1>
    %34 = arith.select %33, %28, %31 : vector<1x64xi1>, vector<1x64xbf16>
    %c0_13 = arith.constant 0 : index
    %c1_14 = arith.constant 1 : index
    %c0_15 = arith.constant 0 : index
    %35 = vector.load %arg1[%c0_13, %c1_14, %c0_15] : memref<1x5x64xbf16, #tpu.memory_space<vmem>>, vector<1x1x64xbf16>
    %36 = vector.shape_cast %35 : vector<1x1x64xbf16> to vector<1x64xbf16>
    %c1_i32_16 = arith.constant 1 : i32
    %37 = vector.broadcast %c1_i32_16 : i32 to vector<1x1xi32>
    %38 = arith.cmpi sge, %16, %37 : vector<1x1xi32>
    %cst_17 = arith.constant 0.000000e+00 : bf16
    %39 = vector.broadcast %cst_17 : bf16 to vector<1x64xbf16>
    %40 = vector.shape_cast %38 : vector<1x1xi1> to vector<1x1xi1>
    %41 = vector.broadcast %40 : vector<1x1xi1> to vector<1x64xi1>
    %42 = arith.select %41, %36, %39 : vector<1x64xi1>, vector<1x64xbf16>
    %c0_18 = arith.constant 0 : index
    %c2_19 = arith.constant 2 : index
    %c0_20 = arith.constant 0 : index
    %43 = vector.load %arg1[%c0_18, %c2_19, %c0_20] : memref<1x5x64xbf16, #tpu.memory_space<vmem>>, vector<1x1x64xbf16>
    %44 = vector.shape_cast %43 : vector<1x1x64xbf16> to vector<1x64xbf16>
    %c0_21 = arith.constant 0 : index
    %c3 = arith.constant 3 : index
    %c0_22 = arith.constant 0 : index
    %45 = vector.load %arg1[%c0_21, %c3, %c0_22] : memref<1x5x64xbf16, #tpu.memory_space<vmem>>, vector<1x1x64xbf16>
    %46 = vector.shape_cast %45 : vector<1x1x64xbf16> to vector<1x64xbf16>
    %c0_i32_23 = arith.constant 0 : i32
    %47 = vector.broadcast %c0_i32_23 : i32 to vector<1x1xi32>
    %48 = arith.cmpi slt, %16, %47 : vector<1x1xi32>
    %cst_24 = arith.constant 0.000000e+00 : bf16
    %49 = vector.broadcast %cst_24 : bf16 to vector<1x64xbf16>
    %50 = vector.shape_cast %48 : vector<1x1xi1> to vector<1x1xi1>
    %51 = vector.broadcast %50 : vector<1x1xi1> to vector<1x64xi1>
    %52 = arith.select %51, %46, %49 : vector<1x64xi1>, vector<1x64xbf16>
    %c0_25 = arith.constant 0 : index
    %c2_26 = arith.constant 2 : index
    %c0_27 = arith.constant 0 : index
    %53 = vector.load %arg1[%c0_25, %c2_26, %c0_27] : memref<1x5x64xbf16, #tpu.memory_space<vmem>>, vector<1x1x64xbf16>
    %54 = vector.shape_cast %53 : vector<1x1x64xbf16> to vector<1x64xbf16>
    %c1_i32_28 = arith.constant 1 : i32
    %55 = vector.broadcast %c1_i32_28 : i32 to vector<1x1xi32>
    %56 = arith.cmpi sge, %16, %55 : vector<1x1xi32>
    %cst_29 = arith.constant 0.000000e+00 : bf16
    %57 = vector.broadcast %cst_29 : bf16 to vector<1x64xbf16>
    %58 = vector.shape_cast %56 : vector<1x1xi1> to vector<1x1xi1>
    %59 = vector.broadcast %58 : vector<1x1xi1> to vector<1x64xi1>
    %60 = arith.select %59, %54, %57 : vector<1x64xi1>, vector<1x64xbf16>
    %c0_30 = arith.constant 0 : index
    %c3_31 = arith.constant 3 : index
    %c0_32 = arith.constant 0 : index
    %61 = vector.load %arg1[%c0_30, %c3_31, %c0_32] : memref<1x5x64xbf16, #tpu.memory_space<vmem>>, vector<1x1x64xbf16>
    %62 = vector.shape_cast %61 : vector<1x1x64xbf16> to vector<1x64xbf16>
    %c0_33 = arith.constant 0 : index
    %c4 = arith.constant 4 : index
    %c0_34 = arith.constant 0 : index
    %63 = vector.load %arg1[%c0_33, %c4, %c0_34] : memref<1x5x64xbf16, #tpu.memory_space<vmem>>, vector<1x1x64xbf16>
    %64 = vector.shape_cast %63 : vector<1x1x64xbf16> to vector<1x64xbf16>
    %c0_i32_35 = arith.constant 0 : i32
    %65 = vector.broadcast %c0_i32_35 : i32 to vector<1x1xi32>
    %66 = arith.cmpi slt, %16, %65 : vector<1x1xi32>
    %cst_36 = arith.constant 0.000000e+00 : bf16
    %67 = vector.broadcast %cst_36 : bf16 to vector<1x64xbf16>
    %68 = vector.shape_cast %66 : vector<1x1xi1> to vector<1x1xi1>
    %69 = vector.broadcast %68 : vector<1x1xi1> to vector<1x64xi1>
    %70 = arith.select %69, %64, %67 : vector<1x64xi1>, vector<1x64xbf16>
    %71 = tpu.concatenate %24, %26, %34, %42, %44, %52, %60, %62, %70 in 1 : vector<1x64xbf16>, vector<1x64xbf16>, vector<1x64xbf16>, vector<1x64xbf16>, vector<1x64xbf16>, vector<1x64xbf16>, vector<1x64xbf16>, vector<1x64xbf16>, vector<1x64xbf16> -> vector<1x576xbf16>
    %c0_37 = arith.constant 0 : index
    %c0_38 = arith.constant 0 : index
    %72 = vector.load %arg2[%c0_37, %c0_38] : memref<576x64xbf16, #tpu.memory_space<vmem>>, vector<576x64xbf16>
    %cst_39 = arith.constant dense<0.000000e+00> : vector<1x64xf32>
    %73 = tpu.matmul %71, %72, %cst_39 {dimension_numbers = #tpu.dot_dimension_numbers<[1], [0], [0], [1], [0, 0, 1, 1], [], []>} : vector<1x576xbf16>, vector<576x64xbf16>, vector<1x64xf32> -> vector<1x64xf32>
    %c0_40 = arith.constant 0 : index
    %c0_41 = arith.constant 0 : index
    %74 = vector.load %arg3[%c0_40, %c0_41] : memref<1x64xf32, #tpu.memory_space<vmem>>, vector<1x64xf32>
    %75 = arith.addf %73, %74 : vector<1x64xf32>
    %cst_42 = arith.constant 0.000000e+00 : f32
    %76 = vector.broadcast %cst_42 : f32 to vector<1x64xf32>
    %77 = arith.maximumf %75, %76 : vector<1x64xf32>
    %78 = arith.truncf %77 : vector<1x64xf32> to vector<1x64xbf16>
    %c0_43 = arith.constant 0 : index
    %c0_44 = arith.constant 0 : index
    %c0_45 = arith.constant 0 : index
    %79 = vector.load %arg4[%c0_43, %c0_44, %c0_45] : memref<1x1x64xbf16, #tpu.memory_space<vmem>>, vector<1x1x64xbf16>
    %80 = vector.shape_cast %79 : vector<1x1x64xbf16> to vector<1x64xbf16>
    %81 = vector.shape_cast %78 : vector<1x64xbf16> to vector<1x1x64xbf16>
    tpu.vector_store %arg4[%c0_43, %c0_44, %c0_45], %81 {strides = array<i32>} : memref<1x1x64xbf16, #tpu.memory_space<vmem>>, vector<1x1x64xbf16>,
    return
  }
  func.func @transform_0(%arg0: i32) -> (i32, i32, i32) {
    %c0_i32 = arith.constant 0 : i32
    %c0_i32_0 = arith.constant 0 : i32
    %c0_i32_1 = arith.constant 0 : i32
    return %arg0, %c0_i32, %c0_i32_0 : i32, i32, i32
  }
  func.func @transform_1(%arg0: i32) -> (i32, i32) {
    %c0_i32 = arith.constant 0 : i32
    %c0_i32_0 = arith.constant 0 : i32
    %c0_i32_1 = arith.constant 0 : i32
    return %c0_i32, %c0_i32_0 : i32, i32
  }
  func.func @transform_2(%arg0: i32) -> (i32, i32) {
    %c0_i32 = arith.constant 0 : i32
    %c0_i32_0 = arith.constant 0 : i32
    %c0_i32_1 = arith.constant 0 : i32
    return %c0_i32, %c0_i32_0 : i32, i32
  }
  func.func @transform_3(%arg0: i32) -> (i32, i32, i32) {
    %c0_i32 = arith.constant 0 : i32
    %c0_i32_0 = arith.constant 0 : i32
    %c0_i32_1 = arith.constant 0 : i32
    return %arg0, %c0_i32, %c0_i32_0 : i32, i32, i32
  }
}

module attributes {stable_mosaic.version = 11 : i64} {
  func.func @_pair_kernel(%arg0: i32, %arg1: memref<1x20x64xbf16, #tpu.memory_space<vmem>>, %arg2: memref<1x12x64xbf16, #tpu.memory_space<vmem>>, %arg3: memref<192x64xbf16, #tpu.memory_space<vmem>>, %arg4: memref<1x64xf32, #tpu.memory_space<vmem>>, %arg5: memref<384x64xbf16, #tpu.memory_space<vmem>>, %arg6: memref<1x64xf32, #tpu.memory_space<vmem>>, %arg7: memref<1x4x64xbf16, #tpu.memory_space<vmem>>, %arg8: memref<36x64xbf16, #tpu.memory_space<vmem>>) attributes {dimension_semantics = [#tpu.dimension_semantics<parallel>], iteration_bounds = array<i64: 2>, scalar_prefetch = 0 : i64, scratch_operands = 1 : i64, tpu.core_type = #tpu.core_type<tc>, window_params = [{transform_indices = @transform_0, window_bounds = array<i64: 1, 20, 64>}, {transform_indices = @transform_1, window_bounds = array<i64: 1, 12, 64>}, {pipeline_mode = #tpu.pipeline_mode<synchronous>, transform_indices = @transform_2, window_bounds = array<i64: 192, 64>}, {pipeline_mode = #tpu.pipeline_mode<synchronous>, transform_indices = @transform_3, window_bounds = array<i64: 1, 64>}, {pipeline_mode = #tpu.pipeline_mode<synchronous>, transform_indices = @transform_4, window_bounds = array<i64: 384, 64>}, {pipeline_mode = #tpu.pipeline_mode<synchronous>, transform_indices = @transform_5, window_bounds = array<i64: 1, 64>}, {transform_indices = @transform_6, window_bounds = array<i64: 1, 4, 64>}]} {
    %c0 = arith.constant 0 : index
    %c0_0 = arith.constant 0 : index
    %c0_1 = arith.constant 0 : index
    %0 = vector.load %arg1[%c0, %c0_0, %c0_1] : memref<1x20x64xbf16, #tpu.memory_space<vmem>>, vector<1x4x64xbf16>
    %1 = vector.shape_cast %0 : vector<1x4x64xbf16> to vector<4x64xbf16>
    %c0_2 = arith.constant 0 : index
    %c8 = arith.constant 8 : index
    %c0_3 = arith.constant 0 : index
    %2 = vector.load %arg1[%c0_2, %c8, %c0_3] : memref<1x20x64xbf16, #tpu.memory_space<vmem>>, vector<1x4x64xbf16>
    %3 = vector.shape_cast %2 : vector<1x4x64xbf16> to vector<4x64xbf16>
    %c0_4 = arith.constant 0 : index
    %c16 = arith.constant 16 : index
    %c0_5 = arith.constant 0 : index
    %4 = vector.load %arg1[%c0_4, %c16, %c0_5] : memref<1x20x64xbf16, #tpu.memory_space<vmem>>, vector<1x4x64xbf16>
    %5 = vector.shape_cast %4 : vector<1x4x64xbf16> to vector<4x64xbf16>
    %6 = tpu.concatenate %1, %3, %5 in 1 : vector<4x64xbf16>, vector<4x64xbf16>, vector<4x64xbf16> -> vector<4x192xbf16>
    %c0_6 = arith.constant 0 : index
    %c0_7 = arith.constant 0 : index
    %7 = vector.load %arg3[%c0_6, %c0_7] : memref<192x64xbf16, #tpu.memory_space<vmem>>, vector<192x64xbf16>
    %cst = arith.constant dense<0.000000e+00> : vector<4x64xf32>
    %8 = tpu.matmul %6, %7, %cst {dimension_numbers = #tpu.dot_dimension_numbers<[1], [0], [0], [1], [0, 0, 1, 1], [], []>} : vector<4x192xbf16>, vector<192x64xbf16>, vector<4x64xf32> -> vector<4x64xf32>
    %c0_8 = arith.constant 0 : index
    %c0_9 = arith.constant 0 : index
    %9 = vector.load %arg4[%c0_8, %c0_9] : memref<1x64xf32, #tpu.memory_space<vmem>>, vector<1x64xf32>
    %10 = vector.broadcast %9 : vector<1x64xf32> to vector<4x64xf32>
    %11 = arith.addf %8, %10 : vector<4x64xf32>
    %cst_10 = arith.constant 0.000000e+00 : f32
    %12 = vector.broadcast %cst_10 : f32 to vector<4x64xf32>
    %13 = arith.maximumf %11, %12 : vector<4x64xf32>
    %14 = arith.truncf %13 : vector<4x64xf32> to vector<4x64xbf16>
    %cst_11 = arith.constant 0.000000e+00 : bf16
    %15 = vector.broadcast %cst_11 : bf16 to vector<36x64xbf16>
    %c0_12 = arith.constant 0 : index
    %c0_13 = arith.constant 0 : index
    %16 = vector.load %arg8[%c0_12, %c0_13] : memref<36x64xbf16, #tpu.memory_space<vmem>>, vector<36x64xbf16>
    tpu.vector_store %arg8[%c0_12, %c0_13], %15 {strides = array<i32>} : memref<36x64xbf16, #tpu.memory_space<vmem>>, vector<36x64xbf16>,
    %c16_14 = arith.constant 16 : index
    %c0_15 = arith.constant 0 : index
    %17 = vector.load %arg8[%c16_14, %c0_15] : memref<36x64xbf16, #tpu.memory_space<vmem>>, vector<4x64xbf16>
    tpu.vector_store %arg8[%c16_14, %c0_15], %14 {strides = array<i32>} : memref<36x64xbf16, #tpu.memory_space<vmem>>, vector<4x64xbf16>,
    %18 = tpu.iota {dimensions = array<i32: 0>} : vector<4x1xi32>
    %c2_i32 = arith.constant 2 : i32
    %c0_i32 = arith.constant 0 : i32
    %19 = arith.cmpi eq, %c2_i32, %c0_i32 : i32
    %c1_i32 = arith.constant 1 : i32
    %20 = arith.select %19, %c1_i32, %c2_i32 : i32
    %21 = vector.broadcast %20 : i32 to vector<4x1xi32>
    %22 = arith.remsi %18, %21 : vector<4x1xi32>
    %c0_i32_16 = arith.constant 0 : i32
    %23 = vector.broadcast %c0_i32_16 : i32 to vector<4x1xi32>
    %24 = arith.cmpi ne, %22, %23 : vector<4x1xi32>
    %c0_i32_17 = arith.constant 0 : i32
    %25 = vector.broadcast %c0_i32_17 : i32 to vector<4x1xi32>
    %26 = arith.cmpi slt, %22, %25 : vector<4x1xi32>
    %c0_i32_18 = arith.constant 0 : i32
    %27 = arith.cmpi slt, %20, %c0_i32_18 : i32
    %28 = vector.broadcast %27 : i1 to vector<4x1xi1>
    %29 = vector.broadcast %28 : vector<4x1xi1> to vector<4x1xi1>
    %30 = arith.xori %26, %29 : vector<4x1xi1>
    %31 = arith.andi %30, %24 : vector<4x1xi1>
    %32 = vector.broadcast %20 : i32 to vector<4x1xi32>
    %33 = arith.addi %22, %32 : vector<4x1xi32>
    %34 = arith.select %31, %33, %22 : vector<4x1xi1>, vector<4x1xi32>
    %c12 = arith.constant 12 : index
    %c0_19 = arith.constant 0 : index
    %35 = vector.load %arg8[%c12, %c0_19] : memref<36x64xbf16, #tpu.memory_space<vmem>>, vector<4x64xbf16>
    %c4_i32 = arith.constant 4 : i32
    %36 = vector.broadcast %c4_i32 : i32 to vector<4x1xi32>
    %37 = arith.cmpi sge, %34, %36 : vector<4x1xi32>
    %cst_20 = arith.constant 0.000000e+00 : bf16
    %38 = vector.broadcast %cst_20 : bf16 to vector<4x64xbf16>
    %39 = vector.shape_cast %37 : vector<4x1xi1> to vector<4x1xi1>
    %40 = vector.broadcast %39 : vector<4x1xi1> to vector<4x64xi1>
    %41 = arith.select %40, %35, %38 : vector<4x64xi1>, vector<4x64xbf16>
    %c16_21 = arith.constant 16 : index
    %c0_22 = arith.constant 0 : index
    %42 = vector.load %arg8[%c16_21, %c0_22] : memref<36x64xbf16, #tpu.memory_space<vmem>>, vector<4x64xbf16>
    %c20 = arith.constant 20 : index
    %c0_23 = arith.constant 0 : index
    %43 = vector.load %arg8[%c20, %c0_23] : memref<36x64xbf16, #tpu.memory_space<vmem>>, vector<4x64xbf16>
    %c-2_i32 = arith.constant -2 : i32
    %44 = vector.broadcast %c-2_i32 : i32 to vector<4x1xi32>
    %45 = arith.cmpi slt, %34, %44 : vector<4x1xi32>
    %cst_24 = arith.constant 0.000000e+00 : bf16
    %46 = vector.broadcast %cst_24 : bf16 to vector<4x64xbf16>
    %47 = vector.shape_cast %45 : vector<4x1xi1> to vector<4x1xi1>
    %48 = vector.broadcast %47 : vector<4x1xi1> to vector<4x64xi1>
    %49 = arith.select %48, %43, %46 : vector<4x64xi1>, vector<4x64xbf16>
    %c0_25 = arith.constant 0 : index
    %c0_26 = arith.constant 0 : index
    %c0_27 = arith.constant 0 : index
    %50 = vector.load %arg2[%c0_25, %c0_26, %c0_27] : memref<1x12x64xbf16, #tpu.memory_space<vmem>>, vector<1x4x64xbf16>
    %51 = vector.shape_cast %50 : vector<1x4x64xbf16> to vector<4x64xbf16>
    %c4_i32_28 = arith.constant 4 : i32
    %52 = vector.broadcast %c4_i32_28 : i32 to vector<4x1xi32>
    %53 = arith.cmpi sge, %34, %52 : vector<4x1xi32>
    %cst_29 = arith.constant 0.000000e+00 : bf16
    %54 = vector.broadcast %cst_29 : bf16 to vector<4x64xbf16>
    %55 = vector.shape_cast %53 : vector<4x1xi1> to vector<4x1xi1>
    %56 = vector.broadcast %55 : vector<4x1xi1> to vector<4x64xi1>
    %57 = arith.select %56, %51, %54 : vector<4x64xi1>, vector<4x64xbf16>
    %c0_30 = arith.constant 0 : index
    %c4 = arith.constant 4 : index
    %c0_31 = arith.constant 0 : index
    %58 = vector.load %arg2[%c0_30, %c4, %c0_31] : memref<1x12x64xbf16, #tpu.memory_space<vmem>>, vector<1x4x64xbf16>
    %59 = vector.shape_cast %58 : vector<1x4x64xbf16> to vector<4x64xbf16>
    %c0_32 = arith.constant 0 : index
    %c8_33 = arith.constant 8 : index
    %c0_34 = arith.constant 0 : index
    %60 = vector.load %arg2[%c0_32, %c8_33, %c0_34] : memref<1x12x64xbf16, #tpu.memory_space<vmem>>, vector<1x4x64xbf16>
    %61 = vector.shape_cast %60 : vector<1x4x64xbf16> to vector<4x64xbf16>
    %c-2_i32_35 = arith.constant -2 : i32
    %62 = vector.broadcast %c-2_i32_35 : i32 to vector<4x1xi32>
    %63 = arith.cmpi slt, %34, %62 : vector<4x1xi32>
    %cst_36 = arith.constant 0.000000e+00 : bf16
    %64 = vector.broadcast %cst_36 : bf16 to vector<4x64xbf16>
    %65 = vector.shape_cast %63 : vector<4x1xi1> to vector<4x1xi1>
    %66 = vector.broadcast %65 : vector<4x1xi1> to vector<4x64xi1>
    %67 = arith.select %66, %61, %64 : vector<4x64xi1>, vector<4x64xbf16>
    %68 = tpu.concatenate %41, %42, %49, %57, %59, %67 in 1 : vector<4x64xbf16>, vector<4x64xbf16>, vector<4x64xbf16>, vector<4x64xbf16>, vector<4x64xbf16>, vector<4x64xbf16> -> vector<4x384xbf16>
    %c0_37 = arith.constant 0 : index
    %c0_38 = arith.constant 0 : index
    %69 = vector.load %arg5[%c0_37, %c0_38] : memref<384x64xbf16, #tpu.memory_space<vmem>>, vector<384x64xbf16>
    %cst_39 = arith.constant dense<0.000000e+00> : vector<4x64xf32>
    %70 = tpu.matmul %68, %69, %cst_39 {dimension_numbers = #tpu.dot_dimension_numbers<[1], [0], [0], [1], [0, 0, 1, 1], [], []>} : vector<4x384xbf16>, vector<384x64xbf16>, vector<4x64xf32> -> vector<4x64xf32>
    %c0_40 = arith.constant 0 : index
    %c0_41 = arith.constant 0 : index
    %71 = vector.load %arg6[%c0_40, %c0_41] : memref<1x64xf32, #tpu.memory_space<vmem>>, vector<1x64xf32>
    %72 = vector.broadcast %71 : vector<1x64xf32> to vector<4x64xf32>
    %73 = arith.addf %70, %72 : vector<4x64xf32>
    %cst_42 = arith.constant 0.000000e+00 : f32
    %74 = vector.broadcast %cst_42 : f32 to vector<4x64xf32>
    %75 = arith.maximumf %73, %74 : vector<4x64xf32>
    %76 = arith.truncf %75 : vector<4x64xf32> to vector<4x64xbf16>
    %c0_43 = arith.constant 0 : index
    %c0_44 = arith.constant 0 : index
    %c0_45 = arith.constant 0 : index
    %77 = vector.load %arg7[%c0_43, %c0_44, %c0_45] : memref<1x4x64xbf16, #tpu.memory_space<vmem>>, vector<1x4x64xbf16>
    %78 = vector.shape_cast %77 : vector<1x4x64xbf16> to vector<4x64xbf16>
    %79 = vector.shape_cast %76 : vector<4x64xbf16> to vector<1x4x64xbf16>
    tpu.vector_store %arg7[%c0_43, %c0_44, %c0_45], %79 {strides = array<i32>} : memref<1x4x64xbf16, #tpu.memory_space<vmem>>, vector<1x4x64xbf16>,
    return
  }
  func.func @transform_0(%arg0: i32) -> (i32, i32, i32) {
    %c0_i32 = arith.constant 0 : i32
    %c0_i32_0 = arith.constant 0 : i32
    %c0_i32_1 = arith.constant 0 : i32
    return %arg0, %c0_i32, %c0_i32_0 : i32, i32, i32
  }
  func.func @transform_1(%arg0: i32) -> (i32, i32, i32) {
    %c0_i32 = arith.constant 0 : i32
    %c0_i32_0 = arith.constant 0 : i32
    %c0_i32_1 = arith.constant 0 : i32
    return %arg0, %c0_i32, %c0_i32_0 : i32, i32, i32
  }
  func.func @transform_2(%arg0: i32) -> (i32, i32) {
    %c0_i32 = arith.constant 0 : i32
    %c0_i32_0 = arith.constant 0 : i32
    %c0_i32_1 = arith.constant 0 : i32
    return %c0_i32, %c0_i32_0 : i32, i32
  }
  func.func @transform_3(%arg0: i32) -> (i32, i32) {
    %c0_i32 = arith.constant 0 : i32
    %c0_i32_0 = arith.constant 0 : i32
    %c0_i32_1 = arith.constant 0 : i32
    return %c0_i32, %c0_i32_0 : i32, i32
  }
  func.func @transform_4(%arg0: i32) -> (i32, i32) {
    %c0_i32 = arith.constant 0 : i32
    %c0_i32_0 = arith.constant 0 : i32
    %c0_i32_1 = arith.constant 0 : i32
    return %c0_i32, %c0_i32_0 : i32, i32
  }
  func.func @transform_5(%arg0: i32) -> (i32, i32) {
    %c0_i32 = arith.constant 0 : i32
    %c0_i32_0 = arith.constant 0 : i32
    %c0_i32_1 = arith.constant 0 : i32
    return %c0_i32, %c0_i32_0 : i32, i32
  }
  func.func @transform_6(%arg0: i32) -> (i32, i32, i32) {
    %c0_i32 = arith.constant 0 : i32
    %c0_i32_0 = arith.constant 0 : i32
    %c0_i32_1 = arith.constant 0 : i32
    return %arg0, %c0_i32, %c0_i32_0 : i32, i32, i32
  }
}

module attributes {stable_mosaic.version = 11 : i64} {
  func.func @_pair_kernel(%arg0: i32, %arg1: memref<1x32x64xbf16, #tpu.memory_space<vmem>>, %arg2: memref<1x20x64xbf16, #tpu.memory_space<vmem>>, %arg3: memref<192x64xbf16, #tpu.memory_space<vmem>>, %arg4: memref<1x64xf32, #tpu.memory_space<vmem>>, %arg5: memref<384x64xbf16, #tpu.memory_space<vmem>>, %arg6: memref<1x64xf32, #tpu.memory_space<vmem>>, %arg7: memref<1x16x64xbf16, #tpu.memory_space<vmem>>, %arg8: memref<48x64xbf16, #tpu.memory_space<vmem>>) attributes {dimension_semantics = [#tpu.dimension_semantics<parallel>], iteration_bounds = array<i64: 2>, scalar_prefetch = 0 : i64, scratch_operands = 1 : i64, tpu.core_type = #tpu.core_type<tc>, window_params = [{transform_indices = @transform_0, window_bounds = array<i64: 1, 32, 64>}, {transform_indices = @transform_1, window_bounds = array<i64: 1, 20, 64>}, {pipeline_mode = #tpu.pipeline_mode<synchronous>, transform_indices = @transform_2, window_bounds = array<i64: 192, 64>}, {pipeline_mode = #tpu.pipeline_mode<synchronous>, transform_indices = @transform_3, window_bounds = array<i64: 1, 64>}, {pipeline_mode = #tpu.pipeline_mode<synchronous>, transform_indices = @transform_4, window_bounds = array<i64: 384, 64>}, {pipeline_mode = #tpu.pipeline_mode<synchronous>, transform_indices = @transform_5, window_bounds = array<i64: 1, 64>}, {transform_indices = @transform_6, window_bounds = array<i64: 1, 16, 64>}]} {
    %c0 = arith.constant 0 : index
    %c0_0 = arith.constant 0 : index
    %c0_1 = arith.constant 0 : index
    %0 = vector.load %arg1[%c0, %c0_0, %c0_1] : memref<1x32x64xbf16, #tpu.memory_space<vmem>>, vector<1x16x64xbf16>
    %1 = vector.shape_cast %0 : vector<1x16x64xbf16> to vector<16x64xbf16>
    %c0_2 = arith.constant 0 : index
    %c8 = arith.constant 8 : index
    %c0_3 = arith.constant 0 : index
    %2 = vector.load %arg1[%c0_2, %c8, %c0_3] : memref<1x32x64xbf16, #tpu.memory_space<vmem>>, vector<1x16x64xbf16>
    %3 = vector.shape_cast %2 : vector<1x16x64xbf16> to vector<16x64xbf16>
    %c0_4 = arith.constant 0 : index
    %c16 = arith.constant 16 : index
    %c0_5 = arith.constant 0 : index
    %4 = vector.load %arg1[%c0_4, %c16, %c0_5] : memref<1x32x64xbf16, #tpu.memory_space<vmem>>, vector<1x16x64xbf16>
    %5 = vector.shape_cast %4 : vector<1x16x64xbf16> to vector<16x64xbf16>
    %6 = tpu.concatenate %1, %3, %5 in 1 : vector<16x64xbf16>, vector<16x64xbf16>, vector<16x64xbf16> -> vector<16x192xbf16>
    %c0_6 = arith.constant 0 : index
    %c0_7 = arith.constant 0 : index
    %7 = vector.load %arg3[%c0_6, %c0_7] : memref<192x64xbf16, #tpu.memory_space<vmem>>, vector<192x64xbf16>
    %cst = arith.constant dense<0.000000e+00> : vector<16x64xf32>
    %8 = tpu.matmul %6, %7, %cst {dimension_numbers = #tpu.dot_dimension_numbers<[1], [0], [0], [1], [0, 0, 1, 1], [], []>} : vector<16x192xbf16>, vector<192x64xbf16>, vector<16x64xf32> -> vector<16x64xf32>
    %c0_8 = arith.constant 0 : index
    %c0_9 = arith.constant 0 : index
    %9 = vector.load %arg4[%c0_8, %c0_9] : memref<1x64xf32, #tpu.memory_space<vmem>>, vector<1x64xf32>
    %10 = vector.broadcast %9 : vector<1x64xf32> to vector<16x64xf32>
    %11 = arith.addf %8, %10 : vector<16x64xf32>
    %cst_10 = arith.constant 0.000000e+00 : f32
    %12 = vector.broadcast %cst_10 : f32 to vector<16x64xf32>
    %13 = arith.maximumf %11, %12 : vector<16x64xf32>
    %14 = arith.truncf %13 : vector<16x64xf32> to vector<16x64xbf16>
    %cst_11 = arith.constant 0.000000e+00 : bf16
    %15 = vector.broadcast %cst_11 : bf16 to vector<48x64xbf16>
    %c0_12 = arith.constant 0 : index
    %c0_13 = arith.constant 0 : index
    %16 = vector.load %arg8[%c0_12, %c0_13] : memref<48x64xbf16, #tpu.memory_space<vmem>>, vector<48x64xbf16>
    tpu.vector_store %arg8[%c0_12, %c0_13], %15 {strides = array<i32>} : memref<48x64xbf16, #tpu.memory_space<vmem>>, vector<48x64xbf16>,
    %c16_14 = arith.constant 16 : index
    %c0_15 = arith.constant 0 : index
    %17 = vector.load %arg8[%c16_14, %c0_15] : memref<48x64xbf16, #tpu.memory_space<vmem>>, vector<16x64xbf16>
    tpu.vector_store %arg8[%c16_14, %c0_15], %14 {strides = array<i32>} : memref<48x64xbf16, #tpu.memory_space<vmem>>, vector<16x64xbf16>,
    %18 = tpu.iota {dimensions = array<i32: 0>} : vector<16x1xi32>
    %c4_i32 = arith.constant 4 : i32
    %c0_i32 = arith.constant 0 : i32
    %19 = arith.cmpi eq, %c4_i32, %c0_i32 : i32
    %c1_i32 = arith.constant 1 : i32
    %20 = arith.select %19, %c1_i32, %c4_i32 : i32
    %21 = vector.broadcast %20 : i32 to vector<16x1xi32>
    %22 = arith.remsi %18, %21 : vector<16x1xi32>
    %c0_i32_16 = arith.constant 0 : i32
    %23 = vector.broadcast %c0_i32_16 : i32 to vector<16x1xi32>
    %24 = arith.cmpi ne, %22, %23 : vector<16x1xi32>
    %c0_i32_17 = arith.constant 0 : i32
    %25 = vector.broadcast %c0_i32_17 : i32 to vector<16x1xi32>
    %26 = arith.cmpi slt, %22, %25 : vector<16x1xi32>
    %c0_i32_18 = arith.constant 0 : i32
    %27 = arith.cmpi slt, %20, %c0_i32_18 : i32
    %28 = vector.broadcast %27 : i1 to vector<16x1xi1>
    %29 = vector.broadcast %28 : vector<16x1xi1> to vector<16x1xi1>
    %30 = arith.xori %26, %29 : vector<16x1xi1>
    %31 = arith.andi %30, %24 : vector<16x1xi1>
    %32 = vector.broadcast %20 : i32 to vector<16x1xi32>
    %33 = arith.addi %22, %32 : vector<16x1xi32>
    %34 = arith.select %31, %33, %22 : vector<16x1xi1>, vector<16x1xi32>
    %c14 = arith.constant 14 : index
    %c0_19 = arith.constant 0 : index
    %35 = vector.load %arg8[%c14, %c0_19] : memref<48x64xbf16, #tpu.memory_space<vmem>>, vector<16x64xbf16>
    %c2_i32 = arith.constant 2 : i32
    %36 = vector.broadcast %c2_i32 : i32 to vector<16x1xi32>
    %37 = arith.cmpi sge, %34, %36 : vector<16x1xi32>
    %cst_20 = arith.constant 0.000000e+00 : bf16
    %38 = vector.broadcast %cst_20 : bf16 to vector<16x64xbf16>
    %39 = vector.shape_cast %37 : vector<16x1xi1> to vector<16x1xi1>
    %40 = vector.broadcast %39 : vector<16x1xi1> to vector<16x64xi1>
    %41 = arith.select %40, %35, %38 : vector<16x64xi1>, vector<16x64xbf16>
    %c16_21 = arith.constant 16 : index
    %c0_22 = arith.constant 0 : index
    %42 = vector.load %arg8[%c16_21, %c0_22] : memref<48x64xbf16, #tpu.memory_space<vmem>>, vector<16x64xbf16>
    %c18 = arith.constant 18 : index
    %c0_23 = arith.constant 0 : index
    %43 = vector.load %arg8[%c18, %c0_23] : memref<48x64xbf16, #tpu.memory_space<vmem>>, vector<16x64xbf16>
    %c2_i32_24 = arith.constant 2 : i32
    %44 = vector.broadcast %c2_i32_24 : i32 to vector<16x1xi32>
    %45 = arith.cmpi slt, %34, %44 : vector<16x1xi32>
    %cst_25 = arith.constant 0.000000e+00 : bf16
    %46 = vector.broadcast %cst_25 : bf16 to vector<16x64xbf16>
    %47 = vector.shape_cast %45 : vector<16x1xi1> to vector<16x1xi1>
    %48 = vector.broadcast %47 : vector<16x1xi1> to vector<16x64xi1>
    %49 = arith.select %48, %43, %46 : vector<16x64xi1>, vector<16x64xbf16>
    %c0_26 = arith.constant 0 : index
    %c0_27 = arith.constant 0 : index
    %c0_28 = arith.constant 0 : index
    %50 = vector.load %arg2[%c0_26, %c0_27, %c0_28] : memref<1x20x64xbf16, #tpu.memory_space<vmem>>, vector<1x16x64xbf16>
    %51 = vector.shape_cast %50 : vector<1x16x64xbf16> to vector<16x64xbf16>
    %c2_i32_29 = arith.constant 2 : i32
    %52 = vector.broadcast %c2_i32_29 : i32 to vector<16x1xi32>
    %53 = arith.cmpi sge, %34, %52 : vector<16x1xi32>
    %cst_30 = arith.constant 0.000000e+00 : bf16
    %54 = vector.broadcast %cst_30 : bf16 to vector<16x64xbf16>
    %55 = vector.shape_cast %53 : vector<16x1xi1> to vector<16x1xi1>
    %56 = vector.broadcast %55 : vector<16x1xi1> to vector<16x64xi1>
    %57 = arith.select %56, %51, %54 : vector<16x64xi1>, vector<16x64xbf16>
    %c0_31 = arith.constant 0 : index
    %c2 = arith.constant 2 : index
    %c0_32 = arith.constant 0 : index
    %58 = vector.load %arg2[%c0_31, %c2, %c0_32] : memref<1x20x64xbf16, #tpu.memory_space<vmem>>, vector<1x16x64xbf16>
    %59 = vector.shape_cast %58 : vector<1x16x64xbf16> to vector<16x64xbf16>
    %c0_33 = arith.constant 0 : index
    %c4 = arith.constant 4 : index
    %c0_34 = arith.constant 0 : index
    %60 = vector.load %arg2[%c0_33, %c4, %c0_34] : memref<1x20x64xbf16, #tpu.memory_space<vmem>>, vector<1x16x64xbf16>
    %61 = vector.shape_cast %60 : vector<1x16x64xbf16> to vector<16x64xbf16>
    %c2_i32_35 = arith.constant 2 : i32
    %62 = vector.broadcast %c2_i32_35 : i32 to vector<16x1xi32>
    %63 = arith.cmpi slt, %34, %62 : vector<16x1xi32>
    %cst_36 = arith.constant 0.000000e+00 : bf16
    %64 = vector.broadcast %cst_36 : bf16 to vector<16x64xbf16>
    %65 = vector.shape_cast %63 : vector<16x1xi1> to vector<16x1xi1>
    %66 = vector.broadcast %65 : vector<16x1xi1> to vector<16x64xi1>
    %67 = arith.select %66, %61, %64 : vector<16x64xi1>, vector<16x64xbf16>
    %68 = tpu.concatenate %41, %42, %49, %57, %59, %67 in 1 : vector<16x64xbf16>, vector<16x64xbf16>, vector<16x64xbf16>, vector<16x64xbf16>, vector<16x64xbf16>, vector<16x64xbf16> -> vector<16x384xbf16>
    %c0_37 = arith.constant 0 : index
    %c0_38 = arith.constant 0 : index
    %69 = vector.load %arg5[%c0_37, %c0_38] : memref<384x64xbf16, #tpu.memory_space<vmem>>, vector<384x64xbf16>
    %cst_39 = arith.constant dense<0.000000e+00> : vector<16x64xf32>
    %70 = tpu.matmul %68, %69, %cst_39 {dimension_numbers = #tpu.dot_dimension_numbers<[1], [0], [0], [1], [0, 0, 1, 1], [], []>} : vector<16x384xbf16>, vector<384x64xbf16>, vector<16x64xf32> -> vector<16x64xf32>
    %c0_40 = arith.constant 0 : index
    %c0_41 = arith.constant 0 : index
    %71 = vector.load %arg6[%c0_40, %c0_41] : memref<1x64xf32, #tpu.memory_space<vmem>>, vector<1x64xf32>
    %72 = vector.broadcast %71 : vector<1x64xf32> to vector<16x64xf32>
    %73 = arith.addf %70, %72 : vector<16x64xf32>
    %cst_42 = arith.constant 0.000000e+00 : f32
    %74 = vector.broadcast %cst_42 : f32 to vector<16x64xf32>
    %75 = arith.maximumf %73, %74 : vector<16x64xf32>
    %76 = arith.truncf %75 : vector<16x64xf32> to vector<16x64xbf16>
    %c0_43 = arith.constant 0 : index
    %c0_44 = arith.constant 0 : index
    %c0_45 = arith.constant 0 : index
    %77 = vector.load %arg7[%c0_43, %c0_44, %c0_45] : memref<1x16x64xbf16, #tpu.memory_space<vmem>>, vector<1x16x64xbf16>
    %78 = vector.shape_cast %77 : vector<1x16x64xbf16> to vector<16x64xbf16>
    %79 = vector.shape_cast %76 : vector<16x64xbf16> to vector<1x16x64xbf16>
    tpu.vector_store %arg7[%c0_43, %c0_44, %c0_45], %79 {strides = array<i32>} : memref<1x16x64xbf16, #tpu.memory_space<vmem>>, vector<1x16x64xbf16>,
    return
  }
  func.func @transform_0(%arg0: i32) -> (i32, i32, i32) {
    %c0_i32 = arith.constant 0 : i32
    %c0_i32_0 = arith.constant 0 : i32
    %c0_i32_1 = arith.constant 0 : i32
    return %arg0, %c0_i32, %c0_i32_0 : i32, i32, i32
  }
  func.func @transform_1(%arg0: i32) -> (i32, i32, i32) {
    %c0_i32 = arith.constant 0 : i32
    %c0_i32_0 = arith.constant 0 : i32
    %c0_i32_1 = arith.constant 0 : i32
    return %arg0, %c0_i32, %c0_i32_0 : i32, i32, i32
  }
  func.func @transform_2(%arg0: i32) -> (i32, i32) {
    %c0_i32 = arith.constant 0 : i32
    %c0_i32_0 = arith.constant 0 : i32
    %c0_i32_1 = arith.constant 0 : i32
    return %c0_i32, %c0_i32_0 : i32, i32
  }
  func.func @transform_3(%arg0: i32) -> (i32, i32) {
    %c0_i32 = arith.constant 0 : i32
    %c0_i32_0 = arith.constant 0 : i32
    %c0_i32_1 = arith.constant 0 : i32
    return %c0_i32, %c0_i32_0 : i32, i32
  }
  func.func @transform_4(%arg0: i32) -> (i32, i32) {
    %c0_i32 = arith.constant 0 : i32
    %c0_i32_0 = arith.constant 0 : i32
    %c0_i32_1 = arith.constant 0 : i32
    return %c0_i32, %c0_i32_0 : i32, i32
  }
  func.func @transform_5(%arg0: i32) -> (i32, i32) {
    %c0_i32 = arith.constant 0 : i32
    %c0_i32_0 = arith.constant 0 : i32
    %c0_i32_1 = arith.constant 0 : i32
    return %c0_i32, %c0_i32_0 : i32, i32
  }
  func.func @transform_6(%arg0: i32) -> (i32, i32, i32) {
    %c0_i32 = arith.constant 0 : i32
    %c0_i32_0 = arith.constant 0 : i32
    %c0_i32_1 = arith.constant 0 : i32
    return %arg0, %c0_i32, %c0_i32_0 : i32, i32, i32
  }
}

module attributes {stable_mosaic.version = 11 : i64} {
  func.func @_pair_kernel(%arg0: i32, %arg1: memref<1x80x64xbf16, #tpu.memory_space<vmem>>, %arg2: memref<1x66x64xbf16, #tpu.memory_space<vmem>>, %arg3: memref<192x64xbf16, #tpu.memory_space<vmem>>, %arg4: memref<1x64xf32, #tpu.memory_space<vmem>>, %arg5: memref<384x64xbf16, #tpu.memory_space<vmem>>, %arg6: memref<1x64xf32, #tpu.memory_space<vmem>>, %arg7: memref<1x64x64xbf16, #tpu.memory_space<vmem>>, %arg8: memref<96x64xbf16, #tpu.memory_space<vmem>>) attributes {dimension_semantics = [#tpu.dimension_semantics<parallel>], iteration_bounds = array<i64: 2>, scalar_prefetch = 0 : i64, scratch_operands = 1 : i64, tpu.core_type = #tpu.core_type<tc>, window_params = [{transform_indices = @transform_0, window_bounds = array<i64: 1, 80, 64>}, {transform_indices = @transform_1, window_bounds = array<i64: 1, 66, 64>}, {pipeline_mode = #tpu.pipeline_mode<synchronous>, transform_indices = @transform_2, window_bounds = array<i64: 192, 64>}, {pipeline_mode = #tpu.pipeline_mode<synchronous>, transform_indices = @transform_3, window_bounds = array<i64: 1, 64>}, {pipeline_mode = #tpu.pipeline_mode<synchronous>, transform_indices = @transform_4, window_bounds = array<i64: 384, 64>}, {pipeline_mode = #tpu.pipeline_mode<synchronous>, transform_indices = @transform_5, window_bounds = array<i64: 1, 64>}, {transform_indices = @transform_6, window_bounds = array<i64: 1, 64, 64>}]} {
    %c0 = arith.constant 0 : index
    %c0_0 = arith.constant 0 : index
    %c0_1 = arith.constant 0 : index
    %0 = vector.load %arg1[%c0, %c0_0, %c0_1] : memref<1x80x64xbf16, #tpu.memory_space<vmem>>, vector<1x64x64xbf16>
    %1 = vector.shape_cast %0 : vector<1x64x64xbf16> to vector<64x64xbf16>
    %c0_2 = arith.constant 0 : index
    %c8 = arith.constant 8 : index
    %c0_3 = arith.constant 0 : index
    %2 = vector.load %arg1[%c0_2, %c8, %c0_3] : memref<1x80x64xbf16, #tpu.memory_space<vmem>>, vector<1x64x64xbf16>
    %3 = vector.shape_cast %2 : vector<1x64x64xbf16> to vector<64x64xbf16>
    %c0_4 = arith.constant 0 : index
    %c16 = arith.constant 16 : index
    %c0_5 = arith.constant 0 : index
    %4 = vector.load %arg1[%c0_4, %c16, %c0_5] : memref<1x80x64xbf16, #tpu.memory_space<vmem>>, vector<1x64x64xbf16>
    %5 = vector.shape_cast %4 : vector<1x64x64xbf16> to vector<64x64xbf16>
    %6 = tpu.concatenate %1, %3, %5 in 1 : vector<64x64xbf16>, vector<64x64xbf16>, vector<64x64xbf16> -> vector<64x192xbf16>
    %c0_6 = arith.constant 0 : index
    %c0_7 = arith.constant 0 : index
    %7 = vector.load %arg3[%c0_6, %c0_7] : memref<192x64xbf16, #tpu.memory_space<vmem>>, vector<192x64xbf16>
    %cst = arith.constant dense<0.000000e+00> : vector<64x64xf32>
    %8 = tpu.matmul %6, %7, %cst {dimension_numbers = #tpu.dot_dimension_numbers<[1], [0], [0], [1], [0, 0, 1, 1], [], []>} : vector<64x192xbf16>, vector<192x64xbf16>, vector<64x64xf32> -> vector<64x64xf32>
    %c0_8 = arith.constant 0 : index
    %c0_9 = arith.constant 0 : index
    %9 = vector.load %arg4[%c0_8, %c0_9] : memref<1x64xf32, #tpu.memory_space<vmem>>, vector<1x64xf32>
    %10 = vector.broadcast %9 : vector<1x64xf32> to vector<64x64xf32>
    %11 = arith.addf %8, %10 : vector<64x64xf32>
    %cst_10 = arith.constant 0.000000e+00 : f32
    %12 = vector.broadcast %cst_10 : f32 to vector<64x64xf32>
    %13 = arith.maximumf %11, %12 : vector<64x64xf32>
    %14 = arith.truncf %13 : vector<64x64xf32> to vector<64x64xbf16>
    %cst_11 = arith.constant 0.000000e+00 : bf16
    %15 = vector.broadcast %cst_11 : bf16 to vector<96x64xbf16>
    %c0_12 = arith.constant 0 : index
    %c0_13 = arith.constant 0 : index
    %16 = vector.load %arg8[%c0_12, %c0_13] : memref<96x64xbf16, #tpu.memory_space<vmem>>, vector<96x64xbf16>
    tpu.vector_store %arg8[%c0_12, %c0_13], %15 {strides = array<i32>} : memref<96x64xbf16, #tpu.memory_space<vmem>>, vector<96x64xbf16>,
    %c16_14 = arith.constant 16 : index
    %c0_15 = arith.constant 0 : index
    %17 = vector.load %arg8[%c16_14, %c0_15] : memref<96x64xbf16, #tpu.memory_space<vmem>>, vector<64x64xbf16>
    tpu.vector_store %arg8[%c16_14, %c0_15], %14 {strides = array<i32>} : memref<96x64xbf16, #tpu.memory_space<vmem>>, vector<64x64xbf16>,
    %18 = tpu.iota {dimensions = array<i32: 0>} : vector<64x1xi32>
    %c8_i32 = arith.constant 8 : i32
    %c0_i32 = arith.constant 0 : i32
    %19 = arith.cmpi eq, %c8_i32, %c0_i32 : i32
    %c1_i32 = arith.constant 1 : i32
    %20 = arith.select %19, %c1_i32, %c8_i32 : i32
    %21 = vector.broadcast %20 : i32 to vector<64x1xi32>
    %22 = arith.remsi %18, %21 : vector<64x1xi32>
    %c0_i32_16 = arith.constant 0 : i32
    %23 = vector.broadcast %c0_i32_16 : i32 to vector<64x1xi32>
    %24 = arith.cmpi ne, %22, %23 : vector<64x1xi32>
    %c0_i32_17 = arith.constant 0 : i32
    %25 = vector.broadcast %c0_i32_17 : i32 to vector<64x1xi32>
    %26 = arith.cmpi slt, %22, %25 : vector<64x1xi32>
    %c0_i32_18 = arith.constant 0 : i32
    %27 = arith.cmpi slt, %20, %c0_i32_18 : i32
    %28 = vector.broadcast %27 : i1 to vector<64x1xi1>
    %29 = vector.broadcast %28 : vector<64x1xi1> to vector<64x1xi1>
    %30 = arith.xori %26, %29 : vector<64x1xi1>
    %31 = arith.andi %30, %24 : vector<64x1xi1>
    %32 = vector.broadcast %20 : i32 to vector<64x1xi32>
    %33 = arith.addi %22, %32 : vector<64x1xi32>
    %34 = arith.select %31, %33, %22 : vector<64x1xi1>, vector<64x1xi32>
    %c15 = arith.constant 15 : index
    %c0_19 = arith.constant 0 : index
    %35 = vector.load %arg8[%c15, %c0_19] : memref<96x64xbf16, #tpu.memory_space<vmem>>, vector<64x64xbf16>
    %c1_i32_20 = arith.constant 1 : i32
    %36 = vector.broadcast %c1_i32_20 : i32 to vector<64x1xi32>
    %37 = arith.cmpi sge, %34, %36 : vector<64x1xi32>
    %cst_21 = arith.constant 0.000000e+00 : bf16
    %38 = vector.broadcast %cst_21 : bf16 to vector<64x64xbf16>
    %39 = vector.shape_cast %37 : vector<64x1xi1> to vector<64x1xi1>
    %40 = vector.broadcast %39 : vector<64x1xi1> to vector<64x64xi1>
    %41 = arith.select %40, %35, %38 : vector<64x64xi1>, vector<64x64xbf16>
    %c16_22 = arith.constant 16 : index
    %c0_23 = arith.constant 0 : index
    %42 = vector.load %arg8[%c16_22, %c0_23] : memref<96x64xbf16, #tpu.memory_space<vmem>>, vector<64x64xbf16>
    %c17 = arith.constant 17 : index
    %c0_24 = arith.constant 0 : index
    %43 = vector.load %arg8[%c17, %c0_24] : memref<96x64xbf16, #tpu.memory_space<vmem>>, vector<64x64xbf16>
    %c7_i32 = arith.constant 7 : i32
    %44 = vector.broadcast %c7_i32 : i32 to vector<64x1xi32>
    %45 = arith.cmpi slt, %34, %44 : vector<64x1xi32>
    %cst_25 = arith.constant 0.000000e+00 : bf16
    %46 = vector.broadcast %cst_25 : bf16 to vector<64x64xbf16>
    %47 = vector.shape_cast %45 : vector<64x1xi1> to vector<64x1xi1>
    %48 = vector.broadcast %47 : vector<64x1xi1> to vector<64x64xi1>
    %49 = arith.select %48, %43, %46 : vector<64x64xi1>, vector<64x64xbf16>
    %c0_26 = arith.constant 0 : index
    %c0_27 = arith.constant 0 : index
    %c0_28 = arith.constant 0 : index
    %50 = vector.load %arg2[%c0_26, %c0_27, %c0_28] : memref<1x66x64xbf16, #tpu.memory_space<vmem>>, vector<1x64x64xbf16>
    %51 = vector.shape_cast %50 : vector<1x64x64xbf16> to vector<64x64xbf16>
    %c1_i32_29 = arith.constant 1 : i32
    %52 = vector.broadcast %c1_i32_29 : i32 to vector<64x1xi32>
    %53 = arith.cmpi sge, %34, %52 : vector<64x1xi32>
    %cst_30 = arith.constant 0.000000e+00 : bf16
    %54 = vector.broadcast %cst_30 : bf16 to vector<64x64xbf16>
    %55 = vector.shape_cast %53 : vector<64x1xi1> to vector<64x1xi1>
    %56 = vector.broadcast %55 : vector<64x1xi1> to vector<64x64xi1>
    %57 = arith.select %56, %51, %54 : vector<64x64xi1>, vector<64x64xbf16>
    %c0_31 = arith.constant 0 : index
    %c1 = arith.constant 1 : index
    %c0_32 = arith.constant 0 : index
    %58 = vector.load %arg2[%c0_31, %c1, %c0_32] : memref<1x66x64xbf16, #tpu.memory_space<vmem>>, vector<1x64x64xbf16>
    %59 = vector.shape_cast %58 : vector<1x64x64xbf16> to vector<64x64xbf16>
    %c0_33 = arith.constant 0 : index
    %c2 = arith.constant 2 : index
    %c0_34 = arith.constant 0 : index
    %60 = vector.load %arg2[%c0_33, %c2, %c0_34] : memref<1x66x64xbf16, #tpu.memory_space<vmem>>, vector<1x64x64xbf16>
    %61 = vector.shape_cast %60 : vector<1x64x64xbf16> to vector<64x64xbf16>
    %c7_i32_35 = arith.constant 7 : i32
    %62 = vector.broadcast %c7_i32_35 : i32 to vector<64x1xi32>
    %63 = arith.cmpi slt, %34, %62 : vector<64x1xi32>
    %cst_36 = arith.constant 0.000000e+00 : bf16
    %64 = vector.broadcast %cst_36 : bf16 to vector<64x64xbf16>
    %65 = vector.shape_cast %63 : vector<64x1xi1> to vector<64x1xi1>
    %66 = vector.broadcast %65 : vector<64x1xi1> to vector<64x64xi1>
    %67 = arith.select %66, %61, %64 : vector<64x64xi1>, vector<64x64xbf16>
    %68 = tpu.concatenate %41, %42, %49, %57, %59, %67 in 1 : vector<64x64xbf16>, vector<64x64xbf16>, vector<64x64xbf16>, vector<64x64xbf16>, vector<64x64xbf16>, vector<64x64xbf16> -> vector<64x384xbf16>
    %c0_37 = arith.constant 0 : index
    %c0_38 = arith.constant 0 : index
    %69 = vector.load %arg5[%c0_37, %c0_38] : memref<384x64xbf16, #tpu.memory_space<vmem>>, vector<384x64xbf16>
    %cst_39 = arith.constant dense<0.000000e+00> : vector<64x64xf32>
    %70 = tpu.matmul %68, %69, %cst_39 {dimension_numbers = #tpu.dot_dimension_numbers<[1], [0], [0], [1], [0, 0, 1, 1], [], []>} : vector<64x384xbf16>, vector<384x64xbf16>, vector<64x64xf32> -> vector<64x64xf32>
    %c0_40 = arith.constant 0 : index
    %c0_41 = arith.constant 0 : index
    %71 = vector.load %arg6[%c0_40, %c0_41] : memref<1x64xf32, #tpu.memory_space<vmem>>, vector<1x64xf32>
    %72 = vector.broadcast %71 : vector<1x64xf32> to vector<64x64xf32>
    %73 = arith.addf %70, %72 : vector<64x64xf32>
    %cst_42 = arith.constant 0.000000e+00 : f32
    %74 = vector.broadcast %cst_42 : f32 to vector<64x64xf32>
    %75 = arith.maximumf %73, %74 : vector<64x64xf32>
    %76 = arith.truncf %75 : vector<64x64xf32> to vector<64x64xbf16>
    %c0_43 = arith.constant 0 : index
    %c0_44 = arith.constant 0 : index
    %c0_45 = arith.constant 0 : index
    %77 = vector.load %arg7[%c0_43, %c0_44, %c0_45] : memref<1x64x64xbf16, #tpu.memory_space<vmem>>, vector<1x64x64xbf16>
    %78 = vector.shape_cast %77 : vector<1x64x64xbf16> to vector<64x64xbf16>
    %79 = vector.shape_cast %76 : vector<64x64xbf16> to vector<1x64x64xbf16>
    tpu.vector_store %arg7[%c0_43, %c0_44, %c0_45], %79 {strides = array<i32>} : memref<1x64x64xbf16, #tpu.memory_space<vmem>>, vector<1x64x64xbf16>,
    return
  }
  func.func @transform_0(%arg0: i32) -> (i32, i32, i32) {
    %c0_i32 = arith.constant 0 : i32
    %c0_i32_0 = arith.constant 0 : i32
    %c0_i32_1 = arith.constant 0 : i32
    return %arg0, %c0_i32, %c0_i32_0 : i32, i32, i32
  }
  func.func @transform_1(%arg0: i32) -> (i32, i32, i32) {
    %c0_i32 = arith.constant 0 : i32
    %c0_i32_0 = arith.constant 0 : i32
    %c0_i32_1 = arith.constant 0 : i32
    return %arg0, %c0_i32, %c0_i32_0 : i32, i32, i32
  }
  func.func @transform_2(%arg0: i32) -> (i32, i32) {
    %c0_i32 = arith.constant 0 : i32
    %c0_i32_0 = arith.constant 0 : i32
    %c0_i32_1 = arith.constant 0 : i32
    return %c0_i32, %c0_i32_0 : i32, i32
  }
  func.func @transform_3(%arg0: i32) -> (i32, i32) {
    %c0_i32 = arith.constant 0 : i32
    %c0_i32_0 = arith.constant 0 : i32
    %c0_i32_1 = arith.constant 0 : i32
    return %c0_i32, %c0_i32_0 : i32, i32
  }
  func.func @transform_4(%arg0: i32) -> (i32, i32) {
    %c0_i32 = arith.constant 0 : i32
    %c0_i32_0 = arith.constant 0 : i32
    %c0_i32_1 = arith.constant 0 : i32
    return %c0_i32, %c0_i32_0 : i32, i32
  }
  func.func @transform_5(%arg0: i32) -> (i32, i32) {
    %c0_i32 = arith.constant 0 : i32
    %c0_i32_0 = arith.constant 0 : i32
    %c0_i32_1 = arith.constant 0 : i32
    return %c0_i32, %c0_i32_0 : i32, i32
  }
  func.func @transform_6(%arg0: i32) -> (i32, i32, i32) {
    %c0_i32 = arith.constant 0 : i32
    %c0_i32_0 = arith.constant 0 : i32
    %c0_i32_1 = arith.constant 0 : i32
    return %arg0, %c0_i32, %c0_i32_0 : i32, i32, i32
  }
}

module attributes {stable_mosaic.version = 11 : i64} {
  func.func @_pair_kernel(%arg0: i32, %arg1: memref<1x288x64xbf16, #tpu.memory_space<vmem>>, %arg2: memref<1x258x4xbf16, #tpu.memory_space<vmem>>, %arg3: memref<192x64xbf16, #tpu.memory_space<vmem>>, %arg4: memref<1x64xf32, #tpu.memory_space<vmem>>, %arg5: memref<204x64xbf16, #tpu.memory_space<vmem>>, %arg6: memref<1x64xf32, #tpu.memory_space<vmem>>, %arg7: memref<1x64xf32, #tpu.memory_space<vmem>>, %arg8: memref<1x256x1xf32, #tpu.memory_space<vmem>>, %arg9: memref<288x64xbf16, #tpu.memory_space<vmem>>) attributes {dimension_semantics = [#tpu.dimension_semantics<parallel>], iteration_bounds = array<i64: 2>, scalar_prefetch = 0 : i64, scratch_operands = 1 : i64, tpu.core_type = #tpu.core_type<tc>, window_params = [{transform_indices = @transform_0, window_bounds = array<i64: 1, 288, 64>}, {transform_indices = @transform_1, window_bounds = array<i64: 1, 258, 4>}, {pipeline_mode = #tpu.pipeline_mode<synchronous>, transform_indices = @transform_2, window_bounds = array<i64: 192, 64>}, {pipeline_mode = #tpu.pipeline_mode<synchronous>, transform_indices = @transform_3, window_bounds = array<i64: 1, 64>}, {pipeline_mode = #tpu.pipeline_mode<synchronous>, transform_indices = @transform_4, window_bounds = array<i64: 204, 64>}, {pipeline_mode = #tpu.pipeline_mode<synchronous>, transform_indices = @transform_5, window_bounds = array<i64: 1, 64>}, {pipeline_mode = #tpu.pipeline_mode<synchronous>, transform_indices = @transform_6, window_bounds = array<i64: 1, 64>}, {transform_indices = @transform_7, window_bounds = array<i64: 1, 256, 1>}]} {
    %c0 = arith.constant 0 : index
    %c0_0 = arith.constant 0 : index
    %c0_1 = arith.constant 0 : index
    %0 = vector.load %arg1[%c0, %c0_0, %c0_1] : memref<1x288x64xbf16, #tpu.memory_space<vmem>>, vector<1x256x64xbf16>
    %1 = vector.shape_cast %0 : vector<1x256x64xbf16> to vector<256x64xbf16>
    %c0_2 = arith.constant 0 : index
    %c16 = arith.constant 16 : index
    %c0_3 = arith.constant 0 : index
    %2 = vector.load %arg1[%c0_2, %c16, %c0_3] : memref<1x288x64xbf16, #tpu.memory_space<vmem>>, vector<1x256x64xbf16>
    %3 = vector.shape_cast %2 : vector<1x256x64xbf16> to vector<256x64xbf16>
    %c0_4 = arith.constant 0 : index
    %c32 = arith.constant 32 : index
    %c0_5 = arith.constant 0 : index
    %4 = vector.load %arg1[%c0_4, %c32, %c0_5] : memref<1x288x64xbf16, #tpu.memory_space<vmem>>, vector<1x256x64xbf16>
    %5 = vector.shape_cast %4 : vector<1x256x64xbf16> to vector<256x64xbf16>
    %6 = tpu.concatenate %1, %3, %5 in 1 : vector<256x64xbf16>, vector<256x64xbf16>, vector<256x64xbf16> -> vector<256x192xbf16>
    %c0_6 = arith.constant 0 : index
    %c0_7 = arith.constant 0 : index
    %7 = vector.load %arg3[%c0_6, %c0_7] : memref<192x64xbf16, #tpu.memory_space<vmem>>, vector<192x64xbf16>
    %cst = arith.constant dense<0.000000e+00> : vector<256x64xf32>
    %8 = tpu.matmul %6, %7, %cst {dimension_numbers = #tpu.dot_dimension_numbers<[1], [0], [0], [1], [0, 0, 1, 1], [], []>} : vector<256x192xbf16>, vector<192x64xbf16>, vector<256x64xf32> -> vector<256x64xf32>
    %c0_8 = arith.constant 0 : index
    %c0_9 = arith.constant 0 : index
    %9 = vector.load %arg4[%c0_8, %c0_9] : memref<1x64xf32, #tpu.memory_space<vmem>>, vector<1x64xf32>
    %10 = vector.broadcast %9 : vector<1x64xf32> to vector<256x64xf32>
    %11 = arith.addf %8, %10 : vector<256x64xf32>
    %cst_10 = arith.constant 0.000000e+00 : f32
    %12 = vector.broadcast %cst_10 : f32 to vector<256x64xf32>
    %13 = arith.maximumf %11, %12 : vector<256x64xf32>
    %14 = arith.truncf %13 : vector<256x64xf32> to vector<256x64xbf16>
    %cst_11 = arith.constant 0.000000e+00 : bf16
    %15 = vector.broadcast %cst_11 : bf16 to vector<288x64xbf16>
    %c0_12 = arith.constant 0 : index
    %c0_13 = arith.constant 0 : index
    %16 = vector.load %arg9[%c0_12, %c0_13] : memref<288x64xbf16, #tpu.memory_space<vmem>>, vector<288x64xbf16>
    tpu.vector_store %arg9[%c0_12, %c0_13], %15 {strides = array<i32>} : memref<288x64xbf16, #tpu.memory_space<vmem>>, vector<288x64xbf16>,
    %c16_14 = arith.constant 16 : index
    %c0_15 = arith.constant 0 : index
    %17 = vector.load %arg9[%c16_14, %c0_15] : memref<288x64xbf16, #tpu.memory_space<vmem>>, vector<256x64xbf16>
    tpu.vector_store %arg9[%c16_14, %c0_15], %14 {strides = array<i32>} : memref<288x64xbf16, #tpu.memory_space<vmem>>, vector<256x64xbf16>,
    %18 = tpu.iota {dimensions = array<i32: 0>} : vector<256x1xi32>
    %c16_i32 = arith.constant 16 : i32
    %c0_i32 = arith.constant 0 : i32
    %19 = arith.cmpi eq, %c16_i32, %c0_i32 : i32
    %c1_i32 = arith.constant 1 : i32
    %20 = arith.select %19, %c1_i32, %c16_i32 : i32
    %21 = vector.broadcast %20 : i32 to vector<256x1xi32>
    %22 = arith.remsi %18, %21 : vector<256x1xi32>
    %c0_i32_16 = arith.constant 0 : i32
    %23 = vector.broadcast %c0_i32_16 : i32 to vector<256x1xi32>
    %24 = arith.cmpi ne, %22, %23 : vector<256x1xi32>
    %c0_i32_17 = arith.constant 0 : i32
    %25 = vector.broadcast %c0_i32_17 : i32 to vector<256x1xi32>
    %26 = arith.cmpi slt, %22, %25 : vector<256x1xi32>
    %c0_i32_18 = arith.constant 0 : i32
    %27 = arith.cmpi slt, %20, %c0_i32_18 : i32
    %28 = vector.broadcast %27 : i1 to vector<256x1xi1>
    %29 = vector.broadcast %28 : vector<256x1xi1> to vector<256x1xi1>
    %30 = arith.xori %26, %29 : vector<256x1xi1>
    %31 = arith.andi %30, %24 : vector<256x1xi1>
    %32 = vector.broadcast %20 : i32 to vector<256x1xi32>
    %33 = arith.addi %22, %32 : vector<256x1xi32>
    %34 = arith.select %31, %33, %22 : vector<256x1xi1>, vector<256x1xi32>
    %c15 = arith.constant 15 : index
    %c0_19 = arith.constant 0 : index
    %35 = vector.load %arg9[%c15, %c0_19] : memref<288x64xbf16, #tpu.memory_space<vmem>>, vector<256x64xbf16>
    %c1_i32_20 = arith.constant 1 : i32
    %36 = vector.broadcast %c1_i32_20 : i32 to vector<256x1xi32>
    %37 = arith.cmpi sge, %34, %36 : vector<256x1xi32>
    %cst_21 = arith.constant 0.000000e+00 : bf16
    %38 = vector.broadcast %cst_21 : bf16 to vector<256x64xbf16>
    %39 = vector.shape_cast %37 : vector<256x1xi1> to vector<256x1xi1>
    %40 = vector.broadcast %39 : vector<256x1xi1> to vector<256x64xi1>
    %41 = arith.select %40, %35, %38 : vector<256x64xi1>, vector<256x64xbf16>
    %c16_22 = arith.constant 16 : index
    %c0_23 = arith.constant 0 : index
    %42 = vector.load %arg9[%c16_22, %c0_23] : memref<288x64xbf16, #tpu.memory_space<vmem>>, vector<256x64xbf16>
    %c17 = arith.constant 17 : index
    %c0_24 = arith.constant 0 : index
    %43 = vector.load %arg9[%c17, %c0_24] : memref<288x64xbf16, #tpu.memory_space<vmem>>, vector<256x64xbf16>
    %c15_i32 = arith.constant 15 : i32
    %44 = vector.broadcast %c15_i32 : i32 to vector<256x1xi32>
    %45 = arith.cmpi slt, %34, %44 : vector<256x1xi32>
    %cst_25 = arith.constant 0.000000e+00 : bf16
    %46 = vector.broadcast %cst_25 : bf16 to vector<256x64xbf16>
    %47 = vector.shape_cast %45 : vector<256x1xi1> to vector<256x1xi1>
    %48 = vector.broadcast %47 : vector<256x1xi1> to vector<256x64xi1>
    %49 = arith.select %48, %43, %46 : vector<256x64xi1>, vector<256x64xbf16>
    %c0_26 = arith.constant 0 : index
    %c0_27 = arith.constant 0 : index
    %c0_28 = arith.constant 0 : index
    %50 = vector.load %arg2[%c0_26, %c0_27, %c0_28] : memref<1x258x4xbf16, #tpu.memory_space<vmem>>, vector<1x256x4xbf16>
    %51 = vector.shape_cast %50 : vector<1x256x4xbf16> to vector<256x4xbf16>
    %c1_i32_29 = arith.constant 1 : i32
    %52 = vector.broadcast %c1_i32_29 : i32 to vector<256x1xi32>
    %53 = arith.cmpi sge, %34, %52 : vector<256x1xi32>
    %cst_30 = arith.constant 0.000000e+00 : bf16
    %54 = vector.broadcast %cst_30 : bf16 to vector<256x4xbf16>
    %55 = vector.shape_cast %53 : vector<256x1xi1> to vector<256x1xi1>
    %56 = vector.broadcast %55 : vector<256x1xi1> to vector<256x4xi1>
    %57 = arith.select %56, %51, %54 : vector<256x4xi1>, vector<256x4xbf16>
    %c0_31 = arith.constant 0 : index
    %c1 = arith.constant 1 : index
    %c0_32 = arith.constant 0 : index
    %58 = vector.load %arg2[%c0_31, %c1, %c0_32] : memref<1x258x4xbf16, #tpu.memory_space<vmem>>, vector<1x256x4xbf16>
    %59 = vector.shape_cast %58 : vector<1x256x4xbf16> to vector<256x4xbf16>
    %c0_33 = arith.constant 0 : index
    %c2 = arith.constant 2 : index
    %c0_34 = arith.constant 0 : index
    %60 = vector.load %arg2[%c0_33, %c2, %c0_34] : memref<1x258x4xbf16, #tpu.memory_space<vmem>>, vector<1x256x4xbf16>
    %61 = vector.shape_cast %60 : vector<1x256x4xbf16> to vector<256x4xbf16>
    %c15_i32_35 = arith.constant 15 : i32
    %62 = vector.broadcast %c15_i32_35 : i32 to vector<256x1xi32>
    %63 = arith.cmpi slt, %34, %62 : vector<256x1xi32>
    %cst_36 = arith.constant 0.000000e+00 : bf16
    %64 = vector.broadcast %cst_36 : bf16 to vector<256x4xbf16>
    %65 = vector.shape_cast %63 : vector<256x1xi1> to vector<256x1xi1>
    %66 = vector.broadcast %65 : vector<256x1xi1> to vector<256x4xi1>
    %67 = arith.select %66, %61, %64 : vector<256x4xi1>, vector<256x4xbf16>
    %68 = tpu.concatenate %41, %42, %49, %57, %59, %67 in 1 : vector<256x64xbf16>, vector<256x64xbf16>, vector<256x64xbf16>, vector<256x4xbf16>, vector<256x4xbf16>, vector<256x4xbf16> -> vector<256x204xbf16>
    %c0_37 = arith.constant 0 : index
    %c0_38 = arith.constant 0 : index
    %69 = vector.load %arg5[%c0_37, %c0_38] : memref<204x64xbf16, #tpu.memory_space<vmem>>, vector<204x64xbf16>
    %cst_39 = arith.constant dense<0.000000e+00> : vector<256x64xf32>
    %70 = tpu.matmul %68, %69, %cst_39 {dimension_numbers = #tpu.dot_dimension_numbers<[1], [0], [0], [1], [0, 0, 1, 1], [], []>} : vector<256x204xbf16>, vector<204x64xbf16>, vector<256x64xf32> -> vector<256x64xf32>
    %c0_40 = arith.constant 0 : index
    %c0_41 = arith.constant 0 : index
    %71 = vector.load %arg6[%c0_40, %c0_41] : memref<1x64xf32, #tpu.memory_space<vmem>>, vector<1x64xf32>
    %72 = vector.broadcast %71 : vector<1x64xf32> to vector<256x64xf32>
    %73 = arith.addf %70, %72 : vector<256x64xf32>
    %cst_42 = arith.constant 0.000000e+00 : f32
    %74 = vector.broadcast %cst_42 : f32 to vector<256x64xf32>
    %75 = arith.maximumf %73, %74 : vector<256x64xf32>
    %c0_43 = arith.constant 0 : index
    %c0_44 = arith.constant 0 : index
    %76 = vector.load %arg7[%c0_43, %c0_44] : memref<1x64xf32, #tpu.memory_space<vmem>>, vector<1x64xf32>
    %77 = vector.broadcast %76 : vector<1x64xf32> to vector<256x64xf32>
    %78 = arith.mulf %75, %77 : vector<256x64xf32>
    %cst_45 = arith.constant dense<0.000000e+00> : vector<256xf32>
    %79 = vector.multi_reduction <add>, %78, %cst_45 [1] : vector<256x64xf32> to vector<256xf32>
    %80 = vector.shape_cast %79 : vector<256xf32> to vector<256x1xf32>
    %c0_46 = arith.constant 0 : index
    %c0_47 = arith.constant 0 : index
    %c0_48 = arith.constant 0 : index
    %81 = vector.load %arg8[%c0_46, %c0_47, %c0_48] : memref<1x256x1xf32, #tpu.memory_space<vmem>>, vector<1x256x1xf32>
    %82 = vector.shape_cast %81 : vector<1x256x1xf32> to vector<256x1xf32>
    %83 = vector.shape_cast %80 : vector<256x1xf32> to vector<1x256x1xf32>
    tpu.vector_store %arg8[%c0_46, %c0_47, %c0_48], %83 {strides = array<i32>} : memref<1x256x1xf32, #tpu.memory_space<vmem>>, vector<1x256x1xf32>,
    return
  }
  func.func @transform_0(%arg0: i32) -> (i32, i32, i32) {
    %c0_i32 = arith.constant 0 : i32
    %c0_i32_0 = arith.constant 0 : i32
    %c0_i32_1 = arith.constant 0 : i32
    return %arg0, %c0_i32, %c0_i32_0 : i32, i32, i32
  }
  func.func @transform_1(%arg0: i32) -> (i32, i32, i32) {
    %c0_i32 = arith.constant 0 : i32
    %c0_i32_0 = arith.constant 0 : i32
    %c0_i32_1 = arith.constant 0 : i32
    return %arg0, %c0_i32, %c0_i32_0 : i32, i32, i32
  }
  func.func @transform_2(%arg0: i32) -> (i32, i32) {
    %c0_i32 = arith.constant 0 : i32
    %c0_i32_0 = arith.constant 0 : i32
    %c0_i32_1 = arith.constant 0 : i32
    return %c0_i32, %c0_i32_0 : i32, i32
  }
  func.func @transform_3(%arg0: i32) -> (i32, i32) {
    %c0_i32 = arith.constant 0 : i32
    %c0_i32_0 = arith.constant 0 : i32
    %c0_i32_1 = arith.constant 0 : i32
    return %c0_i32, %c0_i32_0 : i32, i32
  }
  func.func @transform_4(%arg0: i32) -> (i32, i32) {
    %c0_i32 = arith.constant 0 : i32
    %c0_i32_0 = arith.constant 0 : i32
    %c0_i32_1 = arith.constant 0 : i32
    return %c0_i32, %c0_i32_0 : i32, i32
  }
  func.func @transform_5(%arg0: i32) -> (i32, i32) {
    %c0_i32 = arith.constant 0 : i32
    %c0_i32_0 = arith.constant 0 : i32
    %c0_i32_1 = arith.constant 0 : i32
    return %c0_i32, %c0_i32_0 : i32, i32
  }
  func.func @transform_6(%arg0: i32) -> (i32, i32) {
    %c0_i32 = arith.constant 0 : i32
    %c0_i32_0 = arith.constant 0 : i32
    %c0_i32_1 = arith.constant 0 : i32
    return %c0_i32, %c0_i32_0 : i32, i32
  }
  func.func @transform_7(%arg0: i32) -> (i32, i32, i32) {
    %c0_i32 = arith.constant 0 : i32
    %c0_i32_0 = arith.constant 0 : i32
    %c0_i32_1 = arith.constant 0 : i32
    return %arg0, %c0_i32, %c0_i32_0 : i32, i32, i32
  }
}

</mosaic_0001>

<bundles_post_ra>
// kernel: rrs_1d_forward.10
= control target key start
LH: loop header
LB: loop body
LE: loop exit
PB: predicated region body
PF: predicated region fallthrough
CT: control target
= control target key end

     0   :  { %s1511_s21 = smov 0   ;;  %s1899_s0 = inlined_call_operand.vmem [shape: bf16[2,80,64], index: 0, kind: input, shape index: {}]   ;;  %s1900_s1 = inlined_call_operand.vmem [shape: bf16[192,64], index: 1, kind: input, shape index: {}]   ;;  %s1901_s2 = inlined_call_operand.vmem [shape: f32[1,64], index: 2, kind: input, shape index: {}]   ;;  %s1902_s3 = inlined_call_operand.vmem [shape: bf16[192,64], index: 3, kind: input, shape index: {}]   ;;  %s1903_s4 = inlined_call_operand.vmem [shape: f32[1,64], index: 4, kind: input, shape index: {}]   ;;  %s1904_s5 = inlined_call_operand.vmem [shape: bf16[2,64,64], index: 5, kind: output, shape index: {0}]   ;;  %s1905_s6 = inlined_call_operand.vmem [shape: bf16[2,64,64], index: 6, kind: output, shape index: {1}]  }
   0x1 LB: > { %s1325_s22 = sadd.s32 4294967295, %s1472_s21   ;;  %p1329_p0 = scmp.ge.s32.totalorder %s1472_s21, 1  ;;  %s1472_s21 = sphi %s1511_s21, %s17_s21  }
   0x2   : > { %p215_p1 = scmp.lt.s32.totalorder %s1472_s21, 3 }
   0x4   : > { %p216_p2 = pnand %p1329_p0, %p215_p1 }
   0x5   : > { %p250_p3 = scmp.lt.s32.totalorder (!%p216_p2), %s1325_s22, 1  ;;  %v1441_v0 = vld [vmem:[%s1900_s1] sm:$0xff] (!%p216_p2)   ;;  %v1474_v1 = vmov (!%p216_p2), 0   ;;  %v1442_v2 = vld [vmem:[%s1900_s1 + $0x8] sm:$0xff] (!%p216_p2)   ;;  %vm315_vm0 = vcmask (!%p216_p2), 523264   ;;  %v1443_v3 = vld [vmem:[%s1900_s1 + $0x10] sm:$0xff] (!%p216_p2)   ;;  %v568_v40 = vlaneseq (!%p216_p2) }
   0x6   : > { %219 = sbr.rel (%p216_p2) target bundleno = 746 (0x2ea), region = 40  ;;  %444 = vmatprep.subr.bf16.mxu0 (!%p216_p2), %v1474_v1  ;;  %1124 = vmatprep.subr.bf16.mxu1 (!%p216_p2), %v1474_v1  ;;  %558 = vst.msk [vmem:[#allocation2] sm:$0xff] (!%p216_p2), %vm315_vm0, %v1474_v1  ;;  %559 = vst.msk [vmem:[#allocation2 + $0x8] sm:$0xff] (!%p216_p2), %vm315_vm0, %v1474_v1  ;;  %s1475_s9 = smov (!%p216_p2), 64   ;;  %v1444_v21 = vld [vmem:[%s1900_s1 + $0x18] sm:$0xff] (!%p216_p2)   ;;  %v1445_v24 = vld [vmem:[%s1900_s1 + $0x20] sm:$0xff] (!%p216_p2)  }
   0x7   : > { %445 = vmatpush1.bf16.msra.mxu0 (!%p216_p2), %v1441_v0  ;;  %560 = vst.msk [vmem:[#allocation2 + $0x10] sm:$0xff] (!%p216_p2), %vm315_vm0, %v1474_v1  ;;  %561 = vst.msk [vmem:[#allocation2 + $0x18] sm:$0xff] (!%p216_p2), %vm315_vm0, %v1474_v1  ;;  %v1446_v25 = vld [vmem:[%s1900_s1 + $0x28] sm:$0xff] (!%p216_p2)   ;;  %v1447_v26 = vld [vmem:[%s1900_s1 + $0x30] sm:$0xff] (!%p216_p2)   ;;  %v1598_v41 = vshrl.u32 (!%p216_p2), %v568_v40, 7 }
   0x8   : > { %446 = vmatprep.subr.bf16.mxu0 (!%p216_p2), %v1474_v1  ;;  %562 = vst.msk [vmem:[#allocation2 + $0x20] sm:$0xff] (!%p216_p2), %vm315_vm0, %v1474_v1  ;;  %563 = vst.msk [vmem:[#allocation2 + $0x28] sm:$0xff] (!%p216_p2), %vm315_vm0, %v1474_v1  ;;  %v1448_v27 = vld [vmem:[%s1900_s1 + $0x38] sm:$0xff] (!%p216_p2)   ;;  %v1449_v28 = vld [vmem:[%s1900_s1 + $0x40] sm:$0xff] (!%p216_p2)  }
   0x9   : > { %v1450_v29 = vld [vmem:[%s1900_s1 + $0x48] sm:$0xff] (!%p216_p2)   ;;  %v1451_v30 = vld [vmem:[%s1900_s1 + $0x50] sm:$0xff] (!%p216_p2)   ;;  %v1452_v31 = vld [vmem:[%s1900_s1 + $0x58] sm:$0xff] (!%p216_p2)   ;;  %v1601_v42 = vadd.s32 (!%p216_p2), 8, %v1598_v41  ;;  %v571_v43 = vadd.s32 (!%p216_p2), 16, %v1598_v41  ;;  %v572_v44 = vadd.s32 (!%p216_p2), 24, %v1598_v41 }
   0xa   : > { %v581_v45 = vand.u32 (!%p216_p2), 7, %v1598_v41  ;;  %v573_v52 = vadd.s32 (!%p216_p2), 32, %v1598_v41  ;;  %v574_v53 = vadd.s32 (!%p216_p2), 40, %v1598_v41 }
   0xb   : > { %447 = vmatpush1.bf16.msra.mxu0 (!%p216_p2), %v1442_v2  ;;  %v588_v46 = vand.u32 (!%p216_p2), 7, %v1601_v42  ;;  %v595_v47 = vand.u32 (!%p216_p2), 7, %v571_v43  ;;  %v602_v48 = vand.u32 (!%p216_p2), 7, %v572_v44 }
   0xc   : > { %448 = vmatprep.subr.bf16.mxu0 (!%p216_p2), %v1474_v1  ;;  %vm678_vm1 = vcmp.ge.s32.totalorder (!%p216_p2), %v581_v45, 1  ;;  %v609_v58 = vand.u32 (!%p216_p2), 7, %v573_v52  ;;  %v616_v59 = vand.u32 (!%p216_p2), 7, %v574_v53 }
   0xd   : > { %s1921_s22 = smov (!%p250_p3, %s1325_s22), 1  ;;  %vm679_vm2 = vcmp.ge.s32.totalorder %v588_v46, 1  ;;  %vm680_vm3 = vcmp.ge.s32.totalorder %v595_v47, 1  ;;  %vm702_vm4 = vmpackc.low %vm678_vm1, %vm678_vm1  ;;  %vm1611_vm5 = vcmp.ge.s32.totalorder %v602_v48, 1  ;;  %vm1622_vm9 = vcmp.lt.s32.totalorder %v595_v47, 7 }
   0xe   : > { %s1422_s27 = smul.u32 40, %s1921_s22  ;;  %vm703_vm6 = vmpackc.low %vm679_vm2, %vm679_vm2  ;;  %v710_v50 = vsel %vm702_vm4, 65537, %v1474_v1  ;;  %vm1627_vm10 = vcmp.lt.s32.totalorder %v602_v48, 7  ;;  %vm682_vm13 = vcmp.ge.s32.totalorder %v609_v58, 1  ;;  %vm683_vm14 = vcmp.ge.s32.totalorder %v616_v59, 1 }
   0xf   : > { %449 = vmatpush1.bf16.msra.mxu0 %v1443_v3  ;;  %v711_v51 = vsel %vm703_vm6, 65537, %v1474_v1  ;;  %vm704_vm7 = vmpackc.low %vm680_vm3, %vm680_vm3  ;;  %vm730_vm1 = vsmask.f32 7424  ;;  %vm777_vm3 = vcmp.lt.s32.totalorder %v609_v58, 7  ;;  %vm778_vm4 = vcmp.lt.s32.totalorder %v616_v59, 7 }
  0x10   : > { %s254_s30 = scalar_lea.vmem %s1899_s0, %s1422_s27  ;;  %450 = vmatprep.subr.bf16.mxu0 %v1474_v1  ;;  %v1369_v54 = vcombine.low %v710_v50, %v711_v51  ;;  %vm705_vm8 = vmpackc.low %vm1611_vm5, %vm1611_vm5  ;;  %v712_v56 = vsel %vm704_vm7, 65537, %v1474_v1  ;;  %vm825_vm7 = vsmask.f32 256  ;;  %s1404_s27 = sshll.u32 %s1921_s22, 5 }
  0x11   : > { %v269_v4 = vld [vmem:[%s254_s30 + $0x4] sm:$0xf]  ;;  %v270_v5 = vld [vmem:[%s254_s30 + $0x8] sm:$0xf]  ;;  %v268_v6 = vld [vmem:[%s254_s30] sm:$0xf]  ;;  %s1878_s19 = scalar_lea.vmem %s1905_s6, %s1404_s27 }
  0x12   : > { %v1339_v7 = vcombine.low %v269_v4, %v270_v5  ;;  %v1335_v8 = vcombine.low %v268_v6, %v269_v4  ;;  %v271_v9 = vld [vmem:[%s254_s30 + $0xc] sm:$0xf]  ;;  %v272_v10 = vld [vmem:[%s254_s30 + $0x10] sm:$0xf]  ;;  %v273_v11 = vld [vmem:[%s254_s30 + $0x14] sm:$0xf] }
  0x13   : > { %v274_v12 = vld [vmem:[%s254_s30 + $0x18] sm:$0xf]  ;;  %v275_v13 = vld [vmem:[%s254_s30 + $0x1c] sm:$0xf]  ;;  %v1337_v14 = vcombine.low %v272_v10, %v273_v11  ;;  %v276_v15 = vld [vmem:[%s254_s30 + $0x20] sm:$0xf]  ;;  %v1336_v16 = vcombine.low %v270_v5, %v271_v9  ;;  %v1340_v17 = vcombine.low %v271_v9, %v272_v10  ;;  %451 = vmatpush1.bf16.msra.mxu0 %v1444_v21 }
  0x14   : > { %304 = vrot.lane.b32.xlu0 %v1339_v7, %s1475_s9  ;;  %v1338_v18 = vcombine.low %v274_v12, %v275_v13  ;;  %v1341_v19 = vcombine.low %v273_v11, %v274_v12  ;;  %v277_v20 = vld [vmem:[%s254_s30 + $0x24] sm:$0xf]  ;;  %v1342_v23 = vcombine.low %v275_v13, %v276_v15  ;;  %452 = vmatprep.subr.bf16.mxu0 %v1474_v1  ;;  %v732_v60 = vshll.u32 %v1369_v54, 16  ;;  %vm799_vm11 = vmpackc.low %vm1622_vm9, %vm1622_vm9  ;;  %s1724_s30 = scalar_lea.vmem %s1904_s5, %s1404_s27 }
  0x15   : > { %v1343_v22 = vcombine.low %v276_v15, %v277_v20  ;;  %1357 = vmatprep.mubr.msk.bf16.mxu0 %vm315_vm0, %v1336_v16  ;;  %v735_v61 = vshrl.u32 %v1369_v54, 16  ;;  %v713_v62 = vsel %vm705_vm8, 65537, %v1474_v1  ;;  %vm800_vm12 = vmpackc.low %vm1627_vm10, %vm1627_vm10  ;;  %v807_v7 = vsel %vm799_vm11, 65537, %v1474_v1 }
  0x16   : > { %308 = vrot.lane.b32.xlu1 %v1341_v19, %s1475_s9  ;;  %v1635_v63 = vrot.slane %v732_v60, 1  ;;  %v1370_v0 = vcombine.low %v712_v56, %v713_v62  ;;  %vm706_vm15 = vmpackc.low %vm682_vm13, %vm682_vm13  ;;  %vm773_vm8 = vcmp.lt.s32.totalorder %v581_v45, 7  ;;  %vm774_vm9 = vcmp.lt.s32.totalorder %v588_v46, 7 }
  0x17   : > { %453 = vmatpush1.bf16.msra.mxu0 %v1445_v24  ;;  %vm707_vm2 = vmpackc.low %vm683_vm14, %vm683_vm14  ;;  %v714_v4 = vsel %vm706_vm15, 65537, %v1474_v1 }
  0x18   : > { %306 = vrot.lane.b32.xlu0 %v1340_v17, %s1475_s9  ;;  %454 = vmatprep.subr.bf16.mxu0 %v1474_v1  ;;  %v737_v2 = vor.u32 %v735_v61, %v1635_v63  ;;  %v739_v3 = vshll.u32 %v1370_v0, 16  ;;  %v715_v6 = vsel %vm707_vm2, 65537, %v1474_v1  ;;  %v743_v10 = vshrl.u32 %v1370_v0, 16  ;;  %vm801_vm5 = vmpackc.low %vm777_vm3, %vm777_vm3  ;;  %v1462_v61 = vld [vmem:[%s1902_s3 + $0x40] sm:$0xff]  }
  0x19   : > { %v1645_v9 = vcombine.low %v714_v4, %v715_v6  ;;  %vm802_vm6 = vmpackc.low %vm778_vm4, %vm778_vm4  ;;  %v809_v13 = vsel %vm801_vm5, 65537, %v1474_v1 }
  0x1a   : > { %310 = vrot.lane.b32.xlu1 %v1342_v23, %s1475_s9  ;;  %v741_v5 = vrot.slane %v739_v3, 1  ;;  %vm797_vm10 = vmpackc.low %vm773_vm8, %vm773_vm8 }
  0x1b   : > { %455 = vmatpush1.bf16.msra.mxu0 %v1446_v25  ;;  %v747_v15 = vshll.u32 %v1645_v9, 16  ;;  %vm798_vm11 = vmpackc.low %vm774_vm9, %vm774_vm9 }
  0x1c   : > { %456 = vmatprep.subr.bf16.mxu0 %v1474_v1  ;;  %v1648_v11 = vsel %vm730_vm1, %v737_v2, %v741_v5 }
  0x1d   : > { %vm763_vm8 = vcmp.ne.s16.totalorder %v1648_v11, 0 }
  0x1f   : > { %457 = vmatpush1.bf16.msra.mxu0 %v1447_v26 }
  0x20   : > { %458 = vmatprep.subr.bf16.mxu0 %v1474_v1 }
  0x23   : > { %459 = vmatpush1.bf16.msra.mxu0 %v1448_v27  ;;  %v1454_v27 = vld [vmem:[%s1902_s3] sm:$0xff]  }
  0x24   : > { %460 = vmatprep.subr.bf16.mxu0 %v1474_v1  ;;  %1125 = vmatpush1.bf16.msra.mxu1 %v1454_v27 }
  0x25   : > { %1126 = vmatprep.subr.bf16.mxu1 %v1474_v1 }
  0x27   : > { %461 = vmatpush1.bf16.msra.mxu0 %v1449_v28  ;;  %v1455_v28 = vld [vmem:[%s1902_s3 + $0x8] sm:$0xff]  }
  0x28   : > { %462 = vmatprep.subr.bf16.mxu0 %v1474_v1  ;;  %1127 = vmatpush1.bf16.msra.mxu1 %v1455_v28 }
  0x29   : > { %1128 = vmatprep.subr.bf16.mxu1 %v1474_v1 }
  0x2b   : > { %463 = vmatpush1.bf16.msra.mxu0 %v1450_v29  ;;  %v1456_v29 = vld [vmem:[%s1902_s3 + $0x10] sm:$0xff]  }
  0x2c   : > { %464 = vmatprep.subr.bf16.mxu0 %v1474_v1  ;;  %1129 = vmatpush1.bf16.msra.mxu1 %v1456_v29 }
  0x2d   : > { %1130 = vmatprep.subr.bf16.mxu1 %v1474_v1 }
  0x2f   : > { %465 = vmatpush1.bf16.msra.mxu0 %v1451_v30  ;;  %v1457_v30 = vld [vmem:[%s1902_s3 + $0x18] sm:$0xff]  }
  0x30   : > { %466 = vmatprep.subr.bf16.mxu0 %v1474_v1  ;;  %1131 = vmatpush1.bf16.msra.mxu1 %v1457_v30  ;;  %v1464_v30 = vld [vmem:[%s1902_s3 + $0x50] sm:$0xff]  }
  0x31   : > { %1132 = vmatprep.subr.bf16.mxu1 %v1474_v1 }
  0x33   : > { %467 = vmatpush1.bf16.msra.mxu0 %v1452_v31  ;;  %v1458_v31 = vld [vmem:[%s1902_s3 + $0x20] sm:$0xff]  }
  0x34   : > { %1133 = vmatpush1.bf16.msra.mxu1 %v1458_v31 }
  0x35   : > { %1134 = vmatprep.subr.bf16.mxu1 %v1474_v1 }
  0x86   : > { %v305_v32 = vpop.permute.xlu0 %304 }
  0x87   : > { %v318_v33 = vsel %vm315_vm0, %v1335_v8, %v305_v32  ;;  %v808_v8 = vsel %vm800_vm12, 65537, %v1474_v1  ;;  %v1459_v32 = vld [vmem:[%s1902_s3 + $0x28] sm:$0xff]   ;;  %vm549_vm12 = vcmask 519168  }
  0x88   : > { %477 = vmatmul.mubr.bf16.vlgmr.msra.gmra.mrb[0].mxu0 %v318_v33  ;;  %v309_v36 = vpop.permute.xlu1 %308  ;;  %v1650_v12 = vcombine.low %v807_v7, %v808_v8  ;;  %1135 = vmatpush1.bf16.msra.mxu1 %v1459_v32  ;;  %v1460_v33 = vld [vmem:[%s1902_s3 + $0x30] sm:$0xff]   ;;  %v1463_v8 = vld [vmem:[%s1902_s3 + $0x48] sm:$0xff]  }
  0x89   : > { %1358 = vmatprep.mubr.msk.bf16.mxu0 %vm315_vm0, %v1337_v14  ;;  %v326_v37 = vsel %vm315_vm0, %v1337_v14, %v309_v36  ;;  %v745_v14 = vor.u32 %v743_v10, %v741_v5  ;;  %1136 = vmatprep.subr.bf16.mxu1 %v1474_v1  ;;  %v576_v36 = vadd.s32 56, %v1598_v41 }
  0x8a   : > { %v307_v34 = vpop.permute.xlu0 %306  ;;  %v834_v19 = vshrl.u32 %v1650_v12, 16  ;;  %v837_v2 = vshll.u32 %v1650_v12, 16 }
  0x8b   : > { %v322_v35 = vsel %vm315_vm0, %v1336_v16, %v307_v34  ;;  %v810_v16 = vsel %vm802_vm6, 65537, %v1474_v1  ;;  %v1461_v34 = vld [vmem:[%s1902_s3 + $0x38] sm:$0xff]   ;;  %v630_v45 = vand.u32 7, %v576_v36 }
  0x8c   : > { %v311_v38 = vpop.permute.xlu1 %310  ;;  %v1375_v17 = vcombine.low %v809_v13, %v810_v16  ;;  %v1664_v24 = vrot.slane %v834_v19, 7  ;;  %1137 = vmatpush1.bf16.msra.mxu1 %v1460_v33  ;;  %v751_v33 = vshrl.u32 %v1645_v9, 16 }
  0x8d   : > { %v330_v39 = vsel %vm315_vm0, %v1338_v18, %v311_v38  ;;  %1138 = vmatprep.subr.bf16.mxu1 %v1474_v1  ;;  %v805_v38 = vsel %vm797_vm10, 65537, %v1474_v1  ;;  %vm1730_vm14 = vcmp.ge.s32.totalorder %v630_v45, 1  ;;  %vm1765_vm4 = vcmp.lt.s32.totalorder %v630_v45, 7  ;;  %v1465_v45 = vld [vmem:[%s1902_s3 + $0x58] sm:$0xff]  }
  0x8e   : > { %v842_v20 = vshrl.u32 %v1375_v17, 16  ;;  %vm709_vm2 = vmpackc.low %vm1730_vm14, %vm1730_vm14 }
  0x8f   : > { %v717_v10 = vsel %vm709_vm2, 65537, %v1474_v1  ;;  %vm804_vm6 = vmpackc.low %vm1765_vm4, %vm1765_vm4 }
  0x90   : > { %485 = vmatmul.mubr.bf16.gmra.mrb[4].mxu0 %v322_v35  ;;  %v1662_v23 = vrot.slane %v842_v20, 7  ;;  %1139 = vmatpush1.bf16.msra.mxu1 %v1461_v34  ;;  %v575_v35 = vadd.s32 48, %v1598_v41  ;;  %v839_v20 = vor.u32 %v837_v2, %v1664_v24 }
  0x91   : > { %1359 = vmatprep.mubr.msk.bf16.mxu0 %vm315_vm0, %v1338_v18  ;;  %v1655_v18 = vrot.slane %v747_v15, 1  ;;  %1140 = vmatprep.subr.bf16.mxu1 %v1474_v1 }
  0x92   : > { %v623_v43 = vand.u32 7, %v575_v35 }
  0x93   : > { %v1660_v21 = vsel %vm730_vm1, %v745_v14, %v1655_v18 }
  0x94   : > { %vm1726_vm13 = vcmp.ge.s32.totalorder %v623_v43, 1  ;;  %vm1751_vm3 = vcmp.lt.s32.totalorder %v623_v43, 7  ;;  %1141 = vmatpush1.bf16.msra.mxu1 %v1462_v61 }
  0x95   : > { %vm708_vm15 = vmpackc.low %vm1726_vm13, %vm1726_vm13  ;;  %1142 = vmatprep.subr.bf16.mxu1 %v1474_v1  ;;  %vm913_vm13 = vcmask 1046528  }
  0x96   : > { %v716_v3 = vsel %vm708_vm15, 65537, %v1474_v1  ;;  %vm803_vm5 = vmpackc.low %vm1751_vm3, %vm1751_vm3 }
  0x97   : > { %v1773_v16 = vcombine.low %v716_v3, %v717_v10  ;;  %v811_v11 = vsel %vm803_vm5, 65537, %v1474_v1 }
  0x98   : > { %493 = vmatmul.mubr.bf16.gmra.mrb[8].mxu0 %v326_v37  ;;  %v1712_v37 = vld [vmem:[%s1901_s2] ss:$0 sm:$0xff]  ;;  %1143 = vmatpush1.bf16.msra.mxu1 %v1463_v8 }
  0x99   : > { %1360 = vmatprep.mubr.msk.bf16.mxu0 %vm315_vm0, %v1343_v22  ;;  %v845_v22 = vshll.u32 %v1375_v17, 16  ;;  %1144 = vmatprep.subr.bf16.mxu1 %v1474_v1  ;;  %v755_v34 = vshll.u32 %v1773_v16, 16 }
  0x9b   : > { %v847_v25 = vor.u32 %v845_v22, %v1662_v23 }
  0x9c   : > { %1145 = vmatpush1.bf16.msra.mxu1 %v1464_v30 }
  0x9d   : > { %v1669_v26 = vsel %vm825_vm7, %v1664_v24, %v847_v25  ;;  %v812_v24 = vsel %vm804_vm6, 65537, %v1474_v1  ;;  %1146 = vmatprep.subr.bf16.mxu1 %v1474_v1 }
  0x9e   : > { %v1376_v43 = vcombine.low %v811_v11, %v812_v24  ;;  %vm859_vm14 = vcmp.ne.s16.totalorder %v1669_v26, 0 }
  0xa0   : > { %501 = vmatmul.mubr.bf16.gmra.mrb[12].mxu0 %v330_v39  ;;  %v806_v39 = vsel %vm798_vm11, 65537, %v1474_v1  ;;  %1147 = vmatpush1.bf16.msra.mxu1 %v1465_v45  ;;  %vm764_vm11 = vcmp.ne.s16.totalorder %v1660_v21, 0 }
  0xa1   : > { %v1373_v47 = vcombine.low %v805_v38, %v806_v39 }
  0xa3   : > { %v827_v54 = vshrl.u32 %v1373_v47, 16  ;;  %v830_v60 = vshll.u32 %v1373_v47, 16  ;;  %v757_v47 = vrot.slane %v755_v34, 1 }
  0xa5   : > { %v829_v0 = vrot.slane %v827_v54, 7 }
  0xa7   : > { %v832_v15 = vor.u32 %v830_v60, %v829_v0 }
  0xa9   : > { %vm857_vm9 = vcmp.ne.s16.totalorder %v832_v15, 0 }
 0x15b   : > { %v478_v40 = vpop.f32.mrb[0].mxu0 }
 0x15c   : > { %v479_v42 = vadd.f32 %v1712_v37, %v478_v40  ;;  %v480_v44 = vpop.f32.mrb[1].mxu0  ;;  %v840_v40 = vsel %vm825_vm7, %v829_v0, %v839_v20 }
 0x15d   : > { %v481_v46 = vpop.f32.mrb[2].mxu0  ;;  %vm858_vm10 = vcmp.ne.s16.totalorder %v840_v40, 0 }
 0x15e   : > { %v509_v48 = vmax.f32 %v479_v42, 0.0  ;;  %v482_v41 = vadd.f32 %v1712_v37, %v481_v46  ;;  %v483_v49 = vpop.f32.mrb[3].mxu0  ;;  %v753_v46 = vor.u32 %v751_v33, %v1655_v18 }
 0x160   : > { %v1406_v51 = vpack.c.bf16 %v509_v48, %v509_v48  ;;  %v510_v52 = vmax.f32 %v482_v41, 0.0  ;;  %v758_v21 = vsel %vm730_vm1, %v753_v46, %v757_v47 }
 0x161   : > { %vm765_vm15 = vcmp.ne.s16.totalorder %v758_v21, 0 }
 0x162   : > { %550 = vst.msk [vmem:[%s1724_s30] sm:$0xf] %vm549_vm12, %v1406_v51  ;;  %v517_v55 = vpack.c.bf16 %v510_v52, %v509_v48  ;;  %v1407_v56 = vpack.c.bf16 %v510_v52, %v510_v52  ;;  %v850_v51 = vshrl.u32 %v1376_v43, 16 }
 0x163   : > { %v486_v57 = vpop.f32.mrb[4].mxu0 }
 0x164   : > { %551 = vst.msk [vmem:[%s1724_s30 + $0x4] sm:$0xf] %vm549_vm12, %v1407_v56  ;;  %v487_v58 = vadd.f32 %v1712_v37, %v486_v57  ;;  %v488_v59 = vpop.f32.mrb[5].mxu0  ;;  %v852_v4 = vrot.slane %v850_v51, 7 }
 0x165   : > { %564 = vst.msk [vmem:[#allocation2 + $0x8] sm:$0xff] %vm315_vm0, %v517_v55  ;;  %v489_v62 = vpop.f32.mrb[6].mxu0 }
 0x166   : > { %v511_v5 = vmax.f32 %v487_v58, 0.0  ;;  %v490_v6 = vadd.f32 %v1712_v37, %v489_v62  ;;  %v491_v7 = vpop.f32.mrb[7].mxu0  ;;  %vm861_vm2 = vcmp.ne.s16.totalorder %v852_v4, 0 }
 0x168   : > { %v1408_v13 = vpack.c.bf16 %v511_v5, %v511_v5  ;;  %v512_v14 = vmax.f32 %v490_v6, 0.0 }
 0x16a   : > { %552 = vst.msk [vmem:[%s1724_s30 + $0x8] sm:$0xf] %vm549_vm12, %v1408_v13  ;;  %v518_v17 = vpack.c.bf16 %v512_v14, %v511_v5  ;;  %v1409_v19 = vpack.c.bf16 %v512_v14, %v512_v14  ;;  %v853_v5 = vshll.u32 %v1376_v43, 16 }
 0x16b   : > { %v494_v22 = vpop.f32.mrb[8].mxu0 }
 0x16c   : > { %v674_v25 = vld [vmem:[#allocation2 + $0x8] sm:$0xff]  ;;  %553 = vst.msk [vmem:[%s1724_s30 + $0xc] sm:$0xf] %vm549_vm12, %v1409_v19  ;;  %v495_v27 = vadd.f32 %v1712_v37, %v494_v22  ;;  %v496_v28 = vpop.f32.mrb[9].mxu0  ;;  %v855_v20 = vor.u32 %v853_v5, %v852_v4 }
 0x16d   : > { %565 = vst.msk [vmem:[#allocation2 + $0x10] sm:$0xff] %vm315_vm0, %v518_v17  ;;  %v868_v29 = vshll.u32 %v674_v25, 16  ;;  %v497_v31 = vpop.f32.mrb[10].mxu0  ;;  %v1802_v32 = vsel %vm763_vm8, %v674_v25, 0  ;;  %v862_v9 = vsel %vm857_vm9, %v674_v25, 0  ;;  %v871_v52 = vshrl.u32 %v674_v25, 16 }
 0x16e   : > { %v513_v35 = vmax.f32 %v495_v27, 0.0  ;;  %v498_v36 = vadd.f32 %v1712_v37, %v497_v31  ;;  %v499_v38 = vpop.f32.mrb[11].mxu0  ;;  %v914_v50 = vrot.slane %v862_v9, 1  ;;  %v772_v31 = vld [vmem:[#allocation2 + $0x28] sm:$0x1]  ;;  %v856_v34 = vsel %vm825_vm7, %v1662_v23, %v855_v20 }
 0x16f   : > { %v870_v39 = vrot.slane %v868_v29, 1  ;;  %v866_v38 = vsel %vm861_vm2, %v772_v31, 0  ;;  %vm860_vm4 = vcmp.ne.s16.totalorder %v856_v34, 0 }
 0x170   : > { %v1410_v42 = vpack.c.bf16 %v513_v35, %v513_v35  ;;  %v514_v44 = vmax.f32 %v498_v36, 0.0  ;;  %v980_v3 = vshrl.u32 %v914_v50, 16  ;;  %v921_v46 = vrot.slane %v866_v38, 1 }
 0x171   : > { %898 = vrot.lane.b32.xlu1 %v870_v39, %s1475_s9  ;;  %v873_v59 = vor.u32 %v871_v52, %v870_v39 }
 0x172   : > { %554 = vst.msk [vmem:[%s1724_s30 + $0x10] sm:$0xf] %vm549_vm12, %v1410_v42  ;;  %v519_v48 = vpack.c.bf16 %v514_v44, %v513_v35  ;;  %v1411_v41 = vpack.c.bf16 %v514_v44, %v514_v44  ;;  %v982_v17 = vrot.slane %v980_v3, 7 }
 0x173   : > { %v502_v1 = vpop.f32.mrb[12].mxu0 }
 0x174   : > { %v675_v49 = vld [vmem:[#allocation2 + $0x10] sm:$0xff]  ;;  %555 = vst.msk [vmem:[%s1724_s30 + $0x14] sm:$0xf] %vm549_vm12, %v1411_v41  ;;  %v503_v18 = vadd.f32 %v1712_v37, %v502_v1  ;;  %v504_v53 = vpop.f32.mrb[13].mxu0 }
 0x175   : > { %566 = vst.msk [vmem:[#allocation2 + $0x18] sm:$0xff] %vm315_vm0, %v519_v48  ;;  %v875_v54 = vshll.u32 %v675_v49, 16  ;;  %v863_v55 = vsel %vm858_vm10, %v675_v49, 0  ;;  %v505_v56 = vpop.f32.mrb[14].mxu0  ;;  %v1822_v58 = vsel %vm764_vm11, %v675_v49, 0  ;;  %v879_v27 = vshrl.u32 %v675_v49, 16 }
 0x176   : > { %v915_v57 = vrot.slane %v863_v55, 1  ;;  %v515_v60 = vmax.f32 %v503_v18, 0.0  ;;  %v506_v61 = vadd.f32 %v1712_v37, %v505_v56  ;;  %v507_v62 = vpop.f32.mrb[15].mxu0  ;;  %v759_v37 = vshrl.u32 %v1773_v16, 16 }
 0x177   : > { %v877_v0 = vrot.slane %v875_v54, 1 }
 0x178   : > { %v916_v2 = vsel %vm913_vm13, %v914_v50, %v915_v57  ;;  %v1412_v6 = vpack.c.bf16 %v515_v60, %v515_v60  ;;  %v516_v7 = vmax.f32 %v506_v61, 0.0  ;;  %v761_v29 = vor.u32 %v759_v37, %v757_v47 }
 0x179   : > { %v878_v8 = vsel %vm730_vm1, %v873_v59, %v877_v0  ;;  %v984_v10 = vshrl.u32 %v916_v2, 16  ;;  %v987_v15 = vshll.u32 %v916_v2, 16  ;;  %v881_v11 = vor.u32 %v879_v27, %v877_v0  ;;  %v673_v0 = vld [vmem:[#allocation2] sm:$0x80] }
 0x17a   : > { %900 = vrot.lane.b32.xlu0 %v878_v8, %s1475_s9  ;;  %556 = vst.msk [vmem:[%s1724_s30 + $0x18] sm:$0xf] %vm549_vm12, %v1412_v6  ;;  %v520_v12 = vpack.c.bf16 %v516_v7, %v515_v60  ;;  %v1413_v13 = vpack.c.bf16 %v516_v7, %v516_v7  ;;  %vm766_vm3 = vcmp.ne.s16.totalorder %v761_v29, 0 }
 0x17b   : > { %v986_v14 = vrot.slane %v984_v10, 7 }
 0x17c   : > { %v676_v19 = vld [vmem:[#allocation2 + $0x18] sm:$0xff]  ;;  %557 = vst.msk [vmem:[%s1724_s30 + $0x1c] sm:$0xf] %vm549_vm12, %v1413_v13 }
 0x17d   : > { %567 = vst.msk [vmem:[#allocation2 + $0x20] sm:$0xff] %vm315_vm0, %v520_v12  ;;  %v989_v22 = vor.u32 %v987_v15, %v986_v14  ;;  %v864_v25 = vsel %vm859_vm14, %v676_v19, 0  ;;  %v883_v26 = vshll.u32 %v676_v19, 16  ;;  %v1837_v16 = vsel %vm765_vm15, %v676_v19, 0 }
 0x17e   : > { %v917_v28 = vrot.slane %v864_v25, 1  ;;  %v887_v42 = vshrl.u32 %v676_v19, 16 }
 0x17f   : > { %v990_v30 = vsel %vm825_vm7, %v982_v17, %v989_v22  ;;  %v885_v24 = vrot.slane %v883_v26, 1 }
 0x180   : > { %1390 = vmatprep.mubr.msk.bf16.mxu1 %vm315_vm0, %v990_v30  ;;  %v918_v33 = vsel %vm913_vm13, %v915_v57, %v917_v28 }
 0x181   : > { %v886_v35 = vsel %vm730_vm1, %v881_v11, %v885_v24  ;;  %v999_v36 = vshrl.u32 %v918_v33, 16  ;;  %v1002_v40 = vshll.u32 %v918_v33, 16  ;;  %v889_v47 = vor.u32 %v887_v42, %v885_v24 }
 0x182   : > { %902 = vrot.lane.b32.xlu0 %v886_v35, %s1475_s9 }
 0x183   : > { %v1001_v39 = vrot.slane %v999_v36, 7  ;;  %v1377_v36 = vld [vmem:[%s1903_s4] ss:$0 sm:$0xff] }
 0x184   : > { %v677_v43 = vld [vmem:[#allocation2 + $0x20] sm:$0xff] }
 0x185   : > { %v891_v44 = vshll.u32 %v677_v43, 16  ;;  %v1004_v9 = vor.u32 %v1002_v40, %v1001_v39  ;;  %v771_v45 = vsel %vm766_vm3, %v677_v43, 0  ;;  %v865_v48 = vsel %vm860_vm4, %v677_v43, 0 }
 0x186   : > { %v895_v23 = vshrl.u32 %v677_v43, 16  ;;  %v919_v49 = vrot.slane %v865_v48, 1 }
 0x187   : > { %v893_v41 = vrot.slane %v891_v44, 1  ;;  %v1005_v1 = vsel %vm825_vm7, %v986_v14, %v1004_v9 }
 0x188   : > { %v920_v52 = vsel %vm913_vm13, %v917_v28, %v919_v49  ;;  %v922_v18 = vsel %vm913_vm13, %v919_v49, %v921_v46 }
 0x189   : > { %v894_v50 = vsel %vm730_vm1, %v889_v47, %v893_v41  ;;  %v897_v51 = vor.u32 %v895_v23, %v893_v41  ;;  %v1014_v53 = vshrl.u32 %v920_v52, 16  ;;  %v1029_v54 = vshrl.u32 %v922_v18, 16 }
 0x18a   : > { %904 = vrot.lane.b32.xlu1 %v894_v50, %s1475_s9  ;;  %v1017_v56 = vshll.u32 %v920_v52, 16  ;;  %v1032_v21 = vshll.u32 %v922_v18, 16  ;;  %vm762_vm1 = vcmp.ne.s16.totalorder %v1635_v63, 0 }
 0x18b   : > { %906 = vrot.lane.b32.xlu0 %v897_v51, %s1475_s9  ;;  %v1016_v55 = vrot.slane %v1014_v53, 7  ;;  %v1031_v57 = vrot.slane %v1029_v54, 7  ;;  %v767_v2 = vsel %vm762_vm1, %v673_v0, 0 }
 0x18d   : > { %v1019_v59 = vor.u32 %v1017_v56, %v1016_v55  ;;  %v1034_v60 = vor.u32 %v1032_v21, %v1031_v57 }
 0x18f   : > { %v1020_v61 = vsel %vm825_vm7, %v1001_v39, %v1019_v59  ;;  %v1035_v62 = vsel %vm825_vm7, %v1016_v55, %v1034_v60 }
 0x1e3   : > { %v899_v3 = vpop.permute.xlu1 %898 }
 0x1e4   : > { %v925_v4 = vsel %vm315_vm0, %v767_v2, %v899_v3 }
 0x1e5   : > { %v969_v7 = vshrl.u32 %v925_v4, 16 }
 0x1e7   : > { %v971_v12 = vrot.slane %v969_v7, 7 }
 0x1ec   : > { %v901_v5 = vpop.permute.xlu0 %900 }
 0x1ed   : > { %v928_v6 = vsel %vm315_vm0, %v1802_v32, %v901_v5 }
 0x1ee   : > { %v972_v8 = vshrl.u32 %v928_v6, 16  ;;  %v975_v37 = vshll.u32 %v928_v6, 16 }
 0x1f0   : > { %v974_v10 = vrot.slane %v972_v8, 7 }
 0x1f2   : > { %v977_v13 = vor.u32 %v975_v37, %v974_v10 }
 0x1f4   : > { %v903_v14 = vpop.permute.xlu0 %902  ;;  %v978_v15 = vsel %vm825_vm7, %v971_v12, %v977_v13 }
 0x1f5   : > { %v931_v63 = vsel %vm315_vm0, %v1822_v58, %v903_v14  ;;  %1157 = vmatmul.mubr.bf16.vlgmr.msra.gmra.mrb[0].mxu1 %v978_v15 }
 0x1f6   : > { %v991_v17 = vshrl.u32 %v931_v63, 16  ;;  %1391 = vmatprep.mubr.msk.bf16.mxu1 %vm315_vm0, %v1005_v1  ;;  %v994_v20 = vshll.u32 %v931_v63, 16 }
 0x1f8   : > { %v993_v19 = vrot.slane %v991_v17, 7 }
 0x1fa   : > { %v996_v22 = vor.u32 %v994_v20, %v993_v19 }
 0x1fc   : > { %v905_v32 = vpop.permute.xlu1 %904  ;;  %v997_v25 = vsel %vm825_vm7, %v974_v10, %v996_v22 }
 0x1fd   : > { %v934_v27 = vsel %vm315_vm0, %v1837_v16, %v905_v32  ;;  %v907_v26 = vpop.permute.xlu0 %906  ;;  %1165 = vmatmul.mubr.bf16.gmra.mrb[4].mxu1 %v997_v25 }
 0x1fe   : > { %v1006_v28 = vshrl.u32 %v934_v27, 16  ;;  %v937_v29 = vsel %vm315_vm0, %v771_v45, %v907_v26  ;;  %1392 = vmatprep.mubr.msk.bf16.mxu1 %vm315_vm0, %v1020_v61  ;;  %v1009_v11 = vshll.u32 %v934_v27, 16 }
 0x1ff   : > { %v1021_v58 = vshrl.u32 %v937_v29, 16  ;;  %v1024_v31 = vshll.u32 %v937_v29, 16 }
 0x200   : > { %v1008_v30 = vrot.slane %v1006_v28, 7 }
 0x201   : > { %v1023_v24 = vrot.slane %v1021_v58, 7 }
 0x202   : > { %v1011_v33 = vor.u32 %v1009_v11, %v1008_v30 }
 0x203   : > { %v1026_v34 = vor.u32 %v1024_v31, %v1023_v24 }
 0x204   : > { %v1012_v35 = vsel %vm825_vm7, %v993_v19, %v1011_v33 }
 0x205   : > { %1173 = vmatmul.mubr.bf16.gmra.mrb[8].mxu1 %v1012_v35  ;;  %v1027_v16 = vsel %vm825_vm7, %v1008_v30, %v1026_v34 }
 0x206   : > { %1393 = vmatprep.mubr.msk.bf16.mxu1 %vm315_vm0, %v1035_v62 }
 0x20d   : > { %1181 = vmatmul.mubr.bf16.gmra.mrb[12].mxu1 %v1027_v16 }
 0x2c8   : > { %v1158_v38 = vpop.f32.mrb[0].mxu1 }
 0x2c9   : > { %v1159_v39 = vadd.f32 %v1377_v36, %v1158_v38  ;;  %v1160_v40 = vpop.f32.mrb[1].mxu1 }
 0x2ca   : > { %v1161_v43 = vpop.f32.mrb[2].mxu1 }
 0x2cb   : > { %v1189_v42 = vmax.f32 %v1159_v39, 0.0  ;;  %v1162_v44 = vadd.f32 %v1377_v36, %v1161_v43  ;;  %v1163_v9 = vpop.f32.mrb[3].mxu1 }
 0x2cd   : > { %v1414_v45 = vpack.c.bf16 %v1189_v42, %v1189_v42  ;;  %v1190_v46 = vmax.f32 %v1162_v44, 0.0 }
 0x2cf   : > { %1229 = vst.msk [vmem:[%s1878_s19] sm:$0xf] %vm549_vm12, %v1414_v45  ;;  %v1415_v47 = vpack.c.bf16 %v1190_v46, %v1190_v46 }
 0x2d0   : > { %v1166_v48 = vpop.f32.mrb[4].mxu1 }
 0x2d1   : > { %1230 = vst.msk [vmem:[%s1878_s19 + $0x4] sm:$0xf] %vm549_vm12, %v1415_v47  ;;  %v1167_v41 = vadd.f32 %v1377_v36, %v1166_v48  ;;  %v1168_v23 = vpop.f32.mrb[5].mxu1 }
 0x2d2   : > { %v1169_v1 = vpop.f32.mrb[6].mxu1 }
 0x2d3   : > { %v1191_v49 = vmax.f32 %v1167_v41, 0.0  ;;  %v1170_v50 = vadd.f32 %v1377_v36, %v1169_v1  ;;  %v1171_v51 = vpop.f32.mrb[7].mxu1 }
 0x2d5   : > { %v1416_v52 = vpack.c.bf16 %v1191_v49, %v1191_v49  ;;  %v1192_v18 = vmax.f32 %v1170_v50, 0.0 }
 0x2d7   : > { %1231 = vst.msk [vmem:[%s1878_s19 + $0x8] sm:$0xf] %vm549_vm12, %v1416_v52  ;;  %v1417_v53 = vpack.c.bf16 %v1192_v18, %v1192_v18 }
 0x2d8   : > { %v1174_v54 = vpop.f32.mrb[8].mxu1 }
 0x2d9   : > { %1232 = vst.msk [vmem:[%s1878_s19 + $0xc] sm:$0xf] %vm549_vm12, %v1417_v53  ;;  %v1175_v55 = vadd.f32 %v1377_v36, %v1174_v54  ;;  %v1176_v56 = vpop.f32.mrb[9].mxu1 }
 0x2da   : > { %v1177_v57 = vpop.f32.mrb[10].mxu1 }
 0x2db   : > { %v1193_v21 = vmax.f32 %v1175_v55, 0.0  ;;  %v1178_v59 = vadd.f32 %v1377_v36, %v1177_v57  ;;  %v1179_v60 = vpop.f32.mrb[11].mxu1 }
 0x2dd   : > { %v1418_v61 = vpack.c.bf16 %v1193_v21, %v1193_v21  ;;  %v1194_v62 = vmax.f32 %v1178_v59, 0.0 }
 0x2df   : > { %1233 = vst.msk [vmem:[%s1878_s19 + $0x10] sm:$0xf] %vm549_vm12, %v1418_v61  ;;  %v1419_v0 = vpack.c.bf16 %v1194_v62, %v1194_v62 }
 0x2e0   : > { %v1182_v2 = vpop.f32.mrb[12].mxu1 }
 0x2e1   : > { %1234 = vst.msk [vmem:[%s1878_s19 + $0x14] sm:$0xf] %vm549_vm12, %v1419_v0  ;;  %v1183_v3 = vadd.f32 %v1377_v36, %v1182_v2  ;;  %v1184_v4 = vpop.f32.mrb[13].mxu1 }
 0x2e2   : > { %v1185_v5 = vpop.f32.mrb[14].mxu1 }
 0x2e3   : > { %v1195_v6 = vmax.f32 %v1183_v3, 0.0  ;;  %v1186_v7 = vadd.f32 %v1377_v36, %v1185_v5  ;;  %v1187_v8 = vpop.f32.mrb[15].mxu1 }
 0x2e5   : > { %v1420_v10 = vpack.c.bf16 %v1195_v6, %v1195_v6  ;;  %v1196_v37 = vmax.f32 %v1186_v7, 0.0 }
 0x2e7   : > { %1235 = vst.msk [vmem:[%s1878_s19 + $0x18] sm:$0xf] %vm549_vm12, %v1420_v10  ;;  %v1421_v12 = vpack.c.bf16 %v1196_v37, %v1196_v37 }
 0x2e9   : > { %1236 = vst.msk [vmem:[%s1878_s19 + $0x1c] sm:$0xf] %vm549_vm12, %v1421_v12 }
 0x2ea PF: > { %s17_s21 = sadd.s32 1, %s1472_s21  }
 0x2eb   : > { %p14_p4 = scmp.ge.s32.totalorder %s17_s21, 4  }
 0x2ed   :  { %16 = sbr.rel (!%p14_p4) target bundleno = 1 (0x1), region = 82 }

// kernel: rrs_1d_forward.11
= control target key start
LH: loop header
LB: loop body
LE: loop exit
PB: predicated region body
PF: predicated region fallthrough
CT: control target
= control target key end

     0   :  { %s931_s21 = smov 0   ;;  %s1094_s0 = inlined_call_operand.vmem [shape: bf16[2,32,64], index: 0, kind: input, shape index: {}]   ;;  %s1095_s1 = inlined_call_operand.vmem [shape: bf16[192,64], index: 1, kind: input, shape index: {}]   ;;  %s1096_s2 = inlined_call_operand.vmem [shape: f32[1,64], index: 2, kind: input, shape index: {}]   ;;  %s1097_s3 = inlined_call_operand.vmem [shape: bf16[192,64], index: 3, kind: input, shape index: {}]   ;;  %s1098_s4 = inlined_call_operand.vmem [shape: f32[1,64], index: 4, kind: input, shape index: {}]   ;;  %s1099_s5 = inlined_call_operand.vmem [shape: bf16[2,16,64], index: 5, kind: output, shape index: {0}]   ;;  %s1100_s6 = inlined_call_operand.vmem [shape: bf16[2,16,64], index: 6, kind: output, shape index: {1}]  }
   0x1 LB: > { %s792_s22 = sadd.s32 4294967295, %s892_s21   ;;  %p796_p0 = scmp.ge.s32.totalorder %s892_s21, 1  ;;  %s892_s21 = sphi %s931_s21, %s17_s21  }
   0x2   : > { %p215_p1 = scmp.lt.s32.totalorder %s892_s21, 3 }
   0x4   : > { %p216_p2 = pnand %p796_p0, %p215_p1 }
   0x5   : > { %p250_p3 = scmp.lt.s32.totalorder (!%p216_p2), %s792_s22, 1  ;;  %v861_v0 = vld [vmem:[%s1095_s1] sm:$0xff] (!%p216_p2)   ;;  %v894_v1 = vmov (!%p216_p2), 0   ;;  %v862_v2 = vld [vmem:[%s1095_s1 + $0x8] sm:$0xff] (!%p216_p2)   ;;  %vm285_vm0 = vcmask (!%p216_p2), 523264   ;;  %v863_v3 = vld [vmem:[%s1095_s1 + $0x10] sm:$0xff] (!%p216_p2)   ;;  %v454_v22 = vlaneseq (!%p216_p2) }
   0x6   : > { %219 = sbr.rel (%p216_p2) target bundleno = 706 (0x2c2), region = 40  ;;  %396 = vmatprep.subr.bf16.mxu0 (!%p216_p2), %v894_v1  ;;  %651 = vmatprep.subr.bf16.mxu1 (!%p216_p2), %v894_v1  ;;  %452 = vst.msk [vmem:[#allocation2 + $0x10] sm:$0xff] (!%p216_p2), %vm285_vm0, %v894_v1  ;;  %450 = vst.msk [vmem:[#allocation2] sm:$0xff] (!%p216_p2), %vm285_vm0, %v894_v1  ;;  %s895_s9 = smov (!%p216_p2), 64   ;;  %v864_v9 = vld [vmem:[%s1095_s1 + $0x18] sm:$0xff] (!%p216_p2)   ;;  %v865_v10 = vld [vmem:[%s1095_s1 + $0x20] sm:$0xff] (!%p216_p2)  }
   0x7   : > { %397 = vmatpush1.bf16.msra.mxu0 (!%p216_p2), %v861_v0  ;;  %451 = vst.msk [vmem:[#allocation2 + $0x8] sm:$0xff] (!%p216_p2), %vm285_vm0, %v894_v1  ;;  %v866_v13 = vld [vmem:[%s1095_s1 + $0x28] sm:$0xff] (!%p216_p2)   ;;  %v867_v14 = vld [vmem:[%s1095_s1 + $0x30] sm:$0xff] (!%p216_p2)   ;;  %v868_v15 = vld [vmem:[%s1095_s1 + $0x38] sm:$0xff] (!%p216_p2)   ;;  %v455_v23 = vshrl.u32 (!%p216_p2), %v454_v22, 7  ;;  %vm447_vm9 = vcmask (!%p216_p2), 519168  }
   0x8   : > { %398 = vmatprep.subr.bf16.mxu0 (!%p216_p2), %v894_v1  ;;  %v869_v16 = vld [vmem:[%s1095_s1 + $0x40] sm:$0xff] (!%p216_p2)   ;;  %v870_v17 = vld [vmem:[%s1095_s1 + $0x48] sm:$0xff] (!%p216_p2)   ;;  %v871_v18 = vld [vmem:[%s1095_s1 + $0x50] sm:$0xff] (!%p216_p2)   ;;  %vm526_vm11 = vcmask (!%p216_p2), 1045504   ;;  %vm568_vm12 = vcmask (!%p216_p2), 1040384  }
   0x9   : > { %v872_v19 = vld [vmem:[%s1095_s1 + $0x58] sm:$0xff] (!%p216_p2)   ;;  %v456_v24 = vadd.s32 (!%p216_p2), 8, %v455_v23  ;;  %v461_v25 = vand.u32 (!%p216_p2), 3, %v455_v23  ;;  %v874_v30 = vld [vmem:[%s1097_s3] sm:$0xff] (!%p216_p2)   ;;  %v875_v31 = vld [vmem:[%s1097_s3 + $0x8] sm:$0xff] (!%p216_p2)  }
   0xa   : > { %652 = vmatpush1.bf16.msra.mxu1 (!%p216_p2), %v874_v30  ;;  %v876_v32 = vld [vmem:[%s1097_s3 + $0x10] sm:$0xff] (!%p216_p2)   ;;  %v877_v33 = vld [vmem:[%s1097_s3 + $0x18] sm:$0xff] (!%p216_p2)   ;;  %v878_v34 = vld [vmem:[%s1097_s3 + $0x20] sm:$0xff] (!%p216_p2)  }
   0xb   : > { %399 = vmatpush1.bf16.msra.mxu0 (!%p216_p2), %v862_v2  ;;  %v468_v26 = vand.u32 (!%p216_p2), 3, %v456_v24  ;;  %vm483_vm1 = vcmp.ge.s32.totalorder (!%p216_p2), %v461_v25, 2  ;;  %653 = vmatprep.subr.bf16.mxu1 (!%p216_p2), %v894_v1  ;;  %v879_v35 = vld [vmem:[%s1097_s3 + $0x28] sm:$0xff] (!%p216_p2)   ;;  %v880_v36 = vld [vmem:[%s1097_s3 + $0x30] sm:$0xff] (!%p216_p2)   ;;  %v881_v37 = vld [vmem:[%s1097_s3 + $0x38] sm:$0xff] (!%p216_p2)   ;;  %vm503_vm5 = vcmp.lt.s32.totalorder (!%p216_p2), %v461_v25, 2 }
   0xc   : > { %400 = vmatprep.subr.bf16.mxu0 (!%p216_p2), %v894_v1  ;;  %vm489_vm3 = vmpackc.low (!%p216_p2), %vm483_vm1, %vm483_vm1  ;;  %v882_v38 = vld [vmem:[%s1097_s3 + $0x40] sm:$0xff] (!%p216_p2)   ;;  %v883_v39 = vld [vmem:[%s1097_s3 + $0x48] sm:$0xff] (!%p216_p2)  }
   0xd   : > { %s1102_s22 = smov (!%p250_p3, %s792_s22), 1  ;;  %vm484_vm2 = vcmp.ge.s32.totalorder %v468_v26, 2  ;;  %v1004_v27 = vsel %vm489_vm3, 65537, %v894_v1  ;;  %v884_v40 = vld [vmem:[%s1097_s3 + $0x50] sm:$0xff]   ;;  %vm504_vm6 = vcmp.lt.s32.totalorder %v468_v26, 2  ;;  %vm509_vm7 = vmpackc.low %vm503_vm5, %vm503_vm5  ;;  %v885_v54 = vld [vmem:[%s1097_s3 + $0x58] sm:$0xff]  }
   0xe   : > { %s842_s27 = sshll.u32 %s1102_s22, 4  ;;  %vm490_vm4 = vmpackc.low %vm484_vm2, %vm484_vm2  ;;  %654 = vmatpush1.bf16.msra.mxu1 %v875_v31  ;;  %v806_v41 = vld [vmem:[%s1096_s2] ss:$0 sm:$0xff]  ;;  %v511_v42 = vsel %vm509_vm7, 65537, %v894_v1  ;;  %s843_s10 = sshll.u32 %s1102_s22, 3 }
   0xf   : > { %s254_s30 = scalar_lea.vmem %s1094_s0, %s842_s27  ;;  %401 = vmatpush1.bf16.msra.mxu0 %v863_v3  ;;  %v1007_v28 = vsel %vm490_vm4, 65537, %v894_v1  ;;  %655 = vmatprep.subr.bf16.mxu1 %v894_v1  ;;  %vm510_vm8 = vmpackc.low %vm504_vm6, %vm504_vm6  ;;  %s259_s13 = scalar_lea.vmem %s1099_s5, %s843_s10  ;;  %v502_v58 = vld [vmem:[#allocation2 + $0x10] sm:$0x1] }
  0x10   : > { %v269_v4 = vld [vmem:[%s254_s30 + $0x4] sm:$0xf]  ;;  %v270_v5 = vld [vmem:[%s254_s30 + $0x8] sm:$0xf]  ;;  %v268_v6 = vld [vmem:[%s254_s30] sm:$0xf]  ;;  %402 = vmatprep.subr.bf16.mxu0 %v894_v1  ;;  %v822_v29 = vcombine.low %v1004_v27, %v1007_v28  ;;  %s264_s19 = scalar_lea.vmem %s1100_s6, %s843_s10 }
  0x11   : > { %v804_v7 = vcombine.low %v269_v4, %v270_v5  ;;  %v803_v8 = vcombine.low %v268_v6, %v269_v4  ;;  %v271_v11 = vld [vmem:[%s254_s30 + $0xc] sm:$0xf]  ;;  %v512_v43 = vsel %vm510_vm8, 65537, %v894_v1 }
  0x12   : > { %v805_v12 = vcombine.low %v270_v5, %v271_v11  ;;  %656 = vmatpush1.bf16.msra.mxu1 %v876_v32  ;;  %v823_v48 = vcombine.low %v511_v42, %v512_v43  ;;  %v496_v6 = vrot.slane %v822_v29, 1 }
  0x13   : > { %280 = vrot.lane.b32.xlu0 %v804_v7, %s895_s9  ;;  %403 = vmatpush1.bf16.msra.mxu0 %v864_v9  ;;  %v481_v7 = vld [vmem:[#allocation2] sm:$0x80] }
  0x14   : > { %404 = vmatprep.subr.bf16.mxu0 %v894_v1  ;;  %819 = vmatprep.mubr.msk.bf16.mxu0 %vm285_vm0, %v805_v12  ;;  %v516_v55 = vrot.slane %v823_v48, 7  ;;  %vm497_vm13 = vcmp.ne.s16.totalorder %v496_v6, 0 }
  0x15   : > { %657 = vmatprep.subr.bf16.mxu1 %v894_v1  ;;  %v498_v9 = vsel %vm497_vm13, %v481_v7, 0 }
  0x16   : > { %658 = vmatpush1.bf16.msra.mxu1 %v877_v33  ;;  %vm517_vm10 = vcmp.ne.s16.totalorder %v516_v55, 0 }
  0x17   : > { %405 = vmatpush1.bf16.msra.mxu0 %v865_v10  ;;  %659 = vmatprep.subr.bf16.mxu1 %v894_v1  ;;  %v519_v59 = vsel %vm517_vm10, %v502_v58, 0 }
  0x18   : > { %406 = vmatprep.subr.bf16.mxu0 %v894_v1  ;;  %v528_v62 = vrot.slane %v519_v59, 2 }
  0x1a   : > { %660 = vmatpush1.bf16.msra.mxu1 %v878_v34 }
  0x1b   : > { %407 = vmatpush1.bf16.msra.mxu0 %v866_v13  ;;  %661 = vmatprep.subr.bf16.mxu1 %v894_v1 }
  0x1c   : > { %408 = vmatprep.subr.bf16.mxu0 %v894_v1 }
  0x1e   : > { %662 = vmatpush1.bf16.msra.mxu1 %v879_v35 }
  0x1f   : > { %409 = vmatpush1.bf16.msra.mxu0 %v867_v14  ;;  %663 = vmatprep.subr.bf16.mxu1 %v894_v1 }
  0x20   : > { %410 = vmatprep.subr.bf16.mxu0 %v894_v1 }
  0x22   : > { %664 = vmatpush1.bf16.msra.mxu1 %v880_v36 }
  0x23   : > { %411 = vmatpush1.bf16.msra.mxu0 %v868_v15  ;;  %665 = vmatprep.subr.bf16.mxu1 %v894_v1 }
  0x24   : > { %412 = vmatprep.subr.bf16.mxu0 %v894_v1 }
  0x26   : > { %666 = vmatpush1.bf16.msra.mxu1 %v881_v37 }
  0x27   : > { %413 = vmatpush1.bf16.msra.mxu0 %v869_v16  ;;  %667 = vmatprep.subr.bf16.mxu1 %v894_v1 }
  0x28   : > { %414 = vmatprep.subr.bf16.mxu0 %v894_v1 }
  0x2a   : > { %668 = vmatpush1.bf16.msra.mxu1 %v882_v38 }
  0x2b   : > { %415 = vmatpush1.bf16.msra.mxu0 %v870_v17  ;;  %669 = vmatprep.subr.bf16.mxu1 %v894_v1  ;;  %v824_v17 = vld [vmem:[%s1098_s4] ss:$0 sm:$0xff] }
  0x2c   : > { %416 = vmatprep.subr.bf16.mxu0 %v894_v1 }
  0x2e   : > { %670 = vmatpush1.bf16.msra.mxu1 %v883_v39 }
  0x2f   : > { %417 = vmatpush1.bf16.msra.mxu0 %v871_v18  ;;  %671 = vmatprep.subr.bf16.mxu1 %v894_v1 }
  0x30   : > { %418 = vmatprep.subr.bf16.mxu0 %v894_v1 }
  0x32   : > { %672 = vmatpush1.bf16.msra.mxu1 %v884_v40 }
  0x33   : > { %419 = vmatpush1.bf16.msra.mxu0 %v872_v19  ;;  %673 = vmatprep.subr.bf16.mxu1 %v894_v1 }
  0x36   : > { %674 = vmatpush1.bf16.msra.mxu1 %v885_v54 }
  0x85   : > { %v281_v20 = vpop.permute.xlu0 %280 }
  0x86   : > { %v288_v21 = vsel %vm285_vm0, %v803_v8, %v281_v20 }
  0x87   : > { %429 = vmatmul.mubr.bf16.vlgmr.msra.gmra.mrb[0].mxu0 %v288_v21 }
 0x15a   : > { %v430_v44 = vpop.f32.mrb[0].mxu0 }
 0x15b   : > { %v431_v45 = vadd.f32 %v806_v41, %v430_v44  ;;  %v432_v46 = vpop.f32.mrb[1].mxu0 }
 0x15c   : > { %v433_v47 = vpop.f32.mrb[2].mxu0 }
 0x15d   : > { %v437_v49 = vmax.f32 %v431_v45, 0.0  ;;  %v434_v50 = vadd.f32 %v806_v41, %v433_v47  ;;  %v435_v51 = vpop.f32.mrb[3].mxu0 }
 0x15f   : > { %v845_v52 = vpack.c.bf16 %v437_v49, %v437_v49  ;;  %v438_v53 = vmax.f32 %v434_v50, 0.0 }
 0x161   : > { %448 = vst.msk [vmem:[%s259_s13] sm:$0xf] %vm447_vm9, %v845_v52  ;;  %v439_v56 = vpack.c.bf16 %v438_v53, %v437_v49  ;;  %v846_v57 = vpack.c.bf16 %v438_v53, %v438_v53 }
 0x163   : > { %449 = vst.msk [vmem:[%s259_s13 + $0x4] sm:$0xf] %vm447_vm9, %v846_v57 }
 0x164   : > { %453 = vst.msk [vmem:[#allocation2 + $0x8] sm:$0xff] %vm285_vm0, %v439_v56 }
 0x16b   : > { %v500_v60 = vld [vmem:[#allocation2 + $0x8] sm:$0xff] }
 0x16c   : > { %v501_v61 = vld [vmem:[#allocation2 + $0x8] sm:$0xfe]  ;;  %v521_v63 = vrot.slane %v500_v60, 1 }
 0x16d   : > { %v518_v0 = vsel %vm517_vm10, %v501_v61, 0  ;;  %v482_v8 = vld [vmem:[#allocation2 + $0x8] sm:$0x7f] }
 0x16e   : > { %v527_v1 = vrot.slane %v518_v0, 2  ;;  %522 = vrot.lane.b32.xlu0 %v521_v63, %s895_s9  ;;  %v499_v11 = vsel %vm497_vm13, %v482_v8, 0 }
 0x170   : > { %v529_v2 = vsel %vm526_vm11, %v527_v1, %v528_v62  ;;  %v572_v3 = vrot.slane %v527_v1, 7 }
 0x171   : > { %v573_v4 = vrot.slane %v529_v2, 7 }
 0x173   : > { %v574_v5 = vsel %vm568_vm12, %v572_v3, %v573_v4 }
 0x174   : > { %837 = vmatprep.mubr.msk.bf16.mxu1 %vm285_vm0, %v574_v5 }
 0x1e0   : > { %v523_v10 = vpop.permute.xlu0 %522 }
 0x1e1   : > { %v532_v12 = vsel %vm285_vm0, %v498_v9, %v523_v10  ;;  %v534_v13 = vsel %vm285_vm0, %v499_v11, %v523_v10 }
 0x1e2   : > { %v569_v14 = vrot.slane %v532_v12, 7  ;;  %v570_v15 = vrot.slane %v534_v13, 7 }
 0x1e4   : > { %v571_v16 = vsel %vm568_vm12, %v569_v14, %v570_v15 }
 0x1e5   : > { %684 = vmatmul.mubr.bf16.vlgmr.msra.gmra.mrb[0].mxu1 %v571_v16 }
 0x2b8   : > { %v685_v18 = vpop.f32.mrb[0].mxu1 }
 0x2b9   : > { %v686_v19 = vadd.f32 %v824_v17, %v685_v18  ;;  %v687_v20 = vpop.f32.mrb[1].mxu1 }
 0x2ba   : > { %v688_v21 = vpop.f32.mrb[2].mxu1 }
 0x2bb   : > { %v692_v22 = vmax.f32 %v686_v19, 0.0  ;;  %v689_v23 = vadd.f32 %v824_v17, %v688_v21  ;;  %v690_v24 = vpop.f32.mrb[3].mxu1 }
 0x2bd   : > { %v847_v25 = vpack.c.bf16 %v692_v22, %v692_v22  ;;  %v693_v26 = vmax.f32 %v689_v23, 0.0 }
 0x2bf   : > { %702 = vst.msk [vmem:[%s264_s19] sm:$0xf] %vm447_vm9, %v847_v25  ;;  %v848_v27 = vpack.c.bf16 %v693_v26, %v693_v26 }
 0x2c1   : > { %703 = vst.msk [vmem:[%s264_s19 + $0x4] sm:$0xf] %vm447_vm9, %v848_v27 }
 0x2c2 PF: > { %s17_s21 = sadd.s32 1, %s892_s21  }
 0x2c3   : > { %p14_p4 = scmp.ge.s32.totalorder %s17_s21, 4  }
 0x2c5   :  { %16 = sbr.rel (!%p14_p4) target bundleno = 1 (0x1), region = 82 }

// kernel: rrs_1d_forward.9
= control target key start
LH: loop header
LB: loop body
LE: loop exit
PB: predicated region body
PF: predicated region fallthrough
CT: control target
= control target key end

     0   :  { %s3519_s21 = smov 0   ;;  %s4779_s0 = inlined_call_operand.vmem [shape: bf16[2,288,4], index: 0, kind: input, shape index: {}]   ;;  %s4780_s1 = inlined_call_operand.vmem [shape: bf16[12,4], index: 1, kind: input, shape index: {}]   ;;  %s4781_s2 = inlined_call_operand.vmem [shape: f32[1,4], index: 2, kind: input, shape index: {}]   ;;  %s4782_s3 = inlined_call_operand.vmem [shape: bf16[12,64], index: 3, kind: input, shape index: {}]   ;;  %s4783_s4 = inlined_call_operand.vmem [shape: f32[1,64], index: 4, kind: input, shape index: {}]   ;;  %s4784_s5 = inlined_call_operand.vmem [shape: bf16[2,256,4], index: 5, kind: output, shape index: {0}]   ;;  %s4785_s6 = inlined_call_operand.vmem [shape: bf16[2,256,64], index: 6, kind: output, shape index: {1}]  }
   0x1 LB: > { %s3107_s22 = sadd.s32 4294967295, %s3478_s21   ;;  %p3111_p0 = scmp.ge.s32.totalorder %s3478_s21, 1  ;;  %s3478_s21 = sphi %s3519_s21, %s17_s21  }
   0x2   : > { %p215_p1 = scmp.lt.s32.totalorder %s3478_s21, 3 }
   0x4   : > { %p216_p2 = pnand %p3111_p0, %p215_p1 }
   0x5   : > { %p250_p3 = scmp.lt.s32.totalorder (!%p216_p2), %s3107_s22, 1  ;;  %vm587_vm0 = vcmask (!%p216_p2), 1045504   ;;  %v3470_v0 = vld [vmem:[%s4780_s1] sm:$0x3f] (!%p216_p2)   ;;  %s3480_s29 = smov (!%p216_p2), 8   ;;  %vm458_vm1 = vcmask (!%p216_p2), 31744  }
   0x6   : > { %219 = sbr.rel (%p216_p2) target bundleno = 788 (0x314), region = 40  ;;  %3437 = vmatprep.subr.msk.bf16.mxu0 (!%p216_p2), %vm587_vm0, %v3470_v0  ;;  %v589_v1 = vsel (!%p216_p2), %vm587_vm0, %v3470_v0, 0  ;;  %s3481_s30 = smov (!%p216_p2), 4   ;;  %vm507_vm2 = vcmask (!%p216_p2), 64512   ;;  %vm554_vm3 = vcmask (!%p216_p2), 97280   ;;  %vm3483_vm6 = vmmov (!%p216_p2), 1  }
   0x7   : > { %3370 = vmatpush3.bf16.msra.mxu0 (!%p216_p2), %v589_v1  ;;  %vm1510_vm7 = vmpackc.low (!%p216_p2), %vm3483_vm6, %vm3483_vm6 }
   0xd   : > { %s4843_s22 = smov (!%p250_p3, %s3107_s22), 1 }
   0xe   : > { %s3439_s25 = smul.u32 144, %s4843_s22  ;;  %s3269_s9 = sshll.u32 %s4843_s22, 7 }
   0xf   : > { %s3942_s12 = scalar_lea.vmem %s4784_s5, %s3269_s9  ;;  %s4681_s19 = scalar_lea.vmem %s4785_s6, %s3269_s9 }
  0x10   : > { %s3538_s28 = scalar_lea.vmem %s4779_s0, %s3439_s25 }
  0x11   : > { %v3541_v2 = vld [vmem:[%s3538_s28 + $0x10] sm:$0xff]   ;;  %v3453_v3 = vld [vmem:[%s3538_s28 + $0x8] sm:$0xff]   ;;  %v3547_v4 = vld [vmem:[%s3538_s28 + $0x18] sm:$0xff]  }
  0x12   : > { %426 = vrot.lane.b32.xlu1 %v3541_v2, %s3480_s29  ;;  %389 = vrot.lane.b32.xlu0 %v3453_v3, %s3481_s30  ;;  %v3553_v5 = vld [vmem:[%s3538_s28 + $0x20] sm:$0xff]   ;;  %v3560_v6 = vld [vmem:[%s3538_s28 + $0x28] sm:$0xff]  }
  0x13   : > { %v3567_v7 = vld [vmem:[%s3538_s28 + $0x30] sm:$0xff]   ;;  %v3574_v8 = vld [vmem:[%s3538_s28 + $0x38] sm:$0xff]   ;;  %v3581_v9 = vld [vmem:[%s3538_s28 + $0x40] sm:$0xff]  }
  0x14   : > { %v3588_v10 = vld [vmem:[%s3538_s28 + $0x48] sm:$0xff]   ;;  %v3595_v11 = vld [vmem:[%s3538_s28 + $0x50] sm:$0xff]   ;;  %v3602_v12 = vld [vmem:[%s3538_s28 + $0x58] sm:$0xff]  }
  0x15   : > { %v3609_v13 = vld [vmem:[%s3538_s28 + $0x60] sm:$0xff]   ;;  %v3616_v14 = vld [vmem:[%s3538_s28 + $0x68] sm:$0xff]   ;;  %v3623_v15 = vld [vmem:[%s3538_s28 + $0x70] sm:$0xff]  }
  0x16   : > { %428 = vrot.lane.b32.xlu1 %v3547_v4, %s3480_s29  ;;  %391 = vrot.lane.b32.xlu0 %v3541_v2, %s3481_s30  ;;  %v3630_v16 = vld [vmem:[%s3538_s28 + $0x78] sm:$0xff]   ;;  %v3467_v17 = vld [vmem:[%s3538_s28 + $0x80] sm:$0xff]  }
  0x17   : > { %v3468_v18 = vld [vmem:[%s3538_s28 + $0x88] sm:$0xff]   ;;  %v3469_v19 = vld [vmem:[%s3538_s28] sm:$0xff]  }
  0x1a   : > { %395 = vrot.lane.b32.xlu1 %v3553_v5, %s3481_s30  ;;  %393 = vrot.lane.b32.xlu0 %v3547_v4, %s3481_s30 }
  0x1e   : > { %432 = vrot.lane.b32.xlu1 %v3560_v6, %s3480_s29  ;;  %430 = vrot.lane.b32.xlu0 %v3553_v5, %s3480_s29 }
  0x22   : > { %399 = vrot.lane.b32.xlu1 %v3567_v7, %s3481_s30  ;;  %397 = vrot.lane.b32.xlu0 %v3560_v6, %s3481_s30 }
  0x26   : > { %436 = vrot.lane.b32.xlu1 %v3574_v8, %s3480_s29  ;;  %434 = vrot.lane.b32.xlu0 %v3567_v7, %s3480_s29 }
  0x2a   : > { %403 = vrot.lane.b32.xlu1 %v3581_v9, %s3481_s30  ;;  %401 = vrot.lane.b32.xlu0 %v3574_v8, %s3481_s30 }
  0x2e   : > { %440 = vrot.lane.b32.xlu1 %v3588_v10, %s3480_s29  ;;  %438 = vrot.lane.b32.xlu0 %v3581_v9, %s3480_s29 }
  0x32   : > { %407 = vrot.lane.b32.xlu1 %v3595_v11, %s3481_s30  ;;  %405 = vrot.lane.b32.xlu0 %v3588_v10, %s3481_s30 }
  0x36   : > { %444 = vrot.lane.b32.xlu1 %v3602_v12, %s3480_s29  ;;  %442 = vrot.lane.b32.xlu0 %v3595_v11, %s3480_s29 }
  0x3a   : > { %411 = vrot.lane.b32.xlu1 %v3609_v13, %s3481_s30  ;;  %409 = vrot.lane.b32.xlu0 %v3602_v12, %s3481_s30 }
  0x3e   : > { %448 = vrot.lane.b32.xlu1 %v3616_v14, %s3480_s29  ;;  %446 = vrot.lane.b32.xlu0 %v3609_v13, %s3480_s29 }
  0x42   : > { %415 = vrot.lane.b32.xlu1 %v3623_v15, %s3481_s30  ;;  %413 = vrot.lane.b32.xlu0 %v3616_v14, %s3481_s30 }
  0x46   : > { %452 = vrot.lane.b32.xlu1 %v3630_v16, %s3480_s29  ;;  %450 = vrot.lane.b32.xlu0 %v3623_v15, %s3480_s29 }
  0x4a   : > { %419 = vrot.lane.b32.xlu1 %v3467_v17, %s3481_s30  ;;  %417 = vrot.lane.b32.xlu0 %v3630_v16, %s3481_s30 }
  0x4e   : > { %456 = vrot.lane.b32.xlu1 %v3468_v18, %s3480_s29  ;;  %454 = vrot.lane.b32.xlu0 %v3467_v17, %s3480_s29 }
  0x84   : > { %v427_v20 = vpop.permute.xlu1 %426  ;;  %v390_v21 = vpop.permute.xlu0 %389 }
  0x85   : > { %v461_v22 = vsel %vm458_vm1, %v3469_v19, %v390_v21 }
  0x86   : > { %v509_v23 = vsel %vm507_vm2, %v461_v22, %v427_v20  ;;  %v3482_v22 = vmov 0  }
  0x87   : > { %3371 = vmatprep.mubr.msk.bf16.mxu0 %vm554_vm3, %v509_v23  ;;  %947 = vst.msk [vmem:[#allocation2 + $0x10] sm:$0xff] %vm458_vm1, %v3482_v22  ;;  %945 = vst.msk [vmem:[#allocation2] sm:$0xff] %vm458_vm1, %v3482_v22 }
  0x88   : > { %v429_v24 = vpop.permute.xlu1 %428  ;;  %v392_v25 = vpop.permute.xlu0 %391  ;;  %946 = vst.msk [vmem:[#allocation2 + $0x8] sm:$0xff] %vm458_vm1, %v3482_v22  ;;  %948 = vst.msk [vmem:[#allocation2 + $0x18] sm:$0xff] %vm458_vm1, %v3482_v22 }
  0x89   : > { %v464_v26 = vsel %vm458_vm1, %v3453_v3, %v392_v25  ;;  %949 = vst.msk [vmem:[#allocation2 + $0x20] sm:$0xff] %vm458_vm1, %v3482_v22  ;;  %950 = vst.msk [vmem:[#allocation2 + $0x28] sm:$0xff] %vm458_vm1, %v3482_v22 }
  0x8a   : > { %v511_v27 = vsel %vm507_vm2, %v464_v26, %v429_v24  ;;  %951 = vst.msk [vmem:[#allocation2 + $0x30] sm:$0xff] %vm458_vm1, %v3482_v22  ;;  %952 = vst.msk [vmem:[#allocation2 + $0x38] sm:$0xff] %vm458_vm1, %v3482_v22 }
  0x8b   : > { %3372 = vmatmul.mubr.msk.bf16.vlgmr.msra.gmra.mrb[0].mxu0 %vm554_vm3, %v511_v27  ;;  %953 = vst.msk [vmem:[#allocation2 + $0x40] sm:$0xff] %vm458_vm1, %v3482_v22  ;;  %954 = vst.msk [vmem:[#allocation2 + $0x48] sm:$0xff] %vm458_vm1, %v3482_v22 }
  0x8c   : > { %v396_v28 = vpop.permute.xlu1 %395  ;;  %v394_v29 = vpop.permute.xlu0 %393  ;;  %955 = vst.msk [vmem:[#allocation2 + $0x50] sm:$0xff] %vm458_vm1, %v3482_v22  ;;  %956 = vst.msk [vmem:[#allocation2 + $0x58] sm:$0xff] %vm458_vm1, %v3482_v22 }
  0x8d   : > { %v470_v30 = vsel %vm458_vm1, %v3547_v4, %v396_v28  ;;  %v467_v32 = vsel %vm458_vm1, %v3541_v2, %v394_v29  ;;  %957 = vst.msk [vmem:[#allocation2 + $0x60] sm:$0xff] %vm458_vm1, %v3482_v22  ;;  %958 = vst.msk [vmem:[#allocation2 + $0x68] sm:$0xff] %vm458_vm1, %v3482_v22 }
  0x8e   : > { %959 = vst.msk [vmem:[#allocation2 + $0x70] sm:$0xff] %vm458_vm1, %v3482_v22  ;;  %960 = vst.msk [vmem:[#allocation2 + $0x78] sm:$0xff] %vm458_vm1, %v3482_v22 }
  0x8f   : > { %961 = vst.msk [vmem:[#allocation2 + $0x80] sm:$0xff] %vm458_vm1, %v3482_v22  ;;  %962 = vst.msk [vmem:[#allocation2 + $0x88] sm:$0xff] %vm458_vm1, %v3482_v22 }
  0x90   : > { %v433_v31 = vpop.permute.xlu1 %432  ;;  %v431_v34 = vpop.permute.xlu0 %430 }
  0x91   : > { %v515_v33 = vsel %vm507_vm2, %v470_v30, %v433_v31  ;;  %v513_v35 = vsel %vm507_vm2, %v467_v32, %v431_v34 }
  0x92   : > { %3375 = vmatprep.mubr.msk.bf16.mxu0 %vm554_vm3, %v513_v35 }
  0x93   : > { %3376 = vmatmul.mubr.msk.bf16.gmra.mrb[4].mxu0 %vm554_vm3, %v515_v33 }
  0x94   : > { %v400_v36 = vpop.permute.xlu1 %399  ;;  %v398_v37 = vpop.permute.xlu0 %397 }
  0x95   : > { %v476_v38 = vsel %vm458_vm1, %v3560_v6, %v400_v36  ;;  %v473_v40 = vsel %vm458_vm1, %v3553_v5, %v398_v37 }
  0x98   : > { %v437_v39 = vpop.permute.xlu1 %436  ;;  %v435_v42 = vpop.permute.xlu0 %434 }
  0x99   : > { %v519_v41 = vsel %vm507_vm2, %v476_v38, %v437_v39  ;;  %v517_v43 = vsel %vm507_vm2, %v473_v40, %v435_v42 }
  0x9a   : > { %3379 = vmatprep.mubr.msk.bf16.mxu0 %vm554_vm3, %v517_v43 }
  0x9b   : > { %3380 = vmatmul.mubr.msk.bf16.gmra.mrb[8].mxu0 %vm554_vm3, %v519_v41 }
  0x9c   : > { %v404_v44 = vpop.permute.xlu1 %403  ;;  %v402_v45 = vpop.permute.xlu0 %401 }
  0x9d   : > { %v482_v46 = vsel %vm458_vm1, %v3574_v8, %v404_v44  ;;  %v479_v48 = vsel %vm458_vm1, %v3567_v7, %v402_v45  ;;  %v3789_v45 = vsel %vm1510_vm7, 65537, %v3482_v22 }
  0xa0   : > { %v441_v47 = vpop.permute.xlu1 %440  ;;  %v439_v50 = vpop.permute.xlu0 %438 }
  0xa1   : > { %v523_v49 = vsel %vm507_vm2, %v482_v46, %v441_v47  ;;  %v521_v51 = vsel %vm507_vm2, %v479_v48, %v439_v50 }
  0xa2   : > { %3383 = vmatprep.mubr.msk.bf16.mxu0 %vm554_vm3, %v521_v51 }
  0xa3   : > { %3384 = vmatmul.mubr.msk.bf16.gmra.mrb[12].mxu0 %vm554_vm3, %v523_v49 }
  0xa4   : > { %v408_v52 = vpop.permute.xlu1 %407  ;;  %v406_v53 = vpop.permute.xlu0 %405 }
  0xa5   : > { %v488_v54 = vsel %vm458_vm1, %v3588_v10, %v408_v52  ;;  %v485_v56 = vsel %vm458_vm1, %v3581_v9, %v406_v53 }
  0xa8   : > { %v445_v55 = vpop.permute.xlu1 %444  ;;  %v443_v58 = vpop.permute.xlu0 %442 }
  0xa9   : > { %v527_v57 = vsel %vm507_vm2, %v488_v54, %v445_v55  ;;  %v525_v59 = vsel %vm507_vm2, %v485_v56, %v443_v58 }
  0xaa   : > { %3387 = vmatprep.mubr.msk.bf16.mxu0 %vm554_vm3, %v525_v59 }
  0xab   : > { %3388 = vmatmul.mubr.msk.bf16.gmra.mrb[16].mxu0 %vm554_vm3, %v527_v57 }
  0xac   : > { %v412_v60 = vpop.permute.xlu1 %411  ;;  %v410_v61 = vpop.permute.xlu0 %409 }
  0xad   : > { %v494_v62 = vsel %vm458_vm1, %v3602_v12, %v412_v60  ;;  %v491_v0 = vsel %vm458_vm1, %v3595_v11, %v410_v61 }
  0xb0   : > { %v449_v63 = vpop.permute.xlu1 %448  ;;  %v447_v2 = vpop.permute.xlu0 %446 }
  0xb1   : > { %v531_v1 = vsel %vm507_vm2, %v494_v62, %v449_v63  ;;  %v529_v3 = vsel %vm507_vm2, %v491_v0, %v447_v2 }
  0xb2   : > { %3391 = vmatprep.mubr.msk.bf16.mxu0 %vm554_vm3, %v529_v3 }
  0xb3   : > { %3392 = vmatmul.mubr.msk.bf16.gmra.mrb[20].mxu0 %vm554_vm3, %v531_v1 }
  0xb4   : > { %v416_v4 = vpop.permute.xlu1 %415  ;;  %v414_v5 = vpop.permute.xlu0 %413 }
  0xb5   : > { %v500_v6 = vsel %vm458_vm1, %v3616_v14, %v416_v4  ;;  %v497_v8 = vsel %vm458_vm1, %v3609_v13, %v414_v5 }
  0xb8   : > { %v453_v7 = vpop.permute.xlu1 %452  ;;  %v451_v10 = vpop.permute.xlu0 %450 }
  0xb9   : > { %v535_v9 = vsel %vm507_vm2, %v500_v6, %v453_v7  ;;  %v533_v11 = vsel %vm507_vm2, %v497_v8, %v451_v10 }
  0xba   : > { %3395 = vmatprep.mubr.msk.bf16.mxu0 %vm554_vm3, %v533_v11 }
  0xbb   : > { %3396 = vmatmul.mubr.msk.bf16.gmra.mrb[24].mxu0 %vm554_vm3, %v535_v9 }
  0xbc   : > { %v420_v12 = vpop.permute.xlu1 %419  ;;  %v418_v17 = vpop.permute.xlu0 %417 }
  0xbd   : > { %v506_v18 = vsel %vm458_vm1, %v3630_v16, %v420_v12  ;;  %v503_v14 = vsel %vm458_vm1, %v3623_v15, %v418_v17  ;;  %v979_v15 = vlaneseq }
  0xbf   : > { %v3744_v16 = vshrl.u32 %v979_v15, 7 }
  0xc0   : > { %v457_v19 = vpop.permute.xlu1 %456  ;;  %v455_v20 = vpop.permute.xlu0 %454 }
  0xc1   : > { %v539_v13 = vsel %vm507_vm2, %v506_v18, %v457_v19  ;;  %v537_v21 = vsel %vm507_vm2, %v503_v14, %v455_v20  ;;  %v983_v23 = vadd.s32 24, %v3744_v16  ;;  %v981_v24 = vadd.s32 8, %v3744_v16 }
  0xc2   : > { %3399 = vmatprep.mubr.msk.bf16.mxu0 %vm554_vm3, %v537_v21  ;;  %v987_v25 = vadd.s32 56, %v3744_v16  ;;  %v985_v26 = vadd.s32 40, %v3744_v16  ;;  %v991_v28 = vadd.s32 88, %v3744_v16  ;;  %v989_v30 = vadd.s32 72, %v3744_v16 }
  0xc3   : > { %3400 = vmatmul.mubr.msk.bf16.gmra.mrb[28].mxu0 %vm554_vm3, %v539_v13  ;;  %v1037_v27 = vand.u32 15, %v983_v23  ;;  %v1023_v29 = vand.u32 15, %v981_v24  ;;  %v995_v37 = vadd.s32 120, %v3744_v16  ;;  %v993_v39 = vadd.s32 104, %v3744_v16 }
  0xc4   : > { %v1065_v31 = vand.u32 15, %v987_v25  ;;  %v1051_v32 = vand.u32 15, %v985_v26  ;;  %v1093_v34 = vand.u32 15, %v991_v28  ;;  %v1079_v36 = vand.u32 15, %v989_v30 }
  0xc5   : > { %vm3752_vm4 = vcmp.lt.s32.totalorder %v1037_v27, 15  ;;  %vm3756_vm5 = vcmp.lt.s32.totalorder %v1023_v29, 15  ;;  %v999_v42 = vadd.s32 152, %v3744_v16  ;;  %v1121_v44 = vand.u32 15, %v995_v37 }
  0xc6   : > { %vm3761_vm8 = vcmp.lt.s32.totalorder %v1065_v31, 15  ;;  %vm1883_vm9 = vmpackc.low %vm3752_vm4, %vm3752_vm4  ;;  %vm3769_vm10 = vcmp.lt.s32.totalorder %v1051_v32, 15  ;;  %vm3776_vm12 = vcmp.lt.s32.totalorder %v1093_v34, 15  ;;  %vm3784_vm14 = vcmp.lt.s32.totalorder %v1079_v36, 15 }
  0xc7   : > { %vm1881_vm11 = vmpackc.low %vm3756_vm5, %vm3756_vm5  ;;  %v1915_v46 = vsel %vm1883_vm9, 65537, %v3482_v22  ;;  %v1107_v47 = vand.u32 15, %v993_v39  ;;  %v997_v48 = vadd.s32 136, %v3744_v16  ;;  %v1149_v51 = vand.u32 15, %v999_v42 }
  0xc8   : > { %vm1887_vm13 = vmpackc.low %vm3761_vm8, %vm3761_vm8  ;;  %v1913_v49 = vsel %vm1881_vm11, 65537, %v3482_v22  ;;  %v3202_v52 = vcombine.low %v3789_v45, %v1915_v46  ;;  %vm3806_vm6 = vcmp.lt.s32.totalorder %v1121_v44, 15  ;;  %v1003_v55 = vadd.s32 184, %v3744_v16 }
  0xc9   : > { %vm1885_vm15 = vmpackc.low %vm3769_vm10, %vm3769_vm10  ;;  %v1919_v50 = vsel %vm1887_vm13, 65537, %v3482_v22  ;;  %vm3812_vm7 = vcmp.lt.s32.totalorder %v1107_v47, 15  ;;  %v1001_v58 = vadd.s32 168, %v3744_v16  ;;  %v3201_v59 = vcombine.low %v3789_v45, %v1913_v49 }
  0xca   : > { %vm1891_vm4 = vmpackc.low %vm3776_vm12, %vm3776_vm12  ;;  %v1917_v53 = vsel %vm1885_vm15, 65537, %v3482_v22  ;;  %v3204_v60 = vcombine.low %v3789_v45, %v1919_v50  ;;  %v1135_v62 = vand.u32 15, %v997_v48  ;;  %vm3824_vm9 = vcmp.lt.s32.totalorder %v1149_v51, 15 }
  0xcb   : > { %vm1889_vm5 = vmpackc.low %vm3784_vm14, %vm3784_vm14  ;;  %v1923_v56 = vsel %vm1891_vm4, 65537, %v3482_v22  ;;  %v3203_v63 = vcombine.low %v3789_v45, %v1917_v53  ;;  %v2001_v1 = vshrl.u32 %v3202_v52, 16  ;;  %v1177_v3 = vand.u32 15, %v1003_v55  ;;  %v3891_v55 = vld [vmem:[%s4781_s2] ss:$0 sm:$0xff] }
  0xcc   : > { %v1921_v61 = vsel %vm1889_vm5, 65537, %v3482_v22  ;;  %vm1895_vm8 = vmpackc.low %vm3806_vm6, %vm3806_vm6  ;;  %v3206_v2 = vcombine.low %v3789_v45, %v1923_v56  ;;  %v1163_v5 = vand.u32 15, %v1001_v58  ;;  %v1994_v6 = vshrl.u32 %v3201_v59, 16 }
  0xcd   : > { %vm1893_vm10 = vmpackc.low %vm3812_vm7, %vm3812_vm7  ;;  %v3205_v4 = vcombine.low %v3789_v45, %v1921_v61  ;;  %v2017_v7 = vshrl.u32 %v3204_v60, 16  ;;  %v1927_v8 = vsel %vm1895_vm8, 65537, %v3482_v22  ;;  %vm3834_vm11 = vcmp.lt.s32.totalorder %v1135_v62, 15 }
  0xce   : > { %vm1899_vm12 = vmpackc.low %vm3824_vm9, %vm3824_vm9  ;;  %v2009_v10 = vshrl.u32 %v3203_v63, 16  ;;  %v1925_v11 = vsel %vm1893_vm10, 65537, %v3482_v22  ;;  %v1007_v12 = vadd.s32 216, %v3744_v16  ;;  %v2003_v17 = vrot.slane %v2001_v1, 7 }
  0xcf   : > { %v2004_v18 = vshll.u32 %v3202_v52, 16  ;;  %v2033_v19 = vshrl.u32 %v3206_v2, 16  ;;  %vm3843_vm13 = vcmp.lt.s32.totalorder %v1177_v3, 15  ;;  %v2025_v13 = vshrl.u32 %v3205_v4, 16  ;;  %vm1897_vm14 = vmpackc.low %vm3834_vm11, %vm3834_vm11 }
  0xd0   : > { %v3848_v20 = vcombine.low %v3789_v45, %v1927_v8  ;;  %v1931_v21 = vsel %vm1899_vm12, 65537, %v3482_v22  ;;  %vm3854_vm15 = vcmp.lt.s32.totalorder %v1163_v5, 15  ;;  %v1996_v23 = vrot.slane %v1994_v6, 7  ;;  %vm1903_vm4 = vmpackc.low %vm3843_vm13, %vm3843_vm13 }
  0xd1   : > { %v2019_v24 = vrot.slane %v2017_v7, 7  ;;  %v2020_v25 = vshll.u32 %v3204_v60, 16  ;;  %v3207_v26 = vcombine.low %v3789_v45, %v1925_v11  ;;  %v2011_v27 = vrot.slane %v2009_v10, 7  ;;  %vm1901_vm5 = vmpackc.low %vm3854_vm15, %vm3854_vm15 }
  0xd2   : > { %v2012_v28 = vshll.u32 %v3203_v63, 16  ;;  %v1005_v29 = vadd.s32 200, %v3744_v16  ;;  %v1205_v30 = vand.u32 15, %v1007_v12  ;;  %v3863_v31 = vrot.slane %v2033_v19, 7 }
  0xd3   : > { %v2036_v32 = vshll.u32 %v3206_v2, 16  ;;  %v1929_v33 = vsel %vm1897_vm14, 65537, %v3482_v22  ;;  %v3210_v34 = vcombine.low %v3789_v45, %v1931_v21  ;;  %v1997_v35 = vshll.u32 %v3201_v59, 16 }
  0xd4   : > { %v2027_v36 = vrot.slane %v2025_v13, 7  ;;  %v2028_v37 = vshll.u32 %v3205_v4, 16  ;;  %v2049_v38 = vshrl.u32 %v3848_v20, 16  ;;  %v2006_v39 = vor.u32 %v2004_v18, %v2003_v17 }
  0xd5   : > { %v2022_v40 = vor.u32 %v2020_v25, %v2019_v24  ;;  %v2041_v41 = vshrl.u32 %v3207_v26, 16  ;;  %v1935_v42 = vsel %vm1903_vm4, 65537, %v3482_v22  ;;  %v3873_v43 = vcombine.low %v3789_v45, %v1929_v33 }
  0xd6   : > { %v1933_v44 = vsel %vm1901_vm5, 65537, %v3482_v22  ;;  %v1191_v46 = vand.u32 15, %v1005_v29  ;;  %vm3876_vm6 = vcmp.lt.s32.totalorder %v1205_v30, 15  ;;  %vm912_vm7 = vcmask 27648  }
  0xd7   : > { %vm1992_vm8 = vsmask.f32 256  ;;  %v2014_v48 = vor.u32 %v2012_v28, %v2011_v27  ;;  %v2038_v49 = vor.u32 %v2036_v32, %v3863_v31  ;;  %v2065_v50 = vshrl.u32 %v3210_v34, 16  ;;  %vm1907_vm9 = vmpackc.low %vm3876_vm6, %vm3876_vm6 }
  0xd8   : > { %v3881_v51 = vor.u32 %v1997_v35, %v1996_v23  ;;  %v2030_v52 = vor.u32 %v2028_v37, %v2027_v36  ;;  %v3883_v53 = vrot.slane %v2049_v38, 7  ;;  %v3886_v54 = vcombine.low %v3789_v45, %v1935_v42 }
  0xd9   : > { %v3893_v56 = vrot.slane %v2041_v41, 7  ;;  %v2044_v57 = vshll.u32 %v3207_v26, 16  ;;  %v2052_v58 = vshll.u32 %v3848_v20, 16  ;;  %v3897_v59 = vcombine.low %v3789_v45, %v1933_v44 }
  0xda   : > { %v3903_v60 = vsel %vm1992_vm8, %v1996_v23, %v2006_v39  ;;  %v3906_v61 = vsel %vm1992_vm8, %v2011_v27, %v2022_v40  ;;  %v2057_v62 = vshrl.u32 %v3873_v43, 16  ;;  %vm3909_vm10 = vcmp.lt.s32.totalorder %v1191_v46, 15 }
  0xdb   : > { %v3914_v1 = vsel %vm1992_vm8, %v2003_v17, %v2014_v48  ;;  %v3917_v2 = vsel %vm1992_vm8, %v2027_v36, %v2038_v49  ;;  %v3919_v3 = vrot.slane %v2065_v50, 7  ;;  %v2068_v4 = vshll.u32 %v3210_v34, 16  ;;  %vm1905_vm11 = vmpackc.low %vm3909_vm10, %vm3909_vm10 }
  0xdc   : > { %v3924_v7 = vsel %vm1992_vm8, %v2019_v24, %v2030_v52  ;;  %v2081_v8 = vshrl.u32 %v3886_v54, 16  ;;  %v1939_v9 = vsel %vm1907_vm9, 65537, %v3482_v22  ;;  %v2046_v12 = vor.u32 %v2044_v57, %v3893_v56 }
  0xdd   : > { %v2054_v17 = vor.u32 %v2052_v58, %v3883_v53  ;;  %v2073_v18 = vshrl.u32 %v3897_v59, 16  ;;  %v2059_v20 = vrot.slane %v2057_v62, 7  ;;  %v2060_v21 = vshll.u32 %v3873_v43, 16 }
  0xde   : > { %v2070_v24 = vor.u32 %v2068_v4, %v3919_v3  ;;  %v3947_v25 = vcombine.low %v3789_v45, %v1939_v9  ;;  %v3949_v28 = vrot.slane %v2081_v8, 7  ;;  %v1937_v29 = vsel %vm1905_vm11, 65537, %v3482_v22 }
  0xdf   : > { %vm2121_vm12 = vcmp.ne.s16.totalorder %v3903_v60, 0  ;;  %v2075_v33 = vrot.slane %v2073_v18, 7  ;;  %v2084_v34 = vshll.u32 %v3886_v54, 16  ;;  %vm2120_vm13 = vcmp.ne.s16.totalorder %v3881_v51, 0 }
  0xe0   : > { %v2076_v37 = vshll.u32 %v3897_v59, 16  ;;  %v1011_v38 = vadd.s32 248, %v3744_v16  ;;  %v3962_v42 = vcombine.low %v3789_v45, %v1937_v29  ;;  %v2097_v43 = vshrl.u32 %v3947_v25, 16 }
  0xe1   : > { %v3971_v47 = vsel %vm1992_vm8, %v3863_v31, %v2046_v12  ;;  %v3975_v48 = vsel %vm1992_vm8, %v3893_v56, %v2054_v17  ;;  %v1009_v49 = vadd.s32 232, %v3744_v16  ;;  %vm2332_vm14 = vcmask 1046528  }
  0xe2   : > { %v2062_v54 = vor.u32 %v2060_v21, %v2059_v20  ;;  %v3983_v57 = vsel %vm1992_vm8, %v2059_v20, %v2070_v24  ;;  %v2086_v31 = vor.u32 %v2084_v34, %v3949_v28  ;;  %v2078_v62 = vor.u32 %v2076_v37, %v2075_v33 }
  0xe3   : > { %v1233_v63 = vand.u32 15, %v1011_v38  ;;  %vm1621_vm15 = vsmask.f32 7424  ;;  %vm2122_vm4 = vcmp.ne.s16.totalorder %v3914_v1, 0  ;;  %vm2123_vm6 = vcmp.ne.s16.totalorder %v3906_v61, 0 }
  0xe4   : > { %v3994_v18 = vsel %vm1992_vm8, %v3883_v53, %v2062_v54  ;;  %v4004_v20 = vsel %vm1992_vm8, %v3919_v3, %v2078_v62 }
  0xe5   : > { %vm4006_vm5 = vcmp.lt.s32.totalorder %v1233_v63, 15 }
  0xe6   : > { %vm1911_vm10 = vmpackc.low %vm4006_vm5, %vm4006_vm5  ;;  %vm2127_vm5 = vcmp.ne.s16.totalorder %v3975_v48, 0 }
  0xe7   : > { %v1943_v54 = vsel %vm1911_vm10, 65537, %v3482_v22 }
 0x15e   : > { %v3373_v0 = vpop.f32.mrb[0].mxu0 }
 0x15f   : > { %v634_v5 = vadd.f32 %v3373_v0, %v3891_v55  ;;  %v625_v6 = vpop.f32.mrb[1].mxu0 }
 0x160   : > { %v626_v10 = vadd.f32 %v3891_v55, %v625_v6  ;;  %v3374_v11 = vpop.f32.mrb[2].mxu0  ;;  %v3989_v6 = vrot.slane %v2097_v43, 7 }
 0x161   : > { %v754_v19 = vmax.f32 %v634_v5, 0.0  ;;  %v637_v14 = vadd.f32 %v3374_v11, %v3891_v55  ;;  %v628_v13 = vpop.f32.mrb[3].mxu0  ;;  %v2089_v5 = vshrl.u32 %v3962_v42, 16  ;;  %v1219_v11 = vand.u32 15, %v1009_v49 }
 0x162   : > { %v752_v15 = vmax.f32 %v626_v10, 0.0  ;;  %v629_v23 = vadd.f32 %v3891_v55, %v628_v13  ;;  %v2100_v10 = vshll.u32 %v3947_v25, 16 }
 0x163   : > { %v3273_v26 = vpack.c.bf16 %v754_v19, %v754_v19  ;;  %v755_v27 = vmax.f32 %v637_v14, 0.0  ;;  %v2091_v25 = vrot.slane %v2089_v5, 7  ;;  %vm4028_vm9 = vcmp.lt.s32.totalorder %v1219_v11, 15 }
 0x164   : > { %v3271_v30 = vpack.c.bf16 %v752_v15, %v752_v15  ;;  %v753_v32 = vmax.f32 %v629_v23, 0.0  ;;  %vm1909_vm11 = vmpackc.low %vm4028_vm9, %vm4028_vm9  ;;  %vm2129_vm9 = vcmp.ne.s16.totalorder %v3983_v57, 0 }
 0x165   : > { %915 = vst.msk [vmem:[%s3942_s12 + $0x8] sm:$0xf] %vm912_vm7, %v3273_v26  ;;  %v785_v35 = vpack.c.bf16 %v755_v27, %v754_v19  ;;  %v3274_v36 = vpack.c.bf16 %v755_v27, %v755_v27  ;;  %v3997_v19 = vsel %vm1992_vm8, %v2075_v33, %v2086_v31  ;;  %v2092_v26 = vshll.u32 %v3962_v42, 16 }
 0x166   : > { %913 = vst.msk [vmem:[%s3942_s12] sm:$0xf] %vm912_vm7, %v3271_v30  ;;  %v784_v39 = vpack.c.bf16 %v753_v32, %v752_v15  ;;  %v3272_v40 = vpack.c.bf16 %v753_v32, %v753_v32  ;;  %v3377_v41 = vpop.f32.mrb[4].mxu0  ;;  %v2102_v32 = vor.u32 %v2100_v10, %v3989_v6  ;;  %vm2131_vm10 = vcmp.ne.s16.totalorder %v3997_v19, 0 }
 0x167   : > { %916 = vst.msk [vmem:[%s3942_s12 + $0xc] sm:$0xf] %vm912_vm7, %v3274_v36  ;;  %v650_v44 = vadd.f32 %v3377_v41, %v3891_v55  ;;  %v641_v46 = vpop.f32.mrb[5].mxu0 }
 0x168   : > { %964 = vst.msk [vmem:[#allocation2 + $0x10] sm:$0xff] %vm458_vm1, %v785_v35  ;;  %963 = vst.msk [vmem:[#allocation2 + $0x8] sm:$0xff] %vm458_vm1, %v784_v39  ;;  %v642_v50 = vadd.f32 %v3891_v55, %v641_v46  ;;  %v3378_v52 = vpop.f32.mrb[6].mxu0 }
 0x169   : > { %914 = vst.msk [vmem:[%s3942_s12 + $0x4] sm:$0xf] %vm912_vm7, %v3272_v40  ;;  %v758_v58 = vmax.f32 %v650_v44, 0.0  ;;  %v653_v56 = vadd.f32 %v3378_v52, %v3891_v55  ;;  %v644_v59 = vpop.f32.mrb[7].mxu0 }
 0x16a   : > { %v756_v0 = vmax.f32 %v642_v50, 0.0  ;;  %v645_v4 = vadd.f32 %v3891_v55, %v644_v59 }
 0x16b   : > { %v3277_v8 = vpack.c.bf16 %v758_v58, %v758_v58  ;;  %v759_v9 = vmax.f32 %v653_v56, 0.0 }
 0x16c   : > { %v3275_v12 = vpack.c.bf16 %v756_v0, %v756_v0  ;;  %v757_v17 = vmax.f32 %v645_v4, 0.0  ;;  %v4064_v4 = vsel %vm1992_vm8, %v2091_v25, %v2102_v32 }
 0x16d   : > { %919 = vst.msk [vmem:[%s3942_s12 + $0x18] sm:$0xf] %vm912_vm7, %v3277_v8  ;;  %v787_v14 = vpack.c.bf16 %v759_v9, %v758_v58  ;;  %v3278_v13 = vpack.c.bf16 %v759_v9, %v759_v9 }
 0x16e   : > { %917 = vst.msk [vmem:[%s3942_s12 + $0x10] sm:$0xf] %vm912_vm7, %v3275_v12  ;;  %v786_v53 = vpack.c.bf16 %v757_v17, %v756_v0  ;;  %v3276_v15 = vpack.c.bf16 %v757_v17, %v757_v17  ;;  %v3381_v23 = vpop.f32.mrb[8].mxu0  ;;  %v2094_v0 = vor.u32 %v2092_v26, %v2091_v25 }
 0x16f   : > { %v4012_v24 = vld [vmem:[#allocation2 + $0x10] sm:$0xff]  ;;  %920 = vst.msk [vmem:[%s3942_s12 + $0x1c] sm:$0xf] %vm912_vm7, %v3278_v13  ;;  %v666_v3 = vadd.f32 %v3381_v23, %v3891_v55  ;;  %v657_v27 = vpop.f32.mrb[9].mxu0  ;;  %v4020_v29 = vld [vmem:[#allocation2 + $0x8] sm:$0xff] }
 0x170   : > { %966 = vst.msk [vmem:[#allocation2 + $0x20] sm:$0xff] %vm458_vm1, %v787_v14  ;;  %v4025_v30 = vsel %vm2121_vm12, %v4012_v24, 0  ;;  %965 = vst.msk [vmem:[#allocation2 + $0x18] sm:$0xff] %vm458_vm1, %v786_v53  ;;  %v658_v34 = vadd.f32 %v3891_v55, %v657_v27  ;;  %v3382_v35 = vpop.f32.mrb[10].mxu0  ;;  %v2155_v36 = vshll.u32 %v4020_v29, 16  ;;  %v4040_v60 = vsel %vm2120_vm13, %v4020_v29, 0 }
 0x171   : > { %918 = vst.msk [vmem:[%s3942_s12 + $0x14] sm:$0xf] %vm912_vm7, %v3276_v15  ;;  %v2162_v37 = vshll.u32 %v4012_v24, 16  ;;  %v762_v38 = vmax.f32 %v666_v3, 0.0  ;;  %v669_v39 = vadd.f32 %v3382_v35, %v3891_v55  ;;  %v660_v40 = vpop.f32.mrb[11].mxu0  ;;  %v2333_v41 = vrot.slane %v4040_v60, 1 }
 0x172   : > { %v2334_v42 = vrot.slane %v4025_v30, 1  ;;  %v760_v43 = vmax.f32 %v658_v34, 0.0  ;;  %v661_v51 = vadd.f32 %v3891_v55, %v660_v40  ;;  %v2157_v44 = vrot.slane %v2155_v36, 1 }
 0x173   : > { %v2158_v46 = vshrl.u32 %v4020_v29, 16  ;;  %v3281_v49 = vpack.c.bf16 %v762_v38, %v762_v38  ;;  %v763_v50 = vmax.f32 %v669_v39, 0.0  ;;  %v2164_v59 = vrot.slane %v2162_v37, 1 }
 0x174   : > { %v2335_v52 = vsel %vm2332_vm14, %v2333_v41, %v2334_v42  ;;  %v3279_v31 = vpack.c.bf16 %v760_v43, %v760_v43  ;;  %v761_v58 = vmax.f32 %v661_v51, 0.0  ;;  %2281 = vrot.lane.b32.xlu1 %v2157_v44, %s3481_s30  ;;  %vm2124_vm12 = vcmp.ne.s16.totalorder %v3924_v7, 0 }
 0x175   : > { %v2160_v56 = vor.u32 %v2158_v46, %v2157_v44  ;;  %2368 = vrot.lane.b32.xlu0 %v2335_v52, %s3480_s29  ;;  %923 = vst.msk [vmem:[%s3942_s12 + $0x28] sm:$0xf] %vm912_vm7, %v3281_v49  ;;  %v789_v62 = vpack.c.bf16 %v763_v50, %v762_v38  ;;  %v3282_v63 = vpack.c.bf16 %v763_v50, %v763_v50  ;;  %v2166_v11 = vshrl.u32 %v4012_v24, 16  ;;  %v4110_v44 = vld [vmem:[%s4782_s3] sm:$0x3f]  }
 0x176   : > { %921 = vst.msk [vmem:[%s3942_s12 + $0x20] sm:$0xf] %vm912_vm7, %v3279_v31  ;;  %v788_v5 = vpack.c.bf16 %v761_v58, %v760_v43  ;;  %v3280_v8 = vpack.c.bf16 %v761_v58, %v761_v58  ;;  %v3385_v9 = vpop.f32.mrb[12].mxu0  ;;  %vm2125_vm13 = vcmp.ne.s16.totalorder %v3917_v2, 0  ;;  %v1941_v53 = vsel %vm1909_vm11, 65537, %v3482_v22  ;;  %3438 = vmatprep.subr.msk.bf16.mxu1 %vm587_vm0, %v4110_v44 }
 0x177   : > { %v2165_v10 = vsel %vm1621_vm15, %v2160_v56, %v2164_v59  ;;  %v4070_v12 = vld [vmem:[#allocation2 + $0x20] sm:$0xff]  ;;  %924 = vst.msk [vmem:[%s3942_s12 + $0x2c] sm:$0xf] %vm912_vm7, %v3282_v63  ;;  %v682_v17 = vadd.f32 %v3385_v9, %v3891_v55  ;;  %v673_v14 = vpop.f32.mrb[13].mxu0  ;;  %v4077_v13 = vld [vmem:[#allocation2 + $0x18] sm:$0xff]  ;;  %v4087_v15 = vcombine.low %v3789_v45, %v1943_v54  ;;  %v2168_v3 = vor.u32 %v2166_v11, %v2164_v59 }
 0x178   : > { %968 = vst.msk [vmem:[#allocation2 + $0x30] sm:$0xff] %vm458_vm1, %v789_v62  ;;  %v2178_v21 = vshll.u32 %v4070_v12, 16  ;;  %967 = vst.msk [vmem:[#allocation2 + $0x28] sm:$0xff] %vm458_vm1, %v788_v5  ;;  %v674_v23 = vadd.f32 %v3891_v55, %v673_v14  ;;  %v3386_v25 = vpop.f32.mrb[14].mxu0  ;;  %v2139_v26 = vsel %vm2122_vm4, %v4077_v13, 0  ;;  %v2170_v27 = vshll.u32 %v4077_v13, 16 }
 0x179   : > { %922 = vst.msk [vmem:[%s3942_s12 + $0x24] sm:$0xf] %vm912_vm7, %v3280_v8  ;;  %2283 = vrot.lane.b32.xlu0 %v2165_v10, %s3481_s30  ;;  %v766_v30 = vmax.f32 %v682_v17, 0.0  ;;  %v685_v32 = vadd.f32 %v3386_v25, %v3891_v55  ;;  %v676_v33 = vpop.f32.mrb[15].mxu0  ;;  %v2336_v34 = vrot.slane %v2139_v26, 1  ;;  %v4102_v35 = vsel %vm2123_vm6, %v4070_v12, 0 }
 0x17a   : > { %v764_v36 = vmax.f32 %v674_v23, 0.0  ;;  %v677_v37 = vadd.f32 %v3891_v55, %v676_v33  ;;  %v2172_v38 = vrot.slane %v2170_v27, 1  ;;  %v2174_v1 = vshrl.u32 %v4077_v13, 16 }
 0x17b   : > { %v3285_v39 = vpack.c.bf16 %v766_v30, %v766_v30  ;;  %v767_v40 = vmax.f32 %v685_v32, 0.0  ;;  %v2337_v43 = vsel %vm2332_vm14, %v2334_v42, %v2336_v34  ;;  %v2180_v51 = vrot.slane %v2178_v21, 1 }
 0x17c   : > { %v3283_v61 = vpack.c.bf16 %v764_v36, %v764_v36  ;;  %v765_v46 = vmax.f32 %v677_v37, 0.0  ;;  %v2173_v49 = vsel %vm1621_vm15, %v2168_v3, %v2172_v38  ;;  %v2176_v50 = vor.u32 %v2174_v1, %v2172_v38 }
 0x17d   : > { %2370 = vrot.lane.b32.xlu0 %v2337_v43, %s3480_s29  ;;  %927 = vst.msk [vmem:[%s3942_s12 + $0x38] sm:$0xf] %vm912_vm7, %v3285_v39  ;;  %v791_v52 = vpack.c.bf16 %v767_v40, %v766_v30  ;;  %v3286_v54 = vpack.c.bf16 %v767_v40, %v767_v40  ;;  %2285 = vrot.lane.b32.xlu1 %v2173_v49, %s3481_s30  ;;  %v2338_v42 = vrot.slane %v4102_v35, 1  ;;  %vm2126_vm4 = vcmp.ne.s16.totalorder %v3971_v47, 0 }
 0x17e   : > { %v4121_v31 = vsel %vm1992_vm8, %v3949_v28, %v2094_v0  ;;  %925 = vst.msk [vmem:[%s3942_s12 + $0x30] sm:$0xf] %vm912_vm7, %v3283_v61  ;;  %v790_v58 = vpack.c.bf16 %v765_v46, %v764_v36  ;;  %v3284_v56 = vpack.c.bf16 %v765_v46, %v765_v46  ;;  %v3389_v59 = vpop.f32.mrb[16].mxu0  ;;  %v2181_v62 = vsel %vm1621_vm15, %v2176_v50, %v2180_v51 }
 0x17f   : > { %v2182_v63 = vshrl.u32 %v4070_v12, 16  ;;  %v4129_v5 = vld [vmem:[#allocation2 + $0x30] sm:$0xff]  ;;  %928 = vst.msk [vmem:[%s3942_s12 + $0x3c] sm:$0xf] %vm912_vm7, %v3286_v54  ;;  %v698_v28 = vadd.f32 %v3389_v59, %v3891_v55  ;;  %v689_v0 = vpop.f32.mrb[17].mxu0  ;;  %v4136_v8 = vld [vmem:[#allocation2 + $0x28] sm:$0xff]  ;;  %v4140_v10 = vcombine.low %v3789_v45, %v1941_v53  ;;  %v2339_v27 = vsel %vm2332_vm14, %v2336_v34, %v2338_v42 }
 0x180   : > { %970 = vst.msk [vmem:[#allocation2 + $0x40] sm:$0xff] %vm458_vm1, %v791_v52  ;;  %v2194_v9 = vshll.u32 %v4129_v5, 16  ;;  %v2113_v11 = vshrl.u32 %v4087_v15, 16  ;;  %969 = vst.msk [vmem:[#allocation2 + $0x38] sm:$0xff] %vm458_vm1, %v790_v58  ;;  %v690_v17 = vadd.f32 %v3891_v55, %v689_v0  ;;  %v3390_v14 = vpop.f32.mrb[18].mxu0  ;;  %v2186_v23 = vshll.u32 %v4136_v8, 16 }
 0x181   : > { %926 = vst.msk [vmem:[%s3942_s12 + $0x34] sm:$0xf] %vm912_vm7, %v3284_v56  ;;  %2287 = vrot.lane.b32.xlu0 %v2181_v62, %s3481_s30  ;;  %v2184_v21 = vor.u32 %v2182_v63, %v2180_v51  ;;  %v2141_v25 = vsel %vm2124_vm12, %v4136_v8, 0  ;;  %v770_v53 = vmax.f32 %v698_v28, 0.0  ;;  %v701_v26 = vadd.f32 %v3390_v14, %v3891_v55  ;;  %v692_v3 = vpop.f32.mrb[19].mxu0  ;;  %2366 = vrot.lane.b32.xlu1 %v2333_v41, %s3480_s29 }
 0x182   : > { %v4162_v30 = vsel %vm2125_vm13, %v4129_v5, 0  ;;  %v768_v7 = vmax.f32 %v690_v17, 0.0  ;;  %v693_v32 = vadd.f32 %v3891_v55, %v692_v3  ;;  %v2188_v33 = vrot.slane %v2186_v23, 1 }
 0x183   : > { %v2190_v36 = vshrl.u32 %v4136_v8, 16  ;;  %v3289_v37 = vpack.c.bf16 %v770_v53, %v770_v53  ;;  %v771_v60 = vmax.f32 %v701_v26, 0.0  ;;  %v2196_v41 = vrot.slane %v2194_v9, 1 }
 0x184   : > { %v2340_v38 = vrot.slane %v2141_v25, 1  ;;  %v3287_v1 = vpack.c.bf16 %v768_v7, %v768_v7  ;;  %v769_v39 = vmax.f32 %v693_v32, 0.0  ;;  %v2189_v34 = vsel %vm1621_vm15, %v2184_v21, %v2188_v33 }
 0x185   : > { %2372 = vrot.lane.b32.xlu0 %v2339_v27, %s3480_s29  ;;  %v2192_v2 = vor.u32 %v2190_v36, %v2188_v33  ;;  %931 = vst.msk [vmem:[%s3942_s12 + $0x48] sm:$0xf] %vm912_vm7, %v3289_v37  ;;  %v793_v40 = vpack.c.bf16 %v771_v60, %v770_v53  ;;  %v3290_v43 = vpack.c.bf16 %v771_v60, %v771_v60  ;;  %v2342_v51 = vrot.slane %v4162_v30, 1 }
 0x186   : > { %2289 = vrot.lane.b32.xlu1 %v2189_v34, %s3481_s30  ;;  %vm2128_vm6 = vcmp.ne.s16.totalorder %v3994_v18, 0  ;;  %v2663_v61 = vsel %vm587_vm0, %v4110_v44, 0  ;;  %929 = vst.msk [vmem:[%s3942_s12 + $0x40] sm:$0xf] %vm912_vm7, %v3287_v1  ;;  %v792_v46 = vpack.c.bf16 %v769_v39, %v768_v7  ;;  %v3288_v49 = vpack.c.bf16 %v769_v39, %v769_v39  ;;  %v3393_v50 = vpop.f32.mrb[20].mxu0 }
 0x187   : > { %v2197_v52 = vsel %vm1621_vm15, %v2192_v2, %v2196_v41  ;;  %v2198_v54 = vshrl.u32 %v4129_v5, 16  ;;  %v4179_v58 = vld [vmem:[#allocation2 + $0x40] sm:$0xff]  ;;  %3404 = vmatpush3.bf16.msra.mxu1 %v2663_v61  ;;  %932 = vst.msk [vmem:[%s3942_s12 + $0x4c] sm:$0xf] %vm912_vm7, %v3290_v43  ;;  %v714_v44 = vadd.f32 %v3393_v50, %v3891_v55  ;;  %v705_v56 = vpop.f32.mrb[21].mxu0  ;;  %v2341_v59 = vsel %vm2332_vm14, %v2338_v42, %v2340_v38  ;;  %v4189_v62 = vld [vmem:[#allocation2 + $0x38] sm:$0xff] }
 0x188   : > { %972 = vst.msk [vmem:[#allocation2 + $0x50] sm:$0xff] %vm458_vm1, %v793_v40  ;;  %v2210_v63 = vshll.u32 %v4179_v58, 16  ;;  %v2105_v28 = vshrl.u32 %v4140_v10, 16  ;;  %971 = vst.msk [vmem:[#allocation2 + $0x48] sm:$0xff] %vm458_vm1, %v792_v46  ;;  %v706_v0 = vadd.f32 %v3891_v55, %v705_v56  ;;  %v3394_v9 = vpop.f32.mrb[22].mxu0  ;;  %v2202_v35 = vshll.u32 %v4189_v62, 16 }
 0x189   : > { %930 = vst.msk [vmem:[%s3942_s12 + $0x44] sm:$0xf] %vm912_vm7, %v3288_v49  ;;  %2291 = vrot.lane.b32.xlu0 %v2197_v52, %s3481_s30  ;;  %v2200_v17 = vor.u32 %v2198_v54, %v2196_v41  ;;  %v2143_v42 = vsel %vm2126_vm4, %v4189_v62, 0  ;;  %v774_v14 = vmax.f32 %v714_v44, 0.0  ;;  %v717_v21 = vadd.f32 %v3394_v9, %v3891_v55  ;;  %v708_v23 = vpop.f32.mrb[23].mxu0 }
 0x18a   : > { %2374 = vrot.lane.b32.xlu1 %v2341_v59, %s3480_s29  ;;  %v2343_v25 = vsel %vm2332_vm14, %v2340_v38, %v2342_v51  ;;  %v4210_v53 = vsel %vm2127_vm5, %v4179_v58, 0  ;;  %v772_v26 = vmax.f32 %v706_v0, 0.0  ;;  %v709_v47 = vadd.f32 %v3891_v55, %v708_v23 }
 0x18b   : > { %v2204_v3 = vrot.slane %v2202_v35, 1  ;;  %v2206_v27 = vshrl.u32 %v4189_v62, 16  ;;  %v3293_v7 = vpack.c.bf16 %v774_v14, %v774_v14  ;;  %v775_v32 = vmax.f32 %v717_v21, 0.0 }
 0x18c   : > { %v2212_v33 = vrot.slane %v2210_v63, 1  ;;  %v2344_v36 = vrot.slane %v2143_v42, 1  ;;  %v3291_v37 = vpack.c.bf16 %v772_v26, %v772_v26  ;;  %v773_v60 = vmax.f32 %v709_v47, 0.0 }
 0x18d   : > { %2376 = vrot.lane.b32.xlu0 %v2343_v25, %s3480_s29  ;;  %v2205_v41 = vsel %vm1621_vm15, %v2200_v17, %v2204_v3  ;;  %v2208_v48 = vor.u32 %v2206_v27, %v2204_v3  ;;  %935 = vst.msk [vmem:[%s3942_s12 + $0x58] sm:$0xf] %vm912_vm7, %v3293_v7  ;;  %v795_v38 = vpack.c.bf16 %v775_v32, %v774_v14  ;;  %v2346_v39 = vrot.slane %v4210_v53, 1 }
 0x18e   : > { %v3294_v1 = vpack.c.bf16 %v775_v32, %v775_v32  ;;  %2293 = vrot.lane.b32.xlu1 %v2205_v41, %s3481_s30  ;;  %vm2130_vm0 = vcmp.ne.s16.totalorder %v4004_v20, 0  ;;  %v4223_v34 = vrot.slane %v2113_v11, 7  ;;  %933 = vst.msk [vmem:[%s3942_s12 + $0x50] sm:$0xf] %vm912_vm7, %v3291_v37  ;;  %v794_v2 = vpack.c.bf16 %v773_v60, %v772_v26  ;;  %v3397_v43 = vpop.f32.mrb[24].mxu0 }
 0x18f   : > { %v3292_v40 = vpack.c.bf16 %v773_v60, %v773_v60  ;;  %v2213_v61 = vsel %vm1621_vm15, %v2208_v48, %v2212_v33  ;;  %v2214_v46 = vshrl.u32 %v4179_v58, 16  ;;  %v4229_v49 = vld [vmem:[#allocation2 + $0x50] sm:$0xff]  ;;  %974 = vst.msk [vmem:[#allocation2 + $0x60] sm:$0xff] %vm458_vm1, %v795_v38  ;;  %v730_v11 = vadd.f32 %v3397_v43, %v3891_v55  ;;  %v721_v50 = vpop.f32.mrb[25].mxu0  ;;  %v4239_v54 = vld [vmem:[#allocation2 + $0x48] sm:$0xff] }
 0x190   : > { %936 = vst.msk [vmem:[%s3942_s12 + $0x5c] sm:$0xf] %vm912_vm7, %v3294_v1  ;;  %v2345_v52 = vsel %vm2332_vm14, %v2342_v51, %v2344_v36  ;;  %v2226_v44 = vshll.u32 %v4229_v49, 16  ;;  %v2116_v56 = vshll.u32 %v4087_v15, 16  ;;  %v722_v59 = vadd.f32 %v3891_v55, %v721_v50  ;;  %v3398_v63 = vpop.f32.mrb[26].mxu0 }
 0x191   : > { %934 = vst.msk [vmem:[%s3942_s12 + $0x54] sm:$0xf] %vm912_vm7, %v3292_v40  ;;  %2295 = vrot.lane.b32.xlu0 %v2213_v61, %s3481_s30  ;;  %v2216_v0 = vor.u32 %v2214_v46, %v2212_v33  ;;  %v2218_v30 = vshll.u32 %v4239_v54, 16  ;;  %v2145_v51 = vsel %vm2128_vm6, %v4239_v54, 0  ;;  %v778_v9 = vmax.f32 %v730_v11, 0.0  ;;  %v724_v35 = vpop.f32.mrb[27].mxu0 }
 0x192   : > { %973 = vst.msk [vmem:[#allocation2 + $0x58] sm:$0xff] %vm458_vm1, %v794_v2  ;;  %v733_v17 = vadd.f32 %v3398_v63, %v3891_v55  ;;  %2378 = vrot.lane.b32.xlu1 %v2345_v52, %s3480_s29  ;;  %v2347_v42 = vsel %vm2332_vm14, %v2344_v36, %v2346_v39  ;;  %v4260_v14 = vsel %vm2129_vm9, %v4229_v49, 0  ;;  %v776_v21 = vmax.f32 %v722_v59, 0.0 }
 0x193   : > { %v725_v18 = vadd.f32 %v3891_v55, %v724_v35  ;;  %v2220_v23 = vrot.slane %v2218_v30, 1  ;;  %v2222_v25 = vshrl.u32 %v4239_v54, 16  ;;  %v3297_v26 = vpack.c.bf16 %v778_v9, %v778_v9 }
 0x194   : > { %v779_v47 = vmax.f32 %v733_v17, 0.0  ;;  %v2228_v3 = vrot.slane %v2226_v44, 1  ;;  %v2348_v27 = vrot.slane %v2145_v51, 1  ;;  %v3295_v7 = vpack.c.bf16 %v776_v21, %v776_v21 }
 0x195   : > { %v777_v32 = vmax.f32 %v725_v18, 0.0  ;;  %2380 = vrot.lane.b32.xlu0 %v2347_v42, %s3480_s29  ;;  %v2221_v57 = vsel %vm1621_vm15, %v2216_v0, %v2220_v23  ;;  %v2224_v33 = vor.u32 %v2222_v25, %v2220_v23  ;;  %939 = vst.msk [vmem:[%s3942_s12 + $0x68] sm:$0xf] %vm912_vm7, %v3297_v26  ;;  %v2350_v60 = vrot.slane %v4260_v14, 1 }
 0x196   : > { %v797_v36 = vpack.c.bf16 %v779_v47, %v778_v9  ;;  %v3298_v37 = vpack.c.bf16 %v779_v47, %v779_v47  ;;  %2297 = vrot.lane.b32.xlu1 %v2221_v57, %s3481_s30  ;;  %v4272_v41 = vrot.slane %v2105_v28, 7  ;;  %937 = vst.msk [vmem:[%s3942_s12 + $0x60] sm:$0xf] %vm912_vm7, %v3295_v7  ;;  %v3401_v1 = vpop.f32.mrb[28].mxu0  ;;  %v2230_v40 = vshrl.u32 %v4229_v49, 16  ;;  %v4278_v43 = vld [vmem:[#allocation2 + $0x60] sm:$0xff] }
 0x197   : > { %v796_v48 = vpack.c.bf16 %v777_v32, %v776_v21  ;;  %v3296_v38 = vpack.c.bf16 %v777_v32, %v777_v32  ;;  %v2229_v2 = vsel %vm1621_vm15, %v2224_v33, %v2228_v3  ;;  %v746_v61 = vadd.f32 %v3401_v1, %v3891_v55  ;;  %v737_v28 = vpop.f32.mrb[29].mxu0 }
 0x198   : > { %940 = vst.msk [vmem:[%s3942_s12 + $0x6c] sm:$0xf] %vm912_vm7, %v3298_v37  ;;  %v2349_v46 = vsel %vm2332_vm14, %v2346_v39, %v2348_v27  ;;  %v2242_v50 = vshll.u32 %v4278_v43, 16  ;;  %v2108_v52 = vshll.u32 %v4140_v10, 16  ;;  %v738_v44 = vadd.f32 %v3891_v55, %v737_v28  ;;  %v3402_v59 = vpop.f32.mrb[30].mxu0 }
 0x199   : > { %976 = vst.msk [vmem:[#allocation2 + $0x70] sm:$0xff] %vm458_vm1, %v797_v36  ;;  %v4287_v11 = vld [vmem:[#allocation2 + $0x58] sm:$0xff]  ;;  %975 = vst.msk [vmem:[#allocation2 + $0x68] sm:$0xff] %vm458_vm1, %v796_v48  ;;  %2299 = vrot.lane.b32.xlu0 %v2229_v2, %s3481_s30  ;;  %v2232_v63 = vor.u32 %v2230_v40, %v2228_v3  ;;  %v782_v0 = vmax.f32 %v746_v61, 0.0  ;;  %v749_v30 = vadd.f32 %v3402_v59, %v3891_v55  ;;  %v740_v10 = vpop.f32.mrb[31].mxu0  ;;  %v2148_v9 = vsel %vm2131_vm10, %v4278_v43, 0 }
 0x19a   : > { %938 = vst.msk [vmem:[%s3942_s12 + $0x64] sm:$0xf] %vm912_vm7, %v3296_v38  ;;  %v2234_v53 = vshll.u32 %v4287_v11, 16  ;;  %v2147_v39 = vsel %vm2130_vm0, %v4287_v11, 0  ;;  %2382 = vrot.lane.b32.xlu1 %v2349_v46, %s3480_s29  ;;  %v2351_v51 = vsel %vm2332_vm14, %v2348_v27, %v2350_v60  ;;  %v780_v17 = vmax.f32 %v738_v44, 0.0 }
 0x19b   : > { %v741_v35 = vadd.f32 %v3891_v55, %v740_v10  ;;  %v2238_v42 = vshrl.u32 %v4287_v11, 16  ;;  %v3301_v21 = vpack.c.bf16 %v782_v0, %v782_v0  ;;  %v783_v18 = vmax.f32 %v749_v30, 0.0 }
 0x19c   : > { %v2236_v20 = vrot.slane %v2234_v53, 1  ;;  %v2244_v23 = vrot.slane %v2242_v50, 1  ;;  %v2352_v25 = vrot.slane %v2147_v39, 1  ;;  %v3299_v26 = vpack.c.bf16 %v780_v17, %v780_v17 }
 0x19d   : > { %v781_v47 = vmax.f32 %v741_v35, 0.0  ;;  %2384 = vrot.lane.b32.xlu0 %v2351_v51, %s3480_s29  ;;  %943 = vst.msk [vmem:[%s3942_s12 + $0x78] sm:$0xf] %vm912_vm7, %v3301_v21  ;;  %v799_v27 = vpack.c.bf16 %v783_v18, %v782_v0  ;;  %v3302_v55 = vpack.c.bf16 %v783_v18, %v783_v18  ;;  %vm2132_vm11 = vcmp.ne.s16.totalorder %v4121_v31, 0 }
 0x19e   : > { %v2237_v3 = vsel %vm1621_vm15, %v2232_v63, %v2236_v20  ;;  %v2240_v19 = vor.u32 %v2238_v42, %v2236_v20  ;;  %941 = vst.msk [vmem:[%s3942_s12 + $0x70] sm:$0xf] %vm912_vm7, %v3299_v26  ;;  %v2354_v36 = vrot.slane %v2148_v9, 1  ;;  %vm2133_vm12 = vcmp.ne.s16.totalorder %v4064_v4, 0 }
 0x19f   : > { %2301 = vrot.lane.b32.xlu1 %v2237_v3, %s3481_s30  ;;  %v798_v7 = vpack.c.bf16 %v781_v47, %v780_v17  ;;  %v3300_v32 = vpack.c.bf16 %v781_v47, %v781_v47  ;;  %944 = vst.msk [vmem:[%s3942_s12 + $0x7c] sm:$0xf] %vm912_vm7, %v3302_v55  ;;  %v2110_v48 = vor.u32 %v2108_v52, %v4272_v41  ;;  %v2246_v2 = vshrl.u32 %v4278_v43, 16  ;;  %v1783_v47 = vld [vmem:[#allocation2 + $0x88] sm:$0x1] }
 0x1a0   : > { %v2245_v57 = vsel %vm1621_vm15, %v2240_v19, %v2244_v23  ;;  %v4318_v33 = vld [vmem:[#allocation2 + $0x70] sm:$0xff]  ;;  %978 = vst.msk [vmem:[#allocation2 + $0x80] sm:$0xff] %vm458_vm1, %v799_v27  ;;  %v4324_v37 = vld [vmem:[#allocation2 + $0x68] sm:$0xff]  ;;  %v2118_v38 = vor.u32 %v2116_v56, %v4223_v34  ;;  %v2353_v1 = vsel %vm2332_vm14, %v2350_v60, %v2352_v25  ;;  %v2355_v14 = vsel %vm2332_vm14, %v2352_v25, %v2354_v36 }
 0x1a1   : > { %942 = vst.msk [vmem:[%s3942_s12 + $0x74] sm:$0xf] %vm912_vm7, %v3300_v32  ;;  %2303 = vrot.lane.b32.xlu0 %v2245_v57, %s3481_s30  ;;  %v2250_v40 = vshll.u32 %v4324_v37, 16  ;;  %v2258_v61 = vshll.u32 %v4318_v33, 16  ;;  %v2149_v15 = vsel %vm2132_vm11, %v4324_v37, 0  ;;  %v2248_v56 = vor.u32 %v2246_v2, %v2244_v23 }
 0x1a2   : > { %977 = vst.msk [vmem:[#allocation2 + $0x78] sm:$0xff] %vm458_vm1, %v798_v7  ;;  %v2254_v46 = vshrl.u32 %v4324_v37, 16  ;;  %v2150_v60 = vsel %vm2133_vm12, %v4318_v33, 0  ;;  %v2111_v50 = vsel %vm1992_vm8, %v3989_v6, %v2110_v48  ;;  %v2119_v52 = vsel %vm1992_vm8, %v4272_v41, %v2118_v38 }
 0x1a3   : > { %2386 = vrot.lane.b32.xlu1 %v2353_v1, %s3480_s29  ;;  %v2252_v28 = vrot.slane %v2250_v40, 1  ;;  %v2260_v59 = vrot.slane %v2258_v61, 1  ;;  %v2356_v63 = vrot.slane %v2149_v15, 1  ;;  %vm2134_vm7 = vcmp.ne.s16.totalorder %v2111_v50, 0 }
 0x1a4   : > { %v2358_v4 = vrot.slane %v2150_v60, 1  ;;  %vm2135_vm13 = vcmp.ne.s16.totalorder %v2119_v52, 0  ;;  %v2262_v41 = vshrl.u32 %v4318_v33, 16  ;;  %vm2136_vm4 = vcmp.ne.s16.totalorder %v4223_v34, 0 }
 0x1a5   : > { %2388 = vrot.lane.b32.xlu0 %v2355_v14, %s3480_s29  ;;  %v2253_v31 = vsel %vm1621_vm15, %v2248_v56, %v2252_v28  ;;  %v2256_v44 = vor.u32 %v2254_v46, %v2252_v28  ;;  %v2357_v6 = vsel %vm2332_vm14, %v2354_v36, %v2356_v63  ;;  %v2153_v55 = vsel %vm2136_vm4, %v1783_v47, 0 }
 0x1a6   : > { %v2264_v9 = vor.u32 %v2262_v41, %v2260_v59  ;;  %v2359_v20 = vsel %vm2332_vm14, %v2356_v63, %v2358_v4  ;;  %v2364_v57 = vrot.slane %v2153_v55, 1  ;;  %v1016_v36 = vand.u32 15, %v3744_v16 }
 0x1a7   : > { %2305 = vrot.lane.b32.xlu1 %v2253_v31, %s3481_s30  ;;  %v2261_v53 = vsel %vm1621_vm15, %v2256_v44, %v2260_v59  ;;  %v4358_v39 = vld [vmem:[#allocation2 + $0x80] sm:$0xff]  ;;  %v982_v48 = vadd.s32 16, %v3744_v16  ;;  %v984_v1 = vadd.s32 32, %v3744_v16  ;;  %v986_v2 = vadd.s32 48, %v3744_v16 }
 0x1a8   : > { %v2274_v10 = vshll.u32 %v4358_v39, 16  ;;  %v2152_v42 = vsel %vm2135_vm13, %v4358_v39, 0  ;;  %v2278_v27 = vshrl.u32 %v4358_v39, 16  ;;  %vm1413_vm5 = vcmp.ge.s32.totalorder %v1016_v36, 1 }
 0x1a9   : > { %v4360_v0 = vld [vmem:[#allocation2 + $0x78] sm:$0xff]  ;;  %2307 = vrot.lane.b32.xlu0 %v2261_v53, %s3481_s30  ;;  %v2362_v3 = vrot.slane %v2152_v42, 1  ;;  %v1030_v38 = vand.u32 15, %v982_v48  ;;  %vm1509_vm6 = vmpackc.low %vm1413_vm5, %vm1413_vm5  ;;  %v1044_v40 = vand.u32 15, %v984_v1  ;;  %v1058_v15 = vand.u32 15, %v986_v2 }
 0x1aa   : > { %v2266_v30 = vshll.u32 %v4360_v0, 16  ;;  %v2151_v51 = vsel %vm2134_vm7, %v4360_v0, 0  ;;  %v2270_v35 = vshrl.u32 %v4360_v0, 16  ;;  %v2276_v23 = vrot.slane %v2274_v10, 1 }
 0x1ab   : > { %2390 = vrot.lane.b32.xlu1 %v2357_v6, %s3480_s29  ;;  %v2360_v25 = vrot.slane %v2151_v51, 1  ;;  %v2365_v34 = vsel %vm2332_vm14, %v2362_v3, %v2364_v57  ;;  %vm1415_vm9 = vcmp.ge.s32.totalorder %v1030_v38, 1  ;;  %v1541_v61 = vsel %vm1509_vm6, 65537, %v3482_v22 }
 0x1ac   : > { %v2268_v17 = vrot.slane %v2266_v30, 1  ;;  %v2280_v32 = vor.u32 %v2278_v27, %v2276_v23  ;;  %vm1511_vm0 = vmpackc.low %vm1415_vm9, %vm1415_vm9  ;;  %v988_v56 = vadd.s32 64, %v3744_v16  ;;  %v990_v28 = vadd.s32 80, %v3744_v16 }
 0x1ad   : > { %2392 = vrot.lane.b32.xlu0 %v2359_v20, %s3480_s29  ;;  %v2361_v19 = vsel %vm2332_vm14, %v2358_v4, %v2360_v25  ;;  %v2363_v7 = vsel %vm2332_vm14, %v2360_v25, %v2362_v3  ;;  %v3185_v46 = vcombine.low %v1541_v61, %v3789_v45  ;;  %vm1417_vm14 = vcmp.ge.s32.totalorder %v1044_v40, 1 }
 0x1ae   : > { %v2269_v21 = vsel %vm1621_vm15, %v2264_v9, %v2268_v17  ;;  %v2272_v18 = vor.u32 %v2270_v35, %v2268_v17  ;;  %v1543_v14 = vsel %vm1511_vm0, 65537, %v3482_v22  ;;  %vm1419_vm10 = vcmp.ge.s32.totalorder %v1058_v15, 1  ;;  %vm1513_vm11 = vmpackc.low %vm1417_vm14, %vm1417_vm14 }
 0x1af   : > { %2309 = vrot.lane.b32.xlu1 %v2269_v21, %s3481_s30  ;;  %v1072_v60 = vand.u32 15, %v988_v56  ;;  %v1086_v50 = vand.u32 15, %v990_v28  ;;  %v992_v52 = vadd.s32 96, %v3744_v16  ;;  %v1623_v31 = vshll.u32 %v3185_v46, 16  ;;  %vm1515_vm12 = vmpackc.low %vm1419_vm10, %vm1419_vm10 }
 0x1b0   : > { %v2277_v26 = vsel %vm1621_vm15, %v2272_v18, %v2276_v23  ;;  %v3186_v44 = vcombine.low %v1543_v14, %v3789_v45  ;;  %v1545_v59 = vsel %vm1513_vm11, 65537, %v3482_v22  ;;  %v1547_v53 = vsel %vm1515_vm12, 65537, %v3482_v22 }
 0x1b1   : > { %2311 = vrot.lane.b32.xlu0 %v2277_v26, %s3481_s30  ;;  %vm4398_vm7 = vcmp.ge.s32.totalorder %v1072_v60, 1  ;;  %vm4403_vm13 = vcmp.ge.s32.totalorder %v1086_v50, 1  ;;  %v1100_v6 = vand.u32 15, %v992_v52  ;;  %v4407_v41 = vrot.slane %v1623_v31, 1 }
 0x1b2   : > { %v1626_v30 = vshrl.u32 %v3185_v46, 16  ;;  %v1630_v10 = vshll.u32 %v3186_v44, 16  ;;  %v3187_v51 = vcombine.low %v1545_v59, %v3789_v45  ;;  %vm1517_vm4 = vmpackc.low %vm4398_vm7, %vm4398_vm7  ;;  %v994_v9 = vadd.s32 112, %v3744_v16 }
 0x1b3   : > { %2394 = vrot.lane.b32.xlu1 %v2361_v19, %s3480_s29  ;;  %v3188_v17 = vcombine.low %v1547_v53, %v3789_v45  ;;  %vm1519_vm5 = vmpackc.low %vm4403_vm13, %vm4403_vm13  ;;  %vm4418_vm6 = vcmp.ge.s32.totalorder %v1100_v6, 1  ;;  %v1549_v21 = vsel %vm1517_vm4, 65537, %v3482_v22  ;;  %v1634_v18 = vshrl.u32 %v3186_v44, 16 }
 0x1b4   : > { %v1628_v20 = vor.u32 %v1626_v30, %v4407_v41  ;;  %v1632_v42 = vrot.slane %v1630_v10, 1  ;;  %v1638_v23 = vshll.u32 %v3187_v51, 16  ;;  %v1551_v25 = vsel %vm1519_vm5, 65537, %v3482_v22  ;;  %vm1521_vm9 = vmpackc.low %vm4418_vm6, %vm4418_vm6 }
 0x1b5   : > { %2396 = vrot.lane.b32.xlu0 %v2363_v7, %s3480_s29  ;;  %v1114_v26 = vand.u32 15, %v994_v9  ;;  %v1646_v47 = vshll.u32 %v3188_v17, 16  ;;  %v996_v3 = vadd.s32 128, %v3744_v16  ;;  %v3189_v19 = vcombine.low %v1549_v21, %v3789_v45 }
 0x1b6   : > { %v1633_v27 = vsel %vm1621_vm15, %v1628_v20, %v1632_v42  ;;  %v3190_v55 = vcombine.low %v1551_v25, %v3789_v45  ;;  %v1636_v7 = vor.u32 %v1634_v18, %v1632_v42  ;;  %v1553_v57 = vsel %vm1521_vm9, 65537, %v3482_v22  ;;  %v1396_v25 = vld [vmem:[#allocation2] sm:$0x80] }
 0x1b7   : > { %2313 = vrot.lane.b32.xlu1 %v2280_v32, %s3481_s30  ;;  %v1640_v32 = vrot.slane %v1638_v23, 1  ;;  %vm4433_vm0 = vcmp.ge.s32.totalorder %v1114_v26, 1  ;;  %v1642_v36 = vshrl.u32 %v3187_v51, 16  ;;  %v1648_v48 = vrot.slane %v1646_v47, 1 }
 0x1b8   : > { %v1650_v38 = vshrl.u32 %v3188_v17, 16  ;;  %v1128_v1 = vand.u32 15, %v996_v3  ;;  %v1654_v2 = vshll.u32 %v3189_v19, 16  ;;  %v998_v40 = vadd.s32 144, %v3744_v16  ;;  %vm1523_vm14 = vmpackc.low %vm4433_vm0, %vm4433_vm0 }
 0x1b9   : > { %v1662_v61 = vshll.u32 %v3190_v55, 16  ;;  %v3191_v15 = vcombine.low %v1553_v57, %v3789_v45  ;;  %vm1750_vm10 = vcmp.ne.s16.totalorder %v1633_v27, 0  ;;  %v1641_v28 = vsel %vm1621_vm15, %v1636_v7, %v1640_v32 }
 0x1ba   : > { %v1644_v46 = vor.u32 %v1642_v36, %v1640_v32  ;;  %v1652_v14 = vor.u32 %v1650_v38, %v1648_v48  ;;  %vm4443_vm11 = vcmp.ge.s32.totalorder %v1128_v1, 1  ;;  %v1656_v50 = vrot.slane %v1654_v2, 1 }
 0x1bb   : > { %2398 = vrot.lane.b32.xlu1 %v2365_v34, %s3480_s29  ;;  %v1658_v52 = vshrl.u32 %v3189_v19, 16  ;;  %v1555_v31 = vsel %vm1523_vm14, 65537, %v3482_v22  ;;  %v1142_v44 = vand.u32 15, %v998_v40  ;;  %v1664_v59 = vrot.slane %v1662_v61, 1  ;;  %vm1525_vm7 = vmpackc.low %vm4443_vm11, %vm4443_vm11 }
 0x1bc   : > { %v1666_v63 = vshrl.u32 %v3190_v55, 16  ;;  %v1670_v53 = vshll.u32 %v3191_v15, 16  ;;  %vm1751_vm12 = vcmp.ne.s16.totalorder %v1641_v28, 0  ;;  %v1767_v6 = vsel %vm1750_vm10, %v4020_v29, 0 }
 0x1bd   : > { %v1649_v30 = vsel %vm1621_vm15, %v1644_v46, %v1648_v48  ;;  %v3192_v10 = vcombine.low %v1555_v31, %v3789_v45  ;;  %v1000_v51 = vadd.s32 160, %v3744_v16  ;;  %v4458_v35 = vsel %vm1621_vm15, %v1652_v14, %v1656_v50 }
 0x1be   : > { %v1660_v20 = vor.u32 %v1658_v52, %v1656_v50  ;;  %vm4460_vm13 = vcmp.ge.s32.totalorder %v1142_v44, 1  ;;  %v1668_v29 = vor.u32 %v1666_v63, %v1664_v59  ;;  %v1672_v18 = vrot.slane %v1670_v53, 1 }
 0x1bf   : > { %v1557_v23 = vsel %vm1525_vm7, 65537, %v3482_v22  ;;  %vm1749_vm4 = vcmp.ne.s16.totalorder %v4407_v41, 0  ;;  %v1674_v26 = vshrl.u32 %v3191_v15, 16  ;;  %vm1752_vm5 = vcmp.ne.s16.totalorder %v1649_v30, 0  ;;  %vm1527_vm6 = vmpackc.low %vm4460_vm13, %vm4460_vm13 }
 0x1c0   : > { %v1678_v3 = vshll.u32 %v3192_v10, 16  ;;  %v1156_v19 = vand.u32 15, %v1000_v51  ;;  %v1002_v27 = vadd.s32 176, %v3744_v16  ;;  %v1768_v7 = vsel %vm1751_vm12, %v4012_v24, 0 }
 0x1c1   : > { %vm1753_vm9 = vcmp.ne.s16.totalorder %v4458_v35, 0  ;;  %v4475_v41 = vcombine.low %v1557_v23, %v3789_v45  ;;  %v1766_v57 = vsel %vm1749_vm4, %v1396_v25, 0  ;;  %v1665_v36 = vsel %vm1621_vm15, %v1660_v20, %v1664_v59 }
 0x1c2   : > { %v4480_v48 = vsel %vm1621_vm15, %v1668_v29, %v1672_v18  ;;  %v1676_v1 = vor.u32 %v1674_v26, %v1672_v18  ;;  %v1682_v2 = vshrl.u32 %v3192_v10, 16  ;;  %v1559_v24 = vsel %vm1527_vm6, 65537, %v3482_v22 }
 0x1c3   : > { %v1680_v15 = vrot.slane %v1678_v3, 1  ;;  %vm4484_vm0 = vcmp.ge.s32.totalorder %v1156_v19, 1  ;;  %v1170_v28 = vand.u32 15, %v1002_v27  ;;  %v1686_v50 = vshll.u32 %v4475_v41, 16 }
 0x1c4   : > { %v1004_v52 = vadd.s32 192, %v3744_v16  ;;  %v4493_v63 = vcombine.low %v1559_v24, %v3789_v45  ;;  %vm1529_vm14 = vmpackc.low %vm4484_vm0, %vm4484_vm0  ;;  %vm1754_vm11 = vcmp.ne.s16.totalorder %v1665_v36, 0  ;;  %vm1755_vm12 = vcmp.ne.s16.totalorder %v4480_v48, 0 }
 0x1c5   : > { %v4498_v10 = vsel %vm1621_vm15, %v1676_v1, %v1680_v15  ;;  %v1684_v20 = vor.u32 %v1682_v2, %v1680_v15  ;;  %vm4504_vm10 = vcmp.ge.s32.totalorder %v1170_v28, 1  ;;  %v1688_v26 = vrot.slane %v1686_v50, 1 }
 0x1c6   : > { %v1184_v18 = vand.u32 15, %v1004_v52  ;;  %v1690_v19 = vshrl.u32 %v4475_v41, 16  ;;  %vm1756_vm7 = vcmp.ne.s16.totalorder %v4498_v10, 0  ;;  %vm1531_vm13 = vmpackc.low %vm4504_vm10, %vm4504_vm10  ;;  %v1008_v28 = vadd.s32 224, %v3744_v16 }
 0x1c7   : > { %v4535_v24 = vsel %vm1621_vm15, %v1684_v20, %v1688_v26  ;;  %v1010_v20 = vadd.s32 240, %v3744_v16 }
 0x1c8   : > { %vm4529_vm4 = vcmp.ge.s32.totalorder %v1184_v18, 1  ;;  %v1692_v50 = vor.u32 %v1690_v19, %v1688_v26  ;;  %v1773_v19 = vsel %vm1756_vm7, %v4189_v62, 0 }
 0x1c9   : > { %v1226_v10 = vand.u32 15, %v1010_v20 }
 0x1e6   : > { %v2282_v9 = vpop.permute.xlu1 %2281 }
 0x1e7   : > { %v2369_v56 = vpop.permute.xlu0 %2368  ;;  %v2402_v46 = vsel %vm458_vm1, %v1766_v57, %v2282_v9  ;;  %v1006_v57 = vadd.s32 208, %v3744_v16 }
 0x1e9   : > { %v1198_v52 = vand.u32 15, %v1006_v57 }
 0x1eb   : > { %v2284_v4 = vpop.permute.xlu0 %2283  ;;  %vm4559_vm6 = vcmp.ge.s32.totalorder %v1198_v52, 1 }
 0x1ec   : > { %v2405_v17 = vsel %vm458_vm1, %v1767_v6, %v2284_v4  ;;  %v1769_v4 = vsel %vm1752_vm5, %v4077_v13, 0  ;;  %vm1533_vm5 = vmpackc.low %vm4529_vm4, %vm4529_vm4 }
 0x1ed   : > { %v2454_v21 = vsel %vm507_vm2, %v2405_v17, %v2369_v56  ;;  %v1563_v56 = vsel %vm1531_vm13, 65537, %v3482_v22 }
 0x1ee   : > { %v2497_v55 = vshrl.u32 %v2454_v21, 16  ;;  %v2500_v53 = vshll.u32 %v2454_v21, 16 }
 0x1ef   : > { %v2371_v47 = vpop.permute.xlu0 %2370  ;;  %v2286_v32 = vpop.permute.xlu1 %2285 }
 0x1f0   : > { %v2408_v34 = vsel %vm458_vm1, %v1768_v7, %v2286_v32  ;;  %v2499_v14 = vrot.slane %v2497_v55, 7  ;;  %v1770_v7 = vsel %vm1753_vm9, %v4070_v12, 0  ;;  %vm1535_vm9 = vmpackc.low %vm4559_vm6, %vm4559_vm6 }
 0x1f1   : > { %v2456_v38 = vsel %vm507_vm2, %v2408_v34, %v2371_v47  ;;  %v1561_v47 = vsel %vm1529_vm14, 65537, %v3482_v22  ;;  %vm1757_vm14 = vcmp.ne.s16.totalorder %v4535_v24, 0 }
 0x1f2   : > { %v2504_v40 = vshrl.u32 %v2456_v38, 16  ;;  %v2507_v44 = vshll.u32 %v2456_v38, 16  ;;  %v2502_v29 = vor.u32 %v2500_v53, %v2499_v14  ;;  %v1694_v38 = vshll.u32 %v4493_v63, 16 }
 0x1f3   : > { %v2288_v61 = vpop.permute.xlu0 %2287  ;;  %v2367_v60 = vpop.permute.xlu1 %2366  ;;  %v4527_v12 = vcombine.low %v1561_v47, %v3789_v45 }
 0x1f4   : > { %v2506_v31 = vrot.slane %v2504_v40, 7  ;;  %v2452_v59 = vsel %vm507_vm2, %v2402_v46, %v2367_v60  ;;  %v2411_v9 = vsel %vm458_vm1, %v1769_v4, %v2288_v61  ;;  %v1698_v40 = vshrl.u32 %v4493_v63, 16 }
 0x1f5   : > { %v2494_v6 = vshrl.u32 %v2452_v59, 16  ;;  %v1771_v61 = vsel %vm1754_vm11, %v4136_v8, 0  ;;  %v1696_v63 = vrot.slane %v1694_v38, 1  ;;  %v1702_v4 = vshll.u32 %v4527_v12, 16 }
 0x1f6   : > { %v2509_v51 = vor.u32 %v2507_v44, %v2506_v31 }
 0x1f7   : > { %v2373_v17 = vpop.permute.xlu0 %2372  ;;  %v2496_v21 = vrot.slane %v2494_v6, 7  ;;  %v4551_v6 = vcombine.low %v1563_v56, %v3789_v45  ;;  %v1697_v26 = vsel %vm1621_vm15, %v1692_v50, %v1696_v63  ;;  %v1700_v47 = vor.u32 %v1698_v40, %v1696_v63 }
 0x1f8   : > { %v2458_v13 = vsel %vm507_vm2, %v2411_v9, %v2373_v17  ;;  %v2290_v30 = vpop.permute.xlu1 %2289  ;;  %v2510_v25 = vsel %vm1992_vm8, %v2499_v14, %v2509_v51  ;;  %v1565_v9 = vsel %vm1533_vm5, 65537, %v3482_v22  ;;  %v1212_v17 = vand.u32 15, %v1008_v28 }
 0x1f9   : > { %v2511_v23 = vshrl.u32 %v2458_v13, 16  ;;  %v2503_v3 = vsel %vm1992_vm8, %v2496_v21, %v2502_v29  ;;  %v2514_v55 = vshll.u32 %v2458_v13, 16  ;;  %v2414_v34 = vsel %vm458_vm1, %v1770_v7, %v2290_v30 }
 0x1fa   : > { %3405 = vmatprep.mubr.msk.bf16.mxu1 %vm554_vm3, %v2503_v3  ;;  %v1772_v13 = vsel %vm1755_vm12, %v4129_v5, 0  ;;  %v1704_v48 = vrot.slane %v1702_v4, 1  ;;  %v1710_v5 = vshll.u32 %v4551_v6, 16  ;;  %v3197_v7 = vcombine.low %v1565_v9, %v3789_v45 }
 0x1fb   : > { %v2513_v27 = vrot.slane %v2511_v23, 7  ;;  %v2292_v32 = vpop.permute.xlu0 %2291  ;;  %3406 = vmatmul.mubr.msk.bf16.vlgmr.msra.gmra.mrb[0].mxu1 %vm554_vm3, %v2510_v25  ;;  %vm4576_vm0 = vcmp.ge.s32.totalorder %v1212_v17, 1  ;;  %vm1758_vm10 = vcmp.ne.s16.totalorder %v1697_v26, 0  ;;  %v1567_v40 = vsel %vm1535_vm9, 65537, %v3482_v22 }
 0x1fc   : > { %v2375_v41 = vpop.permute.xlu1 %2374  ;;  %v2417_v46 = vsel %vm458_vm1, %v1771_v61, %v2292_v32  ;;  %vm1537_vm11 = vmpackc.low %vm4576_vm0, %vm4576_vm0  ;;  %v1714_v56 = vshrl.u32 %v4551_v6, 16  ;;  %v1718_v28 = vshll.u32 %v3197_v7, 16  ;;  %vm4599_vm12 = vcmp.ge.s32.totalorder %v1226_v10, 1 }
 0x1fd   : > { %v2516_v1 = vor.u32 %v2514_v55, %v2513_v27  ;;  %v2460_v2 = vsel %vm507_vm2, %v2414_v34, %v2375_v41  ;;  %v1569_v63 = vsel %vm1537_vm11, 65537, %v3482_v22  ;;  %v1722_v24 = vshrl.u32 %v3197_v7, 16  ;;  %vm1539_vm13 = vmpackc.low %vm4599_vm12, %vm4599_vm12 }
 0x1fe   : > { %v2518_v15 = vshrl.u32 %v2460_v2, 16  ;;  %v2521_v59 = vshll.u32 %v2460_v2, 16  ;;  %v1775_v6 = vsel %vm1758_vm10, %v4239_v54, 0  ;;  %v1720_v9 = vrot.slane %v1718_v28, 1 }
 0x1ff   : > { %v2377_v14 = vpop.permute.xlu0 %2376  ;;  %v2517_v60 = vsel %vm1992_vm8, %v2506_v31, %v2516_v1  ;;  %v1706_v31 = vshrl.u32 %v4527_v12, 16  ;;  %v1705_v1 = vsel %vm1621_vm15, %v1700_v47, %v1704_v48 }
 0x200   : > { %v2520_v44 = vrot.slane %v2518_v15, 7  ;;  %v2462_v8 = vsel %vm507_vm2, %v2417_v46, %v2377_v14  ;;  %v2294_v36 = vpop.permute.xlu1 %2293  ;;  %3409 = vmatprep.mubr.msk.bf16.mxu1 %vm554_vm3, %v2517_v60  ;;  %v1712_v15 = vrot.slane %v1710_v5, 1  ;;  %v1774_v60 = vsel %vm1757_vm14, %v4179_v58, 0 }
 0x201   : > { %v2525_v53 = vshrl.u32 %v2462_v8, 16  ;;  %v2528_v21 = vshll.u32 %v2462_v8, 16  ;;  %v2420_v18 = vsel %vm458_vm1, %v1772_v13, %v2294_v36  ;;  %v1708_v2 = vor.u32 %v1706_v31, %v1704_v48 }
 0x202   : > { %v2523_v51 = vor.u32 %v2521_v59, %v2520_v44  ;;  %v3198_v36 = vcombine.low %v1567_v40, %v3789_v45  ;;  %vm1759_vm7 = vcmp.ne.s16.totalorder %v1705_v1, 0  ;;  %v1724_v47 = vor.u32 %v1722_v24, %v1720_v9 }
 0x203   : > { %v2527_v42 = vrot.slane %v2525_v53, 7  ;;  %v2296_v30 = vpop.permute.xlu0 %2295  ;;  %v1713_v58 = vsel %vm1621_vm15, %v1708_v2, %v1712_v15  ;;  %v1776_v5 = vsel %vm1759_vm7, %v4229_v49, 0 }
 0x204   : > { %v2379_v23 = vpop.permute.xlu1 %2378  ;;  %v2524_v25 = vsel %vm1992_vm8, %v2513_v27, %v2523_v51  ;;  %v2423_v32 = vsel %vm458_vm1, %v1773_v19, %v2296_v30  ;;  %v1716_v51 = vor.u32 %v1714_v56, %v1712_v15  ;;  %vm1760_vm4 = vcmp.ne.s16.totalorder %v1713_v58, 0 }
 0x205   : > { %v2530_v16 = vor.u32 %v2528_v21, %v2527_v42  ;;  %v2464_v3 = vsel %vm507_vm2, %v2420_v18, %v2379_v23  ;;  %3410 = vmatmul.mubr.msk.bf16.gmra.mrb[4].mxu1 %vm554_vm3, %v2524_v25  ;;  %v3199_v21 = vcombine.low %v1569_v63, %v3789_v45  ;;  %v1726_v18 = vshll.u32 %v3198_v36, 16 }
 0x206   : > { %v2532_v55 = vshrl.u32 %v2464_v3, 16  ;;  %v2535_v41 = vshll.u32 %v2464_v3, 16  ;;  %v1721_v26 = vsel %vm1621_vm15, %v1716_v51, %v1720_v9 }
 0x207   : > { %v2381_v57 = vpop.permute.xlu0 %2380  ;;  %v2531_v34 = vsel %vm1992_vm8, %v2520_v44, %v2530_v16  ;;  %v1571_v16 = vsel %vm1539_vm13, 65537, %v3482_v22  ;;  %vm1761_vm5 = vcmp.ne.s16.totalorder %v1721_v26, 0 }
 0x208   : > { %v2534_v62 = vrot.slane %v2532_v55, 7  ;;  %v2466_v38 = vsel %vm507_vm2, %v2423_v32, %v2381_v57  ;;  %v2298_v12 = vpop.permute.xlu1 %2297  ;;  %3413 = vmatprep.mubr.msk.bf16.mxu1 %vm554_vm3, %v2531_v34  ;;  %v1734_v55 = vshll.u32 %v3199_v21, 16  ;;  %v1728_v57 = vrot.slane %v1726_v18, 1 }
 0x209   : > { %v2539_v35 = vshrl.u32 %v2466_v38, 16  ;;  %v2542_v14 = vshll.u32 %v2466_v38, 16  ;;  %v2426_v44 = vsel %vm458_vm1, %v1774_v60, %v2298_v12  ;;  %v1730_v34 = vshrl.u32 %v3198_v36, 16 }
 0x20a   : > { %v2537_v61 = vor.u32 %v2535_v41, %v2534_v62  ;;  %v3200_v22 = vcombine.low %v1571_v16, %v3789_v45  ;;  %v1777_v41 = vsel %vm1760_vm4, %v4287_v11, 0  ;;  %v1738_v38 = vshrl.u32 %v3199_v21, 16 }
 0x20b   : > { %v2541_v46 = vrot.slane %v2539_v35, 7  ;;  %v2300_v50 = vpop.permute.xlu0 %2299  ;;  %v1729_v2 = vsel %vm1621_vm15, %v1724_v47, %v1728_v57  ;;  %v1736_v40 = vrot.slane %v1734_v55, 1  ;;  %v1732_v45 = vor.u32 %v1730_v34, %v1728_v57 }
 0x20c   : > { %v2383_v59 = vpop.permute.xlu1 %2382  ;;  %v2538_v8 = vsel %vm1992_vm8, %v2527_v42, %v2537_v61  ;;  %v2429_v17 = vsel %vm458_vm1, %v1775_v6, %v2300_v50  ;;  %v1778_v52 = vsel %vm1761_vm5, %v4278_v43, 0  ;;  %vm1762_vm6 = vcmp.ne.s16.totalorder %v1729_v2, 0 }
 0x20d   : > { %v2544_v53 = vor.u32 %v2542_v14, %v2541_v46  ;;  %v2468_v4 = vsel %vm507_vm2, %v2426_v44, %v2383_v59  ;;  %3414 = vmatmul.mubr.msk.bf16.gmra.mrb[8].mxu1 %vm554_vm3, %v2538_v8  ;;  %v1742_v14 = vshll.u32 %v3200_v22, 16  ;;  %v1737_v63 = vsel %vm1621_vm15, %v1732_v45, %v1736_v40  ;;  %v4671_v45 = vld [vmem:[%s4783_s4] ss:$0 sm:$0xff] }
 0x20e   : > { %v2546_v31 = vshrl.u32 %v2468_v4, 16  ;;  %v2549_v30 = vshll.u32 %v2468_v4, 16  ;;  %v1779_v24 = vsel %vm1762_vm6, %v4324_v37, 0  ;;  %vm1763_vm9 = vcmp.ne.s16.totalorder %v1737_v63, 0 }
 0x20f   : > { %v2385_v20 = vpop.permute.xlu0 %2384  ;;  %v2545_v42 = vsel %vm1992_vm8, %v2534_v62, %v2544_v53  ;;  %v1740_v53 = vor.u32 %v1738_v38, %v1736_v40 }
 0x210   : > { %v2548_v13 = vrot.slane %v2546_v31, 7  ;;  %v2470_v29 = vsel %vm507_vm2, %v2429_v17, %v2385_v20  ;;  %3417 = vmatprep.mubr.msk.bf16.mxu1 %vm554_vm3, %v2545_v42  ;;  %v1744_v31 = vrot.slane %v1742_v14, 1  ;;  %v1746_v17 = vshrl.u32 %v3200_v22, 16 }
 0x211   : > { %v2302_v54 = vpop.permute.xlu1 %2301  ;;  %v2553_v23 = vshrl.u32 %v2470_v29, 16  ;;  %v2556_v48 = vshll.u32 %v2470_v29, 16 }
 0x212   : > { %v2551_v25 = vor.u32 %v2549_v30, %v2548_v13  ;;  %v2432_v7 = vsel %vm458_vm1, %v1776_v5, %v2302_v54  ;;  %v1745_v30 = vsel %vm1621_vm15, %v1740_v53, %v1744_v31 }
 0x213   : > { %v2555_v3 = vrot.slane %v2553_v23, 7  ;;  %v2304_v19 = vpop.permute.xlu0 %2303  ;;  %v1780_v23 = vsel %vm1763_vm9, %v4318_v33, 0  ;;  %vm1764_vm0 = vcmp.ne.s16.totalorder %v1745_v30, 0 }
 0x214   : > { %v2552_v32 = vsel %vm1992_vm8, %v2541_v46, %v2551_v25  ;;  %v2435_v12 = vsel %vm458_vm1, %v1777_v41, %v2304_v19  ;;  %v1781_v19 = vsel %vm1764_vm0, %v4360_v0, 0 }
 0x215   : > { %v2387_v27 = vpop.permute.xlu1 %2386  ;;  %v2558_v10 = vor.u32 %v2556_v48, %v2555_v3  ;;  %3418 = vmatmul.mubr.msk.bf16.gmra.mrb[12].mxu1 %vm554_vm3, %v2552_v32 }
 0x216   : > { %v2472_v62 = vsel %vm507_vm2, %v2432_v7, %v2387_v27 }
 0x217   : > { %v2560_v49 = vshrl.u32 %v2472_v62, 16  ;;  %v2389_v35 = vpop.permute.xlu0 %2388  ;;  %v2559_v1 = vsel %vm1992_vm8, %v2548_v13, %v2558_v10  ;;  %v2563_v15 = vshll.u32 %v2472_v62, 16 }
 0x218   : > { %v2474_v56 = vsel %vm507_vm2, %v2435_v12, %v2389_v35  ;;  %3421 = vmatprep.mubr.msk.bf16.mxu1 %vm554_vm3, %v2559_v1 }
 0x219   : > { %v2562_v61 = vrot.slane %v2560_v49, 7  ;;  %v2306_v28 = vpop.permute.xlu1 %2305  ;;  %v2567_v11 = vshrl.u32 %v2474_v56, 16  ;;  %v2570_v50 = vshll.u32 %v2474_v56, 16 }
 0x21a   : > { %v2438_v59 = vsel %vm458_vm1, %v1778_v52, %v2306_v28 }
 0x21b   : > { %v2565_v46 = vor.u32 %v2563_v15, %v2562_v61  ;;  %v2569_v60 = vrot.slane %v2567_v11, 7  ;;  %v2308_v44 = vpop.permute.xlu0 %2307 }
 0x21c   : > { %v2441_v43 = vsel %vm458_vm1, %v1779_v24, %v2308_v44 }
 0x21d   : > { %v2391_v8 = vpop.permute.xlu1 %2390  ;;  %v2566_v36 = vsel %vm1992_vm8, %v2555_v3, %v2565_v46  ;;  %v2572_v4 = vor.u32 %v2570_v50, %v2569_v60  ;;  %v1748_v3 = vor.u32 %v1746_v17, %v1744_v31 }
 0x21e   : > { %v2476_v58 = vsel %vm507_vm2, %v2438_v59, %v2391_v8  ;;  %3422 = vmatmul.mubr.msk.bf16.gmra.mrb[16].mxu1 %vm554_vm3, %v2566_v36 }
 0x21f   : > { %v2574_v6 = vshrl.u32 %v2476_v58, 16  ;;  %v2393_v51 = vpop.permute.xlu0 %2392  ;;  %v2573_v9 = vsel %vm1992_vm8, %v2562_v61, %v2572_v4  ;;  %v2577_v42 = vshll.u32 %v2476_v58, 16  ;;  %vm1765_vm15 = vcmp.ne.s16.totalorder %v1748_v3, 0 }
 0x220   : > { %v2478_v21 = vsel %vm507_vm2, %v2441_v43, %v2393_v51  ;;  %3425 = vmatprep.mubr.msk.bf16.mxu1 %vm554_vm3, %v2573_v9  ;;  %v1782_v0 = vsel %vm1765_vm15, %v4358_v39, 0 }
 0x221   : > { %v2576_v20 = vrot.slane %v2574_v6, 7  ;;  %v2310_v13 = vpop.permute.xlu1 %2309  ;;  %v2581_v29 = vshrl.u32 %v2478_v21, 16  ;;  %v2584_v18 = vshll.u32 %v2478_v21, 16 }
 0x222   : > { %v2444_v26 = vsel %vm458_vm1, %v1780_v23, %v2310_v13 }
 0x223   : > { %v2579_v37 = vor.u32 %v2577_v42, %v2576_v20  ;;  %v2583_v54 = vrot.slane %v2581_v29, 7  ;;  %v2312_v25 = vpop.permute.xlu0 %2311 }
 0x224   : > { %v2447_v7 = vsel %vm458_vm1, %v1781_v19, %v2312_v25 }
 0x225   : > { %v2395_v47 = vpop.permute.xlu1 %2394  ;;  %v2580_v16 = vsel %vm1992_vm8, %v2569_v60, %v2579_v37  ;;  %v2586_v48 = vor.u32 %v2584_v18, %v2583_v54 }
 0x226   : > { %v2480_v5 = vsel %vm507_vm2, %v2444_v26, %v2395_v47  ;;  %3426 = vmatmul.mubr.msk.bf16.gmra.mrb[20].mxu1 %vm554_vm3, %v2580_v16 }
 0x227   : > { %v2588_v55 = vshrl.u32 %v2480_v5, 16  ;;  %v2397_v27 = vpop.permute.xlu0 %2396  ;;  %v2587_v33 = vsel %vm1992_vm8, %v2576_v20, %v2586_v48  ;;  %v2591_v57 = vshll.u32 %v2480_v5, 16 }
 0x228   : > { %v2482_v34 = vsel %vm507_vm2, %v2447_v7, %v2397_v27  ;;  %3429 = vmatprep.mubr.msk.bf16.mxu1 %vm554_vm3, %v2587_v33 }
 0x229   : > { %v2590_v32 = vrot.slane %v2588_v55, 7  ;;  %v2314_v10 = vpop.permute.xlu1 %2313  ;;  %v2595_v62 = vshrl.u32 %v2482_v34, 16  ;;  %v2598_v49 = vshll.u32 %v2482_v34, 16 }
 0x22a   : > { %v2450_v38 = vsel %vm458_vm1, %v1782_v0, %v2314_v10  ;;  %vm2986_vm1 = vcmask 519168  }
 0x22b   : > { %v2593_v22 = vor.u32 %v2591_v57, %v2590_v32  ;;  %v2597_v41 = vrot.slane %v2595_v62, 7 }
 0x22d   : > { %v2399_v12 = vpop.permute.xlu1 %2398  ;;  %v2594_v35 = vsel %vm1992_vm8, %v2583_v54, %v2593_v22  ;;  %v2600_v1 = vor.u32 %v2598_v49, %v2597_v41 }
 0x22e   : > { %v2484_v2 = vsel %vm507_vm2, %v2450_v38, %v2399_v12  ;;  %3430 = vmatmul.mubr.msk.bf16.gmra.mrb[24].mxu1 %vm554_vm3, %v2594_v35 }
 0x22f   : > { %v2602_v40 = vshrl.u32 %v2484_v2, 16  ;;  %v2601_v61 = vsel %vm1992_vm8, %v2590_v32, %v2600_v1  ;;  %v2605_v56 = vshll.u32 %v2484_v2, 16 }
 0x230   : > { %3433 = vmatprep.mubr.msk.bf16.mxu1 %vm554_vm3, %v2601_v61 }
 0x231   : > { %v2604_v15 = vrot.slane %v2602_v40, 7 }
 0x233   : > { %v2607_v28 = vor.u32 %v2605_v56, %v2604_v15 }
 0x235   : > { %v2608_v39 = vsel %vm1992_vm8, %v2597_v41, %v2607_v28 }
 0x236   : > { %3434 = vmatmul.mubr.msk.bf16.gmra.mrb[28].mxu1 %vm554_vm3, %v2608_v39 }
 0x2ce   : > { %v3407_v11 = vpop.f32.mrb[0].mxu1 }
 0x2cf   : > { %v2708_v46 = vadd.f32 %v3407_v11, %v4671_v45  ;;  %v2699_v14 = vpop.f32.mrb[1].mxu1 }
 0x2d0   : > { %v2700_v60 = vadd.f32 %v4671_v45, %v2699_v14  ;;  %v3408_v50 = vpop.f32.mrb[2].mxu1 }
 0x2d1   : > { %v2828_v52 = vmax.f32 %v2708_v46, 0.0  ;;  %v2711_v44 = vadd.f32 %v3408_v50, %v4671_v45  ;;  %v2702_v59 = vpop.f32.mrb[3].mxu1 }
 0x2d2   : > { %v2826_v8 = vmax.f32 %v2700_v60, 0.0  ;;  %v2703_v36 = vadd.f32 %v4671_v45, %v2702_v59 }
 0x2d3   : > { %v3305_v63 = vpack.c.bf16 %v2828_v52, %v2828_v52  ;;  %v2829_v53 = vmax.f32 %v2711_v44, 0.0 }
 0x2d4   : > { %v3303_v4 = vpack.c.bf16 %v2826_v8, %v2826_v8  ;;  %v2827_v58 = vmax.f32 %v2703_v36, 0.0 }
 0x2d5   : > { %2989 = vst.msk [vmem:[%s4681_s19 + $0x8] sm:$0xf] %vm2986_vm1, %v3305_v63  ;;  %v3306_v24 = vpack.c.bf16 %v2829_v53, %v2829_v53 }
 0x2d6   : > { %2987 = vst.msk [vmem:[%s4681_s19] sm:$0xf] %vm2986_vm1, %v3303_v4  ;;  %v3304_v6 = vpack.c.bf16 %v2827_v58, %v2827_v58 }
 0x2d7   : > { %2990 = vst.msk [vmem:[%s4681_s19 + $0xc] sm:$0xf] %vm2986_vm1, %v3306_v24 }
 0x2d8   : > { %v3411_v31 = vpop.f32.mrb[4].mxu1  ;;  %2988 = vst.msk [vmem:[%s4681_s19 + $0x4] sm:$0xf] %vm2986_vm1, %v3304_v6 }
 0x2d9   : > { %v2724_v43 = vadd.f32 %v3411_v31, %v4671_v45  ;;  %v2715_v51 = vpop.f32.mrb[5].mxu1 }
 0x2da   : > { %v2716_v9 = vadd.f32 %v4671_v45, %v2715_v51  ;;  %v3412_v17 = vpop.f32.mrb[6].mxu1 }
 0x2db   : > { %v2832_v20 = vmax.f32 %v2724_v43, 0.0  ;;  %v2727_v42 = vadd.f32 %v3412_v17, %v4671_v45  ;;  %v2718_v21 = vpop.f32.mrb[7].mxu1 }
 0x2dc   : > { %v2830_v13 = vmax.f32 %v2716_v9, 0.0  ;;  %v2719_v30 = vadd.f32 %v4671_v45, %v2718_v21 }
 0x2dd   : > { %v3309_v29 = vpack.c.bf16 %v2832_v20, %v2832_v20  ;;  %v2833_v37 = vmax.f32 %v2727_v42, 0.0 }
 0x2de   : > { %v3307_v54 = vpack.c.bf16 %v2830_v13, %v2830_v13  ;;  %v2831_v18 = vmax.f32 %v2719_v30, 0.0 }
 0x2df   : > { %2993 = vst.msk [vmem:[%s4681_s19 + $0x18] sm:$0xf] %vm2986_vm1, %v3309_v29  ;;  %v3310_v23 = vpack.c.bf16 %v2833_v37, %v2833_v37 }
 0x2e0   : > { %2991 = vst.msk [vmem:[%s4681_s19 + $0x10] sm:$0xf] %vm2986_vm1, %v3307_v54  ;;  %v3308_v25 = vpack.c.bf16 %v2831_v18, %v2831_v18  ;;  %v3415_v26 = vpop.f32.mrb[8].mxu1 }
 0x2e1   : > { %2994 = vst.msk [vmem:[%s4681_s19 + $0x1c] sm:$0xf] %vm2986_vm1, %v3310_v23  ;;  %v2740_v47 = vadd.f32 %v3415_v26, %v4671_v45  ;;  %v2731_v16 = vpop.f32.mrb[9].mxu1 }
 0x2e2   : > { %2992 = vst.msk [vmem:[%s4681_s19 + $0x14] sm:$0xf] %vm2986_vm1, %v3308_v25  ;;  %v2732_v3 = vadd.f32 %v4671_v45, %v2731_v16  ;;  %v3416_v48 = vpop.f32.mrb[10].mxu1 }
 0x2e3   : > { %v2836_v5 = vmax.f32 %v2740_v47, 0.0  ;;  %v2743_v19 = vadd.f32 %v3416_v48, %v4671_v45  ;;  %v2734_v55 = vpop.f32.mrb[11].mxu1 }
 0x2e4   : > { %v2834_v7 = vmax.f32 %v2732_v3, 0.0  ;;  %v2735_v27 = vadd.f32 %v4671_v45, %v2734_v55 }
 0x2e5   : > { %v3313_v33 = vpack.c.bf16 %v2836_v5, %v2836_v5  ;;  %v2837_v32 = vmax.f32 %v2743_v19, 0.0 }
 0x2e6   : > { %v3311_v57 = vpack.c.bf16 %v2834_v7, %v2834_v7  ;;  %v2835_v34 = vmax.f32 %v2735_v27, 0.0 }
 0x2e7   : > { %2997 = vst.msk [vmem:[%s4681_s19 + $0x28] sm:$0xf] %vm2986_vm1, %v3313_v33  ;;  %v3314_v10 = vpack.c.bf16 %v2837_v32, %v2837_v32 }
 0x2e8   : > { %2995 = vst.msk [vmem:[%s4681_s19 + $0x20] sm:$0xf] %vm2986_vm1, %v3311_v57  ;;  %v3312_v62 = vpack.c.bf16 %v2835_v34, %v2835_v34  ;;  %v3419_v22 = vpop.f32.mrb[12].mxu1 }
 0x2e9   : > { %2998 = vst.msk [vmem:[%s4681_s19 + $0x2c] sm:$0xf] %vm2986_vm1, %v3314_v10  ;;  %v2756_v41 = vadd.f32 %v3419_v22, %v4671_v45  ;;  %v2747_v49 = vpop.f32.mrb[13].mxu1 }
 0x2ea   : > { %2996 = vst.msk [vmem:[%s4681_s19 + $0x24] sm:$0xf] %vm2986_vm1, %v3312_v62  ;;  %v2748_v0 = vadd.f32 %v4671_v45, %v2747_v49  ;;  %v3420_v38 = vpop.f32.mrb[14].mxu1 }
 0x2eb   : > { %v2840_v12 = vmax.f32 %v2756_v41, 0.0  ;;  %v2759_v35 = vadd.f32 %v3420_v38, %v4671_v45  ;;  %v2750_v1 = vpop.f32.mrb[15].mxu1 }
 0x2ec   : > { %v2838_v2 = vmax.f32 %v2748_v0, 0.0  ;;  %v2751_v40 = vadd.f32 %v4671_v45, %v2750_v1 }
 0x2ed   : > { %v3317_v61 = vpack.c.bf16 %v2840_v12, %v2840_v12  ;;  %v2841_v15 = vmax.f32 %v2759_v35, 0.0 }
 0x2ee   : > { %v3315_v56 = vpack.c.bf16 %v2838_v2, %v2838_v2  ;;  %v2839_v28 = vmax.f32 %v2751_v40, 0.0 }
 0x2ef   : > { %3001 = vst.msk [vmem:[%s4681_s19 + $0x38] sm:$0xf] %vm2986_vm1, %v3317_v61  ;;  %v3318_v39 = vpack.c.bf16 %v2841_v15, %v2841_v15 }
 0x2f0   : > { %2999 = vst.msk [vmem:[%s4681_s19 + $0x30] sm:$0xf] %vm2986_vm1, %v3315_v56  ;;  %v3316_v11 = vpack.c.bf16 %v2839_v28, %v2839_v28 }
 0x2f1   : > { %v3423_v46 = vpop.f32.mrb[16].mxu1  ;;  %3002 = vst.msk [vmem:[%s4681_s19 + $0x3c] sm:$0xf] %vm2986_vm1, %v3318_v39 }
 0x2f2   : > { %v2772_v14 = vadd.f32 %v3423_v46, %v4671_v45  ;;  %v2763_v60 = vpop.f32.mrb[17].mxu1  ;;  %3000 = vst.msk [vmem:[%s4681_s19 + $0x34] sm:$0xf] %vm2986_vm1, %v3316_v11 }
 0x2f3   : > { %v2764_v50 = vadd.f32 %v4671_v45, %v2763_v60  ;;  %v3424_v52 = vpop.f32.mrb[18].mxu1 }
 0x2f4   : > { %v2844_v44 = vmax.f32 %v2772_v14, 0.0  ;;  %v2775_v59 = vadd.f32 %v3424_v52, %v4671_v45  ;;  %v2766_v8 = vpop.f32.mrb[19].mxu1 }
 0x2f5   : > { %v2842_v36 = vmax.f32 %v2764_v50, 0.0  ;;  %v2767_v63 = vadd.f32 %v4671_v45, %v2766_v8 }
 0x2f6   : > { %v3321_v53 = vpack.c.bf16 %v2844_v44, %v2844_v44  ;;  %v2845_v4 = vmax.f32 %v2775_v59, 0.0 }
 0x2f7   : > { %v3319_v58 = vpack.c.bf16 %v2842_v36, %v2842_v36  ;;  %v2843_v24 = vmax.f32 %v2767_v63, 0.0 }
 0x2f8   : > { %3005 = vst.msk [vmem:[%s4681_s19 + $0x48] sm:$0xf] %vm2986_vm1, %v3321_v53  ;;  %v3322_v6 = vpack.c.bf16 %v2845_v4, %v2845_v4 }
 0x2f9   : > { %3003 = vst.msk [vmem:[%s4681_s19 + $0x40] sm:$0xf] %vm2986_vm1, %v3319_v58  ;;  %v3320_v31 = vpack.c.bf16 %v2843_v24, %v2843_v24  ;;  %v3427_v43 = vpop.f32.mrb[20].mxu1 }
 0x2fa   : > { %3006 = vst.msk [vmem:[%s4681_s19 + $0x4c] sm:$0xf] %vm2986_vm1, %v3322_v6  ;;  %v2788_v51 = vadd.f32 %v3427_v43, %v4671_v45  ;;  %v2779_v9 = vpop.f32.mrb[21].mxu1 }
 0x2fb   : > { %3004 = vst.msk [vmem:[%s4681_s19 + $0x44] sm:$0xf] %vm2986_vm1, %v3320_v31  ;;  %v2780_v17 = vadd.f32 %v4671_v45, %v2779_v9  ;;  %v3428_v20 = vpop.f32.mrb[22].mxu1 }
 0x2fc   : > { %v2848_v42 = vmax.f32 %v2788_v51, 0.0  ;;  %v2791_v21 = vadd.f32 %v3428_v20, %v4671_v45  ;;  %v2782_v13 = vpop.f32.mrb[23].mxu1 }
 0x2fd   : > { %v2846_v30 = vmax.f32 %v2780_v17, 0.0  ;;  %v2783_v29 = vadd.f32 %v4671_v45, %v2782_v13 }
 0x2fe   : > { %v3325_v37 = vpack.c.bf16 %v2848_v42, %v2848_v42  ;;  %v2849_v54 = vmax.f32 %v2791_v21, 0.0 }
 0x2ff   : > { %v3323_v18 = vpack.c.bf16 %v2846_v30, %v2846_v30  ;;  %v2847_v23 = vmax.f32 %v2783_v29, 0.0 }
 0x300   : > { %3009 = vst.msk [vmem:[%s4681_s19 + $0x58] sm:$0xf] %vm2986_vm1, %v3325_v37  ;;  %v3326_v25 = vpack.c.bf16 %v2849_v54, %v2849_v54 }
 0x301   : > { %3007 = vst.msk [vmem:[%s4681_s19 + $0x50] sm:$0xf] %vm2986_vm1, %v3323_v18  ;;  %v3324_v26 = vpack.c.bf16 %v2847_v23, %v2847_v23  ;;  %v3431_v47 = vpop.f32.mrb[24].mxu1 }
 0x302   : > { %3010 = vst.msk [vmem:[%s4681_s19 + $0x5c] sm:$0xf] %vm2986_vm1, %v3326_v25  ;;  %v2804_v16 = vadd.f32 %v3431_v47, %v4671_v45  ;;  %v2795_v3 = vpop.f32.mrb[25].mxu1 }
 0x303   : > { %3008 = vst.msk [vmem:[%s4681_s19 + $0x54] sm:$0xf] %vm2986_vm1, %v3324_v26  ;;  %v2796_v48 = vadd.f32 %v4671_v45, %v2795_v3  ;;  %v3432_v5 = vpop.f32.mrb[26].mxu1 }
 0x304   : > { %v2852_v19 = vmax.f32 %v2804_v16, 0.0  ;;  %v2807_v55 = vadd.f32 %v3432_v5, %v4671_v45  ;;  %v2798_v7 = vpop.f32.mrb[27].mxu1 }
 0x305   : > { %v2850_v27 = vmax.f32 %v2796_v48, 0.0  ;;  %v2799_v33 = vadd.f32 %v4671_v45, %v2798_v7 }
 0x306   : > { %v3329_v32 = vpack.c.bf16 %v2852_v19, %v2852_v19  ;;  %v2853_v57 = vmax.f32 %v2807_v55, 0.0 }
 0x307   : > { %v3327_v34 = vpack.c.bf16 %v2850_v27, %v2850_v27  ;;  %v2851_v10 = vmax.f32 %v2799_v33, 0.0 }
 0x308   : > { %3013 = vst.msk [vmem:[%s4681_s19 + $0x68] sm:$0xf] %vm2986_vm1, %v3329_v32  ;;  %v3330_v62 = vpack.c.bf16 %v2853_v57, %v2853_v57 }
 0x309   : > { %3011 = vst.msk [vmem:[%s4681_s19 + $0x60] sm:$0xf] %vm2986_vm1, %v3327_v34  ;;  %v3328_v22 = vpack.c.bf16 %v2851_v10, %v2851_v10  ;;  %v3435_v41 = vpop.f32.mrb[28].mxu1 }
 0x30a   : > { %3014 = vst.msk [vmem:[%s4681_s19 + $0x6c] sm:$0xf] %vm2986_vm1, %v3330_v62  ;;  %v2820_v49 = vadd.f32 %v3435_v41, %v4671_v45  ;;  %v2811_v0 = vpop.f32.mrb[29].mxu1 }
 0x30b   : > { %3012 = vst.msk [vmem:[%s4681_s19 + $0x64] sm:$0xf] %vm2986_vm1, %v3328_v22  ;;  %v2812_v38 = vadd.f32 %v4671_v45, %v2811_v0  ;;  %v3436_v12 = vpop.f32.mrb[30].mxu1 }
 0x30c   : > { %v2856_v35 = vmax.f32 %v2820_v49, 0.0  ;;  %v2823_v1 = vadd.f32 %v3436_v12, %v4671_v45  ;;  %v2814_v2 = vpop.f32.mrb[31].mxu1 }
 0x30d   : > { %v2854_v40 = vmax.f32 %v2812_v38, 0.0  ;;  %v2815_v61 = vadd.f32 %v4671_v45, %v2814_v2 }
 0x30e   : > { %v3333_v15 = vpack.c.bf16 %v2856_v35, %v2856_v35  ;;  %v2857_v56 = vmax.f32 %v2823_v1, 0.0 }
 0x30f   : > { %v3331_v28 = vpack.c.bf16 %v2854_v40, %v2854_v40  ;;  %v2855_v39 = vmax.f32 %v2815_v61, 0.0 }
 0x310   : > { %3017 = vst.msk [vmem:[%s4681_s19 + $0x78] sm:$0xf] %vm2986_vm1, %v3333_v15  ;;  %v3334_v11 = vpack.c.bf16 %v2857_v56, %v2857_v56 }
 0x311   : > { %3015 = vst.msk [vmem:[%s4681_s19 + $0x70] sm:$0xf] %vm2986_vm1, %v3331_v28  ;;  %v3332_v46 = vpack.c.bf16 %v2855_v39, %v2855_v39 }
 0x312   : > { %3018 = vst.msk [vmem:[%s4681_s19 + $0x7c] sm:$0xf] %vm2986_vm1, %v3334_v11 }
 0x313   : > { %3016 = vst.msk [vmem:[%s4681_s19 + $0x74] sm:$0xf] %vm2986_vm1, %v3332_v46 }
 0x314 PF: > { %s17_s21 = sadd.s32 1, %s3478_s21  }
 0x315   : > { %p14_p4 = scmp.ge.s32.totalorder %s17_s21, 4  }
 0x317   :  { %16 = sbr.rel (!%p14_p4) target bundleno = 1 (0x1), region = 82 }

// kernel: rrs_1d_forward.12
= control target key start
LH: loop header
LB: loop body
LE: loop exit
PB: predicated region body
PF: predicated region fallthrough
CT: control target
= control target key end

     0   :  { %s838_s21 = smov 0   ;;  %s993_s0 = inlined_call_operand.vmem [shape: bf16[2,20,64], index: 0, kind: input, shape index: {}]   ;;  %s994_s1 = inlined_call_operand.vmem [shape: bf16[192,64], index: 1, kind: input, shape index: {}]   ;;  %s995_s2 = inlined_call_operand.vmem [shape: f32[1,64], index: 2, kind: input, shape index: {}]   ;;  %s996_s3 = inlined_call_operand.vmem [shape: bf16[192,64], index: 3, kind: input, shape index: {}]   ;;  %s997_s4 = inlined_call_operand.vmem [shape: f32[1,64], index: 4, kind: input, shape index: {}]   ;;  %s998_s5 = inlined_call_operand.vmem [shape: bf16[2,4,64], index: 5, kind: output, shape index: {0}]   ;;  %s999_s6 = inlined_call_operand.vmem [shape: bf16[2,4,64], index: 6, kind: output, shape index: {1}]  }
   0x1 LB: > { %s714_s22 = sadd.s32 4294967295, %s798_s21   ;;  %p718_p0 = scmp.ge.s32.totalorder %s798_s21, 1  ;;  %s798_s21 = sphi %s838_s21, %s17_s21  }
   0x2   : > { %p215_p1 = scmp.lt.s32.totalorder %s798_s21, 3 }
   0x4   : > { %p216_p2 = pnand %p718_p0, %p215_p1 }
   0x5   : > { %p248_p3 = scmp.lt.s32.totalorder (!%p216_p2), %s714_s22, 1  ;;  %v767_v0 = vld [vmem:[%s994_s1] sm:$0xff] (!%p216_p2)   ;;  %v800_v1 = vmov (!%p216_p2), 0   ;;  %v768_v2 = vld [vmem:[%s994_s1 + $0x8] sm:$0xff] (!%p216_p2)   ;;  %v769_v3 = vld [vmem:[%s994_s1 + $0x10] sm:$0xff] (!%p216_p2)   ;;  %s801_s9 = smov (!%p216_p2), 64  }
   0x6   : > { %219 = sbr.rel (%p216_p2) target bundleno = 699 (0x2bb), region = 40  ;;  %383 = vmatprep.subr.bf16.mxu0 (!%p216_p2), %v800_v1  ;;  %587 = vmatprep.subr.bf16.mxu1 (!%p216_p2), %v800_v1  ;;  %v770_v5 = vld [vmem:[%s994_s1 + $0x18] sm:$0xff] (!%p216_p2)   ;;  %vm272_vm0 = vcmask (!%p216_p2), 523264   ;;  %v771_v6 = vld [vmem:[%s994_s1 + $0x20] sm:$0xff] (!%p216_p2)   ;;  %v772_v8 = vld [vmem:[%s994_s1 + $0x28] sm:$0xff] (!%p216_p2)   ;;  %vm425_vm1 = vcmask (!%p216_p2), 517120  }
   0x7   : > { %384 = vmatpush1.bf16.msra.mxu0 (!%p216_p2), %v767_v0  ;;  %v773_v9 = vld [vmem:[%s994_s1 + $0x30] sm:$0xff] (!%p216_p2)   ;;  %v774_v10 = vld [vmem:[%s994_s1 + $0x38] sm:$0xff] (!%p216_p2)   ;;  %v775_v11 = vld [vmem:[%s994_s1 + $0x40] sm:$0xff] (!%p216_p2)   ;;  %vm427_vm2 = vcmask (!%p216_p2), 519168   ;;  %vm802_vm3 = vmmov (!%p216_p2), 0  }
   0x8   : > { %385 = vmatprep.subr.bf16.mxu0 (!%p216_p2), %v800_v1  ;;  %v776_v12 = vld [vmem:[%s994_s1 + $0x48] sm:$0xff] (!%p216_p2)   ;;  %v777_v13 = vld [vmem:[%s994_s1 + $0x50] sm:$0xff] (!%p216_p2)   ;;  %v778_v14 = vld [vmem:[%s994_s1 + $0x58] sm:$0xff] (!%p216_p2)   ;;  %429 = vst.msk [vmem:[#allocation2 + $0x4] sm:$0xf] (!%p216_p2), %vm427_vm2, %v800_v1 }
   0x9   : > { %430 = vst.msk [vmem:[#allocation2 + $0x8] sm:$0xf] (!%p216_p2), %vm427_vm2, %v800_v1  ;;  %v780_v18 = vld [vmem:[%s996_s3] sm:$0xff] (!%p216_p2)   ;;  %v781_v19 = vld [vmem:[%s996_s3 + $0x8] sm:$0xff] (!%p216_p2)   ;;  %v782_v20 = vld [vmem:[%s996_s3 + $0x10] sm:$0xff] (!%p216_p2)  }
   0xa   : > { %588 = vmatpush1.bf16.msra.mxu1 (!%p216_p2), %v780_v18  ;;  %v783_v21 = vld [vmem:[%s996_s3 + $0x18] sm:$0xff] (!%p216_p2)   ;;  %v784_v22 = vld [vmem:[%s996_s3 + $0x20] sm:$0xff] (!%p216_p2)   ;;  %v785_v23 = vld [vmem:[%s996_s3 + $0x28] sm:$0xff] (!%p216_p2)  }
   0xb   : > { %386 = vmatpush1.bf16.msra.mxu0 (!%p216_p2), %v768_v2  ;;  %589 = vmatprep.subr.bf16.mxu1 (!%p216_p2), %v800_v1  ;;  %v786_v24 = vld [vmem:[%s996_s3 + $0x30] sm:$0xff] (!%p216_p2)   ;;  %v787_v25 = vld [vmem:[%s996_s3 + $0x38] sm:$0xff] (!%p216_p2)   ;;  %v788_v26 = vld [vmem:[%s996_s3 + $0x40] sm:$0xff] (!%p216_p2)  }
   0xc   : > { %387 = vmatprep.subr.bf16.mxu0 (!%p216_p2), %v800_v1  ;;  %v789_v27 = vld [vmem:[%s996_s3 + $0x48] sm:$0xff] (!%p216_p2)   ;;  %v790_v28 = vld [vmem:[%s996_s3 + $0x50] sm:$0xff] (!%p216_p2)   ;;  %vm452_vm4 = vmpackc.low (!%p216_p2), %vm802_vm3, %vm802_vm3 }
   0xd   : > { %s1003_s22 = smov (!%p248_p3, %s714_s22), 1  ;;  %v453_v29 = vsel %vm452_vm4, 65537, %v800_v1  ;;  %v723_v31 = vld [vmem:[%s995_s2] ss:$0 sm:$0xff]  ;;  %v791_v39 = vld [vmem:[%s996_s3 + $0x58] sm:$0xff]  }
   0xe   : > { %s754_s27 = smul.u32 12, %s1003_s22  ;;  %590 = vmatpush1.bf16.msra.mxu1 %v781_v19  ;;  %v454_v30 = vrot.slane %v453_v29, 6  ;;  %s720_s11 = sshll.u32 %s1003_s22, 1  ;;  %v738_v51 = vld [vmem:[%s997_s4] ss:$0 sm:$0xff] }
   0xf   : > { %388 = vmatpush1.bf16.msra.mxu0 %v769_v3  ;;  %591 = vmatprep.subr.bf16.mxu1 %v800_v1  ;;  %s256_s15 = scalar_lea.vmem %s998_s5, %s720_s11  ;;  %v448_v46 = vld [vmem:[#allocation2 + $0x4] sm:$0xc]  ;;  %s260_s19 = scalar_lea.vmem %s999_s6, %s720_s11 }
  0x10   : > { %s861_s30 = scalar_lea.vmem %s993_s0, %s754_s27  ;;  %389 = vmatprep.subr.bf16.mxu0 %v800_v1  ;;  %vm960_vm5 = vcmp.ne.s16.totalorder %v454_v30, 0  ;;  %v458_v40 = vld [vmem:[#allocation2 + $0x8] sm:$0xc] }
  0x11   : > { %v766_v4 = vld [vmem:[%s861_s30 + $0x4] ss:$0 sps:$4 sm:$0x33]   ;;  %v266_v7 = vld [vmem:[%s861_s30 + $0x8] sm:$0x3]  ;;  %v466_v41 = vsel %vm960_vm5, %v458_v40, 0 }
  0x12   : > { %270 = vrot.lane.b32.xlu0 %v766_v4, %s801_s9  ;;  %736 = vmatprep.mubr.msk.bf16.mxu0 %vm272_vm0, %v266_v7  ;;  %v264_v15 = vld [vmem:[%s861_s30] sm:$0x3]  ;;  %v510_v43 = vrot.slane %v466_v41, 2  ;;  %v456_v47 = vsel %vm960_vm5, %v448_v46, 0 }
  0x13   : > { %390 = vmatpush1.bf16.msra.mxu0 %v770_v5  ;;  %592 = vmatpush1.bf16.msra.mxu1 %v782_v20 }
  0x14   : > { %391 = vmatprep.subr.bf16.mxu0 %v800_v1  ;;  %593 = vmatprep.subr.bf16.mxu1 %v800_v1 }
  0x15   : > { %751 = vmatprep.mubr.msk.bf16.mxu1 %vm272_vm0, %v510_v43 }
  0x17   : > { %392 = vmatpush1.bf16.msra.mxu0 %v771_v6  ;;  %594 = vmatpush1.bf16.msra.mxu1 %v783_v21 }
  0x18   : > { %393 = vmatprep.subr.bf16.mxu0 %v800_v1  ;;  %595 = vmatprep.subr.bf16.mxu1 %v800_v1 }
  0x1b   : > { %394 = vmatpush1.bf16.msra.mxu0 %v772_v8  ;;  %596 = vmatpush1.bf16.msra.mxu1 %v784_v22 }
  0x1c   : > { %395 = vmatprep.subr.bf16.mxu0 %v800_v1  ;;  %597 = vmatprep.subr.bf16.mxu1 %v800_v1 }
  0x1f   : > { %396 = vmatpush1.bf16.msra.mxu0 %v773_v9  ;;  %598 = vmatpush1.bf16.msra.mxu1 %v785_v23 }
  0x20   : > { %397 = vmatprep.subr.bf16.mxu0 %v800_v1  ;;  %599 = vmatprep.subr.bf16.mxu1 %v800_v1 }
  0x23   : > { %398 = vmatpush1.bf16.msra.mxu0 %v774_v10  ;;  %600 = vmatpush1.bf16.msra.mxu1 %v786_v24 }
  0x24   : > { %399 = vmatprep.subr.bf16.mxu0 %v800_v1  ;;  %601 = vmatprep.subr.bf16.mxu1 %v800_v1 }
  0x27   : > { %400 = vmatpush1.bf16.msra.mxu0 %v775_v11  ;;  %602 = vmatpush1.bf16.msra.mxu1 %v787_v25 }
  0x28   : > { %401 = vmatprep.subr.bf16.mxu0 %v800_v1  ;;  %603 = vmatprep.subr.bf16.mxu1 %v800_v1 }
  0x2b   : > { %402 = vmatpush1.bf16.msra.mxu0 %v776_v12  ;;  %604 = vmatpush1.bf16.msra.mxu1 %v788_v26 }
  0x2c   : > { %403 = vmatprep.subr.bf16.mxu0 %v800_v1  ;;  %605 = vmatprep.subr.bf16.mxu1 %v800_v1 }
  0x2f   : > { %404 = vmatpush1.bf16.msra.mxu0 %v777_v13  ;;  %606 = vmatpush1.bf16.msra.mxu1 %v789_v27 }
  0x30   : > { %405 = vmatprep.subr.bf16.mxu0 %v800_v1  ;;  %607 = vmatprep.subr.bf16.mxu1 %v800_v1 }
  0x33   : > { %406 = vmatpush1.bf16.msra.mxu0 %v778_v14  ;;  %608 = vmatpush1.bf16.msra.mxu1 %v790_v28 }
  0x34   : > { %609 = vmatprep.subr.bf16.mxu1 %v800_v1 }
  0x37   : > { %610 = vmatpush1.bf16.msra.mxu1 %v791_v39 }
  0x84   : > { %v271_v16 = vpop.permute.xlu0 %270 }
  0x85   : > { %v275_v17 = vsel %vm272_vm0, %v264_v15, %v271_v16 }
  0x86   : > { %416 = vmatmul.mubr.bf16.vlgmr.msra.gmra.mrb[0].mxu0 %v275_v17 }
 0x159   : > { %v417_v32 = vpop.f32.mrb[0].mxu0 }
 0x15a   : > { %v418_v33 = vadd.f32 %v723_v31, %v417_v32  ;;  %v419_v34 = vpop.f32.mrb[1].mxu0 }
 0x15b   : > { %v420_v36 = vpop.f32.mrb[2].mxu0 }
 0x15c   : > { %v423_v37 = vmax.f32 %v418_v33, 0.0  ;;  %v421_v38 = vpop.f32.mrb[3].mxu0 }
 0x15e   : > { %v424_v42 = vpack.c.bf16 %v423_v37, %v423_v37 }
 0x160   : > { %426 = vst.msk [vmem:[%s256_s15] sm:$0x3] %vm425_vm1, %v424_v42  ;;  %433 = vst.msk [vmem:[#allocation2 + $0x8] sm:$0x3] %vm425_vm1, %v424_v42 }
 0x167   : > { %v779_v44 = vld [vmem:[#allocation2 + $0x8] ss:$0 sps:$4 sm:$0x33]  }
 0x168   : > { %v470_v45 = vrot.slane %v779_v44, 6 }
 0x16a   : > { %471 = vrot.lane.b32.xlu0 %v470_v45, %s801_s9 }
 0x1dc   : > { %v472_v48 = vpop.permute.xlu0 %471 }
 0x1dd   : > { %v475_v49 = vsel %vm272_vm0, %v456_v47, %v472_v48 }
 0x1de   : > { %v509_v50 = vrot.slane %v475_v49, 2 }
 0x1e0   : > { %620 = vmatmul.mubr.bf16.vlgmr.msra.gmra.mrb[0].mxu1 %v509_v50 }
 0x2b3   : > { %v621_v52 = vpop.f32.mrb[0].mxu1 }
 0x2b4   : > { %v622_v53 = vadd.f32 %v738_v51, %v621_v52  ;;  %v623_v54 = vpop.f32.mrb[1].mxu1 }
 0x2b5   : > { %v624_v55 = vpop.f32.mrb[2].mxu1 }
 0x2b6   : > { %v627_v56 = vmax.f32 %v622_v53, 0.0  ;;  %v625_v57 = vpop.f32.mrb[3].mxu1 }
 0x2b8   : > { %v628_v58 = vpack.c.bf16 %v627_v56, %v627_v56 }
 0x2ba   : > { %629 = vst.msk [vmem:[%s260_s19] sm:$0x3] %vm425_vm1, %v628_v58 }
 0x2bb PF: > { %s17_s21 = sadd.s32 1, %s798_s21  }
 0x2bc   : > { %p14_p4 = scmp.ge.s32.totalorder %s17_s21, 4  }
 0x2be   :  { %16 = sbr.rel (!%p14_p4) target bundleno = 1 (0x1), region = 82 }

// kernel: rrs_1d_forward.13
= control target key start
LH: loop header
LB: loop body
LE: loop exit
PB: predicated region body
PF: predicated region fallthrough
CT: control target
= control target key end

     0   :  { %s857_s12 = smov 0   ;;  %s995_s0 = inlined_call_operand.vmem [shape: bf16[2,5,64], index: 0, kind: input, shape index: {}]   ;;  %s996_s1 = inlined_call_operand.vmem [shape: bf16[576,64], index: 1, kind: input, shape index: {}]   ;;  %s997_s2 = inlined_call_operand.vmem [shape: f32[1,64], index: 2, kind: input, shape index: {}]   ;;  %s998_s3 = inlined_call_operand.vmem [shape: bf16[2,1,64], index: 3, kind: output, shape index: {}]  }
   0x1 LB: > { %s663_s13 = sadd.s32 4294967295, %s831_s12   ;;  %p667_p0 = scmp.ge.s32.totalorder %s831_s12, 1  ;;  %s831_s12 = sphi %s857_s12, %s13_s12  }
   0x2   : > { %p136_p1 = scmp.lt.s32.totalorder %s831_s12, 3 }
   0x4   : > { %p137_p2 = pnand %p667_p0, %p136_p1 }
   0x5   : > { %p157_p3 = scmp.lt.s32.totalorder (!%p137_p2), %s663_s13, 1  ;;  %v789_v0 = vld [vmem:[%s996_s1 + $0x40] sm:$0xff] (!%p137_p2)   ;;  %v833_v2 = vmov (!%p137_p2), 0   ;;  %v791_v3 = vld [vmem:[%s996_s1 + $0x48] sm:$0xff] (!%p137_p2)   ;;  %v795_v9 = vld [vmem:[%s996_s1 + $0x50] sm:$0xff] (!%p137_p2)   ;;  %s834_s7 = smov (!%p137_p2), 64  }
   0x6   : > { %140 = sbr.rel (%p137_p2) target bundleno = 370 (0x172), region = 32  ;;  %v790_v1 = vld [vmem:[%s996_s1] sm:$0xff] (!%p137_p2)   ;;  %520 = vmatprep.mubr.bf16.mxu0 (!%p137_p2), %v833_v2  ;;  %714 = vmatprep.subr.bf16.mxu0 (!%p137_p2), %v789_v0  ;;  %v792_v4 = vld [vmem:[%s996_s1 + $0x8] sm:$0xff] (!%p137_p2)   ;;  %v796_v12 = vld [vmem:[%s996_s1 + $0x10] sm:$0xff] (!%p137_p2)   ;;  %v835_v36 = vmov (!%p137_p2), 0.0   ;;  %vm185_vm0 = vcmask (!%p137_p2), 523264  }
   0x7   : > { %715 = vmatpush3.bf16.msra.mxu0 (!%p137_p2), %v790_v1  ;;  %v793_v5 = vld [vmem:[%s996_s1 + $0xc0] sm:$0xff] (!%p137_p2)   ;;  %v797_v14 = vld [vmem:[%s996_s1 + $0xc8] sm:$0xff] (!%p137_p2)   ;;  %v799_v16 = vld [vmem:[%s996_s1 + $0x58] sm:$0xff] (!%p137_p2)   ;;  %vm836_vm2 = vmmov (!%p137_p2), 0   ;;  %vm610_vm3 = vcmask (!%p137_p2), 516096  }
   0x8   : > { %716 = vmatprep.subr.bf16.mxu0 (!%p137_p2), %v791_v3  ;;  %v794_v6 = vld [vmem:[%s996_s1 + $0x80] sm:$0xff] (!%p137_p2)   ;;  %736 = vmatprep.subr.bf16.mxu1 (!%p137_p2), %v793_v5  ;;  %v798_v15 = vld [vmem:[%s996_s1 + $0x88] sm:$0xff] (!%p137_p2)   ;;  %v800_v17 = vld [vmem:[%s996_s1 + $0x18] sm:$0xff] (!%p137_p2)   ;;  %vm611_vm4 = vsmask.f32 (!%p137_p2), 256 }
   0x9   : > { %737 = vmatpush3.bf16.msra.mxu1 (!%p137_p2), %v794_v6  ;;  %v801_v18 = vld [vmem:[%s996_s1 + $0xd0] sm:$0xff] (!%p137_p2)   ;;  %v803_v20 = vld [vmem:[%s996_s1 + $0x60] sm:$0xff] (!%p137_p2)   ;;  %v805_v22 = vld [vmem:[%s996_s1 + $0xd8] sm:$0xff] (!%p137_p2)  }
   0xa   : > { %738 = vmatprep.subr.bf16.mxu1 (!%p137_p2), %v797_v14  ;;  %v802_v19 = vld [vmem:[%s996_s1 + $0x90] sm:$0xff] (!%p137_p2)   ;;  %v804_v21 = vld [vmem:[%s996_s1 + $0x20] sm:$0xff] (!%p137_p2)   ;;  %v806_v23 = vld [vmem:[%s996_s1 + $0x98] sm:$0xff] (!%p137_p2)  }
   0xb   : > { %717 = vmatpush3.bf16.msra.mxu0 (!%p137_p2), %v792_v4  ;;  %v807_v24 = vld [vmem:[%s996_s1 + $0x68] sm:$0xff] (!%p137_p2)   ;;  %v809_v26 = vld [vmem:[%s996_s1 + $0xe0] sm:$0xff] (!%p137_p2)   ;;  %v811_v28 = vld [vmem:[%s996_s1 + $0x70] sm:$0xff] (!%p137_p2)  }
   0xc   : > { %718 = vmatprep.subr.bf16.mxu0 (!%p137_p2), %v795_v9  ;;  %v808_v25 = vld [vmem:[%s996_s1 + $0x28] sm:$0xff] (!%p137_p2)   ;;  %v810_v27 = vld [vmem:[%s996_s1 + $0xa0] sm:$0xff] (!%p137_p2)   ;;  %v812_v29 = vld [vmem:[%s996_s1 + $0x30] sm:$0xff] (!%p137_p2)  }
   0xd   : > { %s1000_s13 = smov (!%p157_p3, %s663_s13), 1  ;;  %739 = vmatpush3.bf16.msra.mxu1 %v798_v15  ;;  %v813_v30 = vld [vmem:[%s996_s1 + $0xe8] sm:$0xff]   ;;  %v815_v32 = vld [vmem:[%s996_s1 + $0x78] sm:$0xff]   ;;  %v817_v34 = vld [vmem:[%s996_s1 + $0xf0] sm:$0xff]  }
   0xe   : > { %s668_s20 = sshll.u32 %s1000_s13, 2  ;;  %740 = vmatprep.subr.bf16.mxu1 %v801_v18  ;;  %v814_v31 = vld [vmem:[%s996_s1 + $0xa8] sm:$0xff]   ;;  %v816_v33 = vld [vmem:[%s996_s1 + $0x38] sm:$0xff]   ;;  %v818_v35 = vld [vmem:[%s996_s1 + $0xb0] sm:$0xff]  }
   0xf   : > { %s160_s25 = scalar_lea.vmem %s995_s0, %s668_s20  ;;  %719 = vmatpush3.bf16.msra.mxu0 %v796_v12  ;;  %v820_v37 = vld [vmem:[%s996_s1 + $0xf8] sm:$0xff]   ;;  %vm707_vm1 = vmneg %vm185_vm0  ;;  %v819_v39 = vld [vmem:[%s996_s1 + $0x100] sm:$0xff]   ;;  %s163_s20 = scalar_lea.vmem %s998_s3, %s1000_s13 }
  0x10   : > { %v787_v7 = vld [vmem:[%s160_s25] ss:$0 sps:$4 sm:$0x11]   ;;  %720 = vmatprep.subr.bf16.mxu0 %v799_v16  ;;  %v821_v38 = vld [vmem:[%s996_s1 + $0xb8] sm:$0xff]   ;;  %v822_v42 = vld [vmem:[%s996_s1 + $0x108] sm:$0xff]  }
  0x11   : > { %v890_v8 = vld [vmem:[%s160_s25] ss:$0 sps:$4 sm:$0x22]   ;;  %v171_v10 = vshrl.u32 %v787_v7, 16  ;;  %741 = vmatpush3.bf16.msra.mxu1 %v802_v19  ;;  %v823_v44 = vld [vmem:[%s996_s1 + $0x110] sm:$0xff]   ;;  %v824_v45 = vld [vmem:[%s996_s1 + $0x118] sm:$0xff]  }
  0x12   : > { %v180_v11 = vshrl.u32 %v890_v8, 16  ;;  %742 = vmatprep.subr.bf16.mxu1 %v805_v22  ;;  %v178_v41 = vrot.slane %v890_v8, 1  ;;  %v269_v51 = vld [vmem:[%s997_s2] sm:$0x1]  ;;  %vm612_vm5 = vmand %vm610_vm3, %vm611_vm4 }
  0x13   : > { %173 = vrot.lane.b32.xlu0 %v171_v10, %s834_s7  ;;  %721 = vmatpush3.bf16.msra.mxu0 %v800_v17  ;;  %v613_v1 = vld [vmem:[%s163_s20] sm:$0x1] }
  0x14   : > { %v182_v13 = vrot.slane %v180_v11, 1  ;;  %722 = vmatprep.subr.bf16.mxu0 %v803_v20 }
  0x15   : > { %743 = vmatpush3.bf16.msra.mxu1 %v806_v23 }
  0x16   : > { %744 = vmatprep.subr.bf16.mxu1 %v809_v26 }
  0x17   : > { %183 = vrot.lane.b32.xlu0 %v182_v13, %s834_s7  ;;  %723 = vmatpush3.bf16.msra.mxu0 %v804_v21 }
  0x18   : > { %724 = vmatprep.subr.bf16.mxu0 %v807_v24 }
  0x19   : > { %745 = vmatpush3.bf16.msra.mxu1 %v810_v27 }
  0x1a   : > { %746 = vmatprep.subr.bf16.mxu1 %v813_v30 }
  0x1b   : > { %725 = vmatpush3.bf16.msra.mxu0 %v808_v25 }
  0x1c   : > { %726 = vmatprep.subr.bf16.mxu0 %v811_v28 }
  0x1d   : > { %747 = vmatpush3.bf16.msra.mxu1 %v814_v31 }
  0x1e   : > { %748 = vmatprep.subr.bf16.mxu1 %v817_v34 }
  0x1f   : > { %727 = vmatpush3.bf16.msra.mxu0 %v812_v29 }
  0x20   : > { %728 = vmatprep.subr.bf16.mxu0 %v815_v32 }
  0x21   : > { %749 = vmatpush3.bf16.msra.mxu1 %v818_v35 }
  0x22   : > { %750 = vmatprep.subr.bf16.mxu1 %v820_v37 }
  0x23   : > { %729 = vmatpush3.bf16.msra.mxu0 %v816_v33 }
  0x24   : > { %763 = vmatprep.subr.bf16.mxu0 %v835_v36 }
  0x25   : > { %751 = vmatpush3.bf16.msra.mxu1 %v821_v38 }
  0x85   : > { %v174_v40 = vpop.permute.xlu0 %173 }
  0x86   : > { %708 = vmatmul.mubr.msk.bf16.vlgmr.msra.gmra.mrb[0].mxu0 %vm707_vm1, %v174_v40 }
  0x87   : > { %764 = vmatpush3.bf16.msra.mxu0 %v819_v39  ;;  %771 = vmatprep.mubr.msk.bf16.mxu0 %vm836_vm2, %v835_v36 }
  0x88   : > { %765 = vmatprep.subr.bf16.mxu0 %v835_v36 }
  0x89   : > { %v184_v43 = vpop.permute.xlu0 %183 }
  0x8a   : > { %710 = vmatprep.mubr.msk.bf16.mxu1 %vm707_vm1, %v184_v43 }
  0x8b   : > { %766 = vmatpush3.bf16.msra.mxu0 %v822_v42  ;;  %711 = vmatmul.mubr.msk.bf16.vlgmr.msra.gmra.mrb[0].mxu1 %vm185_vm0, %v178_v41 }
  0x8c   : > { %767 = vmatprep.subr.bf16.mxu0 %v835_v36 }
  0x8f   : > { %768 = vmatpush3.bf16.msra.mxu0 %v823_v44 }
  0x90   : > { %769 = vmatprep.subr.bf16.mxu0 %v835_v36 }
  0x93   : > { %770 = vmatpush3.bf16.msra.mxu0 %v824_v45 }
  0x96   : > { %772 = vmatmul.mubr.bf16.vlgmr.msra.gmra.mrb[4].mxu0 %v833_v2 }
 0x159   : > { %v730_v46 = vpop.f32.mrb[0].mxu0 }
 0x15a   : > { %v731_v47 = vpop.f32.mrb[1].mxu0 }
 0x15b   : > { %v732_v48 = vadd.f32 %v731_v47, %v730_v46  ;;  %v733_v49 = vpop.f32.mrb[2].mxu0 }
 0x15c   : > { %v734_v50 = vpop.f32.mrb[3].mxu0 }
 0x15d   : > { %v523_v54 = vadd.f32 %v732_v48, %v269_v51 }
 0x15e   : > { %v752_v52 = vpop.f32.mrb[0].mxu1 }
 0x15f   : > { %v753_v53 = vpop.f32.mrb[1].mxu1 }
 0x160   : > { %v754_v55 = vadd.f32 %v753_v53, %v752_v52  ;;  %v755_v56 = vpop.f32.mrb[2].mxu1 }
 0x161   : > { %v756_v57 = vpop.f32.mrb[3].mxu1 }
 0x162   : > { %v563_v58 = vadd.f32 %v754_v55, %v523_v54 }
 0x169   : > { %v602_v59 = vpop.f32.mrb[4].mxu0 }
 0x16a   : > { %v603_v60 = vadd.f32 %v602_v59, %v563_v58  ;;  %v773_v61 = vpop.f32.mrb[5].mxu0 }
 0x16b   : > { %v605_v62 = vpop.f32.mrb[6].mxu0 }
 0x16c   : > { %v608_v63 = vmax.f32 %v603_v60, 0.0  ;;  %v774_v0 = vpop.f32.mrb[7].mxu0 }
 0x16e   : > { %v609_v2 = vpack.c.bf16 %v608_v63, %v608_v63 }
 0x170   : > { %v614_v3 = vsel %vm612_vm5, %v609_v2, %v613_v1 }
 0x171   : > { %615 = vst [vmem:[%s163_s20] sm:$0x1] %v614_v3 }
 0x172 PF: > { %s13_s12 = sadd.s32 1, %s831_s12  }
 0x173   : > { %p10_p4 = scmp.ge.s32.totalorder %s13_s12, 4  }
 0x175   :  { %12 = sbr.rel (!%p10_p4) target bundleno = 1 (0x1), region = 62 }

// kernel: rrs_1d_forward.14
= control target key start
LH: loop header
LB: loop body
LE: loop exit
PB: predicated region body
PF: predicated region fallthrough
CT: control target
= control target key end

     0   :  { %s1067_s21 = smov 0   ;;  %s1263_s0 = inlined_call_operand.vmem [shape: bf16[2,20,64], index: 0, kind: input, shape index: {}]   ;;  %s1264_s1 = inlined_call_operand.vmem [shape: bf16[2,12,64], index: 1, kind: input, shape index: {}]   ;;  %s1265_s2 = inlined_call_operand.vmem [shape: bf16[192,64], index: 2, kind: input, shape index: {}]   ;;  %s1266_s3 = inlined_call_operand.vmem [shape: f32[1,64], index: 3, kind: input, shape index: {}]   ;;  %s1267_s4 = inlined_call_operand.vmem [shape: bf16[384,64], index: 4, kind: input, shape index: {}]   ;;  %s1268_s5 = inlined_call_operand.vmem [shape: f32[1,64], index: 5, kind: input, shape index: {}]   ;;  %s1269_s6 = inlined_call_operand.vmem [shape: bf16[2,4,64], index: 6, kind: output, shape index: {}]  }
   0x1 LB: > { %s863_s22 = sadd.s32 4294967295, %s1026_s21   ;;  %p867_p0 = scmp.ge.s32.totalorder %s1026_s21, 1  ;;  %s1026_s21 = sphi %s1067_s21, %s16_s21  }
   0x2   : > { %p222_p1 = scmp.lt.s32.totalorder %s1026_s21, 3 }
   0x4   : > { %p223_p2 = pnand %p867_p0, %p222_p1 }
   0x5   : > { %p256_p3 = scmp.lt.s32.totalorder (!%p223_p2), %s863_s22, 1  ;;  %v983_v0 = vld [vmem:[%s1265_s2] sm:$0xff] (!%p223_p2)   ;;  %v1028_v1 = vmov (!%p223_p2), 0   ;;  %v984_v2 = vld [vmem:[%s1265_s2 + $0x8] sm:$0xff] (!%p223_p2)   ;;  %v985_v3 = vld [vmem:[%s1265_s2 + $0x10] sm:$0xff] (!%p223_p2)   ;;  %s1029_s9 = smov (!%p223_p2), 64  }
   0x6   : > { %226 = sbr.rel (%p223_p2) target bundleno = 731 (0x2db), region = 44  ;;  %392 = vmatprep.subr.bf16.mxu0 (!%p223_p2), %v1028_v1  ;;  %v986_v5 = vld [vmem:[%s1265_s2 + $0x18] sm:$0xff] (!%p223_p2)   ;;  %vm281_vm0 = vcmask (!%p223_p2), 523264   ;;  %v987_v6 = vld [vmem:[%s1265_s2 + $0x20] sm:$0xff] (!%p223_p2)   ;;  %v988_v8 = vld [vmem:[%s1265_s2 + $0x28] sm:$0xff] (!%p223_p2)   ;;  %vm434_vm1 = vcmask (!%p223_p2), 519168  }
   0x7   : > { %393 = vmatpush1.bf16.msra.mxu0 (!%p223_p2), %v983_v0  ;;  %v989_v9 = vld [vmem:[%s1265_s2 + $0x30] sm:$0xff] (!%p223_p2)   ;;  %v990_v10 = vld [vmem:[%s1265_s2 + $0x38] sm:$0xff] (!%p223_p2)   ;;  %v991_v11 = vld [vmem:[%s1265_s2 + $0x40] sm:$0xff] (!%p223_p2)   ;;  %vm439_vm2 = vcmask (!%p223_p2), 517120   ;;  %436 = vst.msk [vmem:[#allocation2 + $0x4] sm:$0xf] (!%p223_p2), %vm434_vm1, %v1028_v1 }
   0x8   : > { %394 = vmatprep.subr.bf16.mxu0 (!%p223_p2), %v1028_v1  ;;  %v992_v12 = vld [vmem:[%s1265_s2 + $0x48] sm:$0xff] (!%p223_p2)   ;;  %v993_v13 = vld [vmem:[%s1265_s2 + $0x50] sm:$0xff] (!%p223_p2)   ;;  %v994_v14 = vld [vmem:[%s1265_s2 + $0x58] sm:$0xff] (!%p223_p2)   ;;  %437 = vst.msk [vmem:[#allocation2 + $0x8] sm:$0xf] (!%p223_p2), %vm434_vm1, %v1028_v1  ;;  %vm1030_vm3 = vmmov (!%p223_p2), 0  }
   0x9   : > { %vm1147_vm4 = vmpackc.low (!%p223_p2), %vm1030_vm3, %vm1030_vm3  ;;  %v996_v23 = vld [vmem:[%s1267_s4 + $0x40] sm:$0xff] (!%p223_p2)   ;;  %v998_v25 = vld [vmem:[%s1267_s4 + $0x48] sm:$0xff] (!%p223_p2)   ;;  %v1031_v55 = vmov (!%p223_p2), 0.0  }
   0xa   : > { %v997_v24 = vld [vmem:[%s1267_s4] sm:$0xff] (!%p223_p2)   ;;  %918 = vmatprep.subr.bf16.mxu1 (!%p223_p2), %v996_v23  ;;  %v999_v26 = vld [vmem:[%s1267_s4 + $0x8] sm:$0xff] (!%p223_p2)   ;;  %v1000_v27 = vld [vmem:[%s1267_s4 + $0x50] sm:$0xff] (!%p223_p2)   ;;  %v461_v39 = vsel (!%p223_p2), %vm1147_vm4, 65537, %v1028_v1 }
   0xb   : > { %395 = vmatpush1.bf16.msra.mxu0 (!%p223_p2), %v984_v2  ;;  %919 = vmatpush3.bf16.msra.mxu1 (!%p223_p2), %v997_v24  ;;  %v1001_v28 = vld [vmem:[%s1267_s4 + $0x10] sm:$0xff] (!%p223_p2)   ;;  %v1002_v29 = vld [vmem:[%s1267_s4 + $0x58] sm:$0xff] (!%p223_p2)   ;;  %v1004_v31 = vld [vmem:[%s1267_s4 + $0x60] sm:$0xff] (!%p223_p2)   ;;  %v462_v40 = vrot.slane (!%p223_p2), %v461_v39, 6 }
   0xc   : > { %396 = vmatprep.subr.bf16.mxu0 (!%p223_p2), %v1028_v1  ;;  %920 = vmatprep.subr.bf16.mxu1 (!%p223_p2), %v998_v25  ;;  %v1003_v30 = vld [vmem:[%s1267_s4 + $0x18] sm:$0xff] (!%p223_p2)   ;;  %v1005_v32 = vld [vmem:[%s1267_s4 + $0x20] sm:$0xff] (!%p223_p2)   ;;  %v1006_v33 = vld [vmem:[%s1267_s4 + $0x68] sm:$0xff] (!%p223_p2)  }
   0xd   : > { %s1275_s22 = smov (!%p256_p3, %s863_s22), 1  ;;  %v1007_v34 = vld [vmem:[%s1267_s4 + $0x28] sm:$0xff]   ;;  %v1008_v35 = vld [vmem:[%s1267_s4 + $0x70] sm:$0xff]   ;;  %v1010_v37 = vld [vmem:[%s1267_s4 + $0x78] sm:$0xff]   ;;  %vm1209_vm5 = vcmp.ne.s16.totalorder %v462_v40, 0 }
   0xe   : > { %s969_s27 = smul.u32 12, %s1275_s22  ;;  %s917_s7 = sshll.u32 %s1275_s22, 3  ;;  %v1009_v36 = vld [vmem:[%s1267_s4 + $0x30] sm:$0xff]   ;;  %v1011_v38 = vld [vmem:[%s1267_s4 + $0x38] sm:$0xff]   ;;  %v873_v41 = vld [vmem:[%s1266_s3] ss:$0 sm:$0xff] }
   0xf   : > { %397 = vmatpush1.bf16.msra.mxu0 %v985_v3  ;;  %s1143_s11 = scalar_lea.vmem %s1264_s1, %s917_s7  ;;  %921 = vmatpush3.bf16.msra.mxu1 %v999_v26  ;;  %v466_v48 = vld [vmem:[#allocation2 + $0x8] sm:$0xc]  ;;  %v456_v62 = vld [vmem:[#allocation2 + $0x4] sm:$0xc]  ;;  %s871_s23 = sshll.u32 %s1275_s22, 1 }
  0x10   : > { %s1089_s30 = scalar_lea.vmem %s1263_s0, %s969_s27  ;;  %398 = vmatprep.subr.bf16.mxu0 %v1028_v1  ;;  %v475_v19 = vld [vmem:[%s1143_s11] sm:$0x3]  ;;  %922 = vmatprep.subr.bf16.mxu1 %v1000_v27  ;;  %v474_v51 = vsel %vm1209_vm5, %v466_v48, 0  ;;  %v478_v56 = vld [vmem:[%s1143_s11 + $0x4] sm:$0x3]  ;;  %v464_v63 = vsel %vm1209_vm5, %v456_v62, 0  ;;  %s269_s26 = scalar_lea.vmem %s1269_s6, %s871_s23 }
  0x11   : > { %v982_v4 = vld [vmem:[%s1089_s30 + $0x4] ss:$0 sps:$4 sm:$0x33]   ;;  %v275_v7 = vld [vmem:[%s1089_s30 + $0x8] sm:$0x3]  ;;  %v476_v20 = vsel %vm1147_vm4, %v475_v19, 0 }
  0x12   : > { %279 = vrot.lane.b32.xlu0 %v982_v4, %s1029_s9  ;;  %886 = vmatprep.mubr.msk.bf16.mxu0 %vm281_vm0, %v275_v7  ;;  %v273_v15 = vld [vmem:[%s1089_s30] sm:$0x3]  ;;  %v888_v21 = vcombine.low %v476_v20, %v476_v20  ;;  %v479_v57 = vsel %vm1147_vm4, %v478_v56, 0  ;;  %v1013_v4 = vld [vmem:[%s1267_s4 + $0x88] sm:$0xff]  }
  0x13   : > { %399 = vmatpush1.bf16.msra.mxu0 %v986_v5  ;;  %923 = vmatpush3.bf16.msra.mxu1 %v1001_v28  ;;  %v889_v59 = vcombine.low %v479_v57, %v479_v57  ;;  %v1012_v2 = vld [vmem:[%s1267_s4 + $0x80] sm:$0xff]   ;;  %v1014_v5 = vld [vmem:[%s1267_s4 + $0x90] sm:$0xff]  }
  0x14   : > { %400 = vmatprep.subr.bf16.mxu0 %v1028_v1  ;;  %v489_v22 = vrot.slane %v888_v21, 6  ;;  %924 = vmatprep.subr.bf16.mxu1 %v1002_v29  ;;  %v1016_v7 = vld [vmem:[%s1267_s4 + $0xa0] sm:$0xff]  }
  0x15   : > { %v495_v61 = vrot.slane %v889_v59, 6  ;;  %v890_v20 = vld [vmem:[%s1268_s5] ss:$0 sm:$0xff] }
  0x16   : > { %490 = vrot.lane.b32.xlu0 %v489_v22, %s1029_s9 }
  0x17   : > { %401 = vmatpush1.bf16.msra.mxu0 %v987_v6  ;;  %925 = vmatpush3.bf16.msra.mxu1 %v1003_v30  ;;  %v1015_v6 = vld [vmem:[%s1267_s4 + $0x98] sm:$0xff]  }
  0x18   : > { %402 = vmatprep.subr.bf16.mxu0 %v1028_v1  ;;  %926 = vmatprep.subr.bf16.mxu1 %v1004_v31 }
  0x1b   : > { %403 = vmatpush1.bf16.msra.mxu0 %v988_v8  ;;  %927 = vmatpush3.bf16.msra.mxu1 %v1005_v32  ;;  %v1017_v8 = vld [vmem:[%s1267_s4 + $0xa8] sm:$0xff]  }
  0x1c   : > { %404 = vmatprep.subr.bf16.mxu0 %v1028_v1  ;;  %928 = vmatprep.subr.bf16.mxu1 %v1006_v33 }
  0x1f   : > { %405 = vmatpush1.bf16.msra.mxu0 %v989_v9  ;;  %929 = vmatpush3.bf16.msra.mxu1 %v1007_v34  ;;  %v1018_v9 = vld [vmem:[%s1267_s4 + $0xb0] sm:$0xff]  }
  0x20   : > { %406 = vmatprep.subr.bf16.mxu0 %v1028_v1  ;;  %930 = vmatprep.subr.bf16.mxu1 %v1008_v35 }
  0x23   : > { %407 = vmatpush1.bf16.msra.mxu0 %v990_v10  ;;  %931 = vmatpush3.bf16.msra.mxu1 %v1009_v36  ;;  %v477_v10 = vld [vmem:[%s1143_s11] sm:$0xc] }
  0x24   : > { %408 = vmatprep.subr.bf16.mxu0 %v1028_v1  ;;  %932 = vmatprep.subr.bf16.mxu1 %v1010_v37 }
  0x27   : > { %409 = vmatpush1.bf16.msra.mxu0 %v991_v11  ;;  %933 = vmatpush3.bf16.msra.mxu1 %v1011_v38 }
  0x28   : > { %410 = vmatprep.subr.bf16.mxu0 %v1028_v1  ;;  %949 = vmatprep.subr.bf16.mxu1 %v1031_v55 }
  0x2b   : > { %411 = vmatpush1.bf16.msra.mxu0 %v992_v12 }
  0x2c   : > { %412 = vmatprep.subr.bf16.mxu0 %v1028_v1 }
  0x2f   : > { %413 = vmatpush1.bf16.msra.mxu0 %v993_v13  ;;  %v1019_v13 = vld [vmem:[%s1267_s4 + $0xb8] sm:$0xff]  }
  0x30   : > { %414 = vmatprep.subr.bf16.mxu0 %v1028_v1 }
  0x33   : > { %415 = vmatpush1.bf16.msra.mxu0 %v994_v14 }
  0x84   : > { %v280_v16 = vpop.permute.xlu0 %279 }
  0x85   : > { %v284_v17 = vsel %vm281_vm0, %v273_v15, %v280_v16 }
  0x86   : > { %425 = vmatmul.mubr.bf16.vlgmr.msra.gmra.mrb[0].mxu0 %v284_v17 }
  0x88   : > { %v491_v46 = vpop.permute.xlu0 %490 }
  0x89   : > { %v503_v52 = vsel %vm281_vm0, %v474_v51, %v491_v46 }
  0x8a   : > { %v566_v54 = vrot.slane %v503_v52, 2 }
  0x8c   : > { %747 = vmatprep.mubr.bf16.mxu1 %v566_v54 }
 0x159   : > { %v426_v42 = vpop.f32.mrb[0].mxu0 }
 0x15a   : > { %v427_v44 = vadd.f32 %v873_v41, %v426_v42  ;;  %v428_v45 = vpop.f32.mrb[1].mxu0 }
 0x15b   : > { %v429_v47 = vpop.f32.mrb[2].mxu0 }
 0x15c   : > { %v432_v49 = vmax.f32 %v427_v44, 0.0  ;;  %v430_v50 = vpop.f32.mrb[3].mxu0 }
 0x15e   : > { %v433_v53 = vpack.c.bf16 %v432_v49, %v432_v49 }
 0x160   : > { %441 = vst.msk [vmem:[#allocation2 + $0x8] sm:$0x3] %vm439_vm2, %v433_v53 }
 0x167   : > { %v995_v58 = vld [vmem:[#allocation2 + $0x8] ss:$0 sps:$4 sm:$0x33]  }
 0x168   : > { %v483_v60 = vrot.slane %v995_v58, 6 }
 0x16a   : > { %484 = vrot.lane.b32.xlu1 %v483_v60, %s1029_s9 }
 0x16e   : > { %496 = vrot.lane.b32.xlu1 %v495_v61, %s1029_s9 }
 0x1dc   : > { %v485_v0 = vpop.permute.xlu1 %484 }
 0x1dd   : > { %v500_v1 = vsel %vm281_vm0, %v464_v63, %v485_v0 }
 0x1de   : > { %v565_v3 = vrot.slane %v500_v1, 2 }
 0x1e0   : > { %748 = vmatmul.mubr.bf16.vlgmr.msra.gmra.mrb[0].mxu1 %v565_v3  ;;  %v497_v11 = vpop.permute.xlu1 %496 }
 0x1e1   : > { %950 = vmatpush3.bf16.msra.mxu1 %v1012_v2  ;;  %965 = vmatprep.mubr.msk.bf16.mxu1 %vm1030_vm3, %v1031_v55  ;;  %v506_v12 = vsel %vm281_vm0, %v477_v10, %v497_v11 }
 0x1e2   : > { %951 = vmatprep.subr.bf16.mxu1 %v1031_v55  ;;  %v567_v14 = vrot.slane %v506_v12, 2 }
 0x1e5   : > { %952 = vmatpush3.bf16.msra.mxu1 %v1013_v4 }
 0x1e6   : > { %953 = vmatprep.subr.bf16.mxu1 %v1031_v55 }
 0x1e9   : > { %954 = vmatpush3.bf16.msra.mxu1 %v1014_v5 }
 0x1ea   : > { %955 = vmatprep.subr.bf16.mxu1 %v1031_v55 }
 0x1ed   : > { %956 = vmatpush3.bf16.msra.mxu1 %v1015_v6 }
 0x1ee   : > { %957 = vmatprep.subr.bf16.mxu1 %v1031_v55 }
 0x1f1   : > { %958 = vmatpush3.bf16.msra.mxu1 %v1016_v7 }
 0x1f2   : > { %959 = vmatprep.subr.bf16.mxu1 %v1031_v55 }
 0x1f5   : > { %960 = vmatpush3.bf16.msra.mxu1 %v1017_v8 }
 0x1f6   : > { %961 = vmatprep.subr.bf16.mxu1 %v1031_v55 }
 0x1f9   : > { %962 = vmatpush3.bf16.msra.mxu1 %v1018_v9 }
 0x1fa   : > { %963 = vmatprep.subr.bf16.mxu1 %v1031_v55 }
 0x1fd   : > { %964 = vmatpush3.bf16.msra.mxu1 %v1019_v13 }
 0x200   : > { %966 = vmatmul.mubr.bf16.vlgmr.msra.gmra.mrb[4].mxu1 %v567_v14 }
 0x2b3   : > { %v934_v15 = vpop.f32.mrb[0].mxu1 }
 0x2b4   : > { %v935_v16 = vpop.f32.mrb[1].mxu1 }
 0x2b5   : > { %v936_v17 = vadd.f32 %v935_v16, %v934_v15  ;;  %v937_v18 = vpop.f32.mrb[2].mxu1 }
 0x2b6   : > { %v938_v19 = vpop.f32.mrb[3].mxu1 }
 0x2b7   : > { %v750_v21 = vadd.f32 %v936_v17, %v890_v20 }
 0x2d3   : > { %v789_v22 = vpop.f32.mrb[4].mxu1 }
 0x2d4   : > { %v790_v23 = vadd.f32 %v789_v22, %v750_v21  ;;  %v967_v24 = vpop.f32.mrb[5].mxu1 }
 0x2d5   : > { %v792_v25 = vpop.f32.mrb[6].mxu1 }
 0x2d6   : > { %v795_v26 = vmax.f32 %v790_v23, 0.0  ;;  %v968_v27 = vpop.f32.mrb[7].mxu1 }
 0x2d8   : > { %v796_v28 = vpack.c.bf16 %v795_v26, %v795_v26 }
 0x2da   : > { %797 = vst.msk [vmem:[%s269_s26] sm:$0x3] %vm439_vm2, %v796_v28 }
 0x2db PF: > { %s16_s21 = sadd.s32 1, %s1026_s21  }
 0x2dc   : > { %p13_p4 = scmp.ge.s32.totalorder %s16_s21, 4  }
 0x2de   :  { %15 = sbr.rel (!%p13_p4) target bundleno = 1 (0x1), region = 77 }

// kernel: rrs_1d_forward.15
= control target key start
LH: loop header
LB: loop body
LE: loop exit
PB: predicated region body
PF: predicated region fallthrough
CT: control target
= control target key end

     0   :  { %s1198_s21 = smov 0   ;;  %s1454_s0 = inlined_call_operand.vmem [shape: bf16[2,32,64], index: 0, kind: input, shape index: {}]   ;;  %s1455_s1 = inlined_call_operand.vmem [shape: bf16[2,20,64], index: 1, kind: input, shape index: {}]   ;;  %s1456_s2 = inlined_call_operand.vmem [shape: bf16[192,64], index: 2, kind: input, shape index: {}]   ;;  %s1457_s3 = inlined_call_operand.vmem [shape: f32[1,64], index: 3, kind: input, shape index: {}]   ;;  %s1458_s4 = inlined_call_operand.vmem [shape: bf16[384,64], index: 4, kind: input, shape index: {}]   ;;  %s1459_s5 = inlined_call_operand.vmem [shape: f32[1,64], index: 5, kind: input, shape index: {}]   ;;  %s1460_s6 = inlined_call_operand.vmem [shape: bf16[2,16,64], index: 6, kind: output, shape index: {}]  }
   0x1 LB: > { %s980_s22 = sadd.s32 4294967295, %s1157_s21   ;;  %p984_p0 = scmp.ge.s32.totalorder %s1157_s21, 1  ;;  %s1157_s21 = sphi %s1198_s21, %s16_s21  }
   0x2   : > { %p222_p1 = scmp.lt.s32.totalorder %s1157_s21, 3 }
   0x4   : > { %p223_p2 = pnand %p984_p0, %p222_p1 }
   0x5   : > { %p257_p3 = scmp.lt.s32.totalorder (!%p223_p2), %s980_s22, 1  ;;  %v1113_v0 = vld [vmem:[%s1456_s2] sm:$0xff] (!%p223_p2)   ;;  %v1159_v1 = vmov (!%p223_p2), 0   ;;  %v1114_v2 = vld [vmem:[%s1456_s2 + $0x8] sm:$0xff] (!%p223_p2)   ;;  %vm292_vm0 = vcmask (!%p223_p2), 523264   ;;  %v451_v3 = vlaneseq (!%p223_p2)  ;;  %v1115_v4 = vld [vmem:[%s1456_s2 + $0x10] sm:$0xff] (!%p223_p2)  }
   0x6   : > { %226 = sbr.rel (%p223_p2) target bundleno = 738 (0x2e2), region = 44  ;;  %403 = vmatprep.subr.bf16.mxu0 (!%p223_p2), %v1159_v1  ;;  %447 = vst.msk [vmem:[#allocation2] sm:$0xff] (!%p223_p2), %vm292_vm0, %v1159_v1  ;;  %448 = vst.msk [vmem:[#allocation2 + $0x8] sm:$0xff] (!%p223_p2), %vm292_vm0, %v1159_v1  ;;  %s1160_s10 = smov (!%p223_p2), 64   ;;  %v1116_v12 = vld [vmem:[%s1456_s2 + $0x18] sm:$0xff] (!%p223_p2)   ;;  %v1117_v16 = vld [vmem:[%s1456_s2 + $0x20] sm:$0xff] (!%p223_p2)  }
   0x7   : > { %404 = vmatpush1.bf16.msra.mxu0 (!%p223_p2), %v1113_v0  ;;  %449 = vst.msk [vmem:[#allocation2 + $0x10] sm:$0xff] (!%p223_p2), %vm292_vm0, %v1159_v1  ;;  %v452_v10 = vshrl.u32 (!%p223_p2), %v451_v3, 7  ;;  %v1118_v25 = vld [vmem:[%s1456_s2 + $0x28] sm:$0xff] (!%p223_p2)   ;;  %v1119_v27 = vld [vmem:[%s1456_s2 + $0x30] sm:$0xff] (!%p223_p2)   ;;  %v1120_v28 = vld [vmem:[%s1456_s2 + $0x38] sm:$0xff] (!%p223_p2)   ;;  %vm525_vm9 = vcmask (!%p223_p2), 1041408  }
   0x8   : > { %405 = vmatprep.subr.bf16.mxu0 (!%p223_p2), %v1159_v1  ;;  %v1121_v29 = vld [vmem:[%s1456_s2 + $0x40] sm:$0xff] (!%p223_p2)   ;;  %v1122_v30 = vld [vmem:[%s1456_s2 + $0x48] sm:$0xff] (!%p223_p2)   ;;  %v1123_v31 = vld [vmem:[%s1456_s2 + $0x50] sm:$0xff] (!%p223_p2)   ;;  %vm526_vm10 = vcmask (!%p223_p2), 1045508   ;;  %vm576_vm15 = vcmask (!%p223_p2), 1044480  }
   0x9   : > { %v453_v11 = vadd.s32 (!%p223_p2), 8, %v452_v10  ;;  %v458_v13 = vand.u32 (!%p223_p2), 3, %v452_v10  ;;  %v1124_v32 = vld [vmem:[%s1456_s2 + $0x58] sm:$0xff] (!%p223_p2)   ;;  %vm527_vm11 = vmor (!%p223_p2), %vm525_vm9, %vm526_vm10  ;;  %v1126_v43 = vld [vmem:[%s1458_s4 + $0x40] sm:$0xff] (!%p223_p2)  }
   0xa   : > { %v1127_v44 = vld [vmem:[%s1458_s4] sm:$0xff] (!%p223_p2)   ;;  %v1128_v45 = vld [vmem:[%s1458_s4 + $0x48] sm:$0xff] (!%p223_p2)   ;;  %1047 = vmatprep.subr.bf16.mxu1 (!%p223_p2), %v1126_v43  ;;  %v1130_v52 = vld [vmem:[%s1458_s4 + $0x50] sm:$0xff] (!%p223_p2)  }
   0xb   : > { %406 = vmatpush1.bf16.msra.mxu0 (!%p223_p2), %v1114_v2  ;;  %v465_v14 = vand.u32 (!%p223_p2), 3, %v453_v11  ;;  %vm1241_vm1 = vcmp.ge.s32.totalorder (!%p223_p2), %v458_v13, 2  ;;  %vm500_vm5 = vcmp.lt.s32.totalorder (!%p223_p2), %v458_v13, 2  ;;  %1048 = vmatpush3.bf16.msra.mxu1 (!%p223_p2), %v1127_v44  ;;  %v1129_v50 = vld [vmem:[%s1458_s4 + $0x8] sm:$0xff] (!%p223_p2)   ;;  %v1131_v57 = vld [vmem:[%s1458_s4 + $0x10] sm:$0xff] (!%p223_p2)   ;;  %v1132_v59 = vld [vmem:[%s1458_s4 + $0x58] sm:$0xff] (!%p223_p2)  }
   0xc   : > { %407 = vmatprep.subr.bf16.mxu0 (!%p223_p2), %v1159_v1  ;;  %vm486_vm3 = vmpackc.low (!%p223_p2), %vm1241_vm1, %vm1241_vm1  ;;  %1049 = vmatprep.subr.bf16.mxu1 (!%p223_p2), %v1128_v45  ;;  %v1133_v61 = vld [vmem:[%s1458_s4 + $0x18] sm:$0xff] (!%p223_p2)   ;;  %v1134_v62 = vld [vmem:[%s1458_s4 + $0x60] sm:$0xff] (!%p223_p2)   ;;  %vm1162_vm1 = vmmov (!%p223_p2), 0  }
   0xd   : > { %s1468_s22 = smov (!%p257_p3, %s980_s22), 1  ;;  %vm1248_vm2 = vcmp.ge.s32.totalorder %v465_v14, 2  ;;  %vm501_vm6 = vcmp.lt.s32.totalorder %v465_v14, 2  ;;  %vm506_vm7 = vmpackc.low %vm500_vm5, %vm500_vm5  ;;  %v1135_v63 = vld [vmem:[%s1458_s4 + $0x20] sm:$0xff]   ;;  %v1136_v0 = vld [vmem:[%s1458_s4 + $0x68] sm:$0xff]  }
   0xe   : > { %s1043_s27 = sshll.u32 %s1468_s22, 4  ;;  %s1098_s9 = smul.u32 12, %s1468_s22  ;;  %vm487_vm4 = vmpackc.low %vm1248_vm2, %vm1248_vm2  ;;  %v1306_v35 = vsel %vm506_vm7, 65537, %v1159_v1  ;;  %v1137_v2 = vld [vmem:[%s1458_s4 + $0x28] sm:$0xff]   ;;  %v1138_v3 = vld [vmem:[%s1458_s4 + $0x70] sm:$0xff]   ;;  %vm661_vm7 = vcmask 1040384  }
   0xf   : > { %s261_s8 = scalar_lea.vmem %s1454_s0, %s1043_s27  ;;  %408 = vmatpush1.bf16.msra.mxu0 %v1115_v4  ;;  %vm507_vm8 = vmpackc.low %vm501_vm6, %vm501_vm6  ;;  %v528_v38 = vrot.slane %v1306_v35, 6  ;;  %1050 = vmatpush3.bf16.msra.mxu1 %v1129_v50  ;;  %v1139_v4 = vld [vmem:[%s1458_s4 + $0x30] sm:$0xff]   ;;  %v1141_v13 = vld [vmem:[%s1458_s4 + $0x38] sm:$0xff]   ;;  %vm545_vm6 = vcmask 1045504   ;;  %s1044_s24 = sshll.u32 %s1468_s22, 3 }
  0x10   : > { %v276_v5 = vld [vmem:[%s261_s8 + $0x4] sm:$0xf]  ;;  %v277_v6 = vld [vmem:[%s261_s8 + $0x8] sm:$0xf]  ;;  %v275_v7 = vld [vmem:[%s261_s8] sm:$0xf]  ;;  %409 = vmatprep.subr.bf16.mxu0 %v1159_v1  ;;  %s1239_s15 = scalar_lea.vmem %s1455_s1, %s1098_s9  ;;  %1051 = vmatprep.subr.bf16.mxu1 %v1130_v52  ;;  %s271_s27 = scalar_lea.vmem %s1460_s6, %s1044_s24 }
  0x11   : > { %v991_v8 = vcombine.low %v276_v5, %v277_v6  ;;  %v990_v9 = vcombine.low %v275_v7, %v276_v5  ;;  %v278_v17 = vld [vmem:[%s261_s8 + $0xc] sm:$0xf]  ;;  %v517_v20 = vld [vmem:[%s1239_s15] sm:$0xf]  ;;  %v1260_v21 = vld [vmem:[%s1239_s15 + $0x4] sm:$0xf] }
  0x12   : > { %v992_v19 = vcombine.low %v277_v6, %v278_v17  ;;  %v519_v22 = vsel %vm486_vm3, %v517_v20, 0  ;;  %v520_v23 = vsel %vm487_vm4, %v1260_v21, 0  ;;  %v1309_v36 = vsel %vm507_vm8, 65537, %v1159_v1  ;;  %v523_v40 = vld [vmem:[%s1239_s15] sm:$0xc]  ;;  %v1140_v5 = vld [vmem:[%s1458_s4 + $0x78] sm:$0xff]  }
  0x13   : > { %287 = vrot.lane.b32.xlu0 %v991_v8, %s1160_s10  ;;  %410 = vmatpush1.bf16.msra.mxu0 %v1116_v12  ;;  %v1009_v24 = vcombine.low %v519_v22, %v520_v23  ;;  %v1008_v37 = vcombine.low %v1306_v35, %v1309_v36  ;;  %v529_v39 = vrot.slane %v528_v38, 4  ;;  %v530_v41 = vrot.slane %v1309_v36, 6  ;;  %v524_v46 = vld [vmem:[%s1239_s15 + $0x8] sm:$0x3]  ;;  %v993_v6 = vld [vmem:[%s1457_s3] ss:$0 sm:$0xff] }
  0x14   : > { %411 = vmatprep.subr.bf16.mxu0 %v1159_v1  ;;  %1006 = vmatprep.mubr.msk.bf16.mxu0 %vm292_vm0, %v992_v19  ;;  %vm1316_vm12 = vcmp.ne.s16.totalorder %v528_v38, 0  ;;  %v1161_v20 = vmov 0.0   ;;  %v499_v22 = vld [vmem:[#allocation2 + $0x10] sm:$0x1]  ;;  %v489_v38 = vsel %vm487_vm4, 65537, %v1159_v1  ;;  %v1142_v18 = vld [vmem:[%s1458_s4 + $0x80] sm:$0xff]  }
  0x15   : > { %v554_v26 = vrot.slane %v1009_v24, 1  ;;  %v531_v47 = vsel %vm527_vm11, %v529_v39, %v530_v41  ;;  %v532_v48 = vrot.slane %v530_v41, 4  ;;  %v536_v49 = vsel %vm1316_vm12, %v523_v40, 0  ;;  %1052 = vmatpush3.bf16.msra.mxu1 %v1131_v57  ;;  %v478_v41 = vld [vmem:[#allocation2] sm:$0x80]  ;;  %v1144_v50 = vld [vmem:[%s1458_s4 + $0x90] sm:$0xff]  }
  0x16   : > { %vm534_vm13 = vcmp.ne.s16.totalorder %v531_v47, 0  ;;  %1053 = vmatprep.subr.bf16.mxu1 %v1132_v59  ;;  %v513_v17 = vrot.slane %v1008_v37, 7  ;;  %v488_v37 = vsel %vm486_vm3, 65537, %v1159_v1  ;;  %v1145_v52 = vld [vmem:[%s1458_s4 + $0x98] sm:$0xff]  }
  0x17   : > { %412 = vmatpush1.bf16.msra.mxu0 %v1117_v16  ;;  %555 = vrot.lane.b32.xlu0 %v554_v26, %s1160_s10  ;;  %vm535_vm14 = vcmp.ne.s16.totalorder %v532_v48, 0  ;;  %v537_v51 = vsel %vm534_vm13, %v1260_v21, 0  ;;  %v1007_v39 = vcombine.low %v488_v37, %v489_v38 }
  0x18   : > { %413 = vmatprep.subr.bf16.mxu0 %v1159_v1  ;;  %v538_v53 = vsel %vm535_vm14, %v524_v46, 0  ;;  %v1339_v54 = vcombine.low %v536_v49, %v537_v51  ;;  %vm514_vm5 = vcmp.ne.s16.totalorder %v513_v17, 0  ;;  %v1143_v49 = vld [vmem:[%s1458_s4 + $0x88] sm:$0xff]   ;;  %v521_v51 = vld [vmem:[%s1239_s15] sm:$0xe] }
  0x19   : > { %v1013_v55 = vcombine.low %v538_v53, %v538_v53  ;;  %1054 = vmatpush3.bf16.msra.mxu1 %v1133_v61  ;;  %v516_v23 = vsel %vm514_vm5, %v499_v22, 0  ;;  %v493_v40 = vrot.slane %v1007_v39, 1  ;;  %v1010_v53 = vcombine.low %v521_v51, %v1260_v21  ;;  %v1148_v61 = vld [vmem:[%s1458_s4 + $0xb0] sm:$0xff]  }
  0x1a   : > { %v577_v56 = vrot.slane %v1339_v54, 3  ;;  %1055 = vmatprep.subr.bf16.mxu1 %v1134_v62  ;;  %v547_v24 = vrot.slane %v516_v23, 2  ;;  %v1149_v54 = vld [vmem:[%s1239_s15 + $0x8] ss:$0 sps:$4 sm:$0x11]  }
  0x1b   : > { %414 = vmatpush1.bf16.msra.mxu0 %v1118_v25  ;;  %v578_v58 = vrot.slane %v1013_v55, 3  ;;  %vm494_vm8 = vcmp.ne.s16.totalorder %v493_v40, 0  ;;  %v1146_v55 = vld [vmem:[%s1458_s4 + $0xa0] sm:$0xff]   ;;  %v566_v57 = vrot.slane %v1149_v54, 2 }
  0x1c   : > { %415 = vmatprep.subr.bf16.mxu0 %v1159_v1  ;;  %v495_v43 = vsel %vm494_vm8, %v478_v41, 0 }
  0x1d   : > { %v579_v60 = vsel %vm576_vm15, %v577_v56, %v578_v58  ;;  %1056 = vmatpush3.bf16.msra.mxu1 %v1135_v63  ;;  %v1147_v58 = vld [vmem:[%s1458_s4 + $0xa8] sm:$0xff]  }
  0x1e   : > { %582 = vrot.lane.b32.xlu0 %v579_v60, %s1160_s10  ;;  %1057 = vmatprep.subr.bf16.mxu1 %v1136_v0 }
  0x1f   : > { %416 = vmatpush1.bf16.msra.mxu0 %v1119_v27 }
  0x20   : > { %417 = vmatprep.subr.bf16.mxu0 %v1159_v1 }
  0x21   : > { %1058 = vmatpush3.bf16.msra.mxu1 %v1137_v2 }
  0x22   : > { %1059 = vmatprep.subr.bf16.mxu1 %v1138_v3  ;;  %v1150_v3 = vld [vmem:[%s1458_s4 + $0xb8] sm:$0xff]  }
  0x23   : > { %418 = vmatpush1.bf16.msra.mxu0 %v1120_v28 }
  0x24   : > { %419 = vmatprep.subr.bf16.mxu0 %v1159_v1 }
  0x25   : > { %1060 = vmatpush3.bf16.msra.mxu1 %v1139_v4 }
  0x26   : > { %1061 = vmatprep.subr.bf16.mxu1 %v1140_v5 }
  0x27   : > { %420 = vmatpush1.bf16.msra.mxu0 %v1121_v29 }
  0x28   : > { %421 = vmatprep.subr.bf16.mxu0 %v1159_v1 }
  0x29   : > { %1062 = vmatpush3.bf16.msra.mxu1 %v1141_v13 }
  0x2a   : > { %1078 = vmatprep.subr.bf16.mxu1 %v1161_v20 }
  0x2b   : > { %422 = vmatpush1.bf16.msra.mxu0 %v1122_v30 }
  0x2c   : > { %423 = vmatprep.subr.bf16.mxu0 %v1159_v1 }
  0x2f   : > { %424 = vmatpush1.bf16.msra.mxu0 %v1123_v31 }
  0x30   : > { %425 = vmatprep.subr.bf16.mxu0 %v1159_v1 }
  0x33   : > { %426 = vmatpush1.bf16.msra.mxu0 %v1124_v32 }
  0x85   : > { %v288_v33 = vpop.permute.xlu0 %287 }
  0x86   : > { %v295_v34 = vsel %vm292_vm0, %v990_v9, %v288_v33 }
  0x87   : > { %436 = vmatmul.mubr.bf16.vlgmr.msra.gmra.mrb[0].mxu0 %v295_v34 }
  0x89   : > { %v556_v27 = vpop.permute.xlu0 %555 }
  0x90   : > { %v583_v21 = vpop.permute.xlu0 %582 }
 0x15a   : > { %v437_v7 = vpop.f32.mrb[0].mxu0 }
 0x15b   : > { %v438_v8 = vadd.f32 %v993_v6, %v437_v7  ;;  %v439_v9 = vpop.f32.mrb[1].mxu0 }
 0x15c   : > { %v440_v10 = vpop.f32.mrb[2].mxu0 }
 0x15d   : > { %v441_v11 = vadd.f32 %v993_v6, %v440_v10  ;;  %v442_v12 = vpop.f32.mrb[3].mxu0  ;;  %v444_v14 = vmax.f32 %v438_v8, 0.0 }
 0x15f   : > { %v445_v16 = vmax.f32 %v441_v11, 0.0  ;;  %v1014_v11 = vld [vmem:[%s1459_s5] ss:$0 sm:$0xff] }
 0x161   : > { %v446_v19 = vpack.c.bf16 %v445_v16, %v444_v14 }
 0x163   : > { %450 = vst.msk [vmem:[#allocation2 + $0x8] sm:$0xff] %vm292_vm0, %v446_v19 }
 0x16a   : > { %v498_v25 = vld [vmem:[#allocation2 + $0x8] sm:$0xfe] }
 0x16b   : > { %v497_v26 = vld [vmem:[#allocation2 + $0x8] sm:$0xff]  ;;  %v515_v28 = vsel %vm514_vm5, %v498_v25, 0 }
 0x16c   : > { %v540_v29 = vrot.slane %v497_v26, 1  ;;  %v546_v30 = vrot.slane %v515_v28, 2  ;;  %v479_v42 = vld [vmem:[#allocation2 + $0x8] sm:$0x7f] }
 0x16d   : > { %v496_v45 = vsel %vm494_vm8, %v479_v42, 0 }
 0x16e   : > { %541 = vrot.lane.b32.xlu1 %v540_v29, %s1160_s10  ;;  %v548_v31 = vsel %vm545_vm6, %v546_v30, %v547_v24  ;;  %v591_v32 = vsel %vm292_vm0, %v546_v30, %v556_v27 }
 0x16f   : > { %v593_v33 = vsel %vm292_vm0, %v548_v31, %v556_v27  ;;  %v665_v34 = vrot.slane %v591_v32, 7 }
 0x170   : > { %v666_v35 = vrot.slane %v593_v33, 7 }
 0x172   : > { %580 = vrot.lane.b32.xlu1 %v577_v56, %s1160_s10  ;;  %v667_v36 = vsel %vm661_vm7, %v665_v34, %v666_v35  ;;  %v565_v56 = vrot.slane %v1010_v53, 2 }
 0x173   : > { %850 = vmatprep.mubr.bf16.mxu1 %v667_v36 }
 0x174   : > { %v567_v59 = vsel %vm545_vm6, %v565_v56, %v566_v57 }
 0x175   : > { %v599_v62 = vsel %vm292_vm0, %v567_v59, %v583_v21 }
 0x176   : > { %v669_v0 = vrot.slane %v599_v62, 7 }
 0x1e0   : > { %v542_v44 = vpop.permute.xlu1 %541 }
 0x1e1   : > { %v586_v15 = vsel %vm292_vm0, %v495_v43, %v542_v44  ;;  %v588_v46 = vsel %vm292_vm0, %v496_v45, %v542_v44 }
 0x1e2   : > { %v662_v47 = vrot.slane %v586_v15, 7  ;;  %v663_v48 = vrot.slane %v588_v46, 7 }
 0x1e4   : > { %v664_v1 = vsel %vm661_vm7, %v662_v47, %v663_v48  ;;  %v581_v60 = vpop.permute.xlu1 %580 }
 0x1e5   : > { %851 = vmatmul.mubr.bf16.vlgmr.msra.gmra.mrb[0].mxu1 %v664_v1  ;;  %v596_v63 = vsel %vm292_vm0, %v565_v56, %v581_v60  ;;  %vm910_vm0 = vcmask 519168  }
 0x1e6   : > { %1079 = vmatpush3.bf16.msra.mxu1 %v1142_v18  ;;  %1094 = vmatprep.mubr.msk.bf16.mxu1 %vm1162_vm1, %v1161_v20  ;;  %v668_v2 = vrot.slane %v596_v63, 7 }
 0x1e7   : > { %1080 = vmatprep.subr.bf16.mxu1 %v1161_v20 }
 0x1e8   : > { %v670_v4 = vsel %vm661_vm7, %v668_v2, %v669_v0 }
 0x1ea   : > { %1081 = vmatpush3.bf16.msra.mxu1 %v1143_v49 }
 0x1eb   : > { %1082 = vmatprep.subr.bf16.mxu1 %v1161_v20 }
 0x1ee   : > { %1083 = vmatpush3.bf16.msra.mxu1 %v1144_v50 }
 0x1ef   : > { %1084 = vmatprep.subr.bf16.mxu1 %v1161_v20 }
 0x1f2   : > { %1085 = vmatpush3.bf16.msra.mxu1 %v1145_v52 }
 0x1f3   : > { %1086 = vmatprep.subr.bf16.mxu1 %v1161_v20 }
 0x1f6   : > { %1087 = vmatpush3.bf16.msra.mxu1 %v1146_v55 }
 0x1f7   : > { %1088 = vmatprep.subr.bf16.mxu1 %v1161_v20 }
 0x1fa   : > { %1089 = vmatpush3.bf16.msra.mxu1 %v1147_v58 }
 0x1fb   : > { %1090 = vmatprep.subr.bf16.mxu1 %v1161_v20 }
 0x1fe   : > { %1091 = vmatpush3.bf16.msra.mxu1 %v1148_v61 }
 0x1ff   : > { %1092 = vmatprep.subr.bf16.mxu1 %v1161_v20 }
 0x202   : > { %1093 = vmatpush3.bf16.msra.mxu1 %v1150_v3 }
 0x205   : > { %1095 = vmatmul.mubr.bf16.vlgmr.msra.gmra.mrb[4].mxu1 %v670_v4 }
 0x2b8   : > { %v1063_v5 = vpop.f32.mrb[0].mxu1 }
 0x2b9   : > { %v1064_v6 = vpop.f32.mrb[1].mxu1 }
 0x2ba   : > { %v1065_v7 = vadd.f32 %v1064_v6, %v1063_v5  ;;  %v1066_v8 = vpop.f32.mrb[2].mxu1 }
 0x2bb   : > { %v1067_v9 = vpop.f32.mrb[3].mxu1 }
 0x2bc   : > { %v1068_v10 = vadd.f32 %v1067_v9, %v1066_v8  ;;  %v853_v12 = vadd.f32 %v1065_v7, %v1014_v11 }
 0x2be   : > { %v856_v17 = vadd.f32 %v1068_v10, %v1014_v11 }
 0x2d8   : > { %v893_v13 = vpop.f32.mrb[4].mxu1 }
 0x2d9   : > { %v894_v14 = vadd.f32 %v893_v13, %v853_v12  ;;  %v1096_v16 = vpop.f32.mrb[5].mxu1 }
 0x2da   : > { %v896_v19 = vpop.f32.mrb[6].mxu1 }
 0x2db   : > { %v900_v20 = vmax.f32 %v894_v14, 0.0  ;;  %v897_v22 = vadd.f32 %v896_v19, %v856_v17  ;;  %v1097_v23 = vpop.f32.mrb[7].mxu1 }
 0x2dd   : > { %v1045_v24 = vpack.c.bf16 %v900_v20, %v900_v20  ;;  %v901_v25 = vmax.f32 %v897_v22, 0.0 }
 0x2df   : > { %911 = vst.msk [vmem:[%s271_s27] sm:$0xf] %vm910_vm0, %v1045_v24  ;;  %v1046_v26 = vpack.c.bf16 %v901_v25, %v901_v25 }
 0x2e1   : > { %912 = vst.msk [vmem:[%s271_s27 + $0x4] sm:$0xf] %vm910_vm0, %v1046_v26 }
 0x2e2 PF: > { %s16_s21 = sadd.s32 1, %s1157_s21  }
 0x2e3   : > { %p13_p4 = scmp.ge.s32.totalorder %s16_s21, 4  }
 0x2e5   :  { %15 = sbr.rel (!%p13_p4) target bundleno = 1 (0x1), region = 77 }

// kernel: rrs_1d_forward.16
= control target key start
LH: loop header
LB: loop body
LE: loop exit
PB: predicated region body
PF: predicated region fallthrough
CT: control target
= control target key end

     0   :  { %s2008_s21 = smov 0   ;;  %s2742_s0 = inlined_call_operand.vmem [shape: bf16[2,80,64], index: 0, kind: input, shape index: {}]   ;;  %s2743_s1 = inlined_call_operand.vmem [shape: bf16[2,66,64], index: 1, kind: input, shape index: {}]   ;;  %s2744_s2 = inlined_call_operand.vmem [shape: bf16[192,64], index: 2, kind: input, shape index: {}]   ;;  %s2745_s3 = inlined_call_operand.vmem [shape: f32[1,64], index: 3, kind: input, shape index: {}]   ;;  %s2746_s4 = inlined_call_operand.vmem [shape: bf16[384,64], index: 4, kind: input, shape index: {}]   ;;  %s2747_s5 = inlined_call_operand.vmem [shape: f32[1,64], index: 5, kind: input, shape index: {}]   ;;  %s2748_s6 = inlined_call_operand.vmem [shape: bf16[2,64,64], index: 6, kind: output, shape index: {}]  }
   0x1 LB: > { %s1721_s22 = sadd.s32 4294967295, %s1969_s21   ;;  %p1725_p0 = scmp.ge.s32.totalorder %s1969_s21, 1  ;;  %s1969_s21 = sphi %s2008_s21, %s16_s21  }
   0x2   : > { %p222_p1 = scmp.lt.s32.totalorder %s1969_s21, 3 }
   0x4   : > { %p223_p2 = pnand %p1725_p0, %p222_p1 }
   0x5   : > { %p257_p3 = scmp.lt.s32.totalorder (!%p223_p2), %s1721_s22, 1  ;;  %v1923_v0 = vld [vmem:[%s2744_s2] sm:$0xff] (!%p223_p2)   ;;  %v1971_v1 = vmov (!%p223_p2), 0   ;;  %v1924_v2 = vld [vmem:[%s2744_s2 + $0x8] sm:$0xff] (!%p223_p2)   ;;  %vm322_vm0 = vcmask (!%p223_p2), 523264   ;;  %v1925_v3 = vld [vmem:[%s2744_s2 + $0x10] sm:$0xff] (!%p223_p2)   ;;  %v538_v27 = vlaneseq (!%p223_p2) }
   0x6   : > { %226 = sbr.rel (%p223_p2) target bundleno = 762 (0x2fa), region = 44  ;;  %451 = vmatprep.subr.bf16.mxu0 (!%p223_p2), %v1971_v1  ;;  %528 = vst.msk [vmem:[#allocation2] sm:$0xff] (!%p223_p2), %vm322_vm0, %v1971_v1  ;;  %529 = vst.msk [vmem:[#allocation2 + $0x8] sm:$0xff] (!%p223_p2), %vm322_vm0, %v1971_v1  ;;  %s1972_s9 = smov (!%p223_p2), 64   ;;  %v1926_v21 = vld [vmem:[%s2744_s2 + $0x18] sm:$0xff] (!%p223_p2)   ;;  %v1927_v24 = vld [vmem:[%s2744_s2 + $0x20] sm:$0xff] (!%p223_p2)  }
   0x7   : > { %452 = vmatpush1.bf16.msra.mxu0 (!%p223_p2), %v1923_v0  ;;  %530 = vst.msk [vmem:[#allocation2 + $0x10] sm:$0xff] (!%p223_p2), %vm322_vm0, %v1971_v1  ;;  %531 = vst.msk [vmem:[#allocation2 + $0x18] sm:$0xff] (!%p223_p2), %vm322_vm0, %v1971_v1  ;;  %v1928_v25 = vld [vmem:[%s2744_s2 + $0x28] sm:$0xff] (!%p223_p2)   ;;  %v1929_v26 = vld [vmem:[%s2744_s2 + $0x30] sm:$0xff] (!%p223_p2)   ;;  %v2097_v29 = vshrl.u32 (!%p223_p2), %v538_v27, 7 }
   0x8   : > { %453 = vmatprep.subr.bf16.mxu0 (!%p223_p2), %v1971_v1  ;;  %532 = vst.msk [vmem:[#allocation2 + $0x20] sm:$0xff] (!%p223_p2), %vm322_vm0, %v1971_v1  ;;  %533 = vst.msk [vmem:[#allocation2 + $0x28] sm:$0xff] (!%p223_p2), %vm322_vm0, %v1971_v1  ;;  %v1930_v28 = vld [vmem:[%s2744_s2 + $0x38] sm:$0xff] (!%p223_p2)   ;;  %v1931_v41 = vld [vmem:[%s2744_s2 + $0x40] sm:$0xff] (!%p223_p2)   ;;  %vm700_vm13 = vsmask.f32 (!%p223_p2), 7424 }
   0x9   : > { %v2100_v30 = vadd.s32 (!%p223_p2), 8, %v2097_v29  ;;  %v541_v31 = vadd.s32 (!%p223_p2), 16, %v2097_v29  ;;  %v542_v32 = vadd.s32 (!%p223_p2), 24, %v2097_v29  ;;  %v551_v33 = vand.u32 (!%p223_p2), 7, %v2097_v29  ;;  %v1932_v48 = vld [vmem:[%s2744_s2 + $0x48] sm:$0xff] (!%p223_p2)   ;;  %v1933_v58 = vld [vmem:[%s2744_s2 + $0x50] sm:$0xff] (!%p223_p2)  }
   0xa   : > { %v545_v42 = vadd.s32 (!%p223_p2), 48, %v2097_v29  ;;  %v546_v43 = vadd.s32 (!%p223_p2), 56, %v2097_v29 }
   0xb   : > { %454 = vmatpush1.bf16.msra.mxu0 (!%p223_p2), %v1924_v2  ;;  %v558_v36 = vand.u32 (!%p223_p2), 7, %v2100_v30  ;;  %v565_v37 = vand.u32 (!%p223_p2), 7, %v541_v31  ;;  %v572_v38 = vand.u32 (!%p223_p2), 7, %v542_v32  ;;  %vm2115_vm1 = vcmp.ge.s32.totalorder (!%p223_p2), %v551_v33, 1 }
   0xc   : > { %455 = vmatprep.subr.bf16.mxu0 (!%p223_p2), %v1971_v1  ;;  %vm672_vm2 = vmpackc.low (!%p223_p2), %vm2115_vm1, %vm2115_vm1  ;;  %vm743_vm14 = vcmp.lt.s32.totalorder (!%p223_p2), %v551_v33, 7  ;;  %v600_v49 = vand.u32 (!%p223_p2), 7, %v546_v43  ;;  %v1946_v33 = vld [vmem:[%s2746_s4 + $0x68] sm:$0xff] (!%p223_p2)  }
   0xd   : > { %s2774_s22 = smov (!%p257_p3, %s1721_s22), 1  ;;  %vm2130_vm3 = vcmp.ge.s32.totalorder %v558_v36, 1  ;;  %vm2134_vm4 = vcmp.ge.s32.totalorder %v565_v37, 1  ;;  %vm2138_vm5 = vcmp.ge.s32.totalorder %v572_v38, 1  ;;  %vm2146_vm7 = vcmp.lt.s32.totalorder %v565_v37, 7  ;;  %vm767_vm1 = vmpackc.low %vm743_vm14, %vm743_vm14 }
   0xe   : > { %s1898_s27 = smul.u32 40, %s2774_s22  ;;  %vm673_vm6 = vmpackc.low %vm2130_vm3, %vm2130_vm3  ;;  %vm2165_vm9 = vcmp.lt.s32.totalorder %v572_v38, 7  ;;  %vm744_vm15 = vcmp.lt.s32.totalorder %v558_v36, 7  ;;  %vm2328_vm14 = vcmp.ge.s32.totalorder %v600_v49, 1  ;;  %s1813_s24 = sshll.u32 %s2774_s22, 5 }
   0xf   : > { %456 = vmatpush1.bf16.msra.mxu0 %v1925_v3  ;;  %s1899_s14 = smul.u32 36, %s2774_s22  ;;  %vm674_vm8 = vmpackc.low %vm2134_vm4, %vm2134_vm4  ;;  %v1934_v3 = vld [vmem:[%s2744_s2 + $0x58] sm:$0xff]  }
  0x10   : > { %s261_s30 = scalar_lea.vmem %s2742_s0, %s1898_s27  ;;  %457 = vmatprep.subr.bf16.mxu0 %v1971_v1  ;;  %vm675_vm10 = vmpackc.low %vm2138_vm5, %vm2138_vm5  ;;  %s2721_s27 = scalar_lea.vmem %s2748_s6, %s1813_s24 }
  0x11   : > { %v2045_v4 = vld [vmem:[%s261_s30 + $0x4] sm:$0xf]  ;;  %v277_v5 = vld [vmem:[%s261_s30 + $0x8] sm:$0xf]  ;;  %v2047_v6 = vld [vmem:[%s261_s30] sm:$0xf]  ;;  %s2092_s23 = scalar_lea.vmem %s2743_s1, %s1899_s14 }
  0x12   : > { %v1734_v7 = vcombine.low %v2045_v4, %v277_v5  ;;  %v1730_v8 = vcombine.low %v2047_v6, %v2045_v4  ;;  %v278_v9 = vld [vmem:[%s261_s30 + $0xc] sm:$0xf]  ;;  %v279_v10 = vld [vmem:[%s261_s30 + $0x10] sm:$0xf]  ;;  %v280_v11 = vld [vmem:[%s261_s30 + $0x14] sm:$0xf] }
  0x13   : > { %v281_v12 = vld [vmem:[%s261_s30 + $0x18] sm:$0xf]  ;;  %v282_v13 = vld [vmem:[%s261_s30 + $0x1c] sm:$0xf]  ;;  %v2053_v14 = vcombine.low %v279_v10, %v280_v11  ;;  %v2055_v15 = vld [vmem:[%s261_s30 + $0x20] sm:$0xf]  ;;  %v2057_v16 = vcombine.low %v277_v5, %v278_v9  ;;  %v1735_v17 = vcombine.low %v278_v9, %v279_v10  ;;  %458 = vmatpush1.bf16.msra.mxu0 %v1926_v21 }
  0x14   : > { %311 = vrot.lane.b32.xlu0 %v1734_v7, %s1972_s9  ;;  %v2060_v18 = vcombine.low %v281_v12, %v282_v13  ;;  %v1736_v19 = vcombine.low %v280_v11, %v281_v12  ;;  %v2062_v20 = vld [vmem:[%s261_s30 + $0x24] sm:$0xf]  ;;  %v1737_v23 = vcombine.low %v282_v13, %v2055_v15  ;;  %459 = vmatprep.subr.bf16.mxu0 %v1971_v1  ;;  %v2106_v34 = vld [vmem:[%s2092_s23] sm:$0xf]  ;;  %v2120_v40 = vld [vmem:[%s2092_s23 + $0x8] sm:$0xf] }
  0x15   : > { %v1738_v22 = vcombine.low %v2055_v15, %v2062_v20  ;;  %1752 = vmatprep.mubr.msk.bf16.mxu0 %vm322_vm0, %v2057_v16  ;;  %v2110_v35 = vld [vmem:[%s2092_s23 + $0x4] sm:$0xf]  ;;  %v2151_v46 = vld [vmem:[%s2092_s23 + $0xc] sm:$0xf]  ;;  %v845_v47 = vsel %vm672_vm2, %v2106_v34, 0  ;;  %v847_v51 = vsel %vm674_vm8, %v2120_v40, 0  ;;  %vm769_vm11 = vmpackc.low %vm2146_vm7, %vm2146_vm7 }
  0x16   : > { %315 = vrot.lane.b32.xlu1 %v1736_v19, %s1972_s9  ;;  %v846_v50 = vsel %vm673_vm6, %v2110_v35, 0  ;;  %v848_v53 = vsel %vm675_vm10, %v2151_v46, 0  ;;  %vm770_vm12 = vmpackc.low %vm2165_vm9, %vm2165_vm9  ;;  %v2198_v54 = vsel %vm769_vm11, 65537, %v1971_v1  ;;  %v681_v13 = vsel %vm673_vm6, 65537, %v1971_v1 }
  0x17   : > { %460 = vmatpush1.bf16.msra.mxu0 %v1927_v24  ;;  %v1764_v52 = vcombine.low %v845_v47, %v846_v50  ;;  %v2200_v55 = vcombine.low %v847_v51, %v848_v53  ;;  %v2206_v59 = vsel %vm770_vm12, 65537, %v1971_v1  ;;  %v683_v15 = vsel %vm675_vm10, 65537, %v1971_v1 }
  0x18   : > { %313 = vrot.lane.b32.xlu0 %v1735_v17, %s1972_s9  ;;  %461 = vmatprep.subr.bf16.mxu0 %v1971_v1  ;;  %v2210_v60 = vcombine.low %v2198_v54, %v2206_v59  ;;  %vm795_vm10 = vsmask.f32 256 }
  0x19   : > { %v976_v56 = vshll.u32 %v1764_v52, 16  ;;  %v979_v57 = vshrl.u32 %v1764_v52, 16  ;;  %v983_v62 = vshll.u32 %v2200_v55, 16 }
  0x1a   : > { %317 = vrot.lane.b32.xlu1 %v1737_v23, %s1972_s9  ;;  %v544_v23 = vadd.s32 40, %v2097_v29  ;;  %v804_v39 = vshrl.u32 %v2210_v60, 16  ;;  %v807_v47 = vshll.u32 %v2210_v60, 16 }
  0x1b   : > { %462 = vmatpush1.bf16.msra.mxu0 %v1928_v25  ;;  %v2212_v61 = vrot.slane %v976_v56, 1  ;;  %v2217_v0 = vrot.slane %v983_v62, 1 }
  0x1c   : > { %463 = vmatprep.subr.bf16.mxu0 %v1971_v1  ;;  %v806_v45 = vrot.slane %v804_v39, 7 }
  0x1d   : > { %v981_v63 = vor.u32 %v979_v57, %v2212_v61 }
  0x1e   : > { %v809_v51 = vor.u32 %v807_v47, %v806_v45 }
  0x1f   : > { %464 = vmatpush1.bf16.msra.mxu0 %v1929_v26  ;;  %v986_v2 = vsel %vm700_vm13, %v981_v63, %v2217_v0 }
  0x20   : > { %465 = vmatprep.subr.bf16.mxu0 %v1971_v1  ;;  %1008 = vrot.lane.b32.xlu0 %v986_v2, %s1972_s9 }
  0x23   : > { %466 = vmatpush1.bf16.msra.mxu0 %v1930_v28  ;;  %v586_v28 = vand.u32 7, %v544_v23 }
  0x24   : > { %467 = vmatprep.subr.bf16.mxu0 %v1971_v1 }
  0x25   : > { %vm2291_vm4 = vcmp.ge.s32.totalorder %v586_v28, 1 }
  0x26   : > { %vm677_vm6 = vmpackc.low %vm2291_vm4, %vm2291_vm4 }
  0x27   : > { %468 = vmatpush1.bf16.msra.mxu0 %v1931_v41  ;;  %v685_v41 = vsel %vm677_vm6, 65537, %v1971_v1 }
  0x28   : > { %469 = vmatprep.subr.bf16.mxu0 %v1971_v1 }
  0x2b   : > { %470 = vmatpush1.bf16.msra.mxu0 %v1932_v48  ;;  %v593_v48 = vand.u32 7, %v545_v42 }
  0x2c   : > { %471 = vmatprep.subr.bf16.mxu0 %v1971_v1 }
  0x2d   : > { %vm2324_vm12 = vcmp.ge.s32.totalorder %v593_v48, 1 }
  0x2f   : > { %472 = vmatpush1.bf16.msra.mxu0 %v1933_v58 }
  0x30   : > { %473 = vmatprep.subr.bf16.mxu0 %v1971_v1 }
  0x33   : > { %474 = vmatpush1.bf16.msra.mxu0 %v1934_v3 }
  0x86   : > { %v312_v5 = vpop.permute.xlu0 %311 }
  0x87   : > { %v325_v7 = vsel %vm322_vm0, %v1730_v8, %v312_v5  ;;  %v680_v8 = vsel %vm672_vm2, 65537, %v1971_v1  ;;  %vm768_vm2 = vmpackc.low %vm744_vm15, %vm744_vm15 }
  0x88   : > { %484 = vmatmul.mubr.bf16.vlgmr.msra.gmra.mrb[0].mxu0 %v325_v7  ;;  %v316_v11 = vpop.permute.xlu1 %315  ;;  %v1756_v17 = vcombine.low %v680_v8, %v681_v13  ;;  %vm678_vm15 = vmpackc.low %vm2324_vm12, %vm2324_vm12 }
  0x89   : > { %1753 = vmatprep.mubr.msk.bf16.mxu0 %vm322_vm0, %v2053_v14  ;;  %v333_v12 = vsel %vm322_vm0, %v2053_v14, %v316_v11  ;;  %v682_v14 = vsel %vm674_vm8, 65537, %v1971_v1  ;;  %vm748_vm8 = vcmp.lt.s32.totalorder %v586_v28, 7  ;;  %v686_v5 = vsel %vm678_vm15, 65537, %v1971_v1 }
  0x8a   : > { %v314_v9 = vpop.permute.xlu0 %313  ;;  %v702_v20 = vshll.u32 %v1756_v17, 16  ;;  %v1757_v21 = vcombine.low %v682_v14, %v683_v15  ;;  %v705_v25 = vshrl.u32 %v1756_v17, 16  ;;  %vm772_vm11 = vmpackc.low %vm748_vm8, %vm748_vm8  ;;  %v866_v28 = vrot.slane %v2206_v59, 7 }
  0x8b   : > { %v329_v10 = vsel %vm322_vm0, %v2057_v16, %v314_v9  ;;  %v2273_v16 = vsel %vm767_vm1, 65537, %v1971_v1  ;;  %v2337_v60 = vsel %vm772_vm11, 65537, %v1971_v1  ;;  %vm679_vm1 = vmpackc.low %vm2328_vm14, %vm2328_vm14  ;;  %vm855_vm11 = vcmask 1040384  }
  0x8c   : > { %v318_v4 = vpop.permute.xlu1 %317  ;;  %v2284_v24 = vrot.slane %v702_v20, 1  ;;  %v709_v26 = vshll.u32 %v1757_v21, 16  ;;  %v713_v52 = vshrl.u32 %v1757_v21, 16  ;;  %v687_v7 = vsel %vm679_vm1, 65537, %v1971_v1 }
  0x8d   : > { %v337_v6 = vsel %vm322_vm0, %v2060_v18, %v318_v4  ;;  %vm945_vm14 = vcmask 1046528  }
  0x8e   : > { %v707_v30 = vor.u32 %v705_v25, %v2284_v24  ;;  %v711_v31 = vrot.slane %v709_v26, 1 }
  0x90   : > { %492 = vmatmul.mubr.bf16.gmra.mrb[4].mxu0 %v329_v10  ;;  %v2299_v36 = vsel %vm700_vm13, %v707_v30, %v711_v31  ;;  %v715_v62 = vor.u32 %v713_v52, %v711_v31  ;;  %v2361_v10 = vcombine.low %v686_v5, %v687_v7  ;;  %v2413_v52 = vld [vmem:[%s2092_s23 + $0x14] sm:$0xf] }
  0x91   : > { %1754 = vmatprep.mubr.msk.bf16.mxu0 %vm322_vm0, %v2060_v18  ;;  %v2276_v18 = vsel %vm768_vm2, 65537, %v1971_v1  ;;  %vm749_vm2 = vcmp.lt.s32.totalorder %v593_v48, 7  ;;  %vm733_vm4 = vcmp.ne.s16.totalorder %v2299_v36, 0 }
  0x92   : > { %v2280_v19 = vcombine.low %v2273_v16, %v2276_v18  ;;  %vm773_vm8 = vmpackc.low %vm749_vm2, %vm749_vm2  ;;  %v725_v17 = vshll.u32 %v2361_v10, 16  ;;  %v860_v26 = vrot.slane %v2276_v18, 7  ;;  %vm856_vm2 = vcmask 1044484  }
  0x93   : > { %v2364_v4 = vsel %vm773_vm8, 65537, %v1971_v1 }
  0x94   : > { %v797_v38 = vshrl.u32 %v2280_v19, 16 }
  0x96   : > { %v2321_v50 = vrot.slane %v797_v38, 7  ;;  %v862_v38 = vrot.slane %v860_v26, 4 }
  0x98   : > { %500 = vmatmul.mubr.bf16.gmra.mrb[8].mxu0 %v333_v12  ;;  %v2334_v58 = vsel %vm795_vm10, %v2321_v50, %v809_v51  ;;  %v2410_v51 = vld [vmem:[%s2092_s23 + $0x10] sm:$0xf] }
  0x99   : > { %1755 = vmatprep.mubr.msk.bf16.mxu0 %vm322_vm0, %v1738_v22  ;;  %v543_v22 = vadd.s32 32, %v2097_v29  ;;  %vm828_vm12 = vcmp.ne.s16.totalorder %v2334_v58, 0 }
  0x9b   : > { %v579_v27 = vand.u32 7, %v543_v22  ;;  %v2375_v22 = vrot.slane %v725_v17, 1 }
  0x9d   : > { %vm2287_vm3 = vcmp.ge.s32.totalorder %v579_v27, 1  ;;  %vm747_vm7 = vcmp.lt.s32.totalorder %v579_v27, 7  ;;  %v863_v27 = vrot.slane %v2198_v54, 7  ;;  %v868_v54 = vrot.slane %v866_v28, 4 }
  0x9e   : > { %vm676_vm5 = vmpackc.low %vm2287_vm3, %vm2287_vm3 }
  0x9f   : > { %v684_v37 = vsel %vm676_vm5, 65537, %v1971_v1  ;;  %vm771_vm9 = vmpackc.low %vm747_vm7, %vm747_vm7  ;;  %vm750_vm7 = vcmp.lt.s32.totalorder %v600_v49, 7 }
  0xa0   : > { %508 = vmatmul.mubr.bf16.gmra.mrb[12].mxu0 %v337_v6  ;;  %v1758_v44 = vcombine.low %v684_v37, %v685_v41  ;;  %v779_v56 = vsel %vm771_vm9, 65537, %v1971_v1  ;;  %vm774_vm9 = vmpackc.low %vm750_vm7, %vm750_vm7  ;;  %v872_v37 = vrot.slane %v2337_v60, 7  ;;  %v865_v41 = vrot.slane %v863_v27, 4 }
  0xa1   : > { %v1762_v2 = vcombine.low %v779_v56, %v2337_v60  ;;  %v2367_v8 = vsel %vm774_vm9, 65537, %v1971_v1  ;;  %v869_v30 = vrot.slane %v779_v56, 7  ;;  %vm2390_vm7 = vmor %vm855_vm11, %vm856_vm2 }
  0xa2   : > { %v717_v53 = vshll.u32 %v1758_v44, 16  ;;  %v1763_v13 = vcombine.low %v2364_v4, %v2367_v8  ;;  %v721_v15 = vshrl.u32 %v1758_v44, 16  ;;  %v864_v43 = vsel %vm2390_vm7, %v862_v38, %v863_v27  ;;  %v1938_v27 = vld [vmem:[%s2746_s4 + $0x48] sm:$0xff]   ;;  %v1942_v38 = vld [vmem:[%s2746_s4 + $0x58] sm:$0xff]  }
  0xa3   : > { %v812_v9 = vshrl.u32 %v1762_v2, 16  ;;  %v815_v12 = vshll.u32 %v1762_v2, 16  ;;  %v871_v42 = vrot.slane %v869_v30, 4  ;;  %v867_v44 = vsel %vm2390_vm7, %v865_v41, %v866_v28  ;;  %v1939_v28 = vld [vmem:[%s2746_s4 + $0x8] sm:$0xff]   ;;  %v1943_v41 = vld [vmem:[%s2746_s4 + $0x18] sm:$0xff]  }
  0xa4   : > { %v719_v63 = vrot.slane %v717_v53, 1  ;;  %v820_v20 = vshrl.u32 %v1763_v13, 16  ;;  %v823_v25 = vshll.u32 %v1763_v13, 16  ;;  %vm883_vm8 = vcmp.ne.s16.totalorder %v864_v43, 0  ;;  %v2459_v43 = vld [vmem:[%s2745_s3] ss:$0 sm:$0xff] }
  0xa5   : > { %v814_v11 = vrot.slane %v812_v9, 7  ;;  %vm884_vm9 = vcmp.ne.s16.totalorder %v867_v44, 0  ;;  %v870_v48 = vsel %vm2390_vm7, %v868_v54, %v869_v30  ;;  %v873_v49 = vsel %vm2390_vm7, %v871_v42, %v872_v37  ;;  %v1940_v30 = vld [vmem:[%s2746_s4 + $0x50] sm:$0xff]   ;;  %v1944_v54 = vld [vmem:[%s2746_s4 + $0x60] sm:$0xff]  }
  0xa6   : > { %v2347_v3 = vsel %vm700_vm13, %v715_v62, %v719_v63  ;;  %v723_v21 = vor.u32 %v721_v15, %v719_v63  ;;  %v2377_v23 = vrot.slane %v820_v20, 7  ;;  %v893_v47 = vsel %vm884_vm9, %v2151_v46, 0  ;;  %v1945_v42 = vld [vmem:[%s2746_s4 + $0x20] sm:$0xff]  }
  0xa7   : > { %v817_v6 = vor.u32 %v815_v12, %v814_v11  ;;  %vm885_vm11 = vcmp.ne.s16.totalorder %v870_v48, 0  ;;  %vm886_vm2 = vcmp.ne.s16.totalorder %v873_v49, 0  ;;  %v878_v29 = vrot.slane %v2367_v8, 7  ;;  %v1951_v8 = vld [vmem:[%s2746_s4 + $0x38] sm:$0xff]  }
  0xa8   : > { %v2382_v1 = vsel %vm700_vm13, %v723_v21, %v2375_v22  ;;  %v825_v31 = vor.u32 %v823_v25, %v2377_v23  ;;  %v894_v56 = vsel %vm885_vm11, %v2410_v51, 0  ;;  %v895_v62 = vsel %vm886_vm2, %v2413_v52, 0  ;;  %v1936_v21 = vld [vmem:[%s2746_s4 + $0x40] sm:$0xff]  }
  0xa9   : > { %v2372_v14 = vsel %vm795_vm10, %v806_v45, %v817_v6  ;;  %v892_v45 = vsel %vm883_vm8, %v2120_v40, 0  ;;  %v1775_v5 = vcombine.low %v894_v56, %v895_v62  ;;  %vm1071_vm8 = vsmask.f32 6400  ;;  %v1937_v25 = vld [vmem:[%s2746_s4] sm:$0xff]   ;;  %1822 = vmatprep.subr.bf16.mxu1 %v1936_v21 }
  0xaa   : > { %v2395_v59 = vsel %vm795_vm10, %v814_v11, %v825_v31  ;;  %v1774_v53 = vcombine.low %v892_v45, %v893_v47  ;;  %1823 = vmatpush3.bf16.msra.mxu1 %v1937_v25  ;;  %v1941_v31 = vld [vmem:[%s2746_s4 + $0x10] sm:$0xff]   ;;  %v874_v57 = vrot.slane %v872_v37, 4  ;;  %vm829_vm11 = vcmp.ne.s16.totalorder %v2372_v14, 0 }
  0xab   : > { %v1090_v11 = vshrl.u32 %v1775_v5, 16  ;;  %v1093_v12 = vshll.u32 %v1775_v5, 16  ;;  %1824 = vmatprep.subr.bf16.mxu1 %v1938_v27  ;;  %v1947_v27 = vld [vmem:[%s2746_s4 + $0x28] sm:$0xff]   ;;  %vm735_vm2 = vcmp.ne.s16.totalorder %v2382_v1, 0 }
  0xac   : > { %v1081_v63 = vshrl.u32 %v1774_v53, 16  ;;  %v1084_v2 = vshll.u32 %v1774_v53, 16 }
  0xad   : > { %v1092_v13 = vrot.slane %v1090_v11, 1  ;;  %v1095_v15 = vrot.slane %v1093_v12, 2  ;;  %v858_v12 = vrot.slane %v2273_v16, 7 }
  0xae   : > { %v1083_v7 = vrot.slane %v1081_v63, 1  ;;  %v1086_v9 = vrot.slane %v1084_v2, 2  ;;  %1825 = vmatpush3.bf16.msra.mxu1 %v1939_v28  ;;  %v800_v63 = vshll.u32 %v2280_v19, 16 }
  0xaf   : > { %v2419_v17 = vor.u32 %v1095_v15, %v1092_v13  ;;  %1826 = vmatprep.subr.bf16.mxu1 %v1940_v30  ;;  %v859_v30 = vrot.slane %v858_v12, 4 }
  0xb0   : > { %v2417_v6 = vor.u32 %v1086_v9, %v1083_v7  ;;  %v849_v7 = vsel %vm676_vm5, %v2410_v51, 0  ;;  %v850_v9 = vsel %vm677_vm6, %v2413_v52, 0  ;;  %v802_v15 = vor.u32 %v800_v63, %v2321_v50  ;;  %v1948_v50 = vld [vmem:[%s2746_s4 + $0x70] sm:$0xff]  }
  0xb1   : > { %v2481_v25 = vcombine.low %v849_v7, %v850_v9  ;;  %v861_v36 = vsel %vm2390_vm7, %v859_v30, %v860_v26  ;;  %v854_v9 = vld [vmem:[%s2092_s23] sm:$0xe]  ;;  %vm2539_vm5 = vcmp.ne.s16.totalorder %v858_v12, 0 }
  0xb2   : > { %v2424_v20 = vsel %vm1071_vm8, %v2417_v6, %v2419_v17  ;;  %1827 = vmatpush3.bf16.msra.mxu1 %v1941_v31  ;;  %vm827_vm3 = vcmp.ne.s16.totalorder %v802_v15, 0  ;;  %v987_v31 = vshrl.u32 %v2200_v55, 16  ;;  %vm882_vm6 = vcmp.ne.s16.totalorder %v861_v36, 0 }
  0xb3   : > { %1828 = vmatprep.subr.bf16.mxu1 %v1942_v38 }
  0xb6   : > { %1829 = vmatpush3.bf16.msra.mxu1 %v1943_v41  ;;  %v991_v41 = vshll.u32 %v2481_v25, 16 }
  0xb7   : > { %1830 = vmatprep.subr.bf16.mxu1 %v1944_v54  ;;  %v2495_v54 = vld [vmem:[%s2092_s23 + $0x18] sm:$0xf] }
  0xb8   : > { %v851_v63 = vsel %vm678_vm15, %v2495_v54, 0  ;;  %v2535_v7 = vrot.slane %v991_v41, 1  ;;  %vm734_vm15 = vcmp.ne.s16.totalorder %v2347_v3, 0 }
  0xba   : > { %1831 = vmatpush3.bf16.msra.mxu1 %v1945_v42  ;;  %v2498_v42 = vld [vmem:[%s2092_s23 + $0x1c] sm:$0xf] }
  0xbb   : > { %1832 = vmatprep.subr.bf16.mxu1 %v1946_v33  ;;  %v852_v18 = vsel %vm679_vm1, %v2498_v42, 0  ;;  %v891_v33 = vsel %vm882_vm6, %v2110_v35, 0 }
  0xbc   : > { %v2553_v12 = vcombine.low %v851_v63, %v852_v18 }
  0xbe   : > { %1833 = vmatpush3.bf16.msra.mxu1 %v1947_v27 }
  0xbf   : > { %1834 = vmatprep.subr.bf16.mxu1 %v1948_v50 }
 0x15b   : > { %v485_v44 = vpop.f32.mrb[0].mxu0 }
 0x15c   : > { %v486_v45 = vadd.f32 %v2459_v43, %v485_v44  ;;  %v487_v47 = vpop.f32.mrb[1].mxu0 }
 0x15d   : > { %v488_v48 = vpop.f32.mrb[2].mxu0  ;;  %v875_v47 = vrot.slane %v2364_v4, 7  ;;  %v1949_v4 = vld [vmem:[%s2746_s4 + $0x30] sm:$0xff]  }
 0x15e   : > { %v489_v49 = vadd.f32 %v2459_v43, %v488_v48  ;;  %v490_v53 = vpop.f32.mrb[3].mxu0  ;;  %v516_v56 = vmax.f32 %v486_v45, 0.0  ;;  %1835 = vmatpush3.bf16.msra.mxu1 %v1949_v4 }
 0x15f   : > { %v876_v30 = vsel %vm2390_vm7, %v874_v57, %v875_v47 }
 0x160   : > { %v517_v62 = vmax.f32 %v489_v49, 0.0  ;;  %vm887_vm1 = vcmp.ne.s16.totalorder %v876_v30, 0 }
 0x162   : > { %v524_v2 = vpack.c.bf16 %v517_v62, %v516_v56  ;;  %v989_v62 = vor.u32 %v987_v31, %v2217_v0  ;;  %v880_v31 = vrot.slane %v878_v29, 4 }
 0x163   : > { %v493_v5 = vpop.f32.mrb[4].mxu0 }
 0x164   : > { %534 = vst.msk [vmem:[#allocation2 + $0x8] sm:$0xff] %vm322_vm0, %v524_v2  ;;  %v494_v19 = vadd.f32 %v2459_v43, %v493_v5  ;;  %v495_v11 = vpop.f32.mrb[5].mxu0  ;;  %v994_v37 = vsel %vm700_vm13, %v989_v62, %v2535_v7  ;;  %vm889_vm9 = vcmp.ne.s16.totalorder %v880_v31, 0 }
 0x165   : > { %v496_v13 = vpop.f32.mrb[6].mxu0  ;;  %v877_v11 = vrot.slane %v875_v47, 4 }
 0x166   : > { %v497_v32 = vadd.f32 %v2459_v43, %v496_v13  ;;  %v498_v21 = vpop.f32.mrb[7].mxu0  ;;  %v518_v28 = vmax.f32 %v494_v19, 0.0  ;;  %v1950_v13 = vld [vmem:[%s2746_s4 + $0x78] sm:$0xff]  }
 0x167   : > { %1836 = vmatprep.subr.bf16.mxu1 %v1950_v13  ;;  %v879_v50 = vsel %vm2390_vm7, %v877_v11, %v878_v29 }
 0x168   : > { %v519_v16 = vmax.f32 %v497_v32, 0.0  ;;  %1837 = vmatpush3.bf16.msra.mxu1 %v1951_v8  ;;  %vm888_vm7 = vcmp.ne.s16.totalorder %v879_v50, 0 }
 0x16a   : > { %v525_v38 = vpack.c.bf16 %v519_v16, %v518_v28  ;;  %v995_v16 = vshrl.u32 %v2481_v25, 16 }
 0x16b   : > { %v501_v44 = vpop.f32.mrb[8].mxu0  ;;  %v2501_v45 = vld [vmem:[#allocation2 + $0x8] sm:$0xff] }
 0x16c   : > { %535 = vst.msk [vmem:[#allocation2 + $0x10] sm:$0xff] %vm322_vm0, %v525_v38  ;;  %v502_v55 = vadd.f32 %v2459_v43, %v501_v44  ;;  %v503_v48 = vpop.f32.mrb[9].mxu0  ;;  %v900_v49 = vshll.u32 %v2501_v45, 16  ;;  %v2509_v53 = vsel %vm827_vm3, %v2501_v45, 0  ;;  %v2532_v26 = vsel %vm733_vm4, %v2501_v45, 0  ;;  %v2571_v38 = vld [vmem:[%s2746_s4 + $0x80] sm:$0xff]  }
 0x16d   : > { %v504_v56 = vpop.f32.mrb[10].mxu0  ;;  %v946_v39 = vrot.slane %v2509_v53, 1  ;;  %1874 = vmatprep.subr.bf16.mxu1 %v2571_v38  ;;  %v997_v57 = vor.u32 %v995_v16, %v2535_v7  ;;  %vm831_vm3 = vcmp.ne.s16.totalorder %v2377_v23, 0  ;;  %vm830_vm4 = vcmp.ne.s16.totalorder %v2395_v59, 0 }
 0x16e   : > { %v505_v2 = vadd.f32 %v2459_v43, %v504_v56  ;;  %v506_v0 = vpop.f32.mrb[11].mxu0  ;;  %v902_v5 = vrot.slane %v900_v49, 1  ;;  %v520_v15 = vmax.f32 %v502_v55, 0.0  ;;  %v903_v55 = vshrl.u32 %v2501_v45, 16 }
 0x16f   : > { %v999_v45 = vshll.u32 %v2553_v12, 16 }
 0x170   : > { %v521_v32 = vmax.f32 %v505_v2, 0.0  ;;  %v1910_v21 = vpack.i.bf16 %v902_v5, %v2212_v61  ;;  %v890_v61 = vsel %vm2539_vm5, %v854_v9, 0  ;;  %v905_v58 = vor.u32 %v903_v55, %v902_v5  ;;  %v2594_v9 = vld [vmem:[%s2092_s23 + $0x20] sm:$0x1] }
 0x171   : > { %v1773_v36 = vcombine.low %v890_v61, %v891_v33  ;;  %v729_v2 = vshrl.u32 %v2361_v10, 16  ;;  %v1001_v11 = vrot.slane %v999_v45, 1  ;;  %v1003_v10 = vshrl.u32 %v2553_v12, 16 }
 0x172   : > { %v526_v60 = vpack.c.bf16 %v521_v32, %v520_v15  ;;  %1911 = vrot.lane.b32.xlu0 %v1910_v21, %s1972_s9  ;;  %v896_v15 = vsel %vm887_vm1, %v2495_v54, 0  ;;  %v897_v32 = vsel %vm888_vm7, %v2498_v42, 0  ;;  %v898_v21 = vsel %vm889_vm9, %v2594_v9, 0 }
 0x173   : > { %v509_v27 = vpop.f32.mrb[12].mxu0  ;;  %v645_v28 = vld [vmem:[#allocation2 + $0x10] sm:$0xff]  ;;  %v1076_v5 = vshrl.u32 %v1773_v36, 16  ;;  %v731_v8 = vor.u32 %v729_v2, %v2375_v22  ;;  %v1002_v50 = vsel %vm700_vm13, %v997_v57, %v1001_v11  ;;  %v1777_v22 = vcombine.low %v898_v21, %v898_v21 }
 0x174   : > { %536 = vst.msk [vmem:[#allocation2 + $0x18] sm:$0xff] %vm322_vm0, %v526_v60  ;;  %v510_v41 = vadd.f32 %v2459_v43, %v509_v27  ;;  %v511_v44 = vpop.f32.mrb[13].mxu0  ;;  %v833_v25 = vsel %vm828_vm12, %v645_v28, 0  ;;  %v907_v47 = vshll.u32 %v645_v28, 16  ;;  %v2582_v4 = vsel %vm734_vm15, %v645_v28, 0 }
 0x175   : > { %v512_v48 = vpop.f32.mrb[14].mxu0  ;;  %v947_v49 = vrot.slane %v833_v25, 1  ;;  %v911_v14 = vshrl.u32 %v645_v28, 16  ;;  %v1078_v61 = vrot.slane %v1076_v5, 1  ;;  %v742_v27 = vld [vmem:[#allocation2 + $0x28] sm:$0x1]  ;;  %v1776_v31 = vcombine.low %v896_v15, %v897_v32 }
 0x176   : > { %v513_v56 = vadd.f32 %v2459_v43, %v512_v48  ;;  %v514_v62 = vpop.f32.mrb[15].mxu0  ;;  %v909_v63 = vrot.slane %v907_v47, 1  ;;  %v522_v0 = vmax.f32 %v510_v41, 0.0  ;;  %v1073_v43 = vshll.u32 %v1773_v36, 16 }
 0x177   : > { %v2589_v18 = vsel %vm945_vm14, %v946_v39, %v947_v49  ;;  %v836_v44 = vsel %vm831_vm3, %v742_v27, 0  ;;  %vm736_vm5 = vcmp.ne.s16.totalorder %v731_v8, 0  ;;  %v1108_v23 = vshrl.u32 %v1777_v22, 16  ;;  %v1009_v8 = vpop.permute.xlu0 %1008 }
 0x178   : > { %v523_v3 = vmax.f32 %v513_v56, 0.0  ;;  %v910_v29 = vsel %vm700_vm13, %v905_v58, %v909_v63  ;;  %v1075_v12 = vrot.slane %v1073_v43, 2  ;;  %v913_v16 = vor.u32 %v911_v14, %v909_v63 }
 0x179   : > { %932 = vrot.lane.b32.xlu1 %v910_v29, %s1972_s9  ;;  %v1111_v55 = vshll.u32 %v1777_v22, 16  ;;  %v1099_v48 = vshrl.u32 %v1776_v31, 16  ;;  %v1102_v36 = vshll.u32 %v1776_v31, 16  ;;  %v953_v56 = vrot.slane %v836_v44, 1 }
 0x17a   : > { %v527_v19 = vpack.c.bf16 %v523_v3, %v522_v0  ;;  %v1079_v25 = vor.u32 %v1078_v61, %v1075_v12  ;;  %v1110_v3 = vrot.slane %v1108_v23, 1  ;;  %v1146_v14 = vsel %vm322_vm0, %v2589_v18, %v1009_v8 }
 0x17b   : > { %v646_v13 = vld [vmem:[#allocation2 + $0x18] sm:$0xff]  ;;  %v1113_v29 = vrot.slane %v1111_v55, 2  ;;  %v1101_v57 = vrot.slane %v1099_v48, 1  ;;  %v1768_v55 = vcombine.low %v2106_v34, %v2110_v35 }
 0x17c   : > { %537 = vst.msk [vmem:[#allocation2 + $0x20] sm:$0xff] %vm322_vm0, %v527_v19  ;;  %v915_v1 = vshll.u32 %v646_v13, 16  ;;  %v834_v60 = vsel %vm829_vm11, %v646_v13, 0  ;;  %v2608_v7 = vsel %vm735_vm2, %v646_v13, 0  ;;  %v1088_v45 = vsel %vm1071_vm8, %v1079_v25, %v2417_v6 }
 0x17d   : > { %1010 = vrot.lane.b32.xlu1 %v994_v37, %s1972_s9  ;;  %v949_v33 = vrot.slane %v834_v60, 1  ;;  %v1005_v37 = vor.u32 %v1003_v10, %v1001_v11  ;;  %v1104_v11 = vrot.slane %v1102_v36, 2  ;;  %v1114_v6 = vor.u32 %v1113_v29, %v1110_v3  ;;  %v643_v60 = vld [vmem:[#allocation2] sm:$0x80]  ;;  %v1954_v29 = vld [vmem:[%s2746_s4 + $0x90] sm:$0xff]  }
 0x17e   : > { %v917_v30 = vrot.slane %v915_v1, 1  ;;  %v1239_v1 = vshrl.u32 %v1146_v14, 16  ;;  %v1039_v35 = vrot.slane %v1768_v55, 1 }
 0x17f   : > { %v2614_v28 = vsel %vm945_vm14, %v947_v49, %v949_v33  ;;  %v919_v49 = vshrl.u32 %v646_v13, 16  ;;  %v1105_v15 = vor.u32 %v1104_v11, %v1101_v57 }
 0x180   : > { %v918_v41 = vsel %vm700_vm13, %v913_v16, %v917_v30 }
 0x181   : > { %934 = vrot.lane.b32.xlu0 %v918_v41, %s1972_s9  ;;  %1012 = vrot.lane.b32.xlu1 %v1002_v50, %s1972_s9  ;;  %v921_v0 = vor.u32 %v919_v49, %v917_v30  ;;  %v1115_v32 = vsel %vm1071_vm8, %v1105_v15, %v1114_v6  ;;  %v1106_v21 = vsel %vm1071_vm8, %v2419_v17, %v1105_v15  ;;  %v1242_v17 = vshll.u32 %v1146_v14, 16 }
 0x183   : > { %v647_v47 = vld [vmem:[#allocation2 + $0x20] sm:$0xff] }
 0x184   : > { %v923_v62 = vshll.u32 %v647_v47, 16  ;;  %v835_v58 = vsel %vm830_vm4, %v647_v47, 0  ;;  %v2620_v63 = vsel %vm736_vm5, %v647_v47, 0  ;;  %v927_v10 = vshrl.u32 %v647_v47, 16 }
 0x185   : > { %1014 = vrot.lane.b32.xlu1 %v1005_v37, %s1972_s9  ;;  %v951_v2 = vrot.slane %v835_v58, 1 }
 0x186   : > { %v925_v59 = vrot.slane %v923_v62, 1 }
 0x187   : > { %v952_v43 = vsel %vm945_vm14, %v949_v33, %v951_v2  ;;  %v2627_v5 = vsel %vm945_vm14, %v951_v2, %v953_v56  ;;  %v1241_v33 = vrot.slane %v1239_v1, 7  ;;  %v1953_v56 = vld [vmem:[%s2746_s4 + $0x88] sm:$0xff]  }
 0x188   : > { %v926_v19 = vsel %vm700_vm13, %v921_v0, %v925_v59  ;;  %v929_v13 = vor.u32 %v927_v10, %v925_v59  ;;  %vm732_vm13 = vcmp.ne.s16.totalorder %v2284_v24, 0 }
 0x189   : > { %936 = vrot.lane.b32.xlu0 %v926_v19, %s1972_s9  ;;  %1118 = vrot.lane.b32.xlu1 %v1088_v45, %s1972_s9  ;;  %v1244_v31 = vor.u32 %v1242_v17, %v1241_v33 }
 0x18d   : > { %938 = vrot.lane.b32.xlu0 %v929_v13, %s1972_s9  ;;  %1116 = vrot.lane.b32.xlu1 %v1075_v12, %s1972_s9 }
 0x191   : > { %1120 = vrot.lane.b32.xlu0 %v2424_v20, %s1972_s9  ;;  %1124 = vrot.lane.b32.xlu1 %v1115_v32, %s1972_s9  ;;  %v737_v20 = vsel %vm732_vm13, %v643_v60, 0 }
 0x195   : > { %1122 = vrot.lane.b32.xlu0 %v1106_v21, %s1972_s9  ;;  %v1955_v21 = vld [vmem:[%s2746_s4 + $0x98] sm:$0xff]  }
 0x1e4   : > { %v1912_v12 = vpop.permute.xlu0 %1911 }
 0x1e5   : > { %v1913_v61 = vunpack.i.l.bf16 %v1912_v12  ;;  %v1914_v27 = vunpack.i.h.bf16 %v1912_v12 }
 0x1e7   : > { %v1143_v16 = vsel %vm322_vm0, %v946_v39, %v1913_v61  ;;  %v1128_v50 = vsel %vm322_vm0, %v737_v20, %v1914_v27  ;;  %v1771_v20 = vcombine.low %v2495_v54, %v2498_v42 }
 0x1e8   : > { %v1236_v30 = vshrl.u32 %v1143_v16, 16  ;;  %v1226_v44 = vshrl.u32 %v1128_v50, 16  ;;  %v1956_v16 = vld [vmem:[%s2746_s4 + $0xa0] sm:$0xff]  }
 0x1ea   : > { %v1238_v22 = vrot.slane %v1236_v30, 7  ;;  %v1228_v36 = vrot.slane %v1226_v44, 7  ;;  %v1044_v44 = vrot.slane %v1771_v20, 1 }
 0x1eb   : > { %v933_v18 = vpop.permute.xlu1 %932 }
 0x1ec   : > { %v1131_v41 = vsel %vm322_vm0, %v2532_v26, %v933_v18  ;;  %v1245_v24 = vsel %vm795_vm10, %v1238_v22, %v1244_v31  ;;  %v1769_v26 = vcombine.low %v2120_v40, %v2151_v46 }
 0x1ed   : > { %v1229_v37 = vshrl.u32 %v1131_v41, 16  ;;  %1507 = vmatprep.mubr.bf16.mxu1 %v1245_v24  ;;  %v1232_v23 = vshll.u32 %v1131_v41, 16 }
 0x1ee   : > { %v1040_v46 = vrot.slane %v1769_v26, 1 }
 0x1ef   : > { %v1231_v25 = vrot.slane %v1229_v37, 7  ;;  %v1011_v53 = vpop.permute.xlu1 %1010  ;;  %v1772_v37 = vcombine.low %v2594_v9, %v2594_v9 }
 0x1f0   : > { %v1149_v39 = vsel %vm322_vm0, %v2614_v28, %v1011_v53  ;;  %v1041_v32 = vsel %vm945_vm14, %v1039_v35, %v1040_v46  ;;  %v1958_v53 = vld [vmem:[%s2746_s4 + $0xa8] sm:$0xff]  }
 0x1f1   : > { %v1234_v47 = vor.u32 %v1232_v23, %v1231_v25  ;;  %v1263_v48 = vshrl.u32 %v1149_v39, 16  ;;  %v1266_v62 = vshll.u32 %v1149_v39, 16 }
 0x1f3   : > { %v1265_v49 = vrot.slane %v1263_v48, 7  ;;  %v935_v58 = vpop.permute.xlu0 %934  ;;  %v1013_v45 = vpop.permute.xlu1 %1012  ;;  %v1235_v2 = vsel %vm795_vm10, %v1228_v36, %v1234_v47 }
 0x1f4   : > { %v1134_v28 = vsel %vm322_vm0, %v2582_v4, %v935_v58  ;;  %v1152_v34 = vsel %vm322_vm0, %v952_v43, %v1013_v45  ;;  %1508 = vmatmul.mubr.bf16.vlgmr.msra.gmra.mrb[0].mxu1 %v1235_v2  ;;  %v1960_v58 = vld [vmem:[%s2746_s4 + $0xb0] sm:$0xff]  }
 0x1f5   : > { %v1268_v0 = vor.u32 %v1266_v62, %v1265_v49  ;;  %v1256_v59 = vshrl.u32 %v1134_v28, 16  ;;  %v1284_v40 = vshrl.u32 %v1152_v34, 16  ;;  %1875 = vmatpush3.bf16.msra.mxu1 %v2571_v38  ;;  %v1259_v3 = vshll.u32 %v1134_v28, 16 }
 0x1f6   : > { %1876 = vmatprep.subr.bf16.mxu1 %v1953_v56  ;;  %v1287_v11 = vshll.u32 %v1152_v34, 16  ;;  %v1770_v38 = vcombine.low %v2410_v51, %v2413_v52 }
 0x1f7   : > { %v1258_v19 = vrot.slane %v1256_v59, 7  ;;  %v1286_v57 = vrot.slane %v1284_v40, 7  ;;  %v1015_v4 = vpop.permute.xlu1 %1014  ;;  %v1269_v43 = vsel %vm795_vm10, %v1241_v33, %v1268_v0  ;;  %v1961_v40 = vld [vmem:[%s2746_s4 + $0xb8] sm:$0xff]  }
 0x1f8   : > { %v1155_v10 = vsel %vm322_vm0, %v2627_v5, %v1015_v4  ;;  %1515 = vmatprep.mubr.bf16.mxu1 %v1269_v43  ;;  %v1042_v61 = vrot.slane %v1770_v38, 1 }
 0x1f9   : > { %v1261_v6 = vor.u32 %v1259_v3, %v1258_v19  ;;  %v1289_v13 = vor.u32 %v1287_v11, %v1286_v57  ;;  %v1305_v15 = vshrl.u32 %v1155_v10, 16  ;;  %1877 = vmatpush3.bf16.msra.mxu1 %v1953_v56  ;;  %v1308_v14 = vshll.u32 %v1155_v10, 16 }
 0x1fa   : > { %1878 = vmatprep.subr.bf16.mxu1 %v1954_v29  ;;  %v1043_v41 = vsel %vm945_vm14, %v1040_v46, %v1042_v61  ;;  %v1045_v9 = vsel %vm945_vm14, %v1042_v61, %v1044_v44  ;;  %v1046_v56 = vrot.slane %v1772_v37, 1 }
 0x1fb   : > { %v1307_v8 = vrot.slane %v1305_v15, 7  ;;  %v937_v1 = vpop.permute.xlu0 %936  ;;  %v1262_v5 = vsel %vm795_vm10, %v1231_v25, %v1261_v6  ;;  %v1290_v60 = vsel %vm795_vm10, %v1265_v49, %v1289_v13  ;;  %v1119_v12 = vpop.permute.xlu1 %1118 }
 0x1fc   : > { %v1137_v51 = vsel %vm322_vm0, %v2608_v7, %v937_v1  ;;  %1516 = vmatmul.mubr.bf16.gmra.mrb[4].mxu1 %v1262_v5  ;;  %v1161_v52 = vsel %vm322_vm0, %v1041_v32, %v1119_v12  ;;  %v1047_v0 = vsel %vm945_vm14, %v1044_v44, %v1046_v56  ;;  %v1778_v44 = vld [vmem:[%s2747_s5] ss:$0 sm:$0xff] }
 0x1fd   : > { %v1310_v33 = vor.u32 %v1308_v14, %v1307_v8  ;;  %v1277_v27 = vshrl.u32 %v1137_v51, 16  ;;  %1879 = vmatpush3.bf16.msra.mxu1 %v1954_v29  ;;  %1523 = vmatprep.mubr.bf16.mxu1 %v1290_v60  ;;  %v1249_v17 = vshrl.u32 %v1161_v52, 16  ;;  %v1280_v50 = vshll.u32 %v1137_v51, 16 }
 0x1fe   : > { %1880 = vmatprep.subr.bf16.mxu1 %v1955_v21  ;;  %v1252_v23 = vshll.u32 %v1161_v52, 16 }
 0x1ff   : > { %v1279_v30 = vrot.slane %v1277_v27, 7  ;;  %v939_v7 = vpop.permute.xlu0 %938  ;;  %v1311_v22 = vsel %vm795_vm10, %v1286_v57, %v1310_v33  ;;  %v1117_v31 = vpop.permute.xlu1 %1116  ;;  %v1251_v25 = vrot.slane %v1249_v17, 7 }
 0x200   : > { %v1140_v18 = vsel %vm322_vm0, %v2620_v63, %v939_v7  ;;  %v1158_v24 = vsel %vm322_vm0, %v1039_v35, %v1117_v31 }
 0x201   : > { %v1282_v54 = vor.u32 %v1280_v50, %v1279_v30  ;;  %v1298_v42 = vshrl.u32 %v1140_v18, 16  ;;  %1881 = vmatpush3.bf16.msra.mxu1 %v1955_v21  ;;  %v1246_v39 = vshrl.u32 %v1158_v24, 16  ;;  %v1301_v55 = vshll.u32 %v1140_v18, 16 }
 0x202   : > { %1882 = vmatprep.subr.bf16.mxu1 %v1956_v16  ;;  %v1254_v49 = vor.u32 %v1252_v23, %v1251_v25 }
 0x203   : > { %v1300_v63 = vrot.slane %v1298_v42, 7  ;;  %v1283_v47 = vsel %vm795_vm10, %v1258_v19, %v1282_v54  ;;  %v1121_v48 = vpop.permute.xlu0 %1120  ;;  %v1248_v62 = vrot.slane %v1246_v39, 7  ;;  %v1125_v59 = vpop.permute.xlu1 %1124 }
 0x204   : > { %1524 = vmatmul.mubr.bf16.gmra.mrb[8].mxu1 %v1283_v47  ;;  %v1164_v36 = vsel %vm322_vm0, %v1043_v41, %v1121_v48  ;;  %v1170_v11 = vsel %vm322_vm0, %v1047_v0, %v1125_v59 }
 0x205   : > { %v1303_v26 = vor.u32 %v1301_v55, %v1300_v63  ;;  %1883 = vmatpush3.bf16.msra.mxu1 %v1956_v16  ;;  %1531 = vmatprep.mubr.bf16.mxu1 %v1311_v22  ;;  %v1270_v45 = vshrl.u32 %v1164_v36, 16  ;;  %v1255_v46 = vsel %vm795_vm10, %v1248_v62, %v1254_v49  ;;  %v1273_v29 = vshll.u32 %v1164_v36, 16 }
 0x206   : > { %1884 = vmatprep.subr.bf16.mxu1 %v1958_v53  ;;  %v1312_v43 = vshrl.u32 %v1170_v11, 16  ;;  %v1315_v6 = vshll.u32 %v1170_v11, 16 }
 0x207   : > { %v1123_v2 = vpop.permute.xlu0 %1122  ;;  %v1304_v28 = vsel %vm795_vm10, %v1279_v30, %v1303_v26  ;;  %v1272_v3 = vrot.slane %v1270_v45, 7 }
 0x208   : > { %v1167_v34 = vsel %vm322_vm0, %v1045_v9, %v1123_v2  ;;  %v1314_v38 = vrot.slane %v1312_v43, 7  ;;  %vm1645_vm0 = vcmask 519168  }
 0x209   : > { %1885 = vmatpush3.bf16.msra.mxu1 %v1958_v53  ;;  %v1291_v35 = vshrl.u32 %v1167_v34, 16  ;;  %v1294_v57 = vshll.u32 %v1167_v34, 16  ;;  %v1275_v4 = vor.u32 %v1273_v29, %v1272_v3 }
 0x20a   : > { %1886 = vmatprep.subr.bf16.mxu1 %v1960_v58  ;;  %v1317_v32 = vor.u32 %v1315_v6, %v1314_v38 }
 0x20b   : > { %v1293_v19 = vrot.slane %v1291_v35, 7  ;;  %v1276_v13 = vsel %vm795_vm10, %v1251_v25, %v1275_v4 }
 0x20c   : > { %1532 = vmatmul.mubr.bf16.gmra.mrb[12].mxu1 %v1304_v28 }
 0x20d   : > { %1887 = vmatpush3.bf16.msra.mxu1 %v1960_v58  ;;  %1890 = vmatprep.mubr.bf16.mxu1 %v1255_v46  ;;  %v1296_v10 = vor.u32 %v1294_v57, %v1293_v19  ;;  %v1318_v21 = vsel %vm795_vm10, %v1293_v19, %v1317_v32 }
 0x20e   : > { %1888 = vmatprep.subr.bf16.mxu1 %v1961_v40 }
 0x20f   : > { %v1297_v15 = vsel %vm795_vm10, %v1272_v3, %v1296_v10 }
 0x211   : > { %1889 = vmatpush3.bf16.msra.mxu1 %v1961_v40 }
 0x214   : > { %1891 = vmatmul.mubr.bf16.vlgmr.msra.gmra.mrb[16].mxu1 %v1276_v13 }
 0x215   : > { %1894 = vmatprep.mubr.bf16.mxu1 %v1297_v15 }
 0x21c   : > { %1895 = vmatmul.mubr.bf16.gmra.mrb[20].mxu1 %v1318_v21 }
 0x2c7   : > { %v1838_v8 = vpop.f32.mrb[0].mxu1 }
 0x2c8   : > { %v1839_v14 = vpop.f32.mrb[1].mxu1 }
 0x2c9   : > { %v1840_v1 = vadd.f32 %v1839_v14, %v1838_v8  ;;  %v1841_v5 = vpop.f32.mrb[2].mxu1 }
 0x2ca   : > { %v1842_v60 = vpop.f32.mrb[3].mxu1 }
 0x2cb   : > { %v1843_v12 = vadd.f32 %v1842_v60, %v1841_v5  ;;  %v1510_v23 = vadd.f32 %v1840_v1, %v1778_v44 }
 0x2cd   : > { %v1513_v48 = vadd.f32 %v1843_v12, %v1778_v44 }
 0x2cf   : > { %v1844_v51 = vpop.f32.mrb[4].mxu1 }
 0x2d0   : > { %v1845_v52 = vpop.f32.mrb[5].mxu1 }
 0x2d1   : > { %v1846_v61 = vadd.f32 %v1845_v52, %v1844_v51  ;;  %v1847_v33 = vpop.f32.mrb[6].mxu1 }
 0x2d2   : > { %v1848_v27 = vpop.f32.mrb[7].mxu1 }
 0x2d3   : > { %v1849_v20 = vadd.f32 %v1848_v27, %v1847_v33  ;;  %v1518_v37 = vadd.f32 %v1846_v61, %v1778_v44 }
 0x2d5   : > { %v1521_v63 = vadd.f32 %v1849_v20, %v1778_v44 }
 0x2d7   : > { %v1850_v16 = vpop.f32.mrb[8].mxu1 }
 0x2d8   : > { %v1851_v17 = vpop.f32.mrb[9].mxu1 }
 0x2d9   : > { %v1852_v30 = vadd.f32 %v1851_v17, %v1850_v16  ;;  %v1853_v50 = vpop.f32.mrb[10].mxu1 }
 0x2da   : > { %v1854_v7 = vpop.f32.mrb[11].mxu1 }
 0x2db   : > { %v1855_v22 = vadd.f32 %v1854_v7, %v1853_v50  ;;  %v1526_v59 = vadd.f32 %v1852_v30, %v1778_v44 }
 0x2dd   : > { %v1529_v57 = vadd.f32 %v1855_v22, %v1778_v44 }
 0x2df   : > { %v1856_v31 = vpop.f32.mrb[12].mxu1 }
 0x2e0   : > { %v1857_v18 = vpop.f32.mrb[13].mxu1 }
 0x2e1   : > { %v1858_v41 = vadd.f32 %v1857_v18, %v1856_v31  ;;  %v1859_v24 = vpop.f32.mrb[14].mxu1 }
 0x2e2   : > { %v1860_v54 = vpop.f32.mrb[15].mxu1 }
 0x2e3   : > { %v1861_v42 = vadd.f32 %v1860_v54, %v1859_v24  ;;  %v1534_v34 = vadd.f32 %v1858_v41, %v1778_v44 }
 0x2e5   : > { %v1537_v3 = vadd.f32 %v1861_v42, %v1778_v44 }
 0x2e7   : > { %v1892_v25 = vpop.f32.mrb[16].mxu1 }
 0x2e8   : > { %v1583_v53 = vadd.f32 %v1892_v25, %v1518_v37  ;;  %v1574_v39 = vpop.f32.mrb[17].mxu1 }
 0x2e9   : > { %v1575_v55 = vadd.f32 %v1574_v39, %v1510_v23  ;;  %v1893_v47 = vpop.f32.mrb[18].mxu1 }
 0x2ea   : > { %v1607_v36 = vmax.f32 %v1583_v53, 0.0  ;;  %v1586_v26 = vadd.f32 %v1893_v47, %v1521_v63  ;;  %v1577_v9 = vpop.f32.mrb[19].mxu1 }
 0x2eb   : > { %v1605_v56 = vmax.f32 %v1575_v55, 0.0  ;;  %v1578_v49 = vadd.f32 %v1577_v9, %v1513_v48 }
 0x2ec   : > { %v1816_v62 = vpack.c.bf16 %v1607_v36, %v1607_v36  ;;  %v1608_v58 = vmax.f32 %v1586_v26, 0.0 }
 0x2ed   : > { %v1814_v45 = vpack.c.bf16 %v1605_v56, %v1605_v56  ;;  %v1606_v2 = vmax.f32 %v1578_v49, 0.0 }
 0x2ee   : > { %1648 = vst.msk [vmem:[%s2721_s27 + $0x8] sm:$0xf] %vm1645_vm0, %v1816_v62  ;;  %v1817_v28 = vpack.c.bf16 %v1608_v58, %v1608_v58 }
 0x2ef   : > { %1646 = vst.msk [vmem:[%s2721_s27] sm:$0xf] %vm1645_vm0, %v1814_v45  ;;  %v1815_v35 = vpack.c.bf16 %v1606_v2, %v1606_v2  ;;  %v1896_v0 = vpop.f32.mrb[20].mxu1 }
 0x2f0   : > { %1649 = vst.msk [vmem:[%s2721_s27 + $0xc] sm:$0xf] %vm1645_vm0, %v1817_v28  ;;  %v1599_v40 = vadd.f32 %v1896_v0, %v1534_v34  ;;  %v1590_v46 = vpop.f32.mrb[21].mxu1 }
 0x2f1   : > { %1647 = vst.msk [vmem:[%s2721_s27 + $0x4] sm:$0xf] %vm1645_vm0, %v1815_v35  ;;  %v1591_v29 = vadd.f32 %v1590_v46, %v1526_v59  ;;  %v1897_v19 = vpop.f32.mrb[22].mxu1 }
 0x2f2   : > { %v1611_v11 = vmax.f32 %v1599_v40, 0.0  ;;  %v1602_v4 = vadd.f32 %v1897_v19, %v1537_v3  ;;  %v1593_v43 = vpop.f32.mrb[23].mxu1 }
 0x2f3   : > { %v1609_v10 = vmax.f32 %v1591_v29, 0.0  ;;  %v1594_v38 = vadd.f32 %v1593_v43, %v1529_v57 }
 0x2f4   : > { %v1820_v6 = vpack.c.bf16 %v1611_v11, %v1611_v11  ;;  %v1612_v13 = vmax.f32 %v1602_v4, 0.0 }
 0x2f5   : > { %v1818_v15 = vpack.c.bf16 %v1609_v10, %v1609_v10  ;;  %v1610_v32 = vmax.f32 %v1594_v38, 0.0 }
 0x2f6   : > { %1652 = vst.msk [vmem:[%s2721_s27 + $0x18] sm:$0xf] %vm1645_vm0, %v1820_v6  ;;  %v1821_v21 = vpack.c.bf16 %v1612_v13, %v1612_v13 }
 0x2f7   : > { %1650 = vst.msk [vmem:[%s2721_s27 + $0x10] sm:$0xf] %vm1645_vm0, %v1818_v15  ;;  %v1819_v8 = vpack.c.bf16 %v1610_v32, %v1610_v32 }
 0x2f8   : > { %1653 = vst.msk [vmem:[%s2721_s27 + $0x1c] sm:$0xf] %vm1645_vm0, %v1821_v21 }
 0x2f9   : > { %1651 = vst.msk [vmem:[%s2721_s27 + $0x14] sm:$0xf] %vm1645_vm0, %v1819_v8 }
 0x2fa PF: > { %s16_s21 = sadd.s32 1, %s1969_s21  }
 0x2fb   : > { %p13_p4 = scmp.ge.s32.totalorder %s16_s21, 4  }
 0x2fd   :  { %15 = sbr.rel (!%p13_p4) target bundleno = 1 (0x1), region = 77 }

// kernel: rrs_1d_forward.17
= control target key start
LH: loop header
LB: loop body
LE: loop exit
PB: predicated region body
PF: predicated region fallthrough
CT: control target
= control target key end

     0   :  { %s4521_s24 = smov 0   ;;  %s6524_s0 = inlined_call_operand.vmem [shape: bf16[2,288,64], index: 0, kind: input, shape index: {}]   ;;  %s6525_s1 = inlined_call_operand.vmem [shape: bf16[2,258,4], index: 1, kind: input, shape index: {}]   ;;  %s6526_s2 = inlined_call_operand.vmem [shape: bf16[192,64], index: 2, kind: input, shape index: {}]   ;;  %s6527_s3 = inlined_call_operand.vmem [shape: f32[1,64], index: 3, kind: input, shape index: {}]   ;;  %s6528_s4 = inlined_call_operand.vmem [shape: bf16[204,64], index: 4, kind: input, shape index: {}]   ;;  %s6529_s5 = inlined_call_operand.vmem [shape: f32[1,64], index: 5, kind: input, shape index: {}]   ;;  %s6530_s6 = inlined_call_operand.vmem [shape: f32[1,64], index: 6, kind: input, shape index: {}]   ;;  %s6531_s7 = inlined_call_operand.vmem [shape: f32[2,256,1], index: 7, kind: output, shape index: {}]  }
   0x1 LB: > { %s4192_s25 = sadd.s32 4294967295, %s4474_s24   ;;  %p4196_p0 = scmp.ge.s32.totalorder %s4474_s24, 1  ;;  %s4474_s24 = sphi %s4521_s24, %s17_s24  }
   0x2   : > { %p247_p1 = scmp.lt.s32.totalorder %s4474_s24, 3 }
   0x4   : > { %p248_p2 = pnand %p4196_p0, %p247_p1 }
   0x6   : > { %251 = sbr.rel (%p248_p2) target bundleno = 984 (0x3d8), region = 48 }
   0xd   : > { %p284_p3 = scmp.lt.s32.totalorder %s4192_s25, 1  ;;  %v4393_v0 = vld [vmem:[%s6526_s2] sm:$0xff]   ;;  %v6562_v1 = vmov 0   ;;  %v4395_v2 = vld [vmem:[%s6526_s2 + $0x8] sm:$0xff]   ;;  %vm6545_vm0 = vcmask 523264   ;;  %v4396_v3 = vld [vmem:[%s6526_s2 + $0x10] sm:$0xff]   ;;  %v905_v29 = vlaneseq }
   0xe   : > { %662 = vmatprep.subr.bf16.mxu0 %v6562_v1  ;;  %3764 = vmatprep.subr.bf16.mxu1 %v6562_v1  ;;  %871 = vst.msk [vmem:[#allocation2] sm:$0xff] %vm6545_vm0, %v6562_v1  ;;  %872 = vst.msk [vmem:[#allocation2 + $0x8] sm:$0xff] %vm6545_vm0, %v6562_v1  ;;  %s4477_s13 = smov 64   ;;  %v4398_v7 = vld [vmem:[%s6526_s2 + $0x18] sm:$0xff]   ;;  %v4399_v10 = vld [vmem:[%s6526_s2 + $0x20] sm:$0xff]   ;;  %vm4478_vm2 = vmmov 1  }
   0xf   : > { %s6845_s25 = smov (!%p284_p3, %s4192_s25), 1  ;;  %663 = vmatpush1.bf16.msra.mxu0 %v4393_v0  ;;  %873 = vst.msk [vmem:[#allocation2 + $0x10] sm:$0xff] %vm6545_vm0, %v6562_v1  ;;  %874 = vst.msk [vmem:[#allocation2 + $0x18] sm:$0xff] %vm6545_vm0, %v6562_v1  ;;  %v4401_v13 = vld [vmem:[%s6526_s2 + $0x28] sm:$0xff]   ;;  %v4402_v16 = vld [vmem:[%s6526_s2 + $0x30] sm:$0xff]   ;;  %v4686_v30 = vshrl.u32 %v905_v29, 7 }
  0x10   : > { %664 = vmatprep.subr.bf16.mxu0 %v6562_v1  ;;  %s4364_s30 = smul.u32 144, %s6845_s25  ;;  %875 = vst.msk [vmem:[#allocation2 + $0x20] sm:$0xff] %vm6545_vm0, %v6562_v1  ;;  %876 = vst.msk [vmem:[#allocation2 + $0x28] sm:$0xff] %vm6545_vm0, %v6562_v1  ;;  %v4404_v20 = vld [vmem:[%s6526_s2 + $0x38] sm:$0xff]   ;;  %v4405_v22 = vld [vmem:[%s6526_s2 + $0x40] sm:$0xff]   ;;  %vm2146_vm7 = vcmask 1040384  }
  0x11   : > { %877 = vst.msk [vmem:[#allocation2 + $0x30] sm:$0xff] %vm6545_vm0, %v6562_v1  ;;  %878 = vst.msk [vmem:[#allocation2 + $0x38] sm:$0xff] %vm6545_vm0, %v6562_v1  ;;  %v4407_v25 = vld [vmem:[%s6526_s2 + $0x48] sm:$0xff]   ;;  %v4408_v27 = vld [vmem:[%s6526_s2 + $0x50] sm:$0xff]   ;;  %v907_v31 = vadd.s32 8, %v4686_v30  ;;  %v909_v32 = vadd.s32 24, %v4686_v30 }
  0x12   : > { %879 = vst.msk [vmem:[#allocation2 + $0x40] sm:$0xff] %vm6545_vm0, %v6562_v1  ;;  %880 = vst.msk [vmem:[#allocation2 + $0x48] sm:$0xff] %vm6545_vm0, %v6562_v1  ;;  %s4580_s10 = scalar_lea.vmem %s6524_s0, %s4364_s30  ;;  %v4410_v28 = vld [vmem:[%s6526_s2 + $0x58] sm:$0xff]   ;;  %s4365_s12 = smul.u32 132, %s6845_s25  ;;  %vm2147_vm8 = vcmask 1044484   ;;  %v908_v62 = vadd.s32 16, %v4686_v30 }
  0x13   : > { %881 = vst.msk [vmem:[#allocation2 + $0x50] sm:$0xff] %vm6545_vm0, %v6562_v1  ;;  %882 = vst.msk [vmem:[#allocation2 + $0x58] sm:$0xff] %vm6545_vm0, %v6562_v1  ;;  %665 = vmatpush1.bf16.msra.mxu0 %v4395_v2  ;;  %v4586_v4 = vld [vmem:[%s4580_s10 + $0x8] sm:$0xff]   ;;  %v4590_v5 = vld [vmem:[%s4580_s10 + $0x10] sm:$0xff]   ;;  %v949_v33 = vand.u32 15, %v907_v31  ;;  %v963_v34 = vand.u32 15, %v909_v32 }
  0x14   : > { %883 = vst.msk [vmem:[#allocation2 + $0x60] sm:$0xff] %vm6545_vm0, %v6562_v1  ;;  %884 = vst.msk [vmem:[#allocation2 + $0x68] sm:$0xff] %vm6545_vm0, %v6562_v1  ;;  %666 = vmatprep.subr.bf16.mxu0 %v6562_v1  ;;  %423 = vrot.lane.b32.xlu0 %v4586_v4, %s4477_s13  ;;  %v4595_v6 = vld [vmem:[%s4580_s10 + $0x18] sm:$0xff]   ;;  %v4605_v8 = vld [vmem:[%s4580_s10 + $0x20] sm:$0xff]   ;;  %s4721_s16 = scalar_lea.vmem %s6525_s1, %s4365_s12  ;;  %v942_v63 = vand.u32 15, %v4686_v30  ;;  %vm6532_vm14 = vcmask 1046528  }
  0x15   : > { %885 = vst.msk [vmem:[#allocation2 + $0x70] sm:$0xff] %vm6545_vm0, %v6562_v1  ;;  %886 = vst.msk [vmem:[#allocation2 + $0x78] sm:$0xff] %vm6545_vm0, %v6562_v1  ;;  %4232 = vmatprep.mubr.msk.bf16.mxu0 %vm6545_vm0, %v4590_v5  ;;  %427 = vrot.lane.b32.xlu1 %v4595_v6, %s4477_s13  ;;  %v4611_v9 = vld [vmem:[%s4580_s10 + $0x28] sm:$0xff]   ;;  %v4619_v11 = vld [vmem:[%s4580_s10 + $0x30] sm:$0xff]   ;;  %vm1711_vm1 = vcmp.lt.s32.totalorder %v949_v33, 15  ;;  %vm1713_vm4 = vcmp.lt.s32.totalorder %v963_v34, 15 }
  0x16   : > { %887 = vst.msk [vmem:[#allocation2 + $0x80] sm:$0xff] %vm6545_vm0, %v6562_v1  ;;  %888 = vst.msk [vmem:[#allocation2 + $0x88] sm:$0xff] %vm6545_vm0, %v6562_v1  ;;  %v4625_v12 = vld [vmem:[%s4580_s10 + $0x38] sm:$0xff]   ;;  %v4633_v14 = vld [vmem:[%s4580_s10 + $0x40] sm:$0xff]   ;;  %vm4751_vm15 = vcmp.ge.s32.totalorder %v942_v63, 1  ;;  %s4479_s17 = smov 68  }
  0x17   : > { %667 = vmatpush1.bf16.msra.mxu0 %v4396_v3  ;;  %v4639_v15 = vld [vmem:[%s4580_s10 + $0x48] sm:$0xff]   ;;  %v4647_v17 = vld [vmem:[%s4580_s10 + $0x50] sm:$0xff]   ;;  %v4397_v18 = vld [vmem:[%s4580_s10 + $0x58] sm:$0xff]   ;;  %v6577_v33 = vmov 0  ;;  %s4480_s18 = smov 72   ;;  %s4363_s11 = sshll.u32 %s6845_s25, 8 }
  0x18   : > { %668 = vmatprep.subr.bf16.mxu0 %v6562_v1  ;;  %425 = vrot.lane.b32.xlu0 %v4590_v5, %s4477_s13  ;;  %v4400_v19 = vld [vmem:[%s4580_s10 + $0x60] sm:$0xff]   ;;  %v4403_v21 = vld [vmem:[%s4580_s10 + $0x68] sm:$0xff]   ;;  %v4406_v23 = vld [vmem:[%s4580_s10 + $0x70] sm:$0xff]   ;;  %s6455_s15 = scalar_lea.vmem %s6531_s7, %s4363_s11 }
  0x19   : > { %429 = vrot.lane.b32.xlu1 %v4605_v8, %s4477_s13  ;;  %v4409_v24 = vld [vmem:[%s4580_s10 + $0x78] sm:$0xff]   ;;  %v4412_v26 = vld [vmem:[%s4580_s10 + $0x80] sm:$0xff]   ;;  %vm4690_vm3 = vmpackc.low %vm4478_vm2, %vm4478_vm2  ;;  %vm6541_vm2 = vsmask.f32 6400 }
  0x1a   : > { %v4697_v36 = vsel %vm4690_vm3, 65537, %v6562_v1  ;;  %vm1807_vm5 = vmpackc.low %vm1711_vm1, %vm1711_vm1  ;;  %v2081_v47 = vld [vmem:[%s4721_s16 + $0x4] sm:$0xf]  ;;  %v2082_v48 = vld [vmem:[%s4721_s16 + $0x8] sm:$0xf] }
  0x1b   : > { %669 = vmatpush1.bf16.msra.mxu0 %v4398_v7  ;;  %vm1809_vm6 = vmpackc.low %vm1713_vm4, %vm1713_vm4  ;;  %v4700_v37 = vsel %vm1807_vm5, 65537, %v6562_v1  ;;  %v4703_v38 = vrot.slane %v4697_v36, 7  ;;  %v4732_v49 = vld [vmem:[%s4721_s16 + $0xc] sm:$0xf]  ;;  %v2080_v51 = vld [vmem:[%s4721_s16] sm:$0xf] }
  0x1c   : > { %670 = vmatprep.subr.bf16.mxu0 %v6562_v1  ;;  %431 = vrot.lane.b32.xlu0 %v4611_v9, %s4477_s13  ;;  %v4706_v39 = vsel %vm1809_vm6, 65537, %v6562_v1  ;;  %v2151_v40 = vrot.slane %v4700_v37, 7  ;;  %vm4714_vm9 = vmor %vm2146_vm7, %vm2147_vm8  ;;  %v4296_v55 = vcombine.low %v2080_v51, %v2081_v47  ;;  %v2145_v56 = vld [vmem:[%s4721_s16] sm:$0xe]  ;;  %v4297_v57 = vcombine.low %v2082_v48, %v4732_v49  ;;  %v2085_v31 = vld [vmem:[%s4721_s16 + $0x14] sm:$0xf] }
  0x1d   : > { %433 = vrot.lane.b32.xlu1 %v4619_v11, %s4477_s13  ;;  %v4711_v41 = vrot.slane %v4703_v38, 4  ;;  %v2157_v42 = vrot.slane %v4706_v39, 7  ;;  %vm2244_vm13 = vcmp.ne.s16.totalorder %v4703_v38, 0  ;;  %v2113_v3 = vsel %vm4690_vm3, %v2081_v47, 0  ;;  %vm6534_vm1 = vmpackc.low %vm4751_vm15, %vm4751_vm15  ;;  %v2084_v34 = vld [vmem:[%s4721_s16 + $0x10] sm:$0xf] }
  0x1e   : > { %v2153_v44 = vrot.slane %v2151_v40, 4  ;;  %v2277_v58 = vsel %vm2244_vm13, %v2145_v56, 0  ;;  %v4742_v60 = vrot.slane %v4296_v55, 1  ;;  %v4746_v0 = vrot.slane %v4297_v57, 1  ;;  %v4819_v63 = vld [vmem:[%s4721_s16 + $0x1c] sm:$0xf] }
  0x1f   : > { %671 = vmatpush1.bf16.msra.mxu0 %v4399_v10  ;;  %v2152_v45 = vsel %vm4714_vm9, %v4711_v41, %v2151_v40  ;;  %v2158_v46 = vsel %vm4714_vm9, %v4711_v41, %v2157_v42  ;;  %v2115_v40 = vsel %vm4690_vm3, %v4732_v49, 0 }
  0x20   : > { %672 = vmatprep.subr.bf16.mxu0 %v6562_v1  ;;  %435 = vrot.lane.b32.xlu0 %v4625_v12, %s4477_s13  ;;  %v2155_v50 = vsel %vm4714_vm9, %v2153_v44, %v4703_v38  ;;  %vm2245_vm10 = vcmp.ne.s16.totalorder %v2152_v45, 0  ;;  %vm2247_vm12 = vcmp.ne.s16.totalorder %v2158_v46, 0  ;;  %v2117_v46 = vsel %vm4690_vm3, %v2085_v31, 0 }
  0x21   : > { %437 = vrot.lane.b32.xlu1 %v4633_v14, %s4477_s13  ;;  %vm2246_vm11 = vcmp.ne.s16.totalorder %v2155_v50, 0  ;;  %v2278_v52 = vsel %vm2245_vm10, %v2081_v47, 0  ;;  %v2280_v54 = vsel %vm2247_vm12, %v4732_v49, 0  ;;  %v2159_v50 = vrot.slane %v2157_v42, 4 }
  0x22   : > { %v2279_v53 = vsel %vm2246_vm11, %v2082_v48, 0  ;;  %v4313_v61 = vcombine.low %v2277_v58, %v2278_v52  ;;  %v912_v52 = vadd.s32 48, %v4686_v30  ;;  %vm6550_vm10 = vsmask.f32 7424 }
  0x23   : > { %673 = vmatpush1.bf16.msra.mxu0 %v4401_v13  ;;  %v4314_v59 = vcombine.low %v2279_v53, %v2280_v54  ;;  %v911_v13 = vadd.s32 40, %v4686_v30  ;;  %v913_v54 = vadd.s32 56, %v4686_v30 }
  0x24   : > { %674 = vmatprep.subr.bf16.mxu0 %v6562_v1  ;;  %439 = vrot.lane.b32.xlu0 %v4639_v15, %s4477_s13  ;;  %v2998_v7 = vshll.u32 %v4313_v61, 16  ;;  %v3001_v10 = vshrl.u32 %v4313_v61, 16  ;;  %v2161_v61 = vsel %vm4714_vm9, %v2159_v50, %v4703_v38 }
  0x25   : > { %441 = vrot.lane.b32.xlu1 %v4647_v17, %s4477_s13  ;;  %v3006_v2 = vshrl.u32 %v4314_v59, 16  ;;  %v977_v44 = vand.u32 15, %v911_v13  ;;  %vm4823_vm12 = vcmp.ne.s16.totalorder %v2161_v61, 0  ;;  %v984_v13 = vand.u32 15, %v912_v52 }
  0x27   : > { %675 = vmatpush1.bf16.msra.mxu0 %v4402_v16  ;;  %v6575_v16 = vmov 0  ;;  %vm1715_vm8 = vcmp.lt.s32.totalorder %v977_v44, 15 }
  0x28   : > { %676 = vmatprep.subr.bf16.mxu0 %v6562_v1  ;;  %443 = vrot.lane.b32.xlu0 %v4397_v18, %s4477_s13  ;;  %v6576_v16 = vsel %vm4751_vm15, 4294967295, %v6575_v16  ;;  %v2848_v18 = vsel %vm6532_vm14, %v4742_v60, %v4746_v0  ;;  %vm1811_vm11 = vmpackc.low %vm1715_vm8, %vm1715_vm8  ;;  %vm4835_vm8 = vcmp.ge.s32.totalorder %v984_v13, 1 }
  0x29   : > { %445 = vrot.lane.b32.xlu1 %v4400_v19, %s4477_s13  ;;  %v3008_v19 = vrot.slane %v3006_v2, 1  ;;  %v4812_v57 = vsel %vm1811_vm11, 65537, %v6562_v1  ;;  %v4411_v2 = vld [vmem:[%s4580_s10] sm:$0xff]   ;;  %vm6537_vm11 = vmpackc.low %vm4835_vm8, %vm4835_vm8 }
  0x2b   : > { %677 = vmatpush1.bf16.msra.mxu0 %v4404_v20  ;;  %v3009_v20 = vshll.u32 %v4314_v59, 16 }
  0x2c   : > { %678 = vmatprep.subr.bf16.mxu0 %v6562_v1  ;;  %447 = vrot.lane.b32.xlu0 %v4403_v21, %s4477_s13  ;;  %v4762_v21 = vrot.slane %v2998_v7, 2 }
  0x2d   : > { %449 = vrot.lane.b32.xlu1 %v4406_v23, %s4477_s13  ;;  %v910_v23 = vadd.s32 32, %v4686_v30 }
  0x2f   : > { %679 = vmatpush1.bf16.msra.mxu0 %v4405_v22  ;;  %v3003_v22 = vrot.slane %v3001_v10, 1  ;;  %v970_v29 = vand.u32 15, %v910_v23 }
  0x30   : > { %680 = vmatprep.subr.bf16.mxu0 %v6562_v1  ;;  %451 = vrot.lane.b32.xlu0 %v4409_v24, %s4477_s13  ;;  %v956_v24 = vand.u32 15, %v908_v62  ;;  %v2163_v62 = vrot.slane %v4812_v57, 7 }
  0x31   : > { %453 = vrot.lane.b32.xlu1 %v4412_v26, %s4477_s13  ;;  %v3011_v26 = vrot.slane %v3009_v20, 2  ;;  %vm4782_vm5 = vcmp.ge.s32.totalorder %v970_v29, 1  ;;  %v2281_v20 = vsel %vm4823_vm12, %v2084_v34, 0  ;;  %v991_v29 = vand.u32 15, %v913_v54 }
  0x32   : > { %vm4774_vm4 = vcmp.ge.s32.totalorder %v956_v24, 1  ;;  %vm6540_vm7 = vmpackc.low %vm4782_vm5, %vm4782_vm5  ;;  %v914_v54 = vadd.s32 64, %v4686_v30 }
  0x33   : > { %681 = vmatpush1.bf16.msra.mxu0 %v4407_v25  ;;  %v2112_v25 = vsel %vm6534_vm1, %v2080_v51, 0  ;;  %v4772_v32 = vor.u32 %v3011_v26, %v3008_v19  ;;  %v6578_v33 = vsel %vm4774_vm4, 4294967295, %v6577_v33  ;;  %vm6533_vm6 = vmpackc.low %vm4774_vm4, %vm4774_vm4  ;;  %v2116_v42 = vsel %vm6540_vm7, %v2084_v34, 0 }
  0x34   : > { %682 = vmatprep.subr.bf16.mxu0 %v6562_v1  ;;  %v2114_v49 = vsel %vm6533_vm6, %v2082_v48, 0  ;;  %v4282_v48 = vcombine.low %v2116_v42, %v2117_v46  ;;  %v2164_v19 = vsel %vm4714_vm9, %v4711_v41, %v2163_v62  ;;  %vm1717_vm12 = vcmp.lt.s32.totalorder %v991_v29, 15 }
  0x35   : > { %2881 = vrot.lane.b32.xlu1 %v2848_v18, %s4479_s17  ;;  %v4281_v53 = vcombine.low %v2114_v49, %v2115_v40  ;;  %vm2249_vm13 = vcmp.ne.s16.totalorder %v2164_v19, 0  ;;  %v2165_v49 = vrot.slane %v2163_v62, 4 }
  0x37   : > { %683 = vmatpush1.bf16.msra.mxu0 %v4408_v27  ;;  %v4280_v27 = vcombine.low %v2112_v25, %v2113_v3  ;;  %v2610_v58 = vshll.u32 %v4281_v53, 16  ;;  %v2614_v59 = vshrl.u32 %v4281_v53, 16  ;;  %v2618_v3 = vshll.u32 %v4282_v48, 16 }
  0x38   : > { %684 = vmatprep.subr.bf16.mxu0 %v6562_v1  ;;  %v2119_v25 = vsel %vm4690_vm3, %v4819_v63, 0 }
  0x39   : > { %v2603_v47 = vshll.u32 %v4280_v27, 16  ;;  %v2606_v56 = vshrl.u32 %v4280_v27, 16  ;;  %v2612_v18 = vrot.slane %v2610_v58, 1  ;;  %v2620_v23 = vrot.slane %v2618_v3, 1 }
  0x3a   : > { %v998_v3 = vand.u32 15, %v914_v54 }
  0x3b   : > { %685 = vmatpush1.bf16.msra.mxu0 %v4410_v28  ;;  %v3004_v28 = vor.u32 %v3003_v22, %v4762_v21  ;;  %v4809_v55 = vrot.slane %v2603_v47, 1  ;;  %v2086_v22 = vld [vmem:[%s4721_s16 + $0x18] sm:$0xf]  ;;  %v2616_v26 = vor.u32 %v2614_v59, %v2612_v18  ;;  %v2622_v47 = vshrl.u32 %v4282_v48, 16  ;;  %v4865_v48 = vld [vmem:[%s4721_s16 + $0x24] sm:$0xf] }
  0x3c   : > { %v2118_v44 = vsel %vm6537_vm11, %v2086_v22, 0  ;;  %v2167_v59 = vsel %vm4714_vm9, %v2165_v49, %v4703_v38  ;;  %v2121_v19 = vsel %vm4690_vm3, %v4865_v48, 0 }
  0x3d   : > { %v3013_v51 = vsel %vm6541_vm2, %v3004_v28, %v4772_v32  ;;  %v2608_v7 = vor.u32 %v2606_v56, %v4809_v55  ;;  %v2282_v28 = vsel %vm2249_vm13, %v2085_v31, 0  ;;  %v2621_v31 = vsel %vm6550_vm10, %v2616_v26, %v2620_v23  ;;  %vm1813_vm13 = vmpackc.low %vm1717_vm12, %vm1717_vm12 }
  0x3e   : > { %3151 = vrot.lane.b32.xlu1 %v3013_v51, %s4480_s18  ;;  %v4315_v40 = vcombine.low %v2281_v20, %v2282_v28  ;;  %v4854_v46 = vcombine.low %v2118_v44, %v2119_v25  ;;  %v4861_v53 = vsel %vm1813_vm13, 65537, %v6562_v1  ;;  %v2624_v61 = vor.u32 %v2622_v47, %v2620_v23 }
  0x3f   : > { %v2613_v27 = vsel %vm6550_vm10, %v2608_v7, %v2612_v18  ;;  %v2169_v62 = vrot.slane %v4861_v53, 7  ;;  %vm4873_vm12 = vcmp.ne.s16.totalorder %v2167_v59, 0  ;;  %v4880_v18 = vld [vmem:[%s4721_s16 + $0x20] sm:$0xf]  ;;  %vm4890_vm13 = vcmp.ge.s32.totalorder %v998_v3, 1 }
  0x40   : > { %2731 = vrot.lane.b32.xlu0 %v2613_v27, %s4477_s13  ;;  %v3015_v50 = vshrl.u32 %v4315_v40, 16  ;;  %v3018_v51 = vshll.u32 %v4315_v40, 16  ;;  %v2626_v42 = vshll.u32 %v4854_v46, 16  ;;  %v2283_v20 = vsel %vm4873_vm12, %v2086_v22, 0  ;;  %vm6535_vm6 = vmpackc.low %vm4890_vm13, %vm4890_vm13  ;;  %v4915_v40 = vld [vmem:[%s4721_s16 + $0x2c] sm:$0xf] }
  0x41   : > { %v2171_v29 = vrot.slane %v2169_v62, 4  ;;  %v917_v44 = vadd.s32 88, %v4686_v30  ;;  %v4930_v59 = vld [vmem:[%s4721_s16 + $0x28] sm:$0xf] }
  0x42   : > { %2879 = vrot.lane.b32.xlu1 %v4742_v60, %s4479_s17  ;;  %v3017_v56 = vrot.slane %v3015_v50, 1  ;;  %v3020_v58 = vrot.slane %v3018_v51, 2  ;;  %v2628_v13 = vrot.slane %v2626_v42, 1  ;;  %v2630_v50 = vshrl.u32 %v4854_v46, 16 }
  0x43   : > { %v2123_v46 = vsel %vm4690_vm3, %v4915_v40, 0  ;;  %v1019_v3 = vand.u32 15, %v917_v44 }
  0x44   : > { %3149 = vrot.lane.b32.xlu0 %v4762_v21, %s4480_s18  ;;  %v3021_v10 = vor.u32 %v3020_v58, %v3017_v56  ;;  %v2170_v21 = vsel %vm4714_vm9, %v4711_v41, %v2169_v62 }
  0x45   : > { %vm2251_vm14 = vcmp.ne.s16.totalorder %v2170_v21, 0 }
  0x46   : > { %2733 = vrot.lane.b32.xlu1 %v2621_v31, %s4477_s13  ;;  %v3022_v25 = vsel %vm6541_vm2, %v4772_v32, %v3021_v10  ;;  %v2284_v22 = vsel %vm2251_vm14, %v4819_v63, 0  ;;  %v2629_v32 = vsel %vm6550_vm10, %v2624_v61, %v2628_v13  ;;  %v916_v63 = vadd.s32 80, %v4686_v30 }
  0x47   : > { %v4316_v27 = vcombine.low %v2283_v20, %v2284_v22 }
  0x48   : > { %v1012_v42 = vand.u32 15, %v916_v63 }
  0x49   : > { %v3024_v31 = vshrl.u32 %v4316_v27, 16  ;;  %v3027_v47 = vshll.u32 %v4316_v27, 16 }
  0x4a   : > { %3153 = vrot.lane.b32.xlu1 %v3022_v25, %s4480_s18 }
  0x4b   : > { %v3026_v56 = vrot.slane %v3024_v31, 1  ;;  %v3029_v58 = vrot.slane %v3027_v47, 2 }
  0x4e   : > { %2735 = vrot.lane.b32.xlu1 %v2629_v32, %s4477_s13  ;;  %v4966_v32 = vld [vmem:[%s4721_s16 + $0x34] sm:$0xf] }
  0x86   : > { %v424_v60 = vpop.permute.xlu0 %423 }
  0x87   : > { %v463_v34 = vsel %vm6545_vm0, %v4411_v2, %v424_v60  ;;  %v2120_v60 = vsel %vm6535_vm6, %v4880_v18, 0 }
  0x88   : > { %695 = vmatmul.mubr.bf16.vlgmr.msra.gmra.mrb[0].mxu0 %v463_v34  ;;  %v4911_v28 = vcombine.low %v2120_v60, %v2121_v19  ;;  %v428_v34 = vpop.permute.xlu1 %427 }
  0x89   : > { %4233 = vmatprep.mubr.msk.bf16.mxu0 %vm6545_vm0, %v4595_v6  ;;  %v471_v54 = vsel %vm6545_vm0, %v4590_v5, %v428_v34  ;;  %v3030_v5 = vor.u32 %v3029_v58, %v3026_v56 }
  0x8a   : > { %v426_v52 = vpop.permute.xlu0 %425  ;;  %v2634_v51 = vshll.u32 %v4911_v28, 16 }
  0x8b   : > { %v467_v7 = vsel %vm6545_vm0, %v4586_v4, %v426_v52  ;;  %v915_v4 = vadd.s32 72, %v4686_v30  ;;  %v2173_v52 = vsel %vm4714_vm9, %v2171_v29, %v4703_v38  ;;  %v3031_v25 = vsel %vm6541_vm2, %v3021_v10, %v3030_v5 }
  0x8c   : > { %v2636_v19 = vrot.slane %v2634_v51, 1  ;;  %v430_v21 = vpop.permute.xlu1 %429  ;;  %3155 = vrot.lane.b32.xlu1 %v3031_v25, %s4480_s18  ;;  %v2638_v10 = vshrl.u32 %v4911_v28, 16  ;;  %v4979_v51 = vld [vmem:[%s4721_s16 + $0x30] sm:$0xf] }
  0x8d   : > { %v1005_v26 = vand.u32 15, %v915_v4  ;;  %v475_v27 = vsel %vm6545_vm0, %v4595_v6, %v430_v21  ;;  %v2125_v6 = vsel %vm4690_vm3, %v4966_v32, 0 }
  0x8f   : > { %vm1719_vm12 = vcmp.lt.s32.totalorder %v1005_v26, 15  ;;  %v918_v26 = vadd.s32 96, %v4686_v30 }
  0x90   : > { %703 = vmatmul.mubr.bf16.gmra.mrb[4].mxu0 %v467_v7  ;;  %vm1815_vm14 = vmpackc.low %vm1719_vm12, %vm1719_vm12  ;;  %vm4936_vm12 = vcmp.ne.s16.totalorder %v2173_v52, 0  ;;  %v2632_v7 = vor.u32 %v2630_v50, %v2628_v13  ;;  %v5037_v52 = vld [vmem:[%s4721_s16 + $0x38] sm:$0xf] }
  0x91   : > { %4234 = vmatprep.mubr.msk.bf16.mxu0 %vm6545_vm0, %v4605_v8  ;;  %v4922_v49 = vsel %vm1815_vm14, 65537, %v6562_v1  ;;  %vm4940_vm14 = vcmp.ge.s32.totalorder %v1012_v42, 1  ;;  %v2285_v4 = vsel %vm4936_vm12, %v4880_v18, 0  ;;  %vm1721_vm12 = vcmp.lt.s32.totalorder %v1019_v3, 15 }
  0x92   : > { %v2175_v61 = vrot.slane %v4922_v49, 7  ;;  %vm6536_vm1 = vmpackc.low %vm4940_vm14, %vm4940_vm14  ;;  %v2637_v29 = vsel %vm6550_vm10, %v2632_v7, %v2636_v19  ;;  %v1026_v44 = vand.u32 15, %v918_v26 }
  0x93   : > { %v2122_v13 = vsel %vm6536_vm1, %v4930_v59, 0  ;;  %vm1817_vm1 = vmpackc.low %vm1721_vm12, %vm1721_vm12  ;;  %2737 = vrot.lane.b32.xlu1 %v2637_v29, %s4477_s13  ;;  %v920_v29 = vadd.s32 112, %v4686_v30 }
  0x94   : > { %v2176_v20 = vsel %vm4714_vm9, %v4711_v41, %v2175_v61  ;;  %v4285_v22 = vcombine.low %v2122_v13, %v2123_v46  ;;  %v2177_v18 = vrot.slane %v2175_v61, 4  ;;  %v4973_v63 = vsel %vm1817_vm1, 65537, %v6562_v1 }
  0x95   : > { %vm2253_vm6 = vcmp.ne.s16.totalorder %v2176_v20, 0  ;;  %v2181_v28 = vrot.slane %v4973_v63, 7  ;;  %v2640_v46 = vor.u32 %v2638_v10, %v2636_v19  ;;  %v432_v20 = vpop.permute.xlu0 %431 }
  0x96   : > { %v2286_v60 = vsel %vm2253_vm6, %v4865_v48, 0  ;;  %v2179_v48 = vsel %vm4714_vm9, %v2177_v18, %v4703_v38  ;;  %v2642_v50 = vshll.u32 %v4285_v22, 16  ;;  %vm4990_vm6 = vcmp.ge.s32.totalorder %v1026_v44, 1 }
  0x97   : > { %v4317_v34 = vcombine.low %v2285_v4, %v2286_v60  ;;  %vm4986_vm1 = vcmp.ne.s16.totalorder %v2179_v48, 0  ;;  %vm6538_vm12 = vmpackc.low %vm4990_vm6, %vm4990_vm6  ;;  %v2182_v61 = vsel %vm4714_vm9, %v4711_v41, %v2181_v28  ;;  %v2183_v25 = vrot.slane %v2181_v28, 4 }
  0x98   : > { %711 = vmatmul.mubr.bf16.gmra.mrb[8].mxu0 %v471_v54  ;;  %v919_v54 = vadd.s32 104, %v4686_v30  ;;  %v2287_v62 = vsel %vm4986_vm1, %v4930_v59, 0  ;;  %v2124_v3 = vsel %vm6538_vm12, %v4979_v51, 0  ;;  %v2644_v19 = vrot.slane %v2642_v50, 1 }
  0x99   : > { %4235 = vmatprep.mubr.msk.bf16.mxu0 %vm6545_vm0, %v4611_v9  ;;  %v3033_v31 = vshrl.u32 %v4317_v34, 16  ;;  %v3036_v47 = vshll.u32 %v4317_v34, 16  ;;  %vm2255_vm11 = vcmp.ne.s16.totalorder %v2182_v61, 0  ;;  %v5012_v21 = vcombine.low %v2124_v3, %v2125_v6  ;;  %v5023_v34 = vld [vmem:[%s4721_s16 + $0x3c] sm:$0xf]  ;;  %v434_v61 = vpop.permute.xlu1 %433 }
  0x9a   : > { %v2288_v4 = vsel %vm2255_vm11, %v4915_v40, 0  ;;  %v2646_v59 = vshrl.u32 %v4285_v22, 16  ;;  %v1033_v13 = vand.u32 15, %v919_v54  ;;  %v479_v40 = vsel %vm6545_vm0, %v4605_v8, %v432_v20 }
  0x9b   : > { %v3035_v56 = vrot.slane %v3033_v31, 1  ;;  %v3038_v58 = vrot.slane %v3036_v47, 2  ;;  %v4318_v18 = vcombine.low %v2287_v62, %v2288_v4  ;;  %v2650_v26 = vshll.u32 %v5012_v21, 16 }
  0x9c   : > { %vm1723_vm1 = vcmp.lt.s32.totalorder %v1033_v13, 15  ;;  %v2648_v48 = vor.u32 %v2646_v59, %v2644_v19  ;;  %v1040_v47 = vand.u32 15, %v920_v29  ;;  %v2127_v8 = vsel %vm4690_vm3, %v5023_v34, 0  ;;  %v5068_v13 = vld [vmem:[%s4721_s16 + $0x44] sm:$0xf] }
  0x9d   : > { %v3039_v7 = vor.u32 %v3038_v58, %v3035_v56  ;;  %v3042_v22 = vshrl.u32 %v4318_v18, 16  ;;  %v3045_v10 = vshll.u32 %v4318_v18, 16  ;;  %vm1819_vm11 = vmpackc.low %vm1723_vm1, %vm1723_vm1  ;;  %v2652_v54 = vrot.slane %v2650_v26, 1 }
  0x9e   : > { %v5029_v44 = vsel %vm1819_vm11, 65537, %v6562_v1  ;;  %vm5046_vm1 = vcmp.ge.s32.totalorder %v1040_v47, 1  ;;  %v2654_v4 = vshrl.u32 %v5012_v21, 16 }
  0x9f   : > { %v3040_v60 = vsel %vm6541_vm2, %v3030_v5, %v3039_v7  ;;  %v2645_v5 = vsel %vm6550_vm10, %v2640_v46, %v2644_v19  ;;  %v3044_v50 = vrot.slane %v3042_v22, 1  ;;  %v3047_v6 = vrot.slane %v3045_v10, 2  ;;  %vm6539_vm11 = vmpackc.low %vm5046_vm1, %vm5046_vm1 }
  0xa0   : > { %719 = vmatmul.mubr.bf16.gmra.mrb[12].mxu0 %v475_v27  ;;  %3157 = vrot.lane.b32.xlu1 %v3040_v60, %s4480_s18  ;;  %v2185_v27 = vsel %vm4714_vm9, %v2183_v25, %v4703_v38  ;;  %v2187_v28 = vrot.slane %v5029_v44, 7  ;;  %v921_v46 = vadd.s32 120, %v4686_v30  ;;  %v922_v19 = vadd.s32 128, %v4686_v30 }
  0xa1   : > { %4236 = vmatprep.mubr.msk.bf16.mxu0 %vm6545_vm0, %v4619_v11  ;;  %vm5031_vm12 = vcmp.ne.s16.totalorder %v2185_v27, 0  ;;  %v3048_v62 = vor.u32 %v3047_v6, %v3044_v50  ;;  %v2126_v20 = vsel %vm6539_vm11, %v5037_v52, 0  ;;  %v483_v27 = vsel %vm6545_vm0, %v4611_v9, %v434_v61 }
  0xa2   : > { %v2289_v56 = vsel %vm5031_vm12, %v4979_v51, 0  ;;  %v2188_v3 = vsel %vm4714_vm9, %v4711_v41, %v2187_v28  ;;  %v2189_v51 = vrot.slane %v2187_v28, 4  ;;  %v1047_v59 = vand.u32 15, %v921_v46 }
  0xa3   : > { %vm2257_vm12 = vcmp.ne.s16.totalorder %v2188_v3, 0  ;;  %v3049_v25 = vsel %vm6541_vm2, %v3039_v7, %v3048_v62  ;;  %v4287_v18 = vcombine.low %v2126_v20, %v2127_v8  ;;  %v1054_v21 = vand.u32 15, %v922_v19  ;;  %v436_v8 = vpop.permute.xlu0 %435 }
  0xa4   : > { %2739 = vrot.lane.b32.xlu1 %v2645_v5, %s4477_s13  ;;  %v2290_v60 = vsel %vm2257_vm12, %v4966_v32, 0  ;;  %v2191_v26 = vsel %vm4714_vm9, %v2189_v51, %v4703_v38  ;;  %vm1725_vm11 = vcmp.lt.s32.totalorder %v1047_v59, 15  ;;  %v5084_v32 = vld [vmem:[%s4721_s16 + $0x40] sm:$0xf]  ;;  %v2129_v22 = vsel %vm4690_vm3, %v5068_v13, 0 }
  0xa5   : > { %v4319_v29 = vcombine.low %v2289_v56, %v2290_v60  ;;  %v2658_v5 = vshll.u32 %v4287_v18, 16  ;;  %vm1821_vm7 = vmpackc.low %vm1725_vm11, %vm1725_vm11  ;;  %vm5079_vm2 = vcmp.ne.s16.totalorder %v2191_v26, 0  ;;  %vm5092_vm12 = vcmp.ge.s32.totalorder %v1054_v21, 1 }
  0xa6   : > { %v5090_v31 = vsel %vm1821_vm7, 65537, %v6562_v1  ;;  %vm6542_vm11 = vmpackc.low %vm5092_vm12, %vm5092_vm12  ;;  %v923_v6 = vadd.s32 136, %v4686_v30  ;;  %v924_v28 = vadd.s32 144, %v4686_v30  ;;  %v2662_v20 = vshrl.u32 %v4287_v18, 16 }
  0xa7   : > { %v3051_v9 = vshrl.u32 %v4319_v29, 16  ;;  %v3054_v10 = vshll.u32 %v4319_v29, 16  ;;  %v2193_v50 = vrot.slane %v5090_v31, 7  ;;  %v2128_v61 = vsel %vm6542_vm11, %v5084_v32, 0 }
  0xa8   : > { %727 = vmatmul.mubr.bf16.gmra.mrb[16].mxu0 %v479_v40  ;;  %3159 = vrot.lane.b32.xlu1 %v3049_v25, %s4480_s18  ;;  %v2653_v40 = vsel %vm6550_vm10, %v2648_v48, %v2652_v54  ;;  %v2656_v48 = vor.u32 %v2654_v4, %v2652_v54  ;;  %v2291_v54 = vsel %vm5079_vm2, %v5037_v52, 0  ;;  %v2660_v3 = vrot.slane %v2658_v5, 1  ;;  %v5118_v25 = vld [vmem:[%s4721_s16 + $0x4c] sm:$0xf] }
  0xa9   : > { %4237 = vmatprep.mubr.msk.bf16.mxu0 %vm6545_vm0, %v4625_v12  ;;  %v3053_v56 = vrot.slane %v3051_v9, 1  ;;  %v3056_v46 = vrot.slane %v3054_v10, 2  ;;  %v2194_v51 = vsel %vm4714_vm9, %v4711_v41, %v2193_v50  ;;  %v4288_v19 = vcombine.low %v2128_v61, %v2129_v22  ;;  %v438_v61 = vpop.permute.xlu1 %437 }
  0xaa   : > { %vm2259_vm2 = vcmp.ne.s16.totalorder %v2194_v51, 0  ;;  %v1061_v52 = vand.u32 15, %v923_v6  ;;  %v2195_v59 = vrot.slane %v2193_v50, 4  ;;  %v487_v60 = vsel %vm6545_vm0, %v4619_v11, %v436_v8 }
  0xab   : > { %v3057_v4 = vor.u32 %v3056_v46, %v3053_v56  ;;  %v2292_v26 = vsel %vm2259_vm2, %v5023_v34, 0  ;;  %vm6605_vm7 = vsmask.f32 6400  ;;  %v2661_v5 = vsel %vm6550_vm10, %v2656_v48, %v2660_v3 }
  0xac   : > { %2741 = vrot.lane.b32.xlu1 %v2653_v40, %s4477_s13  ;;  %v4320_v21 = vcombine.low %v2291_v54, %v2292_v26  ;;  %vm1727_vm11 = vcmp.lt.s32.totalorder %v1061_v52, 15  ;;  %v2197_v18 = vsel %vm4714_vm9, %v2195_v59, %v4703_v38  ;;  %v5128_v40 = vld [vmem:[%s4721_s16 + $0x48] sm:$0xf]  ;;  %v6608_v34 = vmov 0 }
  0xad   : > { %v3058_v29 = vsel %vm6605_vm7, %v3048_v62, %v3057_v4  ;;  %vm1823_vm4 = vmpackc.low %vm1727_vm11, %vm1727_vm11  ;;  %v2131_v62 = vsel %vm4690_vm3, %v5118_v25, 0  ;;  %v2664_v9 = vor.u32 %v2662_v20, %v2660_v3  ;;  %v925_v51 = vadd.s32 152, %v4686_v30 }
  0xae   : > { %v3060_v7 = vshrl.u32 %v4320_v21, 16  ;;  %v3063_v22 = vshll.u32 %v4320_v21, 16  ;;  %v5144_v10 = vsel %vm1823_vm4, 65537, %v6562_v1  ;;  %vm6610_vm4 = vcmask 523264  }
  0xaf   : > { %v2199_v50 = vrot.slane %v5144_v10, 7  ;;  %v926_v20 = vadd.s32 160, %v4686_v30  ;;  %vm6611_vm7 = vmmov %vm6610_vm4 }
  0xb0   : > { %735 = vmatmul.mubr.bf16.gmra.mrb[20].mxu0 %v483_v27  ;;  %v1068_v27 = vand.u32 15, %v924_v28  ;;  %3161 = vrot.lane.b32.xlu1 %v3058_v29, %s4480_s18  ;;  %v2670_v28 = vshrl.u32 %v4288_v19, 16  ;;  %v3062_v8 = vrot.slane %v3060_v7, 1  ;;  %v3065_v56 = vrot.slane %v3063_v22, 2 }
  0xb1   : > { %4238 = vmatprep.mubr.msk.bf16.mxu0 %vm6545_vm0, %v4633_v14  ;;  %v2666_v14 = vshll.u32 %v4288_v19, 16  ;;  %vm5132_vm0 = vcmp.ne.s16.totalorder %v2197_v18, 0  ;;  %v2200_v3 = vsel %vm4714_vm9, %v4711_v41, %v2199_v50  ;;  %v2201_v19 = vrot.slane %v2199_v50, 4 }
  0xb2   : > { %vm5136_vm2 = vcmp.ge.s32.totalorder %v1068_v27, 1  ;;  %v2293_v46 = vsel %vm5132_vm0, %v5084_v32, 0  ;;  %v3066_v52 = vor.u32 %v3065_v56, %v3062_v8  ;;  %vm2261_vm0 = vcmp.ne.s16.totalorder %v2200_v3, 0  ;;  %v5175_v27 = vld [vmem:[%s4721_s16 + $0x54] sm:$0xf] }
  0xb3   : > { %v6609_v34 = vsel %vm5136_vm2, 4294967295, %v6608_v34  ;;  %vm6546_vm11 = vmpackc.low %vm5136_vm2, %vm5136_vm2  ;;  %v2668_v48 = vrot.slane %v2666_v14, 1  ;;  %v2294_v59 = vsel %vm2261_vm0, %v5068_v13, 0  ;;  %v2203_v26 = vsel %vm4714_vm9, %v2201_v19, %v4703_v38 }
  0xb4   : > { %v2130_v6 = vsel %vm6546_vm11, %v5128_v40, 0  ;;  %2743 = vrot.lane.b32.xlu1 %v2661_v5, %s4477_s13  ;;  %v1082_v14 = vand.u32 15, %v926_v20  ;;  %v491_v29 = vsel %vm6611_vm7, %v4625_v12, %v438_v61  ;;  %v4321_v18 = vcombine.low %v2293_v46, %v2294_v59  ;;  %v5191_v12 = vld [vmem:[%s4721_s16 + $0x50] sm:$0xf]  ;;  %v440_v20 = vpop.permute.xlu0 %439 }
  0xb5   : > { %v5159_v54 = vcombine.low %v2130_v6, %v2131_v62  ;;  %vm5180_vm11 = vcmp.ne.s16.totalorder %v2203_v26, 0  ;;  %v2669_v13 = vsel %vm6550_vm10, %v2664_v9, %v2668_v48  ;;  %v2672_v11 = vor.u32 %v2670_v28, %v2668_v48 }
  0xb6   : > { %vm5186_vm15 = vcmp.ge.s32.totalorder %v1082_v14, 1  ;;  %v6615_v62 = vmov 0  ;;  %v3069_v7 = vshrl.u32 %v4321_v18, 16  ;;  %v3072_v22 = vshll.u32 %v4321_v18, 16  ;;  %v2103_v14 = vld [vmem:[%s4721_s16 + $0x5c] sm:$0xf] }
  0xb7   : > { %v2674_v32 = vshll.u32 %v5159_v54, 16  ;;  %v6616_v62 = vsel %vm5186_vm15, 4294967295, %v6615_v62  ;;  %v927_v50 = vadd.s32 168, %v4686_v30  ;;  %v2295_v48 = vsel %vm5180_vm11, %v5128_v40, 0 }
  0xb8   : > { %743 = vmatmul.mubr.bf16.gmra.mrb[24].mxu0 %v487_v60  ;;  %v1075_v60 = vand.u32 15, %v925_v51  ;;  %v928_v28 = vadd.s32 176, %v4686_v30  ;;  %v3071_v8 = vrot.slane %v3069_v7, 1  ;;  %v3074_v56 = vrot.slane %v3072_v22, 2  ;;  %v2102_v7 = vld [vmem:[%s4721_s16 + $0x58] sm:$0xf] }
  0xb9   : > { %4239 = vmatprep.mubr.msk.bf16.mxu0 %vm6610_vm4, %v4639_v15  ;;  %vm6612_vm4 = vsmask.f32 6400  ;;  %v2676_v6 = vrot.slane %v2674_v32, 1  ;;  %v2678_v61 = vshrl.u32 %v5159_v54, 16  ;;  %v1089_v3 = vand.u32 15, %v927_v50  ;;  %v4430_v22 = vld [vmem:[%s4580_s10 + $0x40] sm:$0xff]  }
  0xba   : > { %v3067_v21 = vsel %vm6612_vm4, %v3057_v4, %v3066_v52  ;;  %vm1729_vm0 = vcmp.lt.s32.totalorder %v1075_v60, 15  ;;  %v2133_v4 = vsel %vm4690_vm3, %v5175_v27, 0  ;;  %vm6549_vm4 = vmpackc.low %vm5186_vm15, %vm5186_vm15  ;;  %v1096_v51 = vand.u32 15, %v928_v28  ;;  %v442_v60 = vpop.permute.xlu1 %441 }
  0xbb   : > { %3163 = vrot.lane.b32.xlu1 %v3067_v21, %s4480_s18  ;;  %vm1825_vm7 = vmpackc.low %vm1729_vm0, %vm1729_vm0  ;;  %vm6617_vm0 = vcmask 523264   ;;  %v2132_v40 = vsel %vm6549_vm4, %v5191_v12, 0  ;;  %v929_v19 = vadd.s32 184, %v4686_v30  ;;  %v3075_v54 = vor.u32 %v3074_v56, %v3071_v8 }
  0xbc   : > { %v5198_v9 = vsel %vm1825_vm7, 65537, %v6562_v1  ;;  %v5222_v32 = vcombine.low %v2132_v40, %v2133_v4  ;;  %vm1731_vm7 = vcmp.lt.s32.totalorder %v1089_v3, 15  ;;  %v6618_v26 = vmov 0 }
  0xbd   : > { %v2205_v46 = vrot.slane %v5198_v9, 7  ;;  %vm6620_vm4 = vsmask.f32 6400  ;;  %vm1827_vm10 = vmpackc.low %vm1731_vm7, %vm1731_vm7  ;;  %vm6621_vm15 = vcmask 523264   ;;  %vm6625_vm2 = vsmask.f32 7424 }
  0xbe   : > { %v3076_v21 = vsel %vm6620_vm4, %v3066_v52, %v3075_v54  ;;  %v2682_v5 = vshll.u32 %v5222_v32, 16  ;;  %v495_v4 = vsel %vm6621_vm15, %v4430_v22, %v440_v20  ;;  %v5240_v28 = vsel %vm1827_vm10, 65537, %v6562_v1  ;;  %vm6624_vm7 = vmmov %vm6621_vm15 }
  0xbf   : > { %2745 = vrot.lane.b32.xlu1 %v2669_v13, %s4477_s13  ;;  %v2207_v59 = vrot.slane %v2205_v46, 4  ;;  %v2677_v8 = vsel %vm6625_vm2, %v2672_v11, %v2676_v6  ;;  %v2211_v56 = vrot.slane %v5240_v28, 7  ;;  %vm6626_vm2 = vmmov %vm6624_vm7  ;;  %v2686_v52 = vshrl.u32 %v5222_v32, 16 }
  0xc0   : > { %751 = vmatmul.mubr.bf16.gmra.mrb[28].mxu0 %v491_v29  ;;  %v1103_v29 = vand.u32 15, %v929_v19  ;;  %v2680_v19 = vor.u32 %v2678_v61, %v2676_v6 }
  0xc1   : > { %4240 = vmatprep.mubr.msk.bf16.mxu0 %vm6617_vm0, %v4647_v17  ;;  %v2206_v17 = vsel %vm4714_vm9, %v4711_v41, %v2205_v46  ;;  %vm5224_vm0 = vcmp.ge.s32.totalorder %v1096_v51, 1  ;;  %v2209_v13 = vsel %vm4714_vm9, %v2207_v59, %v4703_v38  ;;  %v444_v51 = vpop.permute.xlu0 %443  ;;  %v2212_v11 = vsel %vm4714_vm9, %v4711_v41, %v2211_v56 }
  0xc2   : > { %vm2263_vm11 = vcmp.ne.s16.totalorder %v2206_v17, 0  ;;  %v6619_v26 = vsel %vm5224_vm0, 4294967295, %v6618_v26  ;;  %vm5242_vm4 = vcmp.ne.s16.totalorder %v2209_v13, 0  ;;  %vm1733_vm15 = vcmp.lt.s32.totalorder %v1103_v29, 15  ;;  %v5267_v17 = vld [vmem:[%s4580_s10 + $0x58] sm:$0xff]  }
  0xc3   : > { %v2296_v18 = vsel %vm2263_vm11, %v5118_v25, 0  ;;  %3165 = vrot.lane.b32.xlu1 %v3076_v21, %s4480_s18  ;;  %vm6556_vm11 = vmpackc.low %vm5224_vm0, %vm5224_vm0  ;;  %v499_v25 = vsel %vm6624_vm7, %v4639_v15, %v442_v60  ;;  %v2684_v15 = vrot.slane %v2682_v5, 1  ;;  %v2297_v20 = vsel %vm5242_vm4, %v5191_v12, 0 }
  0xc4   : > { %v4322_v50 = vcombine.low %v2295_v48, %v2296_v18  ;;  %v2135_v48 = vsel %vm4690_vm3, %v2103_v14, 0  ;;  %v2134_v3 = vsel %vm6556_vm11, %v2102_v7, 0  ;;  %vm1829_vm10 = vmpackc.low %vm1733_vm15, %vm1733_vm15  ;;  %vm2265_vm7 = vcmp.ne.s16.totalorder %v2212_v11, 0  ;;  %v4432_v18 = vld [vmem:[%s4580_s10 + $0x50] sm:$0xff]  }
  0xc5   : > { %v5273_v61 = vsel %vm1829_vm10, 65537, %v6562_v1  ;;  %v2298_v60 = vsel %vm2265_vm7, %v5175_v27, 0  ;;  %v5276_v29 = vcombine.low %v2134_v3, %v2135_v48  ;;  %v2213_v12 = vrot.slane %v2211_v56, 4  ;;  %vm6628_vm4 = vmmov %vm6626_vm2  ;;  %v5293_v56 = vld [vmem:[%s4721_s16 + $0x64] sm:$0xf] }
  0xc6   : > { %v3078_v46 = vshrl.u32 %v4322_v50, 16  ;;  %v3081_v40 = vshll.u32 %v4322_v50, 16  ;;  %6627 = vst [vmem:[#allocation3_spill] sm:$0xff] %v5273_v61  ;;  %v2217_v21 = vrot.slane %v5273_v61, 7  ;;  %v5281_v5 = vsel %vm6628_vm4, %v4432_v18, %v444_v51 }
  0xc7   : > { %2747 = vrot.lane.b32.xlu1 %v2677_v8, %s4477_s13  ;;  %v4323_v22 = vcombine.low %v2297_v20, %v2298_v60  ;;  %vm6629_vm15 = vsmask.f32 7424  ;;  %v2215_v27 = vsel %vm4714_vm9, %v2213_v12, %v4703_v38  ;;  %vm6630_vm10 = vsmask.f32 6400 }
  0xc8   : > { %759 = vmatmul.mubr.bf16.gmra.mrb[32].mxu0 %v495_v4  ;;  %v3080_v59 = vrot.slane %v3078_v46, 1  ;;  %v3083_v6 = vrot.slane %v3081_v40, 2  ;;  %v930_v4 = vadd.s32 192, %v4686_v30  ;;  %v2685_v50 = vsel %vm6629_vm15, %v2680_v19, %v2684_v15 }
  0xc9   : > { %4241 = vmatprep.mubr.msk.bf16.mxu0 %vm6626_vm2, %v5267_v17  ;;  %v2218_v8 = vsel %vm4714_vm9, %v4711_v41, %v2217_v21  ;;  %v3087_v46 = vshrl.u32 %v4323_v22, 16  ;;  %v3090_v40 = vshll.u32 %v4323_v22, 16  ;;  %vm2266_vm2 = vcmp.ne.s16.totalorder %v2215_v27, 0 }
  0xca   : > { %v3084_v13 = vor.u32 %v3083_v6, %v3080_v59  ;;  %v2690_v32 = vshll.u32 %v5276_v29, 16  ;;  %vm2267_vm7 = vcmp.ne.s16.totalorder %v2218_v8, 0  ;;  %v2299_v3 = vsel %vm2266_vm2, %v2102_v7, 0  ;;  %v5299_v59 = vld [vmem:[%s4721_s16 + $0x60] sm:$0xf] }
  0xcb   : > { %v1110_v51 = vand.u32 15, %v930_v4  ;;  %v3089_v19 = vrot.slane %v3087_v46, 1  ;;  %v3092_v11 = vrot.slane %v3090_v40, 2  ;;  %v2300_v20 = vsel %vm2267_vm7, %v2103_v14, 0  ;;  %v5310_v7 = vld [vmem:[%s4580_s10 + $0x60] sm:$0xff]  }
  0xcc   : > { %v3085_v48 = vsel %vm6630_vm10, %v3075_v54, %v3084_v13  ;;  %v2137_v54 = vsel %vm4690_vm3, %v5293_v56, 0  ;;  %v4324_v6 = vcombine.low %v2299_v3, %v2300_v20  ;;  %v6631_v60 = vmov 0 }
  0xcd   : > { %3167 = vrot.lane.b32.xlu1 %v3085_v48, %s4480_s18  ;;  %vm5304_vm4 = vcmp.ge.s32.totalorder %v1110_v51, 1  ;;  %v931_v12 = vadd.s32 200, %v4686_v30  ;;  %v2219_v18 = vrot.slane %v2217_v21, 4  ;;  %vm6633_vm15 = vcmask 523264  }
  0xce   : > { %v6632_v60 = vsel %vm5304_vm4, 4294967295, %v6631_v60  ;;  %v3093_v14 = vor.u32 %v3092_v11, %v3089_v19  ;;  %v2688_v22 = vor.u32 %v2686_v52, %v2684_v15  ;;  %vm6555_vm10 = vmpackc.low %vm5304_vm4, %vm5304_vm4  ;;  %v933_v4 = vadd.s32 216, %v4686_v30  ;;  %v2106_v19 = vld [vmem:[%s4721_s16 + $0x68] sm:$0xf] }
  0xcf   : > { %v2692_v27 = vrot.slane %v2690_v32, 1  ;;  %v3096_v21 = vshrl.u32 %v4324_v6, 16  ;;  %v3099_v8 = vshll.u32 %v4324_v6, 16  ;;  %v2136_v15 = vsel %vm6555_vm10, %v5299_v59, 0 }
  0xd0   : > { %767 = vmatmul.mubr.bf16.gmra.mrb[36].mxu0 %v499_v25  ;;  %v932_v25 = vadd.s32 208, %v4686_v30  ;;  %vm6634_vm2 = vsmask.f32 6400  ;;  %v5327_v48 = vcombine.low %v2136_v15, %v2137_v54  ;;  %v1117_v46 = vand.u32 15, %v931_v12 }
  0xd1   : > { %4242 = vmatprep.mubr.msk.bf16.mxu0 %vm6633_vm15, %v5310_v7  ;;  %2749 = vrot.lane.b32.xlu1 %v2685_v50, %s4477_s13  ;;  %v3094_v52 = vsel %vm6634_vm2, %v3084_v13, %v3093_v14  ;;  %v2221_v50 = vsel %vm4714_vm9, %v2219_v18, %v4703_v38  ;;  %v3098_v40 = vrot.slane %v3096_v21, 1  ;;  %v3101_v32 = vrot.slane %v3099_v8, 2  ;;  %v2107_v13 = vld [vmem:[%s4721_s16 + $0x6c] sm:$0xf] }
  0xd2   : > { %v2694_v3 = vshrl.u32 %v5276_v29, 16  ;;  %v1124_v51 = vand.u32 15, %v932_v25  ;;  %v2698_v11 = vshll.u32 %v5327_v48, 16  ;;  %vm1735_vm7 = vcmp.lt.s32.totalorder %v1117_v46, 15  ;;  %v5369_v46 = vld [vmem:[%s4580_s10 + $0x68] sm:$0xff]   ;;  %v4418_v29 = vld [vmem:[%s6528_s4 + $0x10] sm:$0xff]  }
  0xd3   : > { %vm5335_vm15 = vcmp.ne.s16.totalorder %v2221_v50, 0  ;;  %v1131_v54 = vand.u32 15, %v933_v4  ;;  %vm6637_vm2 = vsmask.f32 7424  ;;  %v5342_v12 = vor.u32 %v3101_v32, %v3098_v40  ;;  %vm1831_vm10 = vmpackc.low %vm1735_vm7, %vm1735_vm7  ;;  %v446_v40 = vpop.permute.xlu1 %445 }
  0xd4   : > { %v2693_v6 = vsel %vm6637_vm2, %v2688_v22, %v2692_v27  ;;  %vm5344_vm11 = vcmp.ge.s32.totalorder %v1124_v51, 1  ;;  %v2139_v18 = vsel %vm4690_vm3, %v2107_v13, 0  ;;  %v5351_v25 = vsel %vm1831_vm10, 65537, %v6562_v1 }
  0xd5   : > { %3169 = vrot.lane.b32.xlu1 %v3094_v52, %s4480_s18  ;;  %6640 = vst [vmem:[#allocation4_spill] sm:$0xff] %v5351_v25  ;;  %vm6561_vm4 = vmpackc.low %vm5344_vm11, %vm5344_vm11  ;;  %vm1737_vm0 = vcmp.lt.s32.totalorder %v1131_v54, 15  ;;  %v934_v22 = vadd.s32 224, %v4686_v30  ;;  %v935_v4 = vadd.s32 232, %v4686_v30  ;;  %v2696_v21 = vor.u32 %v2694_v3, %v2692_v27 }
  0xd6   : > { %v2223_v8 = vrot.slane %v5351_v25, 7  ;;  %v2301_v15 = vsel %vm5335_vm15, %v5299_v59, 0  ;;  %v2138_v52 = vsel %vm6561_vm4, %v2106_v19, 0  ;;  %vm1833_vm10 = vmpackc.low %vm1737_vm0, %vm1737_vm0  ;;  %vm6641_vm7 = vcmask 523264  }
  0xd7   : > { %vm6642_vm2 = vsmask.f32 6400  ;;  %v2700_v27 = vrot.slane %v2698_v11, 1  ;;  %v5376_v50 = vsel %vm1833_vm10, 65537, %v6562_v1  ;;  %v1138_v59 = vand.u32 15, %v934_v22 }
  0xd8   : > { %775 = vmatmul.mubr.bf16.gmra.mrb[40].mxu0 %v5281_v5  ;;  %v3103_v5 = vsel %vm6642_vm2, %v3093_v14, %v5342_v12  ;;  %6643 = vst [vmem:[#allocation5_spill] sm:$0xff] %v5376_v50  ;;  %v2224_v32 = vsel %vm4714_vm9, %v4711_v41, %v2223_v8  ;;  %v5382_v3 = vcombine.low %v2138_v52, %v2139_v18  ;;  %v2225_v51 = vrot.slane %v2223_v8, 4 }
  0xd9   : > { %4243 = vmatprep.mubr.msk.bf16.mxu0 %vm6641_vm7, %v5369_v46  ;;  %2751 = vrot.lane.b32.xlu1 %v2693_v6, %s4477_s13  ;;  %v2229_v20 = vrot.slane %v5376_v50, 7  ;;  %vm2269_vm0 = vcmp.ne.s16.totalorder %v2224_v32, 0  ;;  %v2702_v14 = vshrl.u32 %v5327_v48, 16  ;;  %vm5386_vm15 = vcmp.ge.s32.totalorder %v1138_v59, 1  ;;  %v2108_v48 = vld [vmem:[%s4721_s16 + $0x70] sm:$0xf] }
  0xda   : > { %v6644_v11 = vmov 0  ;;  %v1145_v54 = vand.u32 15, %v935_v4  ;;  %v2302_v6 = vsel %vm2269_vm0, %v5293_v56, 0  ;;  %v2227_v22 = vsel %vm4714_vm9, %v2225_v51, %v4703_v38  ;;  %vm6567_vm10 = vmpackc.low %vm5386_vm15, %vm5386_vm15  ;;  %v2109_v56 = vld [vmem:[%s4721_s16 + $0x74] sm:$0xf] }
  0xdb   : > { %v6645_v11 = vsel %vm5386_vm15, 4294967295, %v6644_v11  ;;  %v2230_v18 = vsel %vm4714_vm9, %v4711_v41, %v2229_v20  ;;  %v2231_v8 = vrot.slane %v2229_v20, 4  ;;  %v507_v52 = vsel %vm6641_vm7, %v5267_v17, %v446_v40 }
  0xdc   : > { %v4325_v4 = vcombine.low %v2301_v15, %v2302_v6  ;;  %vm2270_vm2 = vcmp.ne.s16.totalorder %v2227_v22, 0  ;;  %vm2271_vm0 = vcmp.ne.s16.totalorder %v2230_v18, 0  ;;  %vm6646_vm4 = vsmask.f32 7424 }
  0xdd   : > { %3171 = vrot.lane.b32.xlu1 %v3103_v5, %s4480_s18  ;;  %v2701_v59 = vsel %vm6646_vm4, %v2696_v21, %v2700_v27  ;;  %v2706_v32 = vshll.u32 %v5382_v3, 16  ;;  %v2303_v51 = vsel %vm2270_vm2, %v2106_v19, 0  ;;  %v2304_v1 = vsel %vm2271_vm0, %v2107_v13, 0  ;;  %v448_v13 = vpop.permute.xlu0 %447  ;;  %v5418_v21 = vld [vmem:[%s4580_s10 + $0x70] sm:$0xff]  }
  0xde   : > { %v3105_v50 = vshrl.u32 %v4325_v4, 16  ;;  %v3108_v25 = vshll.u32 %v4325_v4, 16  ;;  %v4326_v61 = vcombine.low %v2303_v51, %v2304_v1  ;;  %v2140_v17 = vsel %vm6567_vm10, %v2108_v48, 0 }
  0xdf   : > { %v2704_v15 = vor.u32 %v2702_v14, %v2700_v27  ;;  %v2141_v5 = vsel %vm4690_vm3, %v2109_v56, 0  ;;  %vm1739_vm7 = vcmp.lt.s32.totalorder %v1145_v54, 15  ;;  %v2233_v19 = vsel %vm4714_vm9, %v2231_v8, %v4703_v38 }
  0xe0   : > { %783 = vmatmul.mubr.bf16.gmra.mrb[44].mxu0 %v507_v52  ;;  %vm6647_vm4 = vcmask 523264   ;;  %v3107_v1 = vrot.slane %v3105_v50, 1  ;;  %v3110_v40 = vrot.slane %v3108_v25, 2  ;;  %v3114_v20 = vshrl.u32 %v4326_v61, 16  ;;  %vm1835_vm2 = vmpackc.low %vm1739_vm7, %vm1739_vm7 }
  0xe1   : > { %4244 = vmatprep.mubr.msk.bf16.mxu0 %vm6647_vm4, %v5418_v21  ;;  %v3117_v6 = vshll.u32 %v4326_v61, 16  ;;  %2753 = vrot.lane.b32.xlu1 %v2701_v59, %s4477_s13  ;;  %v2708_v27 = vrot.slane %v2706_v32, 1  ;;  %v5423_v14 = vcombine.low %v2140_v17, %v2141_v5  ;;  %v6648_v54 = vmov 0   ;;  %vm6651_vm7 = vmmov %vm6647_vm4 }
  0xe2   : > { %v5426_v22 = vsel %vm1835_vm2, 65537, %v6648_v54  ;;  %vm5428_vm0 = vcmp.ne.s16.totalorder %v2233_v19, 0  ;;  %v3111_v8 = vor.u32 %v3110_v40, %v3107_v1  ;;  %v3116_v52 = vrot.slane %v3114_v20, 1  ;;  %v2111_v19 = vld [vmem:[%s4721_s16 + $0x7c] sm:$0xf] }
  0xe3   : > { %v3119_v50 = vrot.slane %v3117_v6, 2  ;;  %v2235_v25 = vrot.slane %v5426_v22, 7  ;;  %v511_v61 = vsel %vm6651_vm7, %v5310_v7, %v448_v13  ;;  %v2710_v4 = vshrl.u32 %v5382_v3, 16  ;;  %v2110_v40 = vld [vmem:[%s4721_s16 + $0x78] sm:$0xf] }
  0xe4   : > { %v936_v59 = vadd.s32 240, %v4686_v30  ;;  %v937_v32 = vadd.s32 248, %v4686_v30  ;;  %vm6652_vm4 = vsmask.f32 6400  ;;  %v2305_v5 = vsel %vm5428_vm0, %v2108_v48, 0 }
  0xe5   : > { %v3112_v51 = vsel %vm6652_vm4, %v5342_v12, %v3111_v8  ;;  %v2236_v17 = vsel %vm4714_vm9, %v4711_v41, %v2235_v25  ;;  %v2237_v7 = vrot.slane %v2235_v25, 4  ;;  %v2714_v3 = vshll.u32 %v5423_v14, 16  ;;  %v5457_v25 = vld [vmem:[%s4580_s10 + $0x78] sm:$0xff]  }
  0xe6   : > { %3173 = vrot.lane.b32.xlu1 %v3112_v51, %s4480_s18  ;;  %vm2273_vm2 = vcmp.ne.s16.totalorder %v2236_v17, 0  ;;  %v1152_v13 = vand.u32 15, %v936_v59  ;;  %vm6653_vm7 = vsmask.f32 7424  ;;  %v3120_v1 = vor.u32 %v3119_v50, %v3116_v52 }
  0xe7   : > { %v2709_v30 = vsel %vm6653_vm7, %v2704_v15, %v2708_v27  ;;  %v2306_v12 = vsel %vm2273_vm2, %v2109_v56, 0  ;;  %v1159_v20 = vand.u32 15, %v937_v32  ;;  %v2143_v48 = vsel %vm4690_vm3, %v2111_v19, 0  ;;  %v450_v15 = vpop.permute.xlu1 %449 }
  0xe8   : > { %791 = vmatmul.mubr.bf16.gmra.mrb[48].mxu0 %v511_v61  ;;  %v4327_v6 = vcombine.low %v2305_v5, %v2306_v12  ;;  %vm5450_vm4 = vcmp.ge.s32.totalorder %v1152_v13, 1  ;;  %vm6656_vm0 = vcmask 523264   ;;  %v2712_v59 = vor.u32 %v2710_v4, %v2708_v27 }
  0xe9   : > { %4245 = vmatprep.mubr.msk.bf16.mxu0 %vm6656_vm0, %v5457_v25  ;;  %vm1465_vm2 = vmpackc.low %vm5450_vm4, %vm5450_vm4  ;;  %vm1741_vm7 = vcmp.lt.s32.totalorder %v1159_v20, 15  ;;  %v2239_v56 = vsel %vm4714_vm9, %v2237_v7, %v4703_v38  ;;  %v2716_v35 = vrot.slane %v2714_v3, 1  ;;  %vm6657_vm0 = vsmask.f32 6400 }
  0xea   : > { %2755 = vrot.lane.b32.xlu1 %v2709_v30, %s4477_s13  ;;  %v3123_v52 = vshrl.u32 %v4327_v6, 16  ;;  %v3126_v50 = vshll.u32 %v4327_v6, 16  ;;  %v2142_v27 = vsel %vm1465_vm2, %v2110_v40, 0  ;;  %vm1837_vm3 = vmpackc.low %vm1741_vm7, %vm1741_vm7  ;;  %v3121_v61 = vsel %vm6657_vm0, %v3111_v8, %v3120_v1  ;;  %v4437_v6 = vld [vmem:[%s4580_s10 + $0x80] sm:$0xff]  }
  0xeb   : > { %v4295_v4 = vcombine.low %v2142_v27, %v2143_v48  ;;  %v5475_v32 = vsel %vm1837_vm3, 65537, %v6648_v54  ;;  %vm5477_vm10 = vcmp.ne.s16.totalorder %v2239_v56, 0  ;;  %vm6660_vm15 = vcmask 523264   ;;  %v452_v48 = vpop.permute.xlu0 %451 }
  0xec   : > { %v3125_v51 = vrot.slane %v3123_v52, 1  ;;  %v3128_v17 = vrot.slane %v3126_v50, 2  ;;  %v2241_v5 = vrot.slane %v5475_v32, 7  ;;  %v515_v7 = vsel %vm6660_vm15, %v5369_v46, %v450_v15  ;;  %v4415_v52 = vld [vmem:[%s4580_s10 + $0x88] sm:$0xff]  }
  0xed   : > { %v2718_v8 = vshrl.u32 %v5423_v14, 16  ;;  %v2307_v13 = vsel %vm5477_vm10, %v2110_v40, 0  ;;  %vm6661_vm7 = vsmask.f32 7424  ;;  %v2722_v20 = vshll.u32 %v4295_v4, 16  ;;  %vm6663_vm10 = vmmov %vm6657_vm0 }
  0xee   : > { %3175 = vrot.lane.b32.xlu1 %v3121_v61, %s4480_s18  ;;  %v2242_v3 = vsel %vm4714_vm9, %v4711_v41, %v2241_v5  ;;  %v2717_v30 = vsel %vm6661_vm7, %v2712_v59, %v2716_v35  ;;  %v3129_v12 = vor.u32 %v3128_v17, %v3125_v51  ;;  %vm6662_vm9 = vmpackc.low %vm4782_vm5, %vm4782_vm5  ;;  %vm6666_vm5 = vsmask.f32 7424  ;;  %v454_v17 = vpop.permute.xlu1 %453 }
  0xef   : > { %vm2275_vm3 = vcmp.ne.s16.totalorder %v2242_v3, 0  ;;  %v1471_v41 = vsel %vm6662_vm9, 65537, %v6648_v54  ;;  %v2720_v43 = vor.u32 %v2718_v8, %v2716_v35  ;;  %v2724_v59 = vrot.slane %v2722_v20, 1  ;;  %vm6664_vm0 = vmpackc.low %vm4835_vm8, %vm4835_vm8 }
  0xf0   : > { %799 = vmatmul.mubr.bf16.gmra.mrb[52].mxu0 %v515_v7  ;;  %v2308_v46 = vsel %vm2275_vm3, %v2111_v19, 0  ;;  %v3130_v40 = vsel %vm6663_vm10, %v3120_v1, %v3129_v12  ;;  %v1473_v15 = vsel %vm6664_vm0, 65537, %v6648_v54  ;;  %vm6665_vm7 = vmmov %vm6660_vm15  ;;  %v4250_v35 = vcombine.low %v1471_v41, %v4697_v36 }
  0xf1   : > { %4246 = vmatprep.mubr.msk.bf16.mxu0 %vm6660_vm15, %v4437_v6  ;;  %v4328_v14 = vcombine.low %v2307_v13, %v2308_v46  ;;  %v519_v45 = vsel %vm6665_vm7, %v5418_v21, %v452_v48  ;;  %v2725_v1 = vsel %vm6666_vm5, %v2720_v43, %v2724_v59  ;;  %v4251_v51 = vcombine.low %v1473_v15, %v4697_v36  ;;  %vm6667_vm8 = vmmov %vm6665_vm7 }
  0xf2   : > { %2757 = vrot.lane.b32.xlu1 %v2717_v30, %s4477_s13  ;;  %v1564_v38 = vshll.u32 %v4250_v35, 16  ;;  %v1568_v24 = vshrl.u32 %v4250_v35, 16  ;;  %vm6668_vm3 = vmpackc.low %vm4890_vm13, %vm4890_vm13  ;;  %v2726_v7 = vshrl.u32 %v4295_v4, 16 }
  0xf3   : > { %v3132_v56 = vshrl.u32 %v4328_v14, 16  ;;  %v3135_v19 = vshll.u32 %v4328_v14, 16  ;;  %v1475_v21 = vsel %vm6668_vm3, 65537, %v6648_v54  ;;  %vm6669_vm15 = vmmov %vm6663_vm10  ;;  %v1572_v13 = vshll.u32 %v4251_v51, 16 }
  0xf4   : > { %v5527_v8 = vrot.slane %v1564_v38, 1  ;;  %vm6670_vm9 = vmmov %vm6665_vm7  ;;  %v4252_v6 = vcombine.low %v1475_v21, %v4697_v36  ;;  %v2728_v23 = vor.u32 %v2726_v7, %v2724_v59  ;;  %v1576_v4 = vshrl.u32 %v4251_v51, 16 }
  0xf5   : > { %v3134_v50 = vrot.slane %v3132_v56, 1  ;;  %v3137_v27 = vrot.slane %v3135_v19, 2  ;;  %v523_v20 = vsel %vm6670_vm9, %v5457_v25, %v454_v17  ;;  %v1574_v46 = vrot.slane %v1572_v13, 1  ;;  %vm6671_vm13 = vmmov %vm6666_vm5 }
  0xf6   : > { %3177 = vrot.lane.b32.xlu1 %v3130_v40, %s4480_s18  ;;  %v1570_v30 = vor.u32 %v1568_v24, %v5527_v8  ;;  %v1580_v48 = vshll.u32 %v4252_v6, 16  ;;  %vm6672_vm10 = vmpackc.low %vm4940_vm14, %vm4940_vm14  ;;  %v1584_v59 = vshrl.u32 %v4252_v6, 16 }
  0xf7   : > { %v5516_v61 = vor.u32 %v3137_v27, %v3134_v50  ;;  %v1578_v41 = vor.u32 %v1576_v4, %v1574_v46  ;;  %v1477_v25 = vsel %vm6672_vm10, 65537, %v6648_v54  ;;  %vm6673_vm0 = vmmov %vm6666_vm5 }
  0xf8   : > { %807 = vmatmul.mubr.bf16.gmra.mrb[56].mxu0 %v519_v45  ;;  %v5537_v14 = vsel %vm6671_vm13, %v1570_v30, %v1574_v46  ;;  %v4253_v40 = vcombine.low %v1477_v25, %v4697_v36  ;;  %vm6674_vm7 = vmpackc.low %vm4990_vm6, %vm4990_vm6 }
  0xf9   : > { %4247 = vmatprep.mubr.msk.bf16.mxu0 %vm6667_vm8, %v4415_v52  ;;  %v3139_v3 = vsel %vm6669_vm15, %v3129_v12, %v5516_v61  ;;  %v1582_v12 = vrot.slane %v1580_v48, 1  ;;  %v1479_v2 = vsel %vm6674_vm7, 65537, %v6648_v54  ;;  %vm6675_vm14 = vmmov %vm6673_vm0 }
  0xfa   : > { %2759 = vrot.lane.b32.xlu1 %v2725_v1, %s4477_s13  ;;  %v1588_v56 = vshll.u32 %v4253_v40, 16  ;;  %v4254_v52 = vcombine.low %v1479_v2, %v4697_v36  ;;  %v1592_v50 = vshrl.u32 %v4253_v40, 16  ;;  %vm6676_vm5 = vmpackc.low %vm5046_vm1, %vm5046_vm1  ;;  %vm6680_vm1 = vnez %v6609_v34 }
  0xfb   : > { %v5547_v43 = vsel %vm6673_vm0, %v1578_v41, %v1582_v12  ;;  %v1586_v19 = vor.u32 %v1584_v59, %v1582_v12  ;;  %v1481_v38 = vsel %vm6676_vm5, 65537, %v6648_v54  ;;  %vm6677_vm8 = vmmov %vm6673_vm0  ;;  %vm6689_vm5 = vnez %v6632_v60 }
  0xfc   : > { %v1590_v15 = vrot.slane %v1588_v56, 1  ;;  %v1596_v27 = vshll.u32 %v4254_v52, 16  ;;  %v4255_v51 = vcombine.low %v1481_v38, %v4697_v36  ;;  %v1600_v24 = vshrl.u32 %v4254_v52, 16  ;;  %vm6678_vm6 = vmpackc.low %vm5092_vm12, %vm5092_vm12 }
  0xfd   : > { %vm6679_vm3 = vmmov %vm6673_vm0  ;;  %vm6683_vm12 = vnez %v6616_v62 }
  0xfe   : > { %3179 = vrot.lane.b32.xlu1 %v3139_v3, %s4480_s18  ;;  %v5557_v45 = vsel %vm6675_vm14, %v1586_v19, %v1590_v15  ;;  %v1594_v35 = vor.u32 %v1592_v50, %v1590_v15  ;;  %v1598_v1 = vrot.slane %v1596_v27, 1  ;;  %v1604_v17 = vshll.u32 %v4255_v51, 16  ;;  %vm6681_vm15 = vmpackc.low %vm6680_vm1, %vm6680_vm1 }
  0xff   : > { %v1483_v3 = vsel %vm6678_vm6, 65537, %v6648_v54  ;;  %v1608_v30 = vshrl.u32 %v4255_v51, 16  ;;  %vm6682_vm9 = vmmov %vm6673_vm0 }
 0x100   : > { %815 = vmatmul.mubr.bf16.gmra.mrb[60].mxu0 %v523_v20  ;;  %v5567_v42 = vsel %vm6677_vm8, %v1594_v35, %v1598_v1  ;;  %v1602_v21 = vor.u32 %v1600_v24, %v1598_v1  ;;  %v1606_v7 = vrot.slane %v1604_v17, 1  ;;  %v4256_v13 = vcombine.low %v1483_v3, %v4697_v36  ;;  %vm6684_vm13 = vmpackc.low %vm6683_vm12, %vm6683_vm12  ;;  %v4416_v17 = vld [vmem:[%s6528_s4] sm:$0xff]  }
 0x101   : > { %v1487_v40 = vsel %vm6684_vm13, 65537, %v6648_v54  ;;  %vm6685_vm10 = vmmov %vm6673_vm0  ;;  %vm6686_vm0 = vnez %v6619_v26  ;;  %3765 = vmatpush1.bf16.msra.mxu1 %v4416_v17  ;;  %vm6698_vm13 = vnez %v6576_v16  ;;  %v5692_v16 = vld [vmem:[%s6527_s3] ss:$0 sm:$0xff] }
 0x102   : > { %2761 = vrot.lane.b32.xlu1 %v2728_v23, %s4477_s13  ;;  %v5577_v58 = vsel %vm6679_vm3, %v1602_v21, %v1606_v7  ;;  %v1612_v20 = vshll.u32 %v4256_v13, 16  ;;  %v1610_v46 = vor.u32 %v1608_v30, %v1606_v7  ;;  %v1485_v23 = vsel %vm6681_vm15, 65537, %v6648_v54  ;;  %vm6687_vm7 = vmpackc.low %vm6686_vm0, %vm6686_vm0  ;;  %3766 = vmatprep.subr.bf16.mxu1 %v6648_v54  ;;  %v4417_v30 = vld [vmem:[%s6528_s4 + $0x8] sm:$0xff]  }
 0x103   : > { %v4257_v4 = vcombine.low %v1485_v23, %v4697_v36  ;;  %v1616_v48 = vshrl.u32 %v4256_v13, 16  ;;  %v4258_v59 = vcombine.low %v1487_v40, %v4697_v36  ;;  %v1489_v52 = vsel %vm6687_vm7, 65537, %v6648_v54  ;;  %vm6688_vm14 = vmmov %vm6679_vm3 }
 0x104   : > { %v1614_v6 = vrot.slane %v1612_v20, 1  ;;  %v4259_v50 = vcombine.low %v1489_v52, %v4697_v36  ;;  %vm6690_vm8 = vmpackc.low %vm6689_vm5, %vm6689_vm5  ;;  %vm6700_vm0 = vnez %v6578_v33 }
 0x105   : > { %v1620_v41 = vshll.u32 %v4257_v4, 16  ;;  %v1624_v56 = vshrl.u32 %v4257_v4, 16  ;;  %v1628_v19 = vshll.u32 %v4258_v59, 16  ;;  %v1632_v27 = vshrl.u32 %v4258_v59, 16  ;;  %vm6691_vm6 = vmmov %vm6679_vm3  ;;  %3767 = vmatpush1.bf16.msra.mxu1 %v4417_v30 }
 0x106   : > { %v5587_v47 = vsel %vm6682_vm9, %v1610_v46, %v1614_v6  ;;  %v1618_v12 = vor.u32 %v1616_v48, %v1614_v6  ;;  %v1636_v35 = vshll.u32 %v4259_v50, 16  ;;  %v1491_v51 = vsel %vm6690_vm8, 65537, %v6648_v54  ;;  %vm6692_vm3 = vmpackc.low %vm5344_vm11, %vm5344_vm11  ;;  %3768 = vmatprep.subr.bf16.mxu1 %v6648_v54 }
 0x107   : > { %v1622_v25 = vrot.slane %v1620_v41, 1  ;;  %v1630_v2 = vrot.slane %v1628_v19, 1  ;;  %v4260_v24 = vcombine.low %v1491_v51, %v4697_v36  ;;  %v1640_v21 = vshrl.u32 %v4259_v50, 16  ;;  %vm6693_vm1 = vmmov %vm6691_vm6  ;;  %v4423_v51 = vld [vmem:[%s6528_s4 + $0x38] sm:$0xff]  }
 0x108   : > { %v1638_v38 = vrot.slane %v1636_v35, 1  ;;  %v1493_v60 = vsel %vm6692_vm3, 65537, %v6648_v54  ;;  %vm6694_vm11 = vnez %v6645_v11  ;;  %vm6696_vm9 = vmmov %vm6693_vm1  ;;  %v4420_v11 = vld [vmem:[%s6528_s4 + $0x20] sm:$0xff]   ;;  %v4422_v35 = vld [vmem:[%s6528_s4 + $0x30] sm:$0xff]  }
 0x109   : > { %v5597_v34 = vsel %vm6685_vm10, %v1618_v12, %v1622_v25  ;;  %v1626_v15 = vor.u32 %v1624_v56, %v1622_v25  ;;  %v1634_v1 = vor.u32 %v1632_v27, %v1630_v2  ;;  %v1644_v7 = vshll.u32 %v4260_v24, 16  ;;  %3769 = vmatpush1.bf16.msra.mxu1 %v4418_v29  ;;  %vm6695_vm15 = vmpackc.low %vm6694_vm11, %vm6694_vm11  ;;  %v4419_v12 = vld [vmem:[%s6528_s4 + $0x18] sm:$0xff]  }
 0x10a   : > { %v1642_v3 = vor.u32 %v1640_v21, %v1638_v38  ;;  %v4261_v46 = vcombine.low %v1493_v60, %v4697_v36  ;;  %v1648_v6 = vshrl.u32 %v4260_v24, 16  ;;  %v1495_v41 = vsel %vm6695_vm15, 65537, %v6648_v54  ;;  %3770 = vmatprep.subr.bf16.mxu1 %v6648_v54  ;;  %vm6697_vm12 = vmmov %vm6693_vm1 }
 0x10b   : > { %v5607_v62 = vsel %vm6688_vm14, %v1626_v15, %v1630_v2  ;;  %v5617_v26 = vsel %vm6691_vm6, %v1634_v1, %v1638_v38  ;;  %v1646_v13 = vrot.slane %v1644_v7, 1  ;;  %v5655_v40 = vcombine.low %v1495_v41, %v4697_v36  ;;  %v4421_v2 = vld [vmem:[%s6528_s4 + $0x28] sm:$0xff]   ;;  %vm6699_vm10 = vmpackc.low %vm6698_vm13, %vm6698_vm13 }
 0x10c   : > { %v1652_v23 = vshll.u32 %v4261_v46, 16  ;;  %v1656_v59 = vshrl.u32 %v4261_v46, 16  ;;  %v1467_v50 = vsel %vm6699_vm10, 65537, %v6648_v54  ;;  %vm6701_vm7 = vmpackc.low %vm6700_vm0, %vm6700_vm0  ;;  %v4424_v46 = vld [vmem:[%s6528_s4 + $0x40] sm:$0xff]   ;;  %vm6702_vm14 = vcmask 523264  }
 0x10d   : > { %v5634_v20 = vsel %vm6693_vm1, %v1642_v3, %v1646_v13  ;;  %v1650_v4 = vor.u32 %v1648_v6, %v1646_v13  ;;  %3771 = vmatpush1.bf16.msra.mxu1 %v4419_v12  ;;  %v1660_v56 = vshll.u32 %v5655_v40, 16  ;;  %v4248_v27 = vcombine.low %v1467_v50, %v4697_v36  ;;  %vm6703_vm8 = vmmov %vm6693_vm1 }
 0x10e   : > { %v1654_v48 = vrot.slane %v1652_v23, 1  ;;  %3772 = vmatprep.subr.bf16.mxu1 %v6648_v54  ;;  %v1469_v1 = vsel %vm6701_vm7, 65537, %v6648_v54  ;;  %v4264_v3 = vcombine.low %v4697_v36, %v4700_v37  ;;  %v4265_v13 = vcombine.low %v4697_v36, %v4706_v39  ;;  %vm6704_vm1 = vmmov %vm6702_vm14 }
 0x10f   : > { %v5662_v15 = vrot.slane %v1660_v56, 1  ;;  %v1549_v24 = vshll.u32 %v4248_v27, 16  ;;  %v5699_v17 = vcombine.low %v1469_v1, %v4697_v36  ;;  %v1552_v6 = vshrl.u32 %v4248_v27, 16  ;;  %v4425_v56 = vld [vmem:[%s6528_s4 + $0x48] sm:$0xff]   ;;  %v2144_v1 = vld [vmem:[%s4721_s16 + $0x80] sm:$0x1]  ;;  %vm6707_vm0 = vmmov %vm6704_vm1 }
 0x110   : > { %v5652_v25 = vsel %vm6696_vm9, %v1650_v4, %v1654_v48  ;;  %v1658_v19 = vor.u32 %v1656_v59, %v1654_v48  ;;  %v1920_v48 = vshrl.u32 %v4264_v3, 16  ;;  %v1927_v39 = vshrl.u32 %v4265_v13, 16  ;;  %vm6706_vm9 = vmmov %vm6703_vm8 }
 0x111   : > { %3773 = vmatpush1.bf16.msra.mxu1 %v4420_v11  ;;  %v5711_v29 = vrot.slane %v1549_v24, 1  ;;  %v1556_v23 = vshll.u32 %v5699_v17, 16  ;;  %v2243_v12 = vrot.slane %v2241_v5, 4  ;;  %v4266_v59 = vcombine.low %v4697_v36, %v4812_v57 }
 0x112   : > { %3774 = vmatprep.subr.bf16.mxu1 %v6648_v54  ;;  %v5670_v52 = vsel %vm6697_vm12, %v1658_v19, %v5662_v15  ;;  %v1930_v57 = vshll.u32 %v4265_v13, 16  ;;  %vm1918_vm6 = vsmask.f32 256  ;;  %vm6705_vm15 = vsmask.f32 6400 }
 0x113   : > { %v1554_v19 = vor.u32 %v1552_v6, %v5711_v29  ;;  %vm2276_vm5 = vcmp.ne.s16.totalorder %v2243_v12, 0  ;;  %vm3760_vm12 = vcmask 1045504   ;;  %vm6708_vm7 = vcmask 1046528  }
 0x114   : > { %v2309_v24 = vsel %vm2276_vm5, %v2144_v1, 0 }
 0x115   : > { %3775 = vmatpush1.bf16.msra.mxu1 %v4421_v2  ;;  %v1558_v2 = vrot.slane %v1556_v23, 1 }
 0x116   : > { %3776 = vmatprep.subr.bf16.mxu1 %v6648_v54 }
 0x119   : > { %3777 = vmatpush1.bf16.msra.mxu1 %v4422_v35  ;;  %v1923_v35 = vshll.u32 %v4264_v3, 16  ;;  %v4426_v3 = vld [vmem:[%s6528_s4 + $0x50] sm:$0xff]  }
 0x11a   : > { %3778 = vmatprep.subr.bf16.mxu1 %v6648_v54 }
 0x11d   : > { %3779 = vmatpush1.bf16.msra.mxu1 %v4423_v51  ;;  %v5726_v51 = vrot.slane %v1927_v39, 7 }
 0x11e   : > { %3780 = vmatprep.subr.bf16.mxu1 %v6648_v54 }
 0x121   : > { %3781 = vmatpush1.bf16.msra.mxu1 %v4424_v46  ;;  %v1560_v46 = vshrl.u32 %v5699_v17, 16  ;;  %v1938_v17 = vshll.u32 %v4266_v59, 16 }
 0x122   : > { %3782 = vmatprep.subr.bf16.mxu1 %v6648_v54 }
 0x125   : > { %3783 = vmatpush1.bf16.msra.mxu1 %v4425_v56 }
 0x126   : > { %3784 = vmatprep.subr.bf16.mxu1 %v6648_v54 }
 0x129   : > { %3785 = vmatpush1.bf16.msra.mxu1 %v4426_v3 }
 0x12a   : > { %3786 = vmatprep.subr.bf16.mxu1 %v6648_v54 }
 0x15b   : > { %v696_v38 = vpop.f32.mrb[0].mxu0 }
 0x15c   : > { %v697_v33 = vadd.f32 %v5692_v16, %v696_v38  ;;  %v698_v21 = vpop.f32.mrb[1].mxu0  ;;  %v1922_v38 = vrot.slane %v1920_v48, 7 }
 0x15d   : > { %v699_v7 = vpop.f32.mrb[2].mxu0 }
 0x15e   : > { %v700_v60 = vadd.f32 %v5692_v16, %v699_v7  ;;  %v701_v30 = vpop.f32.mrb[3].mxu0  ;;  %v823_v4 = vmax.f32 %v697_v33, 0.0  ;;  %v4329_v7 = vcombine.low %v2309_v24, %v2309_v24  ;;  %v1925_v48 = vor.u32 %v1923_v35, %v1922_v38 }
 0x15f   : > { %v1559_v30 = vsel %vm6703_vm8, %v1554_v19, %v1558_v2 }
 0x160   : > { %v824_v37 = vmax.f32 %v700_v60, 0.0  ;;  %v1935_v60 = vshrl.u32 %v4266_v59, 16  ;;  %v3141_v13 = vshrl.u32 %v4329_v7, 16  ;;  %vm1676_vm3 = vcmp.ne.s16.totalorder %v1559_v30, 0  ;;  %v4429_v30 = vld [vmem:[%s6528_s4 + $0x60] sm:$0x3f]  }
 0x161   : > { %vm2046_vm11 = vcmp.ne.s16.totalorder %v1925_v48, 0 }
 0x162   : > { %v855_v41 = vpack.c.bf16 %v824_v37, %v823_v4  ;;  %v3144_v4 = vshll.u32 %v4329_v7, 16  ;;  %v1932_v37 = vor.u32 %v1930_v57, %v5726_v51  ;;  %v5737_v19 = vrot.slane %v1935_v60, 7  ;;  %v4427_v57 = vld [vmem:[%s6528_s4 + $0x58] sm:$0xff]  }
 0x163   : > { %v704_v11 = vpop.f32.mrb[4].mxu0  ;;  %3787 = vmatpush1.bf16.msra.mxu1 %v4427_v57 }
 0x164   : > { %889 = vst.msk [vmem:[#allocation2 + $0x8] sm:$0xff] %vm6702_vm14, %v855_v41  ;;  %v705_v50 = vadd.f32 %v5692_v16, %v704_v11  ;;  %v706_v27 = vpop.f32.mrb[5].mxu0  ;;  %v3143_v41 = vrot.slane %v3141_v13, 1  ;;  %v3146_v12 = vrot.slane %v3144_v4, 2  ;;  %v1940_v60 = vor.u32 %v1938_v17, %v5737_v19  ;;  %3788 = vmatprep.subr.bf16.mxu1 %v6648_v54  ;;  %vm6709_vm14 = vmmov %vm6703_vm8 }
 0x165   : > { %v707_v5 = vpop.f32.mrb[6].mxu0  ;;  %v1562_v27 = vor.u32 %v1560_v46, %v1558_v2  ;;  %v1933_v2 = vsel %vm1918_vm6, %v1922_v38, %v1932_v37  ;;  %v3762_v4 = vsel %vm3760_vm12, %v4429_v30, 0  ;;  %vm6710_vm8 = vmmov %vm6708_vm7 }
 0x166   : > { %v708_v33 = vadd.f32 %v5692_v16, %v707_v5  ;;  %v709_v21 = vpop.f32.mrb[7].mxu0  ;;  %v825_v6 = vmax.f32 %v705_v50, 0.0  ;;  %v4267_v50 = vcombine.low %v4697_v36, %v4861_v53  ;;  %vm2047_vm13 = vcmp.ne.s16.totalorder %v1933_v2, 0  ;;  %vm6714_vm12 = vmmov %vm6708_vm7 }
 0x167   : > { %v3147_v21 = vor.u32 %v3146_v12, %v3143_v41  ;;  %v4439_v41 = vld [vmem:[%s4721_s16 + $0x10] sm:$0xf]  ;;  %3789 = vmatpush1.bf16.msra.mxu1 %v3762_v4  ;;  %v4440_v4 = vld [vmem:[%s4721_s16 + $0x1c] sm:$0xf] }
 0x168   : > { %v826_v23 = vmax.f32 %v708_v33, 0.0  ;;  %v1943_v3 = vshrl.u32 %v4267_v50, 16 }
 0x169   : > { %v3148_v46 = vsel %vm6705_vm15, %v5516_v61, %v3147_v21  ;;  %vm6713_vm15 = vmmov %vm6706_vm9 }
 0x16a   : > { %v856_v39 = vpack.c.bf16 %v826_v23, %v825_v6  ;;  %v1567_v6 = vsel %vm6706_vm9, %v1562_v27, %v5527_v8  ;;  %3181 = vrot.lane.b32.xlu1 %v3148_v46, %s4480_s18  ;;  %v5770_v17 = vrot.slane %v1943_v3, 7  ;;  %v1946_v27 = vshll.u32 %v4267_v50, 16 }
 0x16b   : > { %v712_v11 = vpop.f32.mrb[8].mxu0  ;;  %v1323_v56 = vld [vmem:[#allocation2 + $0x8] sm:$0xff]  ;;  %vm1677_vm10 = vcmp.ne.s16.totalorder %v1567_v6, 0 }
 0x16c   : > { %890 = vst.msk [vmem:[#allocation2 + $0x10] sm:$0xff] %vm6704_vm1, %v856_v39  ;;  %v713_v35 = vadd.f32 %v5692_v16, %v712_v11  ;;  %v714_v1 = vpop.f32.mrb[9].mxu0  ;;  %v2311_v5 = vshll.u32 %v1323_v56, 16  ;;  %v5747_v33 = vsel %vm1676_vm3, %v1323_v56, 0  ;;  %v5764_v61 = vsel %vm2046_vm11, %v1323_v56, 0  ;;  %vm6711_vm1 = vmmov %vm6707_vm0 }
 0x16d   : > { %v715_v24 = vpop.f32.mrb[10].mxu0  ;;  %v4438_v39 = vld [vmem:[%s4721_s16 + $0x14] sm:$0xf]  ;;  %v1948_v30 = vor.u32 %v1946_v27, %v5770_v17  ;;  %vm1678_vm3 = vcmp.ne.s16.totalorder %v5537_v14, 0  ;;  %vm6712_vm11 = vmmov %vm6708_vm7 }
 0x16e   : > { %v716_v59 = vadd.f32 %v5692_v16, %v715_v24  ;;  %v717_v7 = vpop.f32.mrb[11].mxu0  ;;  %v2313_v53 = vrot.slane %v2311_v5, 1  ;;  %v827_v38 = vmax.f32 %v713_v35, 0.0  ;;  %v4298_v12 = vcombine.low %v4439_v41, %v4438_v39 }
 0x16f   : > { %v2314_v5 = vshrl.u32 %v1323_v56, 16 }
 0x170   : > { %v828_v23 = vmax.f32 %v716_v59, 0.0  ;;  %v4379_v13 = vpack.i.bf16 %v2313_v53, %v4809_v55  ;;  %v1941_v55 = vsel %vm1918_vm6, %v5726_v51, %v1940_v60  ;;  %v6570_v59 = vrot.slane %v5764_v61, 1 }
 0x171   : > { %v4268_v51 = vcombine.low %v4697_v36, %v4922_v49  ;;  %v2316_v3 = vor.u32 %v2314_v5, %v2313_v53  ;;  %v2849_v46 = vrot.slane %v4298_v12, 1  ;;  %vm2048_vm5 = vcmp.ne.s16.totalorder %v1941_v55, 0 }
 0x172   : > { %v857_v37 = vpack.c.bf16 %v828_v23, %v827_v38  ;;  %4380 = vrot.lane.b32.xlu0 %v4379_v13, %s4477_s13  ;;  %v4269_v55 = vcombine.low %v4697_v36, %v4973_v63 }
 0x173   : > { %v720_v8 = vpop.f32.mrb[12].mxu0  ;;  %v1324_v11 = vld [vmem:[#allocation2 + $0x10] sm:$0xff]  ;;  %v1951_v23 = vshrl.u32 %v4268_v51, 16  ;;  %v2850_v53 = vsel %vm6710_vm8, %v4746_v0, %v2849_v46  ;;  %vm1680_vm8 = vcmp.ne.s16.totalorder %v5557_v45, 0 }
 0x174   : > { %891 = vst.msk [vmem:[#allocation2 + $0x18] sm:$0xff] %vm6707_vm0, %v857_v37  ;;  %v721_v35 = vadd.f32 %v5692_v16, %v720_v8  ;;  %v722_v48 = vpop.f32.mrb[13].mxu0  ;;  %v2064_v1 = vsel %vm2047_vm13, %v1324_v11, 0  ;;  %v2318_v57 = vshll.u32 %v1324_v11, 16  ;;  %v5779_v7 = vsel %vm1677_vm10, %v1324_v11, 0  ;;  %vm6715_vm10 = vmmov %vm6707_vm0 }
 0x175   : > { %v723_v24 = vpop.f32.mrb[14].mxu0  ;;  %v2490_v21 = vrot.slane %v2064_v1, 1  ;;  %v4441_v37 = vld [vmem:[%s4721_s16 + $0x18] sm:$0xf]  ;;  %v1949_v8 = vsel %vm1918_vm6, %v5737_v19, %v1948_v30  ;;  %v2322_v0 = vshrl.u32 %v1324_v11, 16  ;;  %vm1679_vm13 = vcmp.ne.s16.totalorder %v5547_v43, 0  ;;  %vm6716_vm0 = vmmov %vm6708_vm7 }
 0x176   : > { %v724_v50 = vadd.f32 %v5692_v16, %v723_v24  ;;  %v725_v60 = vpop.f32.mrb[15].mxu0  ;;  %v2320_v2 = vrot.slane %v2318_v57, 1  ;;  %v829_v38 = vmax.f32 %v721_v35, 0.0  ;;  %v4299_v39 = vcombine.low %v4441_v37, %v4440_v4  ;;  %v4442_v4 = vld [vmem:[%s4721_s16 + $0x24] sm:$0xf] }
 0x177   : > { %v5785_v56 = vsel %vm6708_vm7, %v6570_v59, %v2490_v21  ;;  %v1953_v24 = vrot.slane %v1951_v23, 7  ;;  %vm2049_vm9 = vcmp.ne.s16.totalorder %v1949_v8, 0  ;;  %v4443_v37 = vld [vmem:[%s4721_s16 + $0x20] sm:$0xf]  ;;  %vm6717_vm7 = vmmov %vm6709_vm14 }
 0x178   : > { %v830_v49 = vmax.f32 %v724_v50, 0.0  ;;  %v2321_v6 = vsel %vm6709_vm14, %v2316_v3, %v2320_v2  ;;  %v1954_v50 = vshll.u32 %v4268_v51, 16  ;;  %v2324_v3 = vor.u32 %v2322_v0, %v2320_v2 }
 0x179   : > { %2439 = vrot.lane.b32.xlu0 %v2321_v6, %s4477_s13  ;;  %v4300_v2 = vcombine.low %v4443_v37, %v4442_v4  ;;  %v4444_v4 = vld [vmem:[%s4721_s16 + $0x2c] sm:$0xf] }
 0x17a   : > { %v858_v13 = vpack.c.bf16 %v830_v49, %v829_v38  ;;  %v2851_v38 = vrot.slane %v4299_v39, 1  ;;  %v1959_v49 = vshrl.u32 %v4269_v55, 16  ;;  %v1956_v14 = vor.u32 %v1954_v50, %v1953_v24 }
 0x17b   : > { %v1325_v41 = vld [vmem:[#allocation2 + $0x18] sm:$0xff]  ;;  %v728_v12 = vpop.f32.mrb[16].mxu0 }
 0x17c   : > { %892 = vst.msk [vmem:[#allocation2 + $0x20] sm:$0xff] %vm6711_vm1, %v858_v13  ;;  %v2065_v27 = vsel %vm2048_vm5, %v1325_v41, 0  ;;  %v729_v35 = vadd.f32 %v5692_v16, %v728_v12  ;;  %v730_v48 = vpop.f32.mrb[17].mxu0  ;;  %v2326_v1 = vshll.u32 %v1325_v41, 16  ;;  %v5804_v19 = vsel %vm1678_vm3, %v1325_v41, 0  ;;  %vm6718_vm5 = vmmov %vm6716_vm0 }
 0x17d   : > { %v2492_v5 = vrot.slane %v2065_v27, 1  ;;  %v731_v57 = vpop.f32.mrb[18].mxu0  ;;  %2883 = vrot.lane.b32.xlu0 %v2850_v53, %s4479_s17  ;;  %v2852_v53 = vsel %vm6714_vm12, %v2849_v46, %v2851_v38  ;;  %v5816_v12 = vrot.slane %v1959_v49, 7  ;;  %v1962_v27 = vshll.u32 %v4269_v55, 16  ;;  %vm6719_vm3 = vmmov %vm6711_vm1 }
 0x17e   : > { %v732_v63 = vadd.f32 %v5692_v16, %v731_v57  ;;  %v733_v60 = vpop.f32.mrb[19].mxu0  ;;  %v2328_v30 = vrot.slane %v2326_v1, 1  ;;  %v831_v6 = vmax.f32 %v729_v35, 0.0  ;;  %v2330_v0 = vshrl.u32 %v1325_v41, 16  ;;  %vm6720_vm1 = vmmov %vm6716_vm0 }
 0x17f   : > { %v5808_v11 = vsel %vm6712_vm11, %v2490_v21, %v2492_v5  ;;  %v1957_v50 = vsel %vm1918_vm6, %v5770_v17, %v1956_v14  ;;  %v1964_v17 = vor.u32 %v1962_v27, %v5816_v12  ;;  %v4271_v27 = vcombine.low %v4697_v36, %v5090_v31  ;;  %vm6721_vm11 = vmmov %vm6717_vm7 }
 0x180   : > { %v832_v13 = vmax.f32 %v732_v63, 0.0  ;;  %v2329_v51 = vsel %vm6713_vm15, %v2324_v3, %v2328_v30  ;;  %v4270_v63 = vcombine.low %v4697_v36, %v5029_v44  ;;  %v2332_v3 = vor.u32 %v2330_v0, %v2328_v30  ;;  %v4445_v30 = vld [vmem:[%s4721_s16 + $0x28] sm:$0xf] }
 0x181   : > { %2441 = vrot.lane.b32.xlu0 %v2329_v51, %s4477_s13  ;;  %vm2050_vm14 = vcmp.ne.s16.totalorder %v1957_v50, 0  ;;  %v4301_v37 = vcombine.low %v4445_v30, %v4444_v4  ;;  %v4446_v4 = vld [vmem:[%s4721_s16 + $0x34] sm:$0xf]  ;;  %v4447_v30 = vld [vmem:[%s4721_s16 + $0x30] sm:$0xf]  ;;  %vm1681_vm12 = vcmp.ne.s16.totalorder %v5567_v42, 0 }
 0x182   : > { %v859_v23 = vpack.c.bf16 %v832_v13, %v831_v6  ;;  %v2853_v6 = vrot.slane %v4300_v2, 1  ;;  %v1967_v43 = vshrl.u32 %v4270_v63, 16 }
 0x183   : > { %v1326_v39 = vld [vmem:[#allocation2 + $0x20] sm:$0xff]  ;;  %v736_v21 = vpop.f32.mrb[20].mxu0 }
 0x184   : > { %893 = vst.msk [vmem:[#allocation2 + $0x28] sm:$0xff] %vm6715_vm10, %v859_v23  ;;  %v2066_v35 = vsel %vm2049_vm9, %v1326_v39, 0  ;;  %v737_v8 = vadd.f32 %v5692_v16, %v736_v21  ;;  %v738_v48 = vpop.f32.mrb[21].mxu0  ;;  %v2334_v1 = vshll.u32 %v1326_v39, 16  ;;  %v5827_v55 = vsel %vm1679_vm13, %v1326_v39, 0  ;;  %vm6722_vm9 = vmmov %vm6716_vm0 }
 0x185   : > { %v2494_v57 = vrot.slane %v2066_v35, 1  ;;  %v739_v46 = vpop.f32.mrb[22].mxu0  ;;  %2885 = vrot.lane.b32.xlu0 %v2852_v53, %s4479_s17  ;;  %v2854_v53 = vsel %vm6718_vm5, %v2851_v38, %v2853_v6  ;;  %v1965_v21 = vsel %vm1918_vm6, %v1953_v24, %v1964_v17  ;;  %v2338_v0 = vshrl.u32 %v1326_v39, 16  ;;  %vm6723_vm13 = vmmov %vm6719_vm3 }
 0x186   : > { %v740_v60 = vadd.f32 %v5692_v16, %v739_v46  ;;  %v741_v41 = vpop.f32.mrb[23].mxu0  ;;  %v2336_v49 = vrot.slane %v2334_v1, 1  ;;  %v833_v51 = vmax.f32 %v737_v8, 0.0  ;;  %v1969_v50 = vrot.slane %v1967_v43, 7  ;;  %vm6724_vm10 = vmmov %vm6716_vm0 }
 0x187   : > { %v5831_v13 = vsel %vm6716_vm0, %v2492_v5, %v2494_v57  ;;  %vm2051_vm15 = vcmp.ne.s16.totalorder %v1965_v21, 0  ;;  %vm6725_vm0 = vmmov %vm6717_vm7  ;;  %vm1682_vm5 = vcmp.ne.s16.totalorder %v5577_v58, 0 }
 0x188   : > { %v834_v14 = vmax.f32 %v740_v60, 0.0  ;;  %v2337_v44 = vsel %vm6717_vm7, %v2332_v3, %v2336_v49  ;;  %v1970_v60 = vshll.u32 %v4270_v63, 16  ;;  %v2340_v3 = vor.u32 %v2338_v0, %v2336_v49 }
 0x189   : > { %2443 = vrot.lane.b32.xlu0 %v2337_v44, %s4477_s13  ;;  %v4302_v49 = vcombine.low %v4447_v30, %v4446_v4  ;;  %v4448_v4 = vld [vmem:[%s4721_s16 + $0x3c] sm:$0xf] }
 0x18a   : > { %v860_v23 = vpack.c.bf16 %v834_v14, %v833_v51  ;;  %v2855_v51 = vrot.slane %v4301_v37, 1  ;;  %v1975_v14 = vshrl.u32 %v4271_v27, 16  ;;  %v1972_v45 = vor.u32 %v1970_v60, %v1969_v50 }
 0x18b   : > { %v1327_v5 = vld [vmem:[#allocation2 + $0x28] sm:$0xff]  ;;  %v744_v2 = vpop.f32.mrb[24].mxu0 }
 0x18c   : > { %894 = vst.msk [vmem:[#allocation2 + $0x30] sm:$0xff] %vm6719_vm3, %v860_v23  ;;  %v2067_v35 = vsel %vm2050_vm14, %v1327_v5, 0  ;;  %v745_v8 = vadd.f32 %v5692_v16, %v744_v2  ;;  %v746_v48 = vpop.f32.mrb[25].mxu0  ;;  %v2342_v38 = vshll.u32 %v1327_v5, 16  ;;  %v5848_v24 = vsel %vm1680_vm8, %v1327_v5, 0  ;;  %vm6726_vm14 = vmmov %vm6720_vm1 }
 0x18d   : > { %v2496_v1 = vrot.slane %v2067_v35, 1  ;;  %v747_v46 = vpop.f32.mrb[26].mxu0  ;;  %2887 = vrot.lane.b32.xlu0 %v2854_v53, %s4479_s17  ;;  %v2856_v53 = vsel %vm6722_vm9, %v2853_v6, %v2855_v51  ;;  %v5860_v2 = vrot.slane %v1975_v14, 7  ;;  %v1978_v35 = vshll.u32 %v4271_v27, 16  ;;  %vm6727_vm8 = vmmov %vm6719_vm3 }
 0x18e   : > { %v748_v31 = vadd.f32 %v5692_v16, %v747_v46  ;;  %v749_v41 = vpop.f32.mrb[27].mxu0  ;;  %v2344_v17 = vrot.slane %v2342_v38, 1  ;;  %v835_v44 = vmax.f32 %v745_v8, 0.0  ;;  %v2346_v0 = vshrl.u32 %v1327_v5, 16  ;;  %vm6728_vm3 = vmmov %vm6720_vm1 }
 0x18f   : > { %v5852_v39 = vsel %vm6720_vm1, %v2494_v57, %v2496_v1  ;;  %v1973_v60 = vsel %vm1918_vm6, %v5816_v12, %v1972_v45  ;;  %v1980_v12 = vor.u32 %v1978_v35, %v5860_v2  ;;  %v4273_v35 = vcombine.low %v4697_v36, %v5198_v9  ;;  %vm6729_vm1 = vmmov %vm6725_vm0 }
 0x190   : > { %v836_v23 = vmax.f32 %v748_v31, 0.0  ;;  %v2345_v63 = vsel %vm6721_vm11, %v2340_v3, %v2344_v17  ;;  %v4272_v31 = vcombine.low %v4697_v36, %v5144_v10  ;;  %v2348_v3 = vor.u32 %v2346_v0, %v2344_v17  ;;  %v4449_v17 = vld [vmem:[%s4721_s16 + $0x38] sm:$0xf] }
 0x191   : > { %2445 = vrot.lane.b32.xlu0 %v2345_v63, %s4477_s13  ;;  %vm2052_vm7 = vcmp.ne.s16.totalorder %v1973_v60, 0  ;;  %v4303_v30 = vcombine.low %v4449_v17, %v4448_v4  ;;  %v4451_v17 = vld [vmem:[%s4721_s16 + $0x40] sm:$0xf]  ;;  %vm1683_vm9 = vcmp.ne.s16.totalorder %v5587_v47, 0 }
 0x192   : > { %v861_v43 = vpack.c.bf16 %v836_v23, %v835_v44  ;;  %v2857_v44 = vrot.slane %v4302_v49, 1  ;;  %v1983_v42 = vshrl.u32 %v4272_v31, 16 }
 0x193   : > { %v1328_v37 = vld [vmem:[#allocation2 + $0x30] sm:$0xff]  ;;  %v752_v57 = vpop.f32.mrb[28].mxu0 }
 0x194   : > { %895 = vst.msk [vmem:[#allocation2 + $0x38] sm:$0xff] %vm6723_vm13, %v861_v43  ;;  %v2068_v8 = vsel %vm2051_vm15, %v1328_v37, 0  ;;  %v753_v21 = vadd.f32 %v5692_v16, %v752_v57  ;;  %v754_v48 = vpop.f32.mrb[29].mxu0  ;;  %v2350_v38 = vshll.u32 %v1328_v37, 16  ;;  %v5871_v27 = vsel %vm1681_vm12, %v1328_v37, 0  ;;  %vm6730_vm15 = vmmov %vm6728_vm3 }
 0x195   : > { %v2498_v46 = vrot.slane %v2068_v8, 1  ;;  %v755_v6 = vpop.f32.mrb[30].mxu0  ;;  %2889 = vrot.lane.b32.xlu0 %v2856_v53, %s4479_s17  ;;  %v2858_v53 = vsel %vm6726_vm14, %v2855_v51, %v2857_v44  ;;  %v1981_v57 = vsel %vm1918_vm6, %v1969_v50, %v1980_v12  ;;  %v2354_v0 = vshrl.u32 %v1328_v37, 16  ;;  %vm6731_vm12 = vmmov %vm6727_vm8 }
 0x196   : > { %v756_v41 = vadd.f32 %v5692_v16, %v755_v6  ;;  %v757_v5 = vpop.f32.mrb[31].mxu0  ;;  %v2352_v14 = vrot.slane %v2350_v38, 1  ;;  %v837_v63 = vmax.f32 %v753_v21, 0.0  ;;  %v1985_v60 = vrot.slane %v1983_v42, 7  ;;  %vm6732_vm13 = vmmov %vm6728_vm3 }
 0x197   : > { %v5875_v23 = vsel %vm6724_vm10, %v2496_v1, %v2498_v46  ;;  %vm2053_vm11 = vcmp.ne.s16.totalorder %v1981_v57, 0  ;;  %vm6733_vm10 = vmmov %vm6725_vm0  ;;  %vm1684_vm14 = vcmp.ne.s16.totalorder %v5597_v34, 0 }
 0x198   : > { %v838_v45 = vmax.f32 %v756_v41, 0.0  ;;  %v2353_v10 = vsel %vm6725_vm0, %v2348_v3, %v2352_v14  ;;  %v1986_v41 = vshll.u32 %v4272_v31, 16  ;;  %v2356_v3 = vor.u32 %v2354_v0, %v2352_v14  ;;  %v4450_v14 = vld [vmem:[%s4721_s16 + $0x44] sm:$0xf] }
 0x199   : > { %2447 = vrot.lane.b32.xlu0 %v2353_v10, %s4477_s13  ;;  %v5898_v10 = vpop.permute.xlu1 %2881 }
 0x19a   : > { %v862_v43 = vpack.c.bf16 %v838_v45, %v837_v63  ;;  %v2859_v63 = vrot.slane %v4303_v30, 1  ;;  %v1991_v45 = vshrl.u32 %v4273_v35, 16  ;;  %v4304_v30 = vcombine.low %v4451_v17, %v4450_v14 }
 0x19b   : > { %v1329_v1 = vld [vmem:[#allocation2 + $0x38] sm:$0xff]  ;;  %v760_v49 = vpop.f32.mrb[32].mxu0 }
 0x19c   : > { %896 = vst.msk [vmem:[#allocation2 + $0x40] sm:$0xff] %vm6727_vm8, %v862_v43  ;;  %v2069_v8 = vsel %vm2052_vm7, %v1329_v1, 0  ;;  %v761_v21 = vadd.f32 %v5692_v16, %v760_v49  ;;  %v762_v48 = vpop.f32.mrb[33].mxu0  ;;  %v2358_v51 = vshll.u32 %v1329_v1, 16  ;;  %v5892_v50 = vsel %vm1682_vm5, %v1329_v1, 0  ;;  %vm6734_vm7 = vmmov %vm6728_vm3 }
 0x19d   : > { %v2500_v38 = vrot.slane %v2069_v8, 1  ;;  %v763_v6 = vpop.f32.mrb[34].mxu0  ;;  %2891 = vrot.lane.b32.xlu0 %v2858_v53, %s4479_s17  ;;  %v1988_v43 = vor.u32 %v1986_v41, %v1985_v60  ;;  %v2860_v4 = vsel %vm6730_vm15, %v2857_v44, %v2859_v63  ;;  %v5906_v8 = vrot.slane %v1991_v45, 7  ;;  %vm6736_vm5 = vmmov %vm6727_vm8 }
 0x19e   : > { %v764_v9 = vadd.f32 %v5692_v16, %v763_v6  ;;  %v765_v5 = vpop.f32.mrb[35].mxu0  ;;  %v2360_v12 = vrot.slane %v2358_v51, 1  ;;  %v839_v42 = vmax.f32 %v761_v21, 0.0  ;;  %v1994_v21 = vshll.u32 %v4273_v35, 16  ;;  %vm6738_vm8 = vmmov %vm6728_vm3 }
 0x19f   : > { %v5896_v37 = vsel %vm6728_vm3, %v2498_v46, %v2500_v38  ;;  %v2362_v51 = vshrl.u32 %v1329_v1, 16  ;;  %v4274_v5 = vcombine.low %v4697_v36, %v5240_v28  ;;  %vm6739_vm3 = vmmov %vm6729_vm1  ;;  %vm1685_vm15 = vcmp.ne.s16.totalorder %v5607_v62, 0 }
 0x1a0   : > { %v840_v31 = vmax.f32 %v764_v9, 0.0  ;;  %v2361_v58 = vsel %vm6729_vm1, %v2356_v3, %v2360_v12  ;;  %v1989_v9 = vsel %vm1918_vm6, %v5860_v2, %v1988_v43  ;;  %v5919_v3 = vpop.permute.xlu1 %3151  ;;  %v1996_v2 = vor.u32 %v1994_v21, %v5906_v8 }
 0x1a1   : > { %2449 = vrot.lane.b32.xlu0 %v2361_v58, %s4477_s13  ;;  %v2861_v58 = vrot.slane %v4304_v30, 1  ;;  %vm2054_vm0 = vcmp.ne.s16.totalorder %v1989_v9, 0 }
 0x1a2   : > { %v863_v53 = vpack.c.bf16 %v840_v31, %v839_v42  ;;  %v2364_v42 = vor.u32 %v2362_v51, %v2360_v12  ;;  %v4453_v12 = vld [vmem:[%s4721_s16 + $0x48] sm:$0xf]  ;;  %v1997_v21 = vsel %vm1918_vm6, %v1985_v60, %v1996_v2  ;;  %v2002_v60 = vshll.u32 %v4274_v5, 16 }
 0x1a3   : > { %v1330_v46 = vld [vmem:[#allocation2 + $0x40] sm:$0xff]  ;;  %v768_v49 = vpop.f32.mrb[36].mxu0  ;;  %v2862_v17 = vsel %vm6734_vm7, %v2859_v63, %v2861_v58  ;;  %vm2055_vm1 = vcmp.ne.s16.totalorder %v1997_v21, 0 }
 0x1a4   : > { %897 = vst.msk [vmem:[#allocation2 + $0x48] sm:$0xff] %vm6731_vm12, %v863_v53  ;;  %v2070_v48 = vsel %vm2053_vm11, %v1330_v46, 0  ;;  %v769_v57 = vadd.f32 %v5692_v16, %v768_v49  ;;  %v770_v0 = vpop.f32.mrb[37].mxu0  ;;  %v2366_v6 = vshll.u32 %v1330_v46, 16  ;;  %v5917_v35 = vsel %vm1683_vm9, %v1330_v46, 0  ;;  %v5935_v51 = vpop.permute.xlu1 %2879  ;;  %vm6740_vm11 = vmmov %vm6734_vm7 }
 0x1a5   : > { %v2502_v41 = vrot.slane %v2070_v48, 1  ;;  %v771_v44 = vpop.f32.mrb[38].mxu0  ;;  %2893 = vrot.lane.b32.xlu0 %v2860_v4, %s4479_s17  ;;  %v1999_v4 = vshrl.u32 %v4274_v5, 16  ;;  %v4452_v49 = vld [vmem:[%s4721_s16 + $0x4c] sm:$0xf]  ;;  %v2370_v9 = vshrl.u32 %v1330_v46, 16  ;;  %vm6741_vm9 = vmmov %vm6736_vm5 }
 0x1a6   : > { %v772_v1 = vadd.f32 %v5692_v16, %v771_v44  ;;  %v773_v45 = vpop.f32.mrb[39].mxu0  ;;  %v2368_v31 = vrot.slane %v2366_v6, 1  ;;  %v841_v28 = vmax.f32 %v769_v57, 0.0  ;;  %v4305_v48 = vcombine.low %v4453_v12, %v4452_v49  ;;  %v6735_v57 = vld [vmem:[#allocation3_spill] sm:$0xff]  ;;  %vm6744_vm12 = vmmov %vm6734_vm7 }
 0x1a7   : > { %v5923_v53 = vsel %vm6732_vm13, %v2500_v38, %v2502_v41  ;;  %v4275_v0 = vcombine.low %v4697_v36, %v6735_v57  ;;  %vm6746_vm13 = vmmov %vm6739_vm3 }
 0x1a8   : > { %v842_v43 = vmax.f32 %v772_v1, 0.0  ;;  %v2369_v47 = vsel %vm6733_vm10, %v2364_v42, %v2368_v31  ;;  %v2863_v46 = vrot.slane %v4305_v48, 1  ;;  %v5953_v57 = vpop.permute.xlu1 %2733  ;;  %v4455_v48 = vld [vmem:[%s4721_s16 + $0x50] sm:$0xf] }
 0x1a9   : > { %2451 = vrot.lane.b32.xlu0 %v2369_v47, %s4477_s13 }
 0x1aa   : > { %v864_v14 = vpack.c.bf16 %v842_v43, %v841_v28  ;;  %v5940_v28 = vrot.slane %v1999_v4, 7 }
 0x1ab   : > { %v1331_v38 = vld [vmem:[#allocation2 + $0x48] sm:$0xff]  ;;  %v776_v30 = vpop.f32.mrb[40].mxu0 }
 0x1ac   : > { %898 = vst.msk [vmem:[#allocation2 + $0x50] sm:$0xff] %vm6736_vm5, %v864_v14  ;;  %v2071_v6 = vsel %vm2054_vm0, %v1331_v38, 0  ;;  %v777_v44 = vadd.f32 %v5692_v16, %v776_v30  ;;  %v778_v63 = vpop.f32.mrb[41].mxu0  ;;  %v2374_v1 = vshll.u32 %v1331_v38, 16  ;;  %v5944_v2 = vsel %vm1684_vm14, %v1331_v38, 0  ;;  %v5979_v59 = vpop.permute.xlu1 %3153  ;;  %vm6747_vm0 = vmmov %vm6734_vm7 }
 0x1ad   : > { %v2504_v45 = vrot.slane %v2071_v6, 1  ;;  %v779_v42 = vpop.f32.mrb[42].mxu0  ;;  %2895 = vrot.lane.b32.xlu0 %v2862_v17, %s4479_s17  ;;  %6737 = vst [vmem:[#allocation3_spill] sm:$0xff] %v5944_v2  ;;  %v2372_v14 = vor.u32 %v2370_v9, %v2368_v31  ;;  %v2007_v30 = vshrl.u32 %v4275_v0, 16  ;;  %v2004_v34 = vor.u32 %v2002_v60, %v5940_v28  ;;  %v4454_v63 = vld [vmem:[%s4721_s16 + $0x54] sm:$0xf]  ;;  %vm6749_vm14 = vmmov %vm6736_vm5 }
 0x1ae   : > { %v780_v43 = vadd.f32 %v5692_v16, %v779_v42  ;;  %v781_v47 = vpop.f32.mrb[43].mxu0  ;;  %v2376_v49 = vrot.slane %v2374_v1, 1  ;;  %v843_v17 = vmax.f32 %v777_v44, 0.0  ;;  %v2864_v31 = vsel %vm6740_vm11, %v2861_v58, %v2863_v46  ;;  %vm6751_vm5 = vmmov %vm6747_vm0 }
 0x1af   : > { %v5948_v12 = vsel %vm6738_vm8, %v2502_v41, %v2504_v45  ;;  %v4306_v9 = vcombine.low %v4455_v48, %v4454_v63  ;;  %v5959_v1 = vrot.slane %v2007_v30, 7  ;;  %v2010_v42 = vshll.u32 %v4275_v0, 16  ;;  %v6742_v30 = vld [vmem:[#allocation4_spill] sm:$0xff]  ;;  %vm6753_vm8 = vmmov %vm6739_vm3 }
 0x1b0   : > { %v844_v4 = vmax.f32 %v780_v43, 0.0  ;;  %v2377_v5 = vsel %vm6739_vm3, %v2372_v14, %v2376_v49  ;;  %v2378_v47 = vshrl.u32 %v1331_v38, 16  ;;  %v4276_v0 = vcombine.low %v4697_v36, %v6742_v30  ;;  %vm6759_vm4 = vmmov %vm6749_vm14 }
 0x1b1   : > { %2453 = vrot.lane.b32.xlu0 %v2377_v5, %s4477_s13  ;;  %vm1686_vm7 = vcmp.ne.s16.totalorder %v5617_v26, 0  ;;  %vm1687_vm11 = vcmp.ne.s16.totalorder %v5634_v20, 0  ;;  %v1497_v20 = vsel %vm1465_vm2, 65537, %v6648_v54 }
 0x1b2   : > { %v865_v6 = vpack.c.bf16 %v844_v4, %v843_v17  ;;  %v2005_v4 = vsel %vm1918_vm6, %v5906_v8, %v2004_v34  ;;  %v2380_v38 = vor.u32 %v2378_v47, %v2376_v49  ;;  %v4457_v8 = vld [vmem:[%s4721_s16 + $0x58] sm:$0xf]  ;;  %v2015_v49 = vshrl.u32 %v4276_v0, 16 }
 0x1b3   : > { %v1332_v41 = vld [vmem:[#allocation2 + $0x50] sm:$0xff]  ;;  %v784_v44 = vpop.f32.mrb[44].mxu0  ;;  %vm2056_vm10 = vcmp.ne.s16.totalorder %v2005_v4, 0 }
 0x1b4   : > { %899 = vst.msk [vmem:[#allocation2 + $0x58] sm:$0xff] %vm6741_vm9, %v865_v6  ;;  %v2072_v21 = vsel %vm2055_vm1, %v1332_v41, 0  ;;  %v785_v60 = vadd.f32 %v5692_v16, %v784_v44  ;;  %v786_v43 = vpop.f32.mrb[45].mxu0  ;;  %v2382_v58 = vshll.u32 %v1332_v41, 16  ;;  %v5970_v5 = vsel %vm1685_vm15, %v1332_v41, 0  ;;  %vm6754_vm1 = vmmov %vm6747_vm0 }
 0x1b5   : > { %v2506_v14 = vrot.slane %v2072_v21, 1  ;;  %v787_v17 = vpop.f32.mrb[46].mxu0  ;;  %2897 = vrot.lane.b32.xlu0 %v2864_v31, %s4479_s17  ;;  %6743 = vst [vmem:[#allocation4_spill] sm:$0xff] %v5970_v5  ;;  %v2865_v44 = vrot.slane %v4306_v9, 1  ;;  %v2012_v31 = vor.u32 %v2010_v42, %v5959_v1  ;;  %v4456_v43 = vld [vmem:[%s4721_s16 + $0x5c] sm:$0xf]  ;;  %vm6755_vm15 = vmmov %vm6741_vm9 }
 0x1b6   : > { %v788_v6 = vadd.f32 %v5692_v16, %v787_v17  ;;  %v789_v63 = vpop.f32.mrb[47].mxu0  ;;  %v2384_v48 = vrot.slane %v2382_v58, 1  ;;  %v4307_v34 = vcombine.low %v4457_v8, %v4456_v43  ;;  %v845_v30 = vmax.f32 %v785_v60, 0.0  ;;  %vm6756_vm9 = vmmov %vm6747_vm0 }
 0x1b7   : > { %v5974_v21 = vsel %vm6744_vm12, %v2504_v45, %v2506_v14  ;;  %v2866_v9 = vsel %vm6747_vm0, %v2863_v46, %v2865_v44  ;;  %v6748_v45 = vld [vmem:[#allocation5_spill] sm:$0xff]  ;;  %v2013_v60 = vsel %vm1918_vm6, %v5940_v28, %v2012_v31  ;;  %v6000_v31 = vpop.permute.xlu1 %2735  ;;  %vm6757_vm12 = vmmov %vm6753_vm8 }
 0x1b8   : > { %6745 = vst [vmem:[#allocation6_spill] sm:$0xff] %v5974_v21  ;;  %v846_v62 = vmax.f32 %v788_v6, 0.0  ;;  %v2385_v5 = vsel %vm6746_vm13, %v2380_v38, %v2384_v48  ;;  %v4277_v58 = vcombine.low %v4697_v36, %v6748_v45  ;;  %v5989_v6 = vrot.slane %v4307_v34, 1  ;;  %vm6760_vm2 = vmmov %vm6754_vm1 }
 0x1b9   : > { %2455 = vrot.lane.b32.xlu0 %v2385_v5, %s4477_s13  ;;  %v2386_v38 = vshrl.u32 %v1332_v41, 16  ;;  %vm2057_vm3 = vcmp.ne.s16.totalorder %v2013_v60, 0 }
 0x1ba   : > { %v866_v47 = vpack.c.bf16 %v846_v62, %v845_v30  ;;  %v5994_v30 = vrot.slane %v2015_v49, 7  ;;  %v2018_v62 = vshll.u32 %v4276_v0, 16  ;;  %v2868_v26 = vsel %vm6754_vm1, %v2865_v44, %v5989_v6 }
 0x1bb   : > { %v1333_v42 = vld [vmem:[#allocation2 + $0x58] sm:$0xff]  ;;  %v792_v17 = vpop.f32.mrb[48].mxu0  ;;  %v2388_v41 = vor.u32 %v2386_v38, %v2384_v48 }
 0x1bc   : > { %900 = vst.msk [vmem:[#allocation2 + $0x60] sm:$0xff] %vm6749_vm14, %v866_v47  ;;  %v2073_v4 = vsel %vm2056_vm10, %v1333_v42, 0  ;;  %v793_v5 = vadd.f32 %v5692_v16, %v792_v17  ;;  %v794_v63 = vpop.f32.mrb[49].mxu0  ;;  %v2390_v46 = vshll.u32 %v1333_v42, 16  ;;  %v5998_v28 = vsel %vm1686_vm7, %v1333_v42, 0  ;;  %vm6758_vm10 = vmmov %vm6747_vm0 }
 0x1bd   : > { %v2508_v43 = vrot.slane %v2073_v4, 1  ;;  %v795_v8 = vpop.f32.mrb[50].mxu0  ;;  %2899 = vrot.lane.b32.xlu0 %v2866_v9, %s4479_s17  ;;  %6750 = vst [vmem:[#allocation5_spill] sm:$0xff] %v5998_v28  ;;  %v2023_v17 = vshrl.u32 %v4277_v58, 16  ;;  %v2020_v63 = vor.u32 %v2018_v62, %v5994_v30  ;;  %vm1688_vm0 = vcmp.ne.s16.totalorder %v5652_v25, 0  ;;  %vm6761_vm7 = vmmov %vm6753_vm8 }
 0x1be   : > { %v796_v34 = vadd.f32 %v5692_v16, %v795_v8  ;;  %v797_v47 = vpop.f32.mrb[51].mxu0  ;;  %v2392_v45 = vrot.slane %v2390_v46, 1  ;;  %v847_v49 = vmax.f32 %v793_v5, 0.0  ;;  %v4458_v8 = vld [vmem:[%s4721_s16 + $0x64] sm:$0xf] }
 0x1bf   : > { %v6004_v4 = vsel %vm6751_vm5, %v2506_v14, %v2508_v43  ;;  %v4459_v47 = vld [vmem:[%s4721_s16 + $0x60] sm:$0xf]  ;;  %v6013_v46 = vrot.slane %v2023_v17, 7  ;;  %v2026_v14 = vshll.u32 %v4277_v58, 16  ;;  %v2394_v17 = vshrl.u32 %v1333_v42, 16  ;;  %vm6762_vm5 = vmmov %vm6754_vm1 }
 0x1c0   : > { %6752 = vst [vmem:[#allocation7_spill] sm:$0xff] %v6004_v4  ;;  %v848_v9 = vmax.f32 %v796_v34, 0.0  ;;  %v2393_v0 = vsel %vm6753_vm8, %v2388_v41, %v2392_v45  ;;  %v4308_v48 = vcombine.low %v4459_v47, %v4458_v8  ;;  %v4278_v41 = vcombine.low %v4697_v36, %v5426_v22  ;;  %v4460_v4 = vld [vmem:[%s4721_s16 + $0x68] sm:$0xf]  ;;  %vm6764_vm1 = vmmov %vm6761_vm7 }
 0x1c1   : > { %2457 = vrot.lane.b32.xlu0 %v2393_v0, %s4477_s13  ;;  %v6018_v0 = vpop.permute.xlu1 %3155  ;;  %v2021_v22 = vsel %vm1918_vm6, %v5959_v1, %v2020_v63  ;;  %v2396_v28 = vor.u32 %v2394_v17, %v2392_v45  ;;  %v2028_v42 = vor.u32 %v2026_v14, %v6013_v46  ;;  %v6051_v14 = vcombine.low %v1497_v20, %v4697_v36 }
 0x1c2   : > { %v867_v38 = vpack.c.bf16 %v848_v9, %v847_v49  ;;  %v2869_v47 = vrot.slane %v4308_v48, 1  ;;  %v2031_v21 = vshrl.u32 %v4278_v41, 16  ;;  %vm2058_vm13 = vcmp.ne.s16.totalorder %v2021_v22, 0 }
 0x1c3   : > { %v1334_v5 = vld [vmem:[#allocation2 + $0x60] sm:$0xff]  ;;  %v800_v34 = vpop.f32.mrb[52].mxu0  ;;  %vm1689_vm8 = vcmp.ne.s16.totalorder %v5670_v52, 0 }
 0x1c4   : > { %901 = vst.msk [vmem:[#allocation2 + $0x68] sm:$0xff] %vm6755_vm15, %v867_v38  ;;  %v2074_v44 = vsel %vm2057_vm3, %v1334_v5, 0  ;;  %v801_v62 = vadd.f32 %v5692_v16, %v800_v34  ;;  %v802_v49 = vpop.f32.mrb[53].mxu0  ;;  %v2398_v58 = vshll.u32 %v1334_v5, 16  ;;  %v6028_v38 = vsel %vm1687_vm11, %v1334_v5, 0  ;;  %vm6763_vm3 = vmmov %vm6759_vm4 }
 0x1c5   : > { %v2510_v9 = vrot.slane %v2074_v44, 1  ;;  %v803_v8 = vpop.f32.mrb[54].mxu0  ;;  %2901 = vrot.lane.b32.xlu0 %v2868_v26, %s4479_s17  ;;  %v4461_v26 = vld [vmem:[%s4721_s16 + $0x6c] sm:$0xf]  ;;  %v6057_v17 = vrot.slane %v2031_v21, 7  ;;  %vm6765_vm11 = vmmov %vm6760_vm2 }
 0x1c6   : > { %v804_v60 = vadd.f32 %v5692_v16, %v803_v8  ;;  %v805_v34 = vpop.f32.mrb[55].mxu0  ;;  %v2400_v49 = vrot.slane %v2398_v58, 1  ;;  %v4309_v2 = vcombine.low %v4460_v4, %v4461_v26  ;;  %v849_v1 = vmax.f32 %v801_v62, 0.0  ;;  %vm6766_vm15 = vmmov %vm6764_vm1 }
 0x1c7   : > { %v6033_v44 = vsel %vm6756_vm9, %v2508_v43, %v2510_v9  ;;  %v6045_v43 = vpop.permute.xlu1 %2737  ;;  %v2870_v4 = vsel %vm6758_vm10, %v5989_v6, %v2869_v47  ;;  %v2029_v62 = vsel %vm1918_vm6, %v5994_v30, %v2028_v42  ;;  %v2034_v58 = vshll.u32 %v4278_v41, 16 }
 0x1c8   : > { %v850_v63 = vmax.f32 %v804_v60, 0.0  ;;  %v2401_v45 = vsel %vm6757_vm12, %v2396_v28, %v2400_v49  ;;  %v6055_v28 = vrot.slane %v4309_v2, 1  ;;  %v2402_v60 = vshrl.u32 %v1334_v5, 16 }
 0x1c9   : > { %2459 = vrot.lane.b32.xlu0 %v2401_v45, %s4477_s13  ;;  %v4279_v2 = vcombine.low %v4697_v36, %v5475_v32  ;;  %v1664_v30 = vshrl.u32 %v5655_v40, 16  ;;  %v4463_v36 = vld [vmem:[%s4721_s16 + $0x74] sm:$0xf]  ;;  %vm2059_vm14 = vcmp.ne.s16.totalorder %v2029_v62, 0  ;;  %vm3285_vm10 = vcmask 556032  }
 0x1ca   : > { %v868_v48 = vpack.c.bf16 %v850_v63, %v849_v1  ;;  %v2404_v1 = vor.u32 %v2402_v60, %v2400_v49  ;;  %v1668_v63 = vshll.u32 %v6051_v14, 16 }
 0x1cb   : > { %v1335_v18 = vld [vmem:[#allocation2 + $0x68] sm:$0xff]  ;;  %v808_v54 = vpop.f32.mrb[56].mxu0  ;;  %v6077_v25 = vpop.permute.xlu1 %3157  ;;  %v2039_v49 = vshrl.u32 %v4279_v2, 16 }
 0x1cc   : > { %902 = vst.msk [vmem:[#allocation2 + $0x70] sm:$0xff] %vm6759_vm4, %v868_v48  ;;  %v2075_v8 = vsel %vm2058_vm13, %v1335_v18, 0  ;;  %v809_v6 = vadd.f32 %v5692_v16, %v808_v54  ;;  %v810_v22 = vpop.f32.mrb[57].mxu0  ;;  %v2406_v34 = vshll.u32 %v1335_v18, 16  ;;  %v6066_v21 = vsel %vm1688_vm0, %v1335_v18, 0  ;;  %vm6767_vm13 = vmmov %vm6760_vm2 }
 0x1cd   : > { %v2512_v26 = vrot.slane %v2075_v8, 1  ;;  %v811_v20 = vpop.f32.mrb[58].mxu0  ;;  %2903 = vrot.lane.b32.xlu0 %v2870_v4, %s4479_s17  ;;  %v2036_v48 = vor.u32 %v2034_v58, %v6057_v17  ;;  %v4462_v4 = vld [vmem:[%s4721_s16 + $0x70] sm:$0xf]  ;;  %v1666_v58 = vor.u32 %v1664_v30, %v5662_v15  ;;  %v6085_v22 = vrot.slane %v1668_v63, 1  ;;  %vm6768_vm0 = vmmov %vm6763_vm3 }
 0x1ce   : > { %v812_v41 = vadd.f32 %v5692_v16, %v811_v20  ;;  %v813_v42 = vpop.f32.mrb[59].mxu0  ;;  %v2408_v5 = vrot.slane %v2406_v34, 1  ;;  %v4310_v32 = vcombine.low %v4462_v4, %v4463_v36  ;;  %v851_v54 = vmax.f32 %v809_v6, 0.0  ;;  %vm6769_vm4 = vmmov %vm6768_vm0 }
 0x1cf   : > { %v6072_v45 = vsel %vm6760_vm2, %v2510_v9, %v2512_v26  ;;  %v2872_v16 = vsel %vm6762_vm5, %v2869_v47, %v6055_v28  ;;  %v2037_v6 = vsel %vm1918_vm6, %v6013_v46, %v2036_v48  ;;  %v4464_v47 = vld [vmem:[%s6527_s3] ss:$0 sm:$0xff]  ;;  %v6094_v63 = vrot.slane %v2039_v49, 7  ;;  %v6100_v48 = vpop.permute.xlu1 %2739  ;;  %v2732_v49 = vpop.permute.xlu0 %2731 }
 0x1d0   : > { %v852_v8 = vmax.f32 %v812_v41, 0.0  ;;  %v2409_v40 = vsel %vm6761_vm7, %v2404_v1, %v2408_v5  ;;  %v2873_v20 = vrot.slane %v4310_v32, 1  ;;  %v2410_v1 = vshrl.u32 %v1335_v18, 16  ;;  %vm6770_vm7 = vmmov %vm6762_vm5 }
 0x1d1   : > { %2461 = vrot.lane.b32.xlu0 %v2409_v40, %s4477_s13  ;;  %v2042_v36 = vshll.u32 %v4279_v2, 16  ;;  %v1671_v40 = vsel %vm6764_vm1, %v1666_v58, %v6085_v22  ;;  %vm2060_vm9 = vcmp.ne.s16.totalorder %v2037_v6, 0  ;;  %v4466_v58 = vld [vmem:[%s4721_s16 + $0x78] sm:$0xf]  ;;  %vm3320_vm2 = vcmask 588800  }
 0x1d2   : > { %v869_v9 = vpack.c.bf16 %v852_v8, %v851_v54  ;;  %v2412_v8 = vor.u32 %v2410_v1, %v2408_v5  ;;  %vm1690_vm12 = vcmp.ne.s16.totalorder %v1671_v40, 0  ;;  %v2874_v5 = vsel %vm6767_vm13, %v6055_v28, %v2873_v20  ;;  %vm6779_vm13 = vmmov %vm6768_vm0 }
 0x1d3   : > { %v1336_v60 = vld [vmem:[#allocation2 + $0x70] sm:$0xff]  ;;  %v816_v34 = vpop.f32.mrb[60].mxu0  ;;  %v6116_v1 = vpop.permute.xlu1 %3159 }
 0x1d4   : > { %903 = vst.msk [vmem:[#allocation2 + $0x78] sm:$0xff] %vm6763_vm3, %v869_v9  ;;  %v2076_v62 = vsel %vm2059_vm14, %v1336_v60, 0  ;;  %v817_v41 = vadd.f32 %v4464_v47, %v816_v34  ;;  %v818_v42 = vpop.f32.mrb[61].mxu0  ;;  %v2414_v4 = vshll.u32 %v1336_v60, 16  ;;  %v6098_v46 = vsel %vm1689_vm8, %v1336_v60, 0  ;;  %vm6771_vm14 = vmmov %vm6764_vm1 }
 0x1d5   : > { %v2514_v15 = vrot.slane %v2076_v62, 1  ;;  %v819_v30 = vpop.f32.mrb[62].mxu0  ;;  %2905 = vrot.lane.b32.xlu0 %v2872_v16, %s4479_s17  ;;  %v2044_v34 = vor.u32 %v2042_v36, %v6094_v63  ;;  %vm6772_vm8 = vmmov %vm6770_vm7  ;;  %vm1675_vm3 = vcmp.ne.s16.totalorder %v5711_v29, 0 }
 0x1d6   : > { %v820_v32 = vadd.f32 %v4464_v47, %v819_v30  ;;  %v821_v54 = vpop.f32.mrb[63].mxu0  ;;  %v2416_v18 = vrot.slane %v2414_v4, 1  ;;  %v853_v2 = vmax.f32 %v817_v41, 0.0  ;;  %v4465_v47 = vld [vmem:[%s4721_s16 + $0x7c] sm:$0xf]  ;;  %v2418_v4 = vshrl.u32 %v1336_v60, 16  ;;  %vm6773_vm1 = vmmov %vm6770_vm7 }
 0x1d7   : > { %v6105_v16 = vsel %vm6765_vm11, %v2512_v26, %v2514_v15  ;;  %v4311_v42 = vcombine.low %v4466_v58, %v4465_v47  ;;  %v3239_v26 = vsel %vm6768_vm0, %v5785_v56, %v2732_v49  ;;  %v3150_v54 = vpop.permute.xlu0 %3149  ;;  %vm6775_vm11 = vmmov %vm6768_vm0 }
 0x1d8   : > { %v854_v9 = vmax.f32 %v820_v32, 0.0  ;;  %v2417_v52 = vsel %vm6766_vm15, %v2412_v8, %v2416_v18  ;;  %v2045_v32 = vsel %vm1918_vm6, %v6057_v17, %v2044_v34  ;;  %v3289_v56 = vsel %vm3285_vm10, %v3239_v26, %v5898_v10  ;;  %v4467_v10 = vld [vmem:[%s4721_s16 + $0x80] sm:$0x1]  ;;  %vm6776_vm15 = vmmov %vm6771_vm14 }
 0x1d9   : > { %2463 = vrot.lane.b32.xlu0 %v2417_v52, %s4477_s13  ;;  %v2420_v8 = vor.u32 %v2418_v4, %v2416_v18  ;;  %v2875_v49 = vrot.slane %v4311_v42, 1  ;;  %vm2061_vm5 = vcmp.ne.s16.totalorder %v2045_v32, 0  ;;  %v6133_v52 = vpop.permute.xlu1 %2741  ;;  %v4312_v34 = vcombine.low %v4467_v10, %v4467_v10 }
 0x1da   : > { %v870_v62 = vpack.c.bf16 %v854_v9, %v853_v2  ;;  %v3324_v9 = vsel %vm3320_vm2, %v3289_v56, %v5919_v3  ;;  %v6774_v56 = vrot.slane %v5764_v61, 1 }
 0x1db   : > { %v1337_v41 = vld [vmem:[#allocation2 + $0x78] sm:$0xff]  ;;  %v2876_v17 = vsel %vm6772_vm8, %v2873_v20, %v2875_v49  ;;  %vm6783_vm8 = vmmov %vm6769_vm4 }
 0x1dc   : > { %904 = vst.msk [vmem:[#allocation2 + $0x80] sm:$0xff] %vm6769_vm4, %v870_v62  ;;  %v2077_v6 = vsel %vm2060_vm9, %v1337_v41, 0  ;;  %v2422_v30 = vshll.u32 %v1337_v41, 16  ;;  %v6119_v36 = vsel %vm1690_vm12, %v1337_v41, 0  ;;  %v2426_v3 = vshrl.u32 %v1337_v41, 16  ;;  %vm6777_vm9 = vmmov %vm6768_vm0 }
 0x1dd   : > { %v2516_v28 = vrot.slane %v2077_v6, 1  ;;  %2907 = vrot.lane.b32.xlu0 %v2874_v5, %s4479_s17  ;;  %v1322_v5 = vld [vmem:[#allocation2] sm:$0x80]  ;;  %vm6778_vm12 = vmmov %vm6773_vm1  ;;  %vm3711_vm0 = vcmask 621568  }
 0x1de   : > { %v2424_v40 = vrot.slane %v2422_v30, 1  ;;  %v2877_v30 = vrot.slane %v4312_v34, 1  ;;  %v1692_v32 = vsel %vm1675_vm3, %v1322_v5, 0  ;;  %v3404_v5 = vshll.u32 %v3324_v9, 16  ;;  %vm6784_vm3 = vmmov %vm6769_vm4 }
 0x1df   : > { %v6127_v60 = vsel %vm6770_vm7, %v2514_v15, %v2516_v28  ;;  %v3401_v15 = vshrl.u32 %v3324_v9, 16  ;;  %vm6780_vm7 = vmmov %vm6769_vm4 }
 0x1e0   : > { %v2425_v2 = vsel %vm6771_vm14, %v2420_v8, %v2424_v40  ;;  %v2428_v6 = vor.u32 %v2426_v3, %v2424_v40  ;;  %v6154_v8 = vpop.permute.xlu1 %3161  ;;  %vm6781_vm14 = vmmov %vm6769_vm4 }
 0x1e1   : > { %2465 = vrot.lane.b32.xlu0 %v2425_v2, %s4477_s13  ;;  %v3403_v10 = vrot.slane %v3401_v15, 7 }
 0x1e3   : > { %v6137_v18 = vld [vmem:[#allocation2 + $0x80] sm:$0xff] }
 0x1e4   : > { %v6141_v62 = vsel %vm2061_vm5, %v6137_v18, 0  ;;  %v4381_v47 = vpop.permute.xlu0 %4380  ;;  %v2430_v58 = vshll.u32 %v6137_v18, 16  ;;  %vm6782_vm5 = vmmov %vm6769_vm4 }
 0x1e5   : > { %v2518_v42 = vrot.slane %v6141_v62, 1  ;;  %v4382_v26 = vunpack.i.l.bf16 %v4381_v47  ;;  %2909 = vrot.lane.b32.xlu0 %v2876_v17, %s4479_s17  ;;  %v4383_v20 = vunpack.i.h.bf16 %v4381_v47 }
 0x1e6   : > { %v2432_v4 = vrot.slane %v2430_v58, 1  ;;  %v3406_v58 = vor.u32 %v3404_v5, %v3403_v10 }
 0x1e7   : > { %v6149_v29 = vsel %vm6773_vm1, %v2516_v28, %v2518_v42  ;;  %v3236_v41 = vsel %vm6775_vm11, %v6774_v56, %v4382_v26  ;;  %v3185_v17 = vsel %vm6777_vm9, %v1692_v32, %v4383_v20  ;;  %v2878_v28 = vsel %vm6778_vm12, %v2875_v49, %v2877_v30  ;;  %vm6785_vm1 = vmmov %vm6784_vm3 }
 0x1e8   : > { %v2433_v2 = vsel %vm6776_vm15, %v2428_v6, %v2432_v4  ;;  %v3287_v40 = vsel %vm3285_vm10, %v3236_v41, %v5935_v51  ;;  %v3388_v15 = vshrl.u32 %v3185_v17, 16  ;;  %v2434_v51 = vshrl.u32 %v6137_v18, 16  ;;  %vm6786_vm11 = vmmov %vm6785_vm1 }
 0x1e9   : > { %2467 = vrot.lane.b32.xlu0 %v2433_v2, %s4477_s13  ;;  %v3322_v34 = vsel %vm3320_vm2, %v3287_v40, %v3150_v54  ;;  %v3242_v49 = vsel %vm6769_vm4, %v5808_v11, %v5953_v57  ;;  %v6170_v54 = vpop.permute.xlu1 %2743  ;;  %vm6787_vm15 = vmmov %vm6785_vm1 }
 0x1ea   : > { %v3398_v47 = vshrl.u32 %v3322_v34, 16  ;;  %v2436_v32 = vor.u32 %v2434_v51, %v2432_v4  ;;  %v3390_v40 = vrot.slane %v3388_v15, 7  ;;  %vm6788_vm9 = vmmov %vm6785_vm1 }
 0x1eb   : > { %v2440_v61 = vpop.permute.xlu0 %2439  ;;  %vm6789_vm12 = vmmov %vm6785_vm1 }
 0x1ec   : > { %v3188_v3 = vsel %vm6779_vm13, %v5747_v33, %v2440_v61  ;;  %v3400_v6 = vrot.slane %v3398_v47, 7  ;;  %vm6790_vm13 = vmmov %vm6785_vm1 }
 0x1ed   : > { %v3391_v26 = vshrl.u32 %v3188_v3, 16  ;;  %2911 = vrot.lane.b32.xlu0 %v2878_v28, %s4479_s17  ;;  %v3394_v20 = vshll.u32 %v3188_v3, 16  ;;  %v6179_v28 = vpop.permute.xlu1 %3163  ;;  %vm6791_vm4 = vmmov %vm6785_vm1 }
 0x1ee   : > { %v3407_v33 = vsel %vm1918_vm6, %v3400_v6, %v3406_v58 }
 0x1ef   : > { %v3393_v9 = vrot.slane %v3391_v26, 7  ;;  %v2884_v30 = vpop.permute.xlu0 %2883  ;;  %4344 = vmatprep.mubr.msk.bf16.mxu1 %vm3711_vm0, %v3407_v33 }
 0x1f0   : > { %v3291_v56 = vsel %vm3285_vm10, %v3242_v49, %v2884_v30 }
 0x1f1   : > { %v3396_v41 = vor.u32 %v3394_v20, %v3393_v9  ;;  %v3326_v2 = vsel %vm3320_vm2, %v3291_v56, %v5979_v59  ;;  %2469 = vrot.lane.b32.xlu0 %v2436_v32, %s4477_s13  ;;  %v3245_v59 = vsel %vm6781_vm14, %v5831_v13, %v6000_v31  ;;  %vm6794_vm14 = vmmov %vm6785_vm1 }
 0x1f2   : > { %v3415_v11 = vshrl.u32 %v3326_v2, 16  ;;  %v3418_v5 = vshll.u32 %v3326_v2, 16 }
 0x1f3   : > { %v2442_v57 = vpop.permute.xlu0 %2441  ;;  %v3397_v17 = vsel %vm1918_vm6, %v3390_v40, %v3396_v41 }
 0x1f4   : > { %v3417_v34 = vrot.slane %v3415_v11, 7  ;;  %v3191_v4 = vsel %vm6780_vm7, %v5779_v7, %v2442_v57  ;;  %3797 = vmatmul.mubr.bf16.vlgmr.msra.gmra.mrb[0].mxu1 %v3397_v17  ;;  %v6191_v7 = vpop.permute.xlu1 %2745  ;;  %vm6792_vm7 = vmmov %vm6785_vm1 }
 0x1f5   : > { %v3408_v61 = vshrl.u32 %v3191_v4, 16  ;;  %v3411_v58 = vshll.u32 %v3191_v4, 16 }
 0x1f6   : > { %v3420_v47 = vor.u32 %v3418_v5, %v3417_v34 }
 0x1f7   : > { %v3410_v3 = vrot.slane %v3408_v61, 7  ;;  %v2886_v15 = vpop.permute.xlu0 %2885 }
 0x1f8   : > { %v3293_v26 = vsel %vm3285_vm10, %v3245_v59, %v2886_v15  ;;  %v3421_v6 = vsel %vm1918_vm6, %v3403_v10, %v3420_v47  ;;  %v6199_v11 = vpop.permute.xlu1 %3165 }
 0x1f9   : > { %v3413_v51 = vor.u32 %v3411_v58, %v3410_v3  ;;  %v3328_v49 = vsel %vm3320_vm2, %v3293_v26, %v6018_v0  ;;  %4345 = vmatprep.mubr.msk.bf16.mxu1 %vm3711_vm0, %v3421_v6  ;;  %v3248_v0 = vsel %vm6783_vm8, %v5852_v39, %v6045_v43  ;;  %vm6798_vm8 = vmmov %vm6785_vm1 }
 0x1fa   : > { %v3429_v20 = vshrl.u32 %v3328_v49, 16  ;;  %v3432_v31 = vshll.u32 %v3328_v49, 16 }
 0x1fb   : > { %v2444_v30 = vpop.permute.xlu0 %2443  ;;  %v3414_v33 = vsel %vm1918_vm6, %v3393_v9, %v3413_v51 }
 0x1fc   : > { %v3431_v13 = vrot.slane %v3429_v20, 7  ;;  %v3194_v32 = vsel %vm6782_vm5, %v5804_v19, %v2444_v30  ;;  %3805 = vmatmul.mubr.bf16.gmra.mrb[4].mxu1 %v3414_v33  ;;  %v6209_v58 = vpop.permute.xlu1 %2747  ;;  %vm6796_vm5 = vmmov %vm6785_vm1 }
 0x1fd   : > { %v3422_v56 = vshrl.u32 %v3194_v32, 16  ;;  %v3425_v2 = vshll.u32 %v3194_v32, 16 }
 0x1fe   : > { %v3434_v10 = vor.u32 %v3432_v31, %v3431_v13 }
 0x1ff   : > { %v3424_v41 = vrot.slane %v3422_v56, 7  ;;  %v2888_v40 = vpop.permute.xlu0 %2887 }
 0x200   : > { %v3295_v57 = vsel %vm3285_vm10, %v3248_v0, %v2888_v40  ;;  %v3435_v9 = vsel %vm1918_vm6, %v3417_v34, %v3434_v10  ;;  %v6220_v31 = vpop.permute.xlu1 %3167 }
 0x201   : > { %v3427_v17 = vor.u32 %v3425_v2, %v3424_v41  ;;  %v3330_v19 = vsel %vm3320_vm2, %v3295_v57, %v6077_v25  ;;  %4346 = vmatprep.mubr.msk.bf16.mxu1 %vm3711_vm0, %v3435_v9  ;;  %v3251_v25 = vsel %vm6785_vm1, %v5875_v23, %v6100_v48 }
 0x202   : > { %v3443_v5 = vshrl.u32 %v3330_v19, 16  ;;  %v3446_v43 = vshll.u32 %v3330_v19, 16 }
 0x203   : > { %v2446_v4 = vpop.permute.xlu0 %2445  ;;  %v3428_v61 = vsel %vm1918_vm6, %v3410_v3, %v3427_v17 }
 0x204   : > { %v3445_v39 = vrot.slane %v3443_v5, 7  ;;  %v3197_v47 = vsel %vm6784_vm3, %v5827_v55, %v2446_v4  ;;  %3813 = vmatmul.mubr.bf16.gmra.mrb[8].mxu1 %v3428_v61  ;;  %vm6800_vm3 = vmmov %vm6785_vm1 }
 0x205   : > { %v3436_v59 = vshrl.u32 %v3197_v47, 16  ;;  %v3439_v26 = vshll.u32 %v3197_v47, 16 }
 0x206   : > { %v3448_v34 = vor.u32 %v3446_v43, %v3445_v39 }
 0x207   : > { %v3438_v15 = vrot.slane %v3436_v59, 7  ;;  %v2890_v6 = vpop.permute.xlu0 %2889 }
 0x208   : > { %v3297_v51 = vsel %vm3285_vm10, %v3251_v25, %v2890_v6  ;;  %v3449_v3 = vsel %vm1918_vm6, %v3431_v13, %v3448_v34 }
 0x209   : > { %v3441_v49 = vor.u32 %v3439_v26, %v3438_v15  ;;  %v3332_v55 = vsel %vm3320_vm2, %v3297_v51, %v6116_v1  ;;  %4347 = vmatprep.mubr.msk.bf16.mxu1 %vm3711_vm0, %v3449_v3  ;;  %v3254_v1 = vsel %vm6787_vm15, %v5896_v37, %v6133_v52  ;;  %vm6803_vm15 = vmmov %vm6785_vm1 }
 0x20a   : > { %v3457_v20 = vshrl.u32 %v3332_v55, 16  ;;  %v3460_v48 = vshll.u32 %v3332_v55, 16 }
 0x20b   : > { %v2448_v30 = vpop.permute.xlu0 %2447  ;;  %v3442_v33 = vsel %vm1918_vm6, %v3424_v41, %v3441_v49 }
 0x20c   : > { %v3459_v23 = vrot.slane %v3457_v20, 7  ;;  %v3200_v32 = vsel %vm6786_vm11, %v5848_v24, %v2448_v30  ;;  %3821 = vmatmul.mubr.bf16.gmra.mrb[12].mxu1 %v3442_v33  ;;  %v6232_v24 = vpop.permute.xlu1 %2749  ;;  %v3260_v33 = vsel %vm6791_vm4, %v5948_v12, %v6191_v7  ;;  %vm6802_vm11 = vmmov %vm6785_vm1 }
 0x20d   : > { %v3450_v56 = vshrl.u32 %v3200_v32, 16  ;;  %v3453_v0 = vshll.u32 %v3200_v32, 16  ;;  %vm6807_vm4 = vmmov %vm6785_vm1 }
 0x20e   : > { %v3462_v13 = vor.u32 %v3460_v48, %v3459_v23 }
 0x20f   : > { %v3452_v10 = vrot.slane %v3450_v56, 7  ;;  %v2892_v2 = vpop.permute.xlu0 %2891 }
 0x210   : > { %v3299_v40 = vsel %vm3285_vm10, %v3254_v1, %v2892_v2  ;;  %v3463_v41 = vsel %vm1918_vm6, %v3445_v39, %v3462_v13  ;;  %v6240_v34 = vpop.permute.xlu1 %3169 }
 0x211   : > { %v3455_v57 = vor.u32 %v3453_v0, %v3452_v10  ;;  %v3334_v9 = vsel %vm3320_vm2, %v3299_v40, %v6154_v8  ;;  %4348 = vmatprep.mubr.msk.bf16.mxu1 %vm3711_vm0, %v3463_v41  ;;  %v3257_v8 = vsel %vm6789_vm12, %v5923_v53, %v6170_v54  ;;  %vm6805_vm12 = vmmov %vm6785_vm1 }
 0x212   : > { %v3471_v17 = vshrl.u32 %v3334_v9, 16  ;;  %v3474_v52 = vshll.u32 %v3334_v9, 16  ;;  %v6793_v9 = vld [vmem:[#allocation6_spill] sm:$0xff] }
 0x213   : > { %v2450_v19 = vpop.permute.xlu0 %2449  ;;  %v3456_v5 = vsel %vm1918_vm6, %v3438_v15, %v3455_v57 }
 0x214   : > { %v3473_v37 = vrot.slane %v3471_v17, 7  ;;  %v3203_v4 = vsel %vm6788_vm9, %v5871_v27, %v2450_v19  ;;  %3829 = vmatmul.mubr.bf16.gmra.mrb[16].mxu1 %v3456_v5  ;;  %v2752_v20 = vpop.permute.xlu1 %2751  ;;  %v3263_v17 = vsel %vm6794_vm14, %v6793_v9, %v6209_v58  ;;  %vm6804_vm9 = vmmov %vm6785_vm1 }
 0x215   : > { %v3464_v61 = vshrl.u32 %v3203_v4, 16  ;;  %v3467_v47 = vshll.u32 %v3203_v4, 16  ;;  %vm6808_vm14 = vmmov %vm6785_vm1 }
 0x216   : > { %v3476_v39 = vor.u32 %v3474_v52, %v3473_v37 }
 0x217   : > { %v3466_v43 = vrot.slane %v3464_v61, 7  ;;  %v2894_v59 = vpop.permute.xlu0 %2893 }
 0x218   : > { %v3301_v25 = vsel %vm3285_vm10, %v3257_v8, %v2894_v59  ;;  %v3477_v15 = vsel %vm1918_vm6, %v3459_v23, %v3476_v39  ;;  %v3172_v2 = vpop.permute.xlu1 %3171  ;;  %v6795_v59 = vld [vmem:[#allocation3_spill] sm:$0xff] }
 0x219   : > { %v3469_v26 = vor.u32 %v3467_v47, %v3466_v43  ;;  %v3336_v27 = vsel %vm3320_vm2, %v3301_v25, %v6179_v28  ;;  %4349 = vmatprep.mubr.msk.bf16.mxu1 %vm3711_vm0, %v3477_v15 }
 0x21a   : > { %v3485_v6 = vshrl.u32 %v3336_v27, 16  ;;  %v3488_v54 = vshll.u32 %v3336_v27, 16  ;;  %v6797_v27 = vld [vmem:[#allocation7_spill] sm:$0xff] }
 0x21b   : > { %v2452_v51 = vpop.permute.xlu0 %2451  ;;  %v3470_v3 = vsel %vm1918_vm6, %v3452_v10, %v3469_v26 }
 0x21c   : > { %v3487_v53 = vrot.slane %v3485_v6, 7  ;;  %v3206_v49 = vsel %vm6790_vm13, %v5892_v50, %v2452_v51  ;;  %3837 = vmatmul.mubr.bf16.gmra.mrb[20].mxu1 %v3470_v3  ;;  %v3266_v6 = vsel %vm6798_vm8, %v6797_v27, %v6232_v24  ;;  %vm6806_vm13 = vmmov %vm6785_vm1  ;;  %vm6810_vm8 = vcmask 1046528  }
 0x21d   : > { %v3478_v55 = vshrl.u32 %v3206_v49, 16  ;;  %v3481_v23 = vshll.u32 %v3206_v49, 16 }
 0x21e   : > { %v3490_v30 = vor.u32 %v3488_v54, %v3487_v53 }
 0x21f   : > { %v3480_v28 = vrot.slane %v3478_v55, 7  ;;  %v2896_v48 = vpop.permute.xlu0 %2895 }
 0x220   : > { %v3303_v32 = vsel %vm3285_vm10, %v3260_v33, %v2896_v48  ;;  %v3491_v56 = vsel %vm1918_vm6, %v3473_v37, %v3490_v30 }
 0x221   : > { %v3483_v13 = vor.u32 %v3481_v23, %v3480_v28  ;;  %v3338_v1 = vsel %vm3320_vm2, %v3303_v32, %v6199_v11  ;;  %4350 = vmatprep.mubr.msk.bf16.mxu1 %vm3711_vm0, %v3491_v56  ;;  %v6799_v32 = vld [vmem:[#allocation4_spill] sm:$0xff] }
 0x222   : > { %v3499_v50 = vshrl.u32 %v3338_v1, 16  ;;  %v3502_v12 = vshll.u32 %v3338_v1, 16 }
 0x223   : > { %v2454_v10 = vpop.permute.xlu0 %2453  ;;  %v3484_v0 = vsel %vm1918_vm6, %v3466_v43, %v3483_v13 }
 0x224   : > { %v3501_v40 = vrot.slane %v3499_v50, 7  ;;  %v3209_v7 = vsel %vm6792_vm7, %v5917_v35, %v2454_v10  ;;  %3845 = vmatmul.mubr.bf16.gmra.mrb[24].mxu1 %v3484_v0  ;;  %v2754_v35 = vpop.permute.xlu1 %2753  ;;  %v3269_v10 = vsel %vm6785_vm1, %v6033_v44, %v2752_v20  ;;  %v6801_v44 = vld [vmem:[#allocation5_spill] sm:$0xff]  ;;  %vm2062_vm7 = vcmp.ne.s16.totalorder %v6094_v63, 0 }
 0x225   : > { %v3492_v41 = vshrl.u32 %v3209_v7, 16  ;;  %v3495_v19 = vshll.u32 %v3209_v7, 16 }
 0x226   : > { %v3504_v57 = vor.u32 %v3502_v12, %v3501_v40 }
 0x227   : > { %v3494_v11 = vrot.slane %v3492_v41, 7  ;;  %v2898_v5 = vpop.permute.xlu0 %2897 }
 0x228   : > { %v3305_v37 = vsel %vm3285_vm10, %v3263_v17, %v2898_v5  ;;  %v3505_v52 = vsel %vm1918_vm6, %v3487_v53, %v3504_v57  ;;  %v3174_v53 = vpop.permute.xlu1 %3173 }
 0x229   : > { %v3497_v4 = vor.u32 %v3495_v19, %v3494_v11  ;;  %v3340_v61 = vsel %vm3320_vm2, %v3305_v37, %v6220_v31  ;;  %4351 = vmatprep.mubr.msk.bf16.mxu1 %vm3711_vm0, %v3505_v52 }
 0x22a   : > { %v3513_v39 = vshrl.u32 %v3340_v61, 16  ;;  %v3516_v58 = vshll.u32 %v3340_v61, 16  ;;  %v3272_v61 = vsel %vm6803_vm15, %v6072_v45, %v2754_v35  ;;  %vm6812_vm15 = vmmov %vm6785_vm1 }
 0x22b   : > { %v2456_v8 = vpop.permute.xlu0 %2455  ;;  %v3498_v43 = vsel %vm1918_vm6, %v3480_v28, %v3497_v4 }
 0x22c   : > { %v3515_v47 = vrot.slane %v3513_v39, 7  ;;  %v3212_v25 = vsel %vm6796_vm5, %v6795_v59, %v2456_v8  ;;  %3853 = vmatmul.mubr.bf16.gmra.mrb[28].mxu1 %v3498_v43  ;;  %v2756_v1 = vpop.permute.xlu1 %2755  ;;  %vm6809_vm5 = vmmov %vm6785_vm1 }
 0x22d   : > { %v3506_v15 = vshrl.u32 %v3212_v25, 16  ;;  %v3509_v51 = vshll.u32 %v3212_v25, 16 }
 0x22e   : > { %v3518_v26 = vor.u32 %v3516_v58, %v3515_v47 }
 0x22f   : > { %v3508_v31 = vrot.slane %v3506_v15, 7  ;;  %v2900_v3 = vpop.permute.xlu0 %2899 }
 0x230   : > { %v3307_v54 = vsel %vm3285_vm10, %v3266_v6, %v2900_v3  ;;  %v3519_v49 = vsel %vm1918_vm6, %v3501_v40, %v3518_v26  ;;  %v3176_v19 = vpop.permute.xlu1 %3175  ;;  %v3275_v3 = vsel %vm6805_vm12, %v6105_v16, %v2756_v1 }
 0x231   : > { %v3511_v55 = vor.u32 %v3509_v51, %v3508_v31  ;;  %v3342_v30 = vsel %vm3320_vm2, %v3307_v54, %v6240_v34  ;;  %4352 = vmatprep.mubr.msk.bf16.mxu1 %vm3711_vm0, %v3519_v49 }
 0x232   : > { %v3527_v33 = vshrl.u32 %v3342_v30, 16  ;;  %v3530_v24 = vshll.u32 %v3342_v30, 16 }
 0x233   : > { %v2458_v28 = vpop.permute.xlu0 %2457  ;;  %v3512_v23 = vsel %vm1918_vm6, %v3494_v11, %v3511_v55 }
 0x234   : > { %v3529_v48 = vrot.slane %v3527_v33, 7  ;;  %v3215_v56 = vsel %vm6800_vm3, %v6799_v32, %v2458_v28  ;;  %3861 = vmatmul.mubr.bf16.gmra.mrb[32].mxu1 %v3512_v23  ;;  %v2758_v25 = vpop.permute.xlu1 %2757  ;;  %vm6811_vm3 = vmmov %vm6785_vm1 }
 0x235   : > { %v3520_v13 = vshrl.u32 %v3215_v56, 16  ;;  %v3523_v34 = vshll.u32 %v3215_v56, 16 }
 0x236   : > { %v3532_v50 = vor.u32 %v3530_v24, %v3529_v48 }
 0x237   : > { %v3522_v0 = vrot.slane %v3520_v13, 7  ;;  %v2902_v40 = vpop.permute.xlu0 %2901 }
 0x238   : > { %v3309_v12 = vsel %vm3285_vm10, %v3269_v10, %v2902_v40  ;;  %v3533_v7 = vsel %vm1918_vm6, %v3515_v47, %v3532_v50  ;;  %v3178_v55 = vpop.permute.xlu1 %3177  ;;  %v3278_v10 = vsel %vm6807_vm4, %v6127_v60, %v2758_v25 }
 0x239   : > { %v3525_v41 = vor.u32 %v3523_v34, %v3522_v0  ;;  %v3344_v57 = vsel %vm3320_vm2, %v3309_v12, %v3172_v2  ;;  %4353 = vmatprep.mubr.msk.bf16.mxu1 %vm3711_vm0, %v3533_v7 }
 0x23a   : > { %v3541_v9 = vshrl.u32 %v3344_v57, 16  ;;  %v3544_v37 = vshll.u32 %v3344_v57, 16 }
 0x23b   : > { %v2460_v17 = vpop.permute.xlu0 %2459  ;;  %v3526_v11 = vsel %vm1918_vm6, %v3508_v31, %v3525_v41 }
 0x23c   : > { %v3543_v5 = vrot.slane %v3541_v9, 7  ;;  %v3218_v20 = vsel %vm6802_vm11, %v6801_v44, %v2460_v17  ;;  %3869 = vmatmul.mubr.bf16.gmra.mrb[36].mxu1 %v3526_v11  ;;  %v2760_v1 = vpop.permute.xlu1 %2759 }
 0x23d   : > { %v3534_v52 = vshrl.u32 %v3218_v20, 16  ;;  %v3537_v2 = vshll.u32 %v3218_v20, 16 }
 0x23e   : > { %v3546_v4 = vor.u32 %v3544_v37, %v3543_v5 }
 0x23f   : > { %v3536_v39 = vrot.slane %v3534_v52, 7  ;;  %v2904_v8 = vpop.permute.xlu0 %2903 }
 0x240   : > { %v3311_v43 = vsel %vm3285_vm10, %v3272_v61, %v2904_v8  ;;  %v3547_v47 = vsel %vm1918_vm6, %v3529_v48, %v3546_v4  ;;  %v3180_v60 = vpop.permute.xlu1 %3179  ;;  %v3281_v4 = vsel %vm6809_vm5, %v6149_v29, %v2760_v1 }
 0x241   : > { %v3539_v58 = vor.u32 %v3537_v2, %v3536_v39  ;;  %v3346_v59 = vsel %vm3320_vm2, %v3311_v43, %v3174_v53  ;;  %4354 = vmatprep.mubr.msk.bf16.mxu1 %vm3711_vm0, %v3547_v47  ;;  %v1672_v2 = vshrl.u32 %v6051_v14, 16 }
 0x242   : > { %v3555_v15 = vshrl.u32 %v3346_v59, 16  ;;  %v3558_v31 = vshll.u32 %v3346_v59, 16 }
 0x243   : > { %v2462_v26 = vpop.permute.xlu0 %2461  ;;  %v3540_v27 = vsel %vm1918_vm6, %v3522_v0, %v3539_v58 }
 0x244   : > { %v3557_v6 = vrot.slane %v3555_v15, 7  ;;  %v3221_v45 = vsel %vm6804_vm9, %v6028_v38, %v2462_v26  ;;  %3877 = vmatmul.mubr.bf16.gmra.mrb[40].mxu1 %v3540_v27  ;;  %v2762_v59 = vpop.permute.xlu1 %2761  ;;  %v1674_v26 = vor.u32 %v1672_v2, %v6085_v22 }
 0x245   : > { %v3548_v35 = vshrl.u32 %v3221_v45, 16  ;;  %v3551_v53 = vshll.u32 %v3221_v45, 16 }
 0x246   : > { %v3560_v51 = vor.u32 %v3558_v31, %v3557_v6  ;;  %vm1691_vm11 = vcmp.ne.s16.totalorder %v1674_v26, 0 }
 0x247   : > { %v3550_v54 = vrot.slane %v3548_v35, 7  ;;  %v2906_v49 = vpop.permute.xlu0 %2905 }
 0x248   : > { %v3313_v30 = vsel %vm3285_vm10, %v3275_v3, %v2906_v49  ;;  %v3561_v33 = vsel %vm1918_vm6, %v3543_v5, %v3560_v51  ;;  %v3182_v51 = vpop.permute.xlu1 %3181 }
 0x249   : > { %v3553_v28 = vor.u32 %v3551_v53, %v3550_v54  ;;  %v3348_v23 = vsel %vm3320_vm2, %v3313_v30, %v3176_v19  ;;  %4355 = vmatprep.mubr.msk.bf16.mxu1 %vm3711_vm0, %v3561_v33  ;;  %v1708_v30 = vsel %vm1691_vm11, %v6137_v18, 0  ;;  %v6348_v18 = vld [vmem:[%s6529_s5] ss:$0 sm:$0xff] }
 0x24a   : > { %v3569_v38 = vshrl.u32 %v3348_v23, 16  ;;  %v3572_v56 = vshll.u32 %v3348_v23, 16 }
 0x24b   : > { %v2464_v48 = vpop.permute.xlu0 %2463  ;;  %v3554_v24 = vsel %vm1918_vm6, %v3536_v39, %v3553_v28 }
 0x24c   : > { %v3571_v32 = vrot.slane %v3569_v38, 7  ;;  %v3224_v16 = vsel %vm6806_vm13, %v6066_v21, %v2464_v48  ;;  %3885 = vmatmul.mubr.bf16.gmra.mrb[44].mxu1 %v3554_v24  ;;  %v1709_v21 = vld [vmem:[#allocation2 + $0x88] sm:$0x1] }
 0x24d   : > { %v3562_v13 = vshrl.u32 %v3224_v16, 16  ;;  %v3565_v34 = vshll.u32 %v3224_v16, 16  ;;  %v2079_v44 = vsel %vm2062_vm7, %v1709_v21, 0 }
 0x24e   : > { %v3574_v50 = vor.u32 %v3572_v56, %v3571_v32  ;;  %v2520_v8 = vrot.slane %v2079_v44, 1 }
 0x24f   : > { %v3564_v0 = vrot.slane %v3562_v13, 7  ;;  %v2908_v40 = vpop.permute.xlu0 %2907 }
 0x250   : > { %v3315_v12 = vsel %vm3285_vm10, %v3278_v10, %v2908_v40  ;;  %v3575_v7 = vsel %vm1918_vm6, %v3557_v6, %v3574_v50  ;;  %v2521_v14 = vsel %vm6810_vm8, %v2518_v42, %v2520_v8 }
 0x251   : > { %v3567_v41 = vor.u32 %v3565_v34, %v3564_v0  ;;  %v3350_v57 = vsel %vm3320_vm2, %v3315_v12, %v3178_v55  ;;  %4356 = vmatprep.mubr.msk.bf16.mxu1 %vm3711_vm0, %v3575_v7  ;;  %v3284_v3 = vsel %vm6785_vm1, %v2521_v14, %v2762_v59  ;;  %v6354_v12 = vld [vmem:[%s6530_s6] ss:$0 sm:$0xff] }
 0x252   : > { %v3583_v9 = vshrl.u32 %v3350_v57, 16  ;;  %v3586_v5 = vshll.u32 %v3350_v57, 16 }
 0x253   : > { %v2466_v17 = vpop.permute.xlu0 %2465  ;;  %v3568_v11 = vsel %vm1918_vm6, %v3550_v54, %v3567_v41 }
 0x254   : > { %v3585_v19 = vrot.slane %v3583_v9, 7  ;;  %v3227_v37 = vsel %vm6808_vm14, %v6098_v46, %v2466_v17  ;;  %3893 = vmatmul.mubr.bf16.gmra.mrb[48].mxu1 %v3568_v11 }
 0x255   : > { %v3576_v20 = vshrl.u32 %v3227_v37, 16  ;;  %v3579_v39 = vshll.u32 %v3227_v37, 16 }
 0x256   : > { %v3588_v52 = vor.u32 %v3586_v5, %v3585_v19 }
 0x257   : > { %v3578_v61 = vrot.slane %v3576_v20, 7  ;;  %v2910_v63 = vpop.permute.xlu0 %2909 }
 0x258   : > { %v3317_v43 = vsel %vm3285_vm10, %v3281_v4, %v2910_v63  ;;  %v3589_v47 = vsel %vm1918_vm6, %v3571_v32, %v3588_v52 }
 0x259   : > { %v3581_v58 = vor.u32 %v3579_v39, %v3578_v61  ;;  %v3352_v46 = vsel %vm3320_vm2, %v3317_v43, %v3180_v60  ;;  %4357 = vmatprep.mubr.msk.bf16.mxu1 %vm3711_vm0, %v3589_v47 }
 0x25a   : > { %v3597_v25 = vshrl.u32 %v3352_v46, 16  ;;  %v3600_v6 = vshll.u32 %v3352_v46, 16 }
 0x25b   : > { %v2468_v15 = vpop.permute.xlu0 %2467  ;;  %v3582_v29 = vsel %vm1918_vm6, %v3564_v0, %v3581_v58 }
 0x25c   : > { %v3599_v27 = vrot.slane %v3597_v25, 7  ;;  %v3230_v31 = vsel %vm6811_vm3, %v6119_v36, %v2468_v15  ;;  %3901 = vmatmul.mubr.bf16.gmra.mrb[52].mxu1 %v3582_v29 }
 0x25d   : > { %v3590_v45 = vshrl.u32 %v3230_v31, 16  ;;  %v3593_v53 = vshll.u32 %v3230_v31, 16 }
 0x25e   : > { %v3602_v35 = vor.u32 %v3600_v6, %v3599_v27 }
 0x25f   : > { %v3592_v54 = vrot.slane %v3590_v45, 7  ;;  %v2912_v49 = vpop.permute.xlu0 %2911 }
 0x260   : > { %v3319_v22 = vsel %vm3285_vm10, %v3284_v3, %v2912_v49  ;;  %v3603_v62 = vsel %vm1918_vm6, %v3585_v19, %v3602_v35  ;;  %vm6814_vm10 = vmmov %vm6785_vm1 }
 0x261   : > { %v3595_v42 = vor.u32 %v3593_v53, %v3592_v54  ;;  %v3354_v55 = vsel %vm3320_vm2, %v3319_v22, %v3182_v51  ;;  %4358 = vmatprep.mubr.msk.bf16.mxu1 %vm3711_vm0, %v3603_v62  ;;  %vm6815_vm2 = vmmov %vm6785_vm1 }
 0x262   : > { %v3611_v36 = vshrl.u32 %v3354_v55, 16  ;;  %v3614_v38 = vshll.u32 %v3354_v55, 16 }
 0x263   : > { %v2470_v33 = vpop.permute.xlu0 %2469  ;;  %v3596_v28 = vsel %vm1918_vm6, %v3578_v61, %v3595_v42 }
 0x264   : > { %v3613_v23 = vrot.slane %v3611_v36, 7  ;;  %v3233_v48 = vsel %vm6812_vm15, %v1708_v30, %v2470_v33  ;;  %3909 = vmatmul.mubr.bf16.gmra.mrb[56].mxu1 %v3596_v28 }
 0x265   : > { %v3604_v24 = vshrl.u32 %v3233_v48, 16  ;;  %v3607_v16 = vshll.u32 %v3233_v48, 16 }
 0x266   : > { %v3616_v32 = vor.u32 %v3614_v38, %v3613_v23 }
 0x267   : > { %v3606_v56 = vrot.slane %v3604_v24, 7 }
 0x268   : > { %v3617_v13 = vsel %vm1918_vm6, %v3599_v27, %v3616_v32 }
 0x269   : > { %v3609_v1 = vor.u32 %v3607_v16, %v3606_v56  ;;  %4359 = vmatprep.mubr.msk.bf16.mxu1 %vm3711_vm0, %v3617_v13  ;;  %vm6816_vm0 = vmmov %vm6785_vm1 }
 0x26a   : > { %vm6817_vm9 = vmmov %vm6816_vm0 }
 0x26b   : > { %v3610_v50 = vsel %vm1918_vm6, %v3592_v54, %v3609_v1  ;;  %vm6813_vm6 = vmmov %vm6785_vm1 }
 0x26c   : > { %3917 = vmatmul.mubr.bf16.gmra.mrb[60].mxu1 %v3610_v50  ;;  %vm6818_vm12 = vmmov %vm6816_vm0 }
 0x26d   : > { %vm6819_vm13 = vmmov %vm6816_vm0 }
 0x26e   : > { %vm6820_vm4 = vmmov %vm6816_vm0 }
 0x26f   : > { %vm6821_vm7 = vmmov %vm6816_vm0 }
 0x270   : > { %vm6822_vm14 = vmmov %vm6816_vm0 }
 0x271   : > { %vm6823_vm5 = vmmov %vm6816_vm0 }
 0x272   : > { %vm6824_vm8 = vmmov %vm6816_vm0 }
 0x273   : > { %vm6825_vm3 = vmmov %vm6816_vm0 }
 0x274   : > { %vm6826_vm1 = vmmov %vm6816_vm0 }
 0x275   : > { %vm6827_vm11 = vmmov %vm6816_vm0 }
 0x276   : > { %vm6828_vm15 = vmmov %vm6816_vm0 }
 0x2c7   : > { %v3798_v10 = vpop.f32.mrb[0].mxu1 }
 0x2c8   : > { %v3799_v0 = vadd.f32 %v6348_v18, %v3798_v10  ;;  %v3800_v34 = vpop.f32.mrb[1].mxu1 }
 0x2c9   : > { %v3801_v40 = vpop.f32.mrb[2].mxu1 }
 0x2ca   : > { %v3925_v7 = vmax.f32 %v3799_v0, 0.0  ;;  %v3802_v41 = vadd.f32 %v6348_v18, %v3801_v40  ;;  %v3803_v57 = vpop.f32.mrb[3].mxu1 }
 0x2cc   : > { %v3926_v21 = vmax.f32 %v3802_v41, 0.0  ;;  %v3964_v9 = vmul.f32 %v6354_v12, %v3925_v7 }
 0x2ce   : > { %v3996_v17 = vsel %vm6813_vm6, %v3964_v9, 0.0  ;;  %v3965_v11 = vmul.f32 %v6354_v12, %v3926_v21  ;;  %vm6829_vm6 = vmmov %vm6816_vm0 }
 0x2cf   : > { %v3806_v60 = vpop.f32.mrb[4].mxu1  ;;  %3997 = vadd.xlane.f32.xlu1 %v3996_v17 }
 0x2d0   : > { %v3807_v19 = vadd.f32 %v6348_v18, %v3806_v60  ;;  %v3808_v5 = vpop.f32.mrb[5].mxu1  ;;  %v3999_v37 = vsel %vm6814_vm10, %v3965_v11, 0.0  ;;  %vm6830_vm10 = vmmov %vm6816_vm0 }
 0x2d1   : > { %v3809_v44 = vpop.f32.mrb[6].mxu1  ;;  %4000 = vadd.xlane.f32.xlu0 %v3999_v37 }
 0x2d2   : > { %v3927_v20 = vmax.f32 %v3807_v19, 0.0  ;;  %v3810_v52 = vadd.f32 %v6348_v18, %v3809_v44  ;;  %v3811_v4 = vpop.f32.mrb[7].mxu1 }
 0x2d4   : > { %v3928_v61 = vmax.f32 %v3810_v52, 0.0  ;;  %v3966_v39 = vmul.f32 %v6354_v12, %v3927_v20 }
 0x2d6   : > { %v4002_v63 = vsel %vm6815_vm2, %v3966_v39, 0.0  ;;  %v3967_v2 = vmul.f32 %v6354_v12, %v3928_v61  ;;  %vm6831_vm2 = vmmov %vm6816_vm0 }
 0x2d7   : > { %v3814_v8 = vpop.f32.mrb[8].mxu1  ;;  %4003 = vadd.xlane.f32.xlu0 %v4002_v63 }
 0x2d8   : > { %v3815_v43 = vadd.f32 %v6348_v18, %v3814_v8  ;;  %v3816_v47 = vpop.f32.mrb[9].mxu1  ;;  %v4005_v58 = vsel %vm6816_vm0, %v3967_v2, 0.0 }
 0x2d9   : > { %v3817_v46 = vpop.f32.mrb[10].mxu1  ;;  %4006 = vadd.xlane.f32.xlu1 %v4005_v58 }
 0x2da   : > { %v3929_v59 = vmax.f32 %v3815_v43, 0.0  ;;  %v3818_v25 = vadd.f32 %v6348_v18, %v3817_v46  ;;  %v3819_v15 = vpop.f32.mrb[11].mxu1 }
 0x2dc   : > { %v3930_v29 = vmax.f32 %v3818_v25, 0.0  ;;  %v3968_v26 = vmul.f32 %v6354_v12, %v3929_v59 }
 0x2de   : > { %v4008_v14 = vsel %vm6817_vm9, %v3968_v26, 0.0  ;;  %v3969_v27 = vmul.f32 %v6354_v12, %v3930_v29  ;;  %vm6832_vm9 = vmmov %vm6816_vm0 }
 0x2df   : > { %v3822_v6 = vpop.f32.mrb[12].mxu1  ;;  %4009 = vadd.xlane.f32.xlu0 %v4008_v14 }
 0x2e0   : > { %v3823_v31 = vadd.f32 %v6348_v18, %v3822_v6  ;;  %v3824_v45 = vpop.f32.mrb[13].mxu1  ;;  %v4011_v35 = vsel %vm6818_vm12, %v3969_v27, 0.0  ;;  %vm6833_vm12 = vmmov %vm6816_vm0 }
 0x2e1   : > { %v3825_v51 = vpop.f32.mrb[14].mxu1  ;;  %4012 = vadd.xlane.f32.xlu1 %v4011_v35 }
 0x2e2   : > { %v3931_v3 = vmax.f32 %v3823_v31, 0.0  ;;  %v3826_v54 = vadd.f32 %v6348_v18, %v3825_v51  ;;  %v3827_v53 = vpop.f32.mrb[15].mxu1 }
 0x2e4   : > { %v3932_v49 = vmax.f32 %v3826_v54, 0.0  ;;  %v3970_v22 = vmul.f32 %v6354_v12, %v3931_v3 }
 0x2e6   : > { %v4014_v62 = vsel %vm6819_vm13, %v3970_v22, 0.0  ;;  %v3971_v42 = vmul.f32 %v6354_v12, %v3932_v49  ;;  %vm6834_vm13 = vmmov %vm6816_vm0 }
 0x2e7   : > { %v3830_v55 = vpop.f32.mrb[16].mxu1  ;;  %4015 = vadd.xlane.f32.xlu0 %v4014_v62 }
 0x2e8   : > { %v3831_v36 = vadd.f32 %v6348_v18, %v3830_v55  ;;  %v3832_v30 = vpop.f32.mrb[17].mxu1  ;;  %v4017_v33 = vsel %vm6820_vm4, %v3971_v42, 0.0  ;;  %vm6835_vm4 = vmmov %vm6816_vm0 }
 0x2e9   : > { %v3833_v28 = vpop.f32.mrb[18].mxu1  ;;  %4018 = vadd.xlane.f32.xlu1 %v4017_v33 }
 0x2ea   : > { %v3933_v23 = vmax.f32 %v3831_v36, 0.0  ;;  %v3834_v38 = vadd.f32 %v6348_v18, %v3833_v28  ;;  %v3835_v48 = vpop.f32.mrb[19].mxu1 }
 0x2ec   : > { %v3934_v24 = vmax.f32 %v3834_v38, 0.0  ;;  %v3972_v32 = vmul.f32 %v6354_v12, %v3933_v23 }
 0x2ee   : > { %v4020_v56 = vsel %vm6821_vm7, %v3972_v32, 0.0  ;;  %v3973_v16 = vmul.f32 %v6354_v12, %v3934_v24  ;;  %vm6836_vm7 = vmmov %vm6816_vm0 }
 0x2ef   : > { %v3838_v13 = vpop.f32.mrb[20].mxu1  ;;  %4021 = vadd.xlane.f32.xlu0 %v4020_v56 }
 0x2f0   : > { %v3839_v1 = vadd.f32 %v6348_v18, %v3838_v13  ;;  %v3840_v50 = vpop.f32.mrb[21].mxu1  ;;  %v4023_v10 = vsel %vm6822_vm14, %v3973_v16, 0.0  ;;  %vm6837_vm14 = vmmov %vm6816_vm0 }
 0x2f1   : > { %v3841_v0 = vpop.f32.mrb[22].mxu1  ;;  %4024 = vadd.xlane.f32.xlu1 %v4023_v10 }
 0x2f2   : > { %v3935_v34 = vmax.f32 %v3839_v1, 0.0  ;;  %v3842_v40 = vadd.f32 %v6348_v18, %v3841_v0  ;;  %v3843_v7 = vpop.f32.mrb[23].mxu1 }
 0x2f4   : > { %v3936_v41 = vmax.f32 %v3842_v40, 0.0  ;;  %v3974_v57 = vmul.f32 %v6354_v12, %v3935_v34 }
 0x2f6   : > { %v4026_v21 = vsel %vm6823_vm5, %v3974_v57, 0.0  ;;  %v3975_v9 = vmul.f32 %v6354_v12, %v3936_v41  ;;  %vm6838_vm5 = vmmov %vm6816_vm0 }
 0x2f7   : > { %v3846_v17 = vpop.f32.mrb[24].mxu1  ;;  %4027 = vadd.xlane.f32.xlu0 %v4026_v21 }
 0x2f8   : > { %v3847_v11 = vadd.f32 %v6348_v18, %v3846_v17  ;;  %v3848_v60 = vpop.f32.mrb[25].mxu1  ;;  %v4029_v19 = vsel %vm6824_vm8, %v3975_v9, 0.0  ;;  %vm6839_vm8 = vmmov %vm6816_vm0 }
 0x2f9   : > { %v3849_v5 = vpop.f32.mrb[26].mxu1  ;;  %4030 = vadd.xlane.f32.xlu1 %v4029_v19 }
 0x2fa   : > { %v3937_v37 = vmax.f32 %v3847_v11, 0.0  ;;  %v3850_v44 = vadd.f32 %v6348_v18, %v3849_v5  ;;  %v3851_v20 = vpop.f32.mrb[27].mxu1 }
 0x2fc   : > { %v3938_v52 = vmax.f32 %v3850_v44, 0.0  ;;  %v3976_v4 = vmul.f32 %v6354_v12, %v3937_v37 }
 0x2fe   : > { %v4032_v61 = vsel %vm6825_vm3, %v3976_v4, 0.0  ;;  %v3977_v39 = vmul.f32 %v6354_v12, %v3938_v52  ;;  %vm6840_vm3 = vmmov %vm6816_vm0 }
 0x2ff   : > { %v3854_v63 = vpop.f32.mrb[28].mxu1  ;;  %4033 = vadd.xlane.f32.xlu0 %v4032_v61 }
 0x300   : > { %v3855_v2 = vadd.f32 %v6348_v18, %v3854_v63  ;;  %v3856_v8 = vpop.f32.mrb[29].mxu1  ;;  %v4035_v43 = vsel %vm6826_vm1, %v3977_v39, 0.0  ;;  %vm6841_vm1 = vmmov %vm6816_vm0 }
 0x301   : > { %v3857_v47 = vpop.f32.mrb[30].mxu1  ;;  %4036 = vadd.xlane.f32.xlu1 %v4035_v43 }
 0x302   : > { %v3939_v58 = vmax.f32 %v3855_v2, 0.0  ;;  %v3858_v46 = vadd.f32 %v6348_v18, %v3857_v47  ;;  %v3859_v59 = vpop.f32.mrb[31].mxu1 }
 0x304   : > { %v3978_v25 = vmul.f32 %v6354_v12, %v3939_v58  ;;  %v3940_v15 = vmax.f32 %v3858_v46, 0.0 }
 0x306   : > { %v4038_v29 = vsel %vm6827_vm11, %v3978_v25, 0.0  ;;  %v3979_v26 = vmul.f32 %v6354_v12, %v3940_v15  ;;  %vm6842_vm11 = vmmov %vm6816_vm0 }
 0x307   : > { %v3862_v14 = vpop.f32.mrb[32].mxu1  ;;  %4039 = vadd.xlane.f32.xlu0 %v4038_v29 }
 0x308   : > { %v3863_v27 = vadd.f32 %v6348_v18, %v3862_v14  ;;  %v3864_v6 = vpop.f32.mrb[33].mxu1  ;;  %v4041_v31 = vsel %vm6828_vm15, %v3979_v26, 0.0  ;;  %vm6843_vm15 = vmmov %vm6816_vm0 }
 0x309   : > { %v3865_v45 = vpop.f32.mrb[34].mxu1  ;;  %4042 = vadd.xlane.f32.xlu1 %v4041_v31 }
 0x30a   : > { %v3941_v35 = vmax.f32 %v3863_v27, 0.0  ;;  %v3866_v51 = vadd.f32 %v6348_v18, %v3865_v45  ;;  %v3867_v3 = vpop.f32.mrb[35].mxu1 }
 0x30c   : > { %v3980_v54 = vmul.f32 %v6354_v12, %v3941_v35  ;;  %v3942_v53 = vmax.f32 %v3866_v51, 0.0 }
 0x30e   : > { %v3981_v49 = vmul.f32 %v6354_v12, %v3942_v53  ;;  %v4044_v22 = vsel %vm6829_vm6, %v3980_v54, 0.0  ;;  %vm4092_vm6 = vcmask 7168  }
 0x30f   : > { %v3870_v62 = vpop.f32.mrb[36].mxu1  ;;  %4045 = vadd.xlane.f32.xlu0 %v4044_v22 }
 0x310   : > { %v3871_v42 = vadd.f32 %v6348_v18, %v3870_v62  ;;  %v3872_v55 = vpop.f32.mrb[37].mxu1  ;;  %v4047_v36 = vsel %vm6830_vm10, %v3981_v49, 0.0 }
 0x311   : > { %v3873_v30 = vpop.f32.mrb[38].mxu1  ;;  %4048 = vadd.xlane.f32.xlu1 %v4047_v36 }
 0x312   : > { %v3943_v33 = vmax.f32 %v3871_v42, 0.0  ;;  %v3874_v28 = vadd.f32 %v6348_v18, %v3873_v30  ;;  %v3875_v23 = vpop.f32.mrb[39].mxu1 }
 0x314   : > { %v3982_v38 = vmul.f32 %v6354_v12, %v3943_v33  ;;  %v3944_v48 = vmax.f32 %v3874_v28, 0.0 }
 0x316   : > { %v3983_v24 = vmul.f32 %v6354_v12, %v3944_v48  ;;  %v4050_v32 = vsel %vm6831_vm2, %v3982_v38, 0.0 }
 0x317   : > { %v3878_v56 = vpop.f32.mrb[40].mxu1  ;;  %4051 = vadd.xlane.f32.xlu0 %v4050_v32 }
 0x318   : > { %v3879_v16 = vadd.f32 %v6348_v18, %v3878_v56  ;;  %v3880_v13 = vpop.f32.mrb[41].mxu1  ;;  %v4053_v1 = vsel %vm6816_vm0, %v3983_v24, 0.0 }
 0x319   : > { %v3881_v50 = vpop.f32.mrb[42].mxu1  ;;  %4054 = vadd.xlane.f32.xlu1 %v4053_v1 }
 0x31a   : > { %v3945_v10 = vmax.f32 %v3879_v16, 0.0  ;;  %v3882_v0 = vadd.f32 %v6348_v18, %v3881_v50  ;;  %v3883_v34 = vpop.f32.mrb[43].mxu1 }
 0x31c   : > { %v3984_v40 = vmul.f32 %v6354_v12, %v3945_v10  ;;  %v3946_v7 = vmax.f32 %v3882_v0, 0.0 }
 0x31e   : > { %v3985_v41 = vmul.f32 %v6354_v12, %v3946_v7  ;;  %v4056_v57 = vsel %vm6832_vm9, %v3984_v40, 0.0 }
 0x31f   : > { %v3886_v21 = vpop.f32.mrb[44].mxu1  ;;  %4057 = vadd.xlane.f32.xlu0 %v4056_v57 }
 0x320   : > { %v3887_v9 = vadd.f32 %v6348_v18, %v3886_v21  ;;  %v3888_v17 = vpop.f32.mrb[45].mxu1  ;;  %v4059_v11 = vsel %vm6833_vm12, %v3985_v41, 0.0 }
 0x321   : > { %v3889_v60 = vpop.f32.mrb[46].mxu1  ;;  %4060 = vadd.xlane.f32.xlu1 %v4059_v11 }
 0x322   : > { %v3947_v19 = vmax.f32 %v3887_v9, 0.0  ;;  %v3890_v5 = vadd.f32 %v6348_v18, %v3889_v60  ;;  %v3891_v37 = vpop.f32.mrb[47].mxu1 }
 0x324   : > { %v3986_v44 = vmul.f32 %v6354_v12, %v3947_v19  ;;  %v3948_v20 = vmax.f32 %v3890_v5, 0.0 }
 0x326   : > { %v3987_v52 = vmul.f32 %v6354_v12, %v3948_v20  ;;  %v4062_v4 = vsel %vm6834_vm13, %v3986_v44, 0.0 }
 0x327   : > { %v3894_v61 = vpop.f32.mrb[48].mxu1  ;;  %4063 = vadd.xlane.f32.xlu0 %v4062_v4 }
 0x328   : > { %v3895_v39 = vadd.f32 %v6348_v18, %v3894_v61  ;;  %v3896_v63 = vpop.f32.mrb[49].mxu1  ;;  %v4065_v2 = vsel %vm6835_vm4, %v3987_v52, 0.0 }
 0x329   : > { %v3897_v8 = vpop.f32.mrb[50].mxu1  ;;  %4066 = vadd.xlane.f32.xlu1 %v4065_v2 }
 0x32a   : > { %v3949_v43 = vmax.f32 %v3895_v39, 0.0  ;;  %v3898_v47 = vadd.f32 %v6348_v18, %v3897_v8  ;;  %v3899_v58 = vpop.f32.mrb[51].mxu1 }
 0x32c   : > { %v3988_v46 = vmul.f32 %v6354_v12, %v3949_v43  ;;  %v3950_v59 = vmax.f32 %v3898_v47, 0.0 }
 0x32e   : > { %v3989_v25 = vmul.f32 %v6354_v12, %v3950_v59  ;;  %v4068_v15 = vsel %vm6836_vm7, %v3988_v46, 0.0 }
 0x32f   : > { %v3902_v29 = vpop.f32.mrb[52].mxu1  ;;  %4069 = vadd.xlane.f32.xlu0 %v4068_v15 }
 0x330   : > { %v3903_v26 = vadd.f32 %v6348_v18, %v3902_v29  ;;  %v3904_v14 = vpop.f32.mrb[53].mxu1  ;;  %v4071_v27 = vsel %vm6837_vm14, %v3989_v25, 0.0 }
 0x331   : > { %v3905_v6 = vpop.f32.mrb[54].mxu1  ;;  %4072 = vadd.xlane.f32.xlu1 %v4071_v27 }
 0x332   : > { %v3951_v31 = vmax.f32 %v3903_v26, 0.0  ;;  %v3906_v45 = vadd.f32 %v6348_v18, %v3905_v6  ;;  %v3907_v35 = vpop.f32.mrb[55].mxu1 }
 0x334   : > { %v3990_v51 = vmul.f32 %v6354_v12, %v3951_v31  ;;  %v3952_v3 = vmax.f32 %v3906_v45, 0.0 }
 0x336   : > { %v3991_v54 = vmul.f32 %v6354_v12, %v3952_v3  ;;  %v4074_v53 = vsel %vm6838_vm5, %v3990_v51, 0.0 }
 0x337   : > { %v3910_v49 = vpop.f32.mrb[56].mxu1  ;;  %4075 = vadd.xlane.f32.xlu0 %v4074_v53 }
 0x338   : > { %v3911_v22 = vadd.f32 %v6348_v18, %v3910_v49  ;;  %v3912_v62 = vpop.f32.mrb[57].mxu1  ;;  %v4077_v42 = vsel %vm6839_vm8, %v3991_v54, 0.0 }
 0x339   : > { %v3913_v55 = vpop.f32.mrb[58].mxu1  ;;  %4078 = vadd.xlane.f32.xlu1 %v4077_v42 }
 0x33a   : > { %v3953_v36 = vmax.f32 %v3911_v22, 0.0  ;;  %v3914_v30 = vadd.f32 %v6348_v18, %v3913_v55  ;;  %v3915_v33 = vpop.f32.mrb[59].mxu1 }
 0x33c   : > { %v3992_v28 = vmul.f32 %v6354_v12, %v3953_v36  ;;  %v3954_v23 = vmax.f32 %v3914_v30, 0.0 }
 0x33e   : > { %v3993_v38 = vmul.f32 %v6354_v12, %v3954_v23  ;;  %v4080_v48 = vsel %vm6840_vm3, %v3992_v28, 0.0 }
 0x33f   : > { %v3918_v24 = vpop.f32.mrb[60].mxu1  ;;  %4081 = vadd.xlane.f32.xlu0 %v4080_v48 }
 0x340   : > { %v3919_v32 = vadd.f32 %v6348_v18, %v3918_v24  ;;  %v3920_v56 = vpop.f32.mrb[61].mxu1  ;;  %v4083_v16 = vsel %vm6841_vm1, %v3993_v38, 0.0 }
 0x341   : > { %v3921_v13 = vpop.f32.mrb[62].mxu1  ;;  %4084 = vadd.xlane.f32.xlu1 %v4083_v16 }
 0x342   : > { %v3955_v1 = vmax.f32 %v3919_v32, 0.0  ;;  %v3922_v50 = vadd.f32 %v6348_v18, %v3921_v13  ;;  %v3923_v10 = vpop.f32.mrb[63].mxu1 }
 0x344   : > { %v3994_v0 = vmul.f32 %v6354_v12, %v3955_v1  ;;  %v3956_v34 = vmax.f32 %v3922_v50, 0.0 }
 0x346   : > { %v3995_v40 = vmul.f32 %v6354_v12, %v3956_v34  ;;  %v4086_v7 = vsel %vm6842_vm11, %v3994_v0, 0.0 }
 0x347   : > { %4087 = vadd.xlane.f32.xlu0 %v4086_v7 }
 0x348   : > { %v4089_v41 = vsel %vm6843_vm15, %v3995_v40, 0.0 }
 0x349   : > { %4090 = vadd.xlane.f32.xlu1 %v4089_v41 }
 0x35c   : > { %v3998_v18 = vpop.xlane.xlu1 %3997 }
 0x35d   : > { %4093 = vst.msk [vmem:[%s6455_s15] sm:$0xff] %vm4092_vm6, %v3998_v18 }
 0x35e   : > { %v4001_v12 = vpop.xlane.xlu0 %4000 }
 0x35f   : > { %4094 = vst.msk [vmem:[%s6455_s15 + $0x8] sm:$0xff] %vm4092_vm6, %v4001_v12 }
 0x364   : > { %v4004_v57 = vpop.xlane.xlu0 %4003 }
 0x365   : > { %4095 = vst.msk [vmem:[%s6455_s15 + $0x10] sm:$0xff] %vm4092_vm6, %v4004_v57 }
 0x366   : > { %v4007_v21 = vpop.xlane.xlu1 %4006 }
 0x367   : > { %4096 = vst.msk [vmem:[%s6455_s15 + $0x18] sm:$0xff] %vm4092_vm6, %v4007_v21 }
 0x36c   : > { %v4010_v9 = vpop.xlane.xlu0 %4009 }
 0x36d   : > { %4097 = vst.msk [vmem:[%s6455_s15 + $0x20] sm:$0xff] %vm4092_vm6, %v4010_v9 }
 0x36e   : > { %v4013_v17 = vpop.xlane.xlu1 %4012 }
 0x36f   : > { %4098 = vst.msk [vmem:[%s6455_s15 + $0x28] sm:$0xff] %vm4092_vm6, %v4013_v17 }
 0x374   : > { %v4016_v11 = vpop.xlane.xlu0 %4015 }
 0x375   : > { %4099 = vst.msk [vmem:[%s6455_s15 + $0x30] sm:$0xff] %vm4092_vm6, %v4016_v11 }
 0x376   : > { %v4019_v60 = vpop.xlane.xlu1 %4018 }
 0x377   : > { %4100 = vst.msk [vmem:[%s6455_s15 + $0x38] sm:$0xff] %vm4092_vm6, %v4019_v60 }
 0x37c   : > { %v4022_v19 = vpop.xlane.xlu0 %4021 }
 0x37d   : > { %4101 = vst.msk [vmem:[%s6455_s15 + $0x40] sm:$0xff] %vm4092_vm6, %v4022_v19 }
 0x37e   : > { %v4025_v5 = vpop.xlane.xlu1 %4024 }
 0x37f   : > { %4102 = vst.msk [vmem:[%s6455_s15 + $0x48] sm:$0xff] %vm4092_vm6, %v4025_v5 }
 0x384   : > { %v4028_v37 = vpop.xlane.xlu0 %4027 }
 0x385   : > { %4103 = vst.msk [vmem:[%s6455_s15 + $0x50] sm:$0xff] %vm4092_vm6, %v4028_v37 }
 0x386   : > { %v4031_v44 = vpop.xlane.xlu1 %4030 }
 0x387   : > { %4104 = vst.msk [vmem:[%s6455_s15 + $0x58] sm:$0xff] %vm4092_vm6, %v4031_v44 }
 0x38c   : > { %v4034_v20 = vpop.xlane.xlu0 %4033 }
 0x38d   : > { %4105 = vst.msk [vmem:[%s6455_s15 + $0x60] sm:$0xff] %vm4092_vm6, %v4034_v20 }
 0x38e   : > { %v4037_v52 = vpop.xlane.xlu1 %4036 }
 0x38f   : > { %4106 = vst.msk [vmem:[%s6455_s15 + $0x68] sm:$0xff] %vm4092_vm6, %v4037_v52 }
 0x394   : > { %v4040_v4 = vpop.xlane.xlu0 %4039 }
 0x395   : > { %4107 = vst.msk [vmem:[%s6455_s15 + $0x70] sm:$0xff] %vm4092_vm6, %v4040_v4 }
 0x396   : > { %v4043_v61 = vpop.xlane.xlu1 %4042 }
 0x397   : > { %4108 = vst.msk [vmem:[%s6455_s15 + $0x78] sm:$0xff] %vm4092_vm6, %v4043_v61 }
 0x39c   : > { %v4046_v39 = vpop.xlane.xlu0 %4045 }
 0x39d   : > { %4109 = vst.msk [vmem:[%s6455_s15 + $0x80] sm:$0xff] %vm4092_vm6, %v4046_v39 }
 0x39e   : > { %v4049_v63 = vpop.xlane.xlu1 %4048 }
 0x39f   : > { %4110 = vst.msk [vmem:[%s6455_s15 + $0x88] sm:$0xff] %vm4092_vm6, %v4049_v63 }
 0x3a4   : > { %v4052_v2 = vpop.xlane.xlu0 %4051 }
 0x3a5   : > { %4111 = vst.msk [vmem:[%s6455_s15 + $0x90] sm:$0xff] %vm4092_vm6, %v4052_v2 }
 0x3a6   : > { %v4055_v8 = vpop.xlane.xlu1 %4054 }
 0x3a7   : > { %4112 = vst.msk [vmem:[%s6455_s15 + $0x98] sm:$0xff] %vm4092_vm6, %v4055_v8 }
 0x3ac   : > { %v4058_v43 = vpop.xlane.xlu0 %4057 }
 0x3ad   : > { %4113 = vst.msk [vmem:[%s6455_s15 + $0xa0] sm:$0xff] %vm4092_vm6, %v4058_v43 }
 0x3ae   : > { %v4061_v47 = vpop.xlane.xlu1 %4060 }
 0x3af   : > { %4114 = vst.msk [vmem:[%s6455_s15 + $0xa8] sm:$0xff] %vm4092_vm6, %v4061_v47 }
 0x3b4   : > { %v4064_v58 = vpop.xlane.xlu0 %4063 }
 0x3b5   : > { %4115 = vst.msk [vmem:[%s6455_s15 + $0xb0] sm:$0xff] %vm4092_vm6, %v4064_v58 }
 0x3b6   : > { %v4067_v46 = vpop.xlane.xlu1 %4066 }
 0x3b7   : > { %4116 = vst.msk [vmem:[%s6455_s15 + $0xb8] sm:$0xff] %vm4092_vm6, %v4067_v46 }
 0x3bc   : > { %v4070_v59 = vpop.xlane.xlu0 %4069 }
 0x3bd   : > { %4117 = vst.msk [vmem:[%s6455_s15 + $0xc0] sm:$0xff] %vm4092_vm6, %v4070_v59 }
 0x3be   : > { %v4073_v25 = vpop.xlane.xlu1 %4072 }
 0x3bf   : > { %4118 = vst.msk [vmem:[%s6455_s15 + $0xc8] sm:$0xff] %vm4092_vm6, %v4073_v25 }
 0x3c4   : > { %v4076_v15 = vpop.xlane.xlu0 %4075 }
 0x3c5   : > { %4119 = vst.msk [vmem:[%s6455_s15 + $0xd0] sm:$0xff] %vm4092_vm6, %v4076_v15 }
 0x3c6   : > { %v4079_v29 = vpop.xlane.xlu1 %4078 }
 0x3c7   : > { %4120 = vst.msk [vmem:[%s6455_s15 + $0xd8] sm:$0xff] %vm4092_vm6, %v4079_v29 }
 0x3cc   : > { %v4082_v26 = vpop.xlane.xlu0 %4081 }
 0x3cd   : > { %4121 = vst.msk [vmem:[%s6455_s15 + $0xe0] sm:$0xff] %vm4092_vm6, %v4082_v26 }
 0x3ce   : > { %v4085_v14 = vpop.xlane.xlu1 %4084 }
 0x3cf   : > { %4122 = vst.msk [vmem:[%s6455_s15 + $0xe8] sm:$0xff] %vm4092_vm6, %v4085_v14 }
 0x3d4   : > { %v4088_v27 = vpop.xlane.xlu0 %4087 }
 0x3d5   : > { %4123 = vst.msk [vmem:[%s6455_s15 + $0xf0] sm:$0xff] %vm4092_vm6, %v4088_v27 }
 0x3d6   : > { %v4091_v6 = vpop.xlane.xlu1 %4090 }
 0x3d7   : > { %4124 = vst.msk [vmem:[%s6455_s15 + $0xf8] sm:$0xff] %vm4092_vm6, %v4091_v6 }
 0x3d8 PF: > { %s17_s24 = sadd.s32 1, %s4474_s24  }
 0x3d9   : > { %p14_p4 = scmp.ge.s32.totalorder %s17_s24, 4  }
 0x3db   :  { %16 = sbr.rel (!%p14_p4) target bundleno = 1 (0x1), region = 81 }

</bundles_post_ra>
